<compile_context>
chip_gen: v7x
topology: tpu7x:2x2x1
jax: 0.10.0
libtpu: 0.0.40
codegen_flags: <defaults>
</compile_context>

<pallas_src>
import functools

import jax
import jax.numpy as jnp
from jax import lax
from jax.experimental import pallas as pl
from jax.experimental.pallas import tpu as pltpu

KSIZE = 7                      # unified conv footprint (3x3 / 5x5 zero-embedded)
PAD = (KSIZE - 1) // 2         # = 3


# ----------------------------- Pallas kernel ------------------------------ #

def _context_aware_kernel(x_ref, w_ref, rw_ref, brw_ref, o_ref,
                          xpad_ref, patch_ref, *, C, H, W, PADF, KKC,
                          BIAS_ROWS, cdtype):
    """One batch sample per grid step.

    x_ref:     (C, H*W)            input feature map, lane-dense, f32
    w_ref:     (M, KKC+BIAS_ROWS)  fused conv weights + bias column, cdtype
    rw_ref:    (1, M)              1x1 re-weighting conv weights, f32
    brw_ref:   (1,)   SMEM         1x1 re-weighting conv bias
    o_ref:     (C, H*W)            output
    xpad_ref:  (C, H*W + 2*PADF)   VMEM scratch: flat zero-padded x (f32)
    patch_ref: (KKC+BIAS_ROWS, N)  VMEM scratch: im2col patch + bias row (cdtype)
    """
    N = H * W

    x = x_ref[...].astype(jnp.float32)                       # (C, N)

    # Flat zero-padded copy of x, central region at a lane-aligned offset.
    # Out-of-image reads along h land in the zero pads; only the w (row-wrap)
    # boundary needs an explicit mask.  Pads re-written every step on purpose
    # (per-core scratch + megacore sharding; see header comment).
    zpad = jnp.zeros((C, PADF), dtype=jnp.float32)
    xpad_ref[:, 0:PADF] = zpad
    xpad_ref[:, PADF + N:PADF + N + PADF] = zpad
    xpad_ref[:, PADF:PADF + N] = x                            # unmasked, aligned

    # Hoisted w-boundary masks: 6 distinct (dw = +-1..+-3), built once per step.
    ww = lax.broadcasted_iota(jnp.int32, (1, N), 1) % W
    wmask = {dw: (ww + dw >= 0) & (ww + dw < W)
             for dw in range(-PAD, PAD + 1) if dw != 0}

    # im2col staging in the compute dtype (bf16 by default): 49 shifted views of x.
    # Row block (i*K + j)*C .. +C holds the view shifted by (dh, dw), zero outside
    # the image.  Stores are sublane/lane aligned and half-width in bf16.
    for i in range(KSIZE):
        for j in range(KSIZE):
            dh = i - PAD
            dw = j - PAD
            off = dh * W + dw
            win = xpad_ref[:, PADF + off:PADF + off + N]      # (C, N) f32
            if dw != 0:
                win = jnp.where(wmask[dw], win, 0.0)
            patch_ref[pl.ds((i * KSIZE + j) * C, C), :] = win.astype(cdtype)

    # Bias row (constant ones) + zero padding rows -> bias folds into the matmul.
    rowi = lax.broadcasted_iota(jnp.int32, (BIAS_ROWS, N), 0)
    patch_ref[pl.ds(KKC, BIAS_ROWS), :] = jnp.where(rowi == 0, 1.0, 0.0).astype(cdtype)

    # Fused multi-scale conv (+bias) as one deep MXU matmul, then ReLU.
    yb = jnp.dot(w_ref[...], patch_ref[...],
                 preferred_element_type=jnp.float32)          # (M, N) f32
    yb = jnp.maximum(yb, 0.0)

    # 1x1 re-weighting conv + sigmoid -> spatial attention map (tiny; left on MXU).
    s = jnp.dot(rw_ref[...], yb, preferred_element_type=jnp.float32)   # (1, N)
    s = jax.nn.sigmoid(s + brw_ref[0])

    # Gate the original full-precision x; lane-dense unmasked store.
    o_ref[...] = (x * s).astype(o_ref.dtype)


# ------------------------------- wrapper ----------------------------------- #

def context_aware_pallas(x, w1, b1, w2, b2, w3, b3, wrw, brw, *,
                         compute_dtype=jnp.bfloat16):
    B, C, H, W = x.shape
    N = H * W
    M = w1.shape[0] + w2.shape[0] + w3.shape[0]               # 384
    KKC = KSIZE * KSIZE * C
    KKC_P = ((KKC + 1 + 7) // 8) * 8                          # + bias row, 8-aligned
    bias_rows = KKC_P - KKC
    padf = max(128, ((PAD * W + PAD + 127) // 128) * 128)     # lane-aligned pad

    # Fuse the three convs into one zero-embedded 7x7 conv with M output channels,
    # flattened to im2col row order ((i*K + j)*C + c), bias folded as a column.
    def embed(w):
        p = (KSIZE - w.shape[-1]) // 2
        return jnp.pad(w, ((0, 0), (0, 0), (p, p), (p, p)))

    w_all = jnp.concatenate([embed(w1), embed(w2), embed(w3)], axis=0)   # (M,C,7,7)
    w_flat = jnp.transpose(w_all, (0, 2, 3, 1)).reshape(M, KKC)
    b_all = jnp.concatenate([b1, b2, b3]).reshape(M, 1)
    w_aug = jnp.concatenate(
        [w_flat, b_all, jnp.zeros((M, bias_rows - 1), w_flat.dtype)], axis=1)
    w_aug = w_aug.astype(compute_dtype)                                   # (M, KKC_P)
    rw_flat = wrw.reshape(1, M).astype(jnp.float32)
    brw_s = brw.reshape(1).astype(jnp.float32)

    x_flat = x.reshape(B, C, N)                               # free, lane-dense

    kernel = functools.partial(_context_aware_kernel, C=C, H=H, W=W,
                               PADF=padf, KKC=KKC, BIAS_ROWS=bias_rows,
                               cdtype=compute_dtype)

    out = pl.pallas_call(
        kernel,
        out_shape=jax.ShapeDtypeStruct((B, C, N), x.dtype),
        grid_spec=pltpu.PrefetchScalarGridSpec(
            num_scalar_prefetch=0,
            grid=(B,),
            in_specs=[
                pl.BlockSpec((None, C, N), lambda b: (b, 0, 0)),
                pl.BlockSpec((M, KKC_P), lambda b: (0, 0)),     # constant -> DMA once
                pl.BlockSpec((1, M), lambda b: (0, 0)),
                pl.BlockSpec(memory_space=pltpu.MemorySpace.SMEM),
            ],
            out_specs=pl.BlockSpec((None, C, N), lambda b: (b, 0, 0)),
            scratch_shapes=[
                pltpu.VMEM((C, N + 2 * padf), jnp.float32),     # flat zero-padded x
                pltpu.VMEM((KKC_P, N), compute_dtype),          # bf16 im2col patch
            ],
        ),
        compiler_params=pltpu.CompilerParams(
            dimension_semantics=("parallel",),                  # >=2 blocks for v7x
            vmem_limit_bytes=32 * 1024 * 1024,
        ),
    )(x_flat, w_aug, rw_flat, brw_s)

    return out.reshape(B, C, H, W)


# --------------------------- pure-JAX reference ---------------------------- #

def context_aware_reference(x, w1, b1, w2, b2, w3, b3, wrw, brw):
    def conv(inp, w, b, pad):
        out = lax.conv_general_dilated(
            inp, w, window_strides=(1, 1),
            padding=[(pad, pad), (pad, pad)],
            dimension_numbers=('NCHW', 'OIHW', 'NCHW'))
        return out + b.reshape(1, -1, 1, 1)

    yb1 = jax.nn.relu(conv(x, w1, b1, 1))
    yb2 = jax.nn.relu(conv(x, w2, b2, 2))
    yb3 = jax.nn.relu(conv(x, w3, b3, 3))
    y = jnp.concatenate([yb1, yb2, yb3], axis=1)
    s = jax.nn.sigmoid(conv(y, wrw, brw, 0))                  # (B, 1, H, W)
    return x * s                                              # == repeat over channels


# --------------------------------- main ------------------------------------ #

if __name__ == "__main__":
    B, C, H, W = 2, 32, 16, 16      # small "channel" for the test; module fixes 512/384
    MID = 128                       # per-branch out-channels (fixed by the module)

    key = jax.random.PRNGKey(0)
    keys = jax.random.split(key, 10)

    x = jax.random.normal(keys[0], (B, C, H, W), dtype=jnp.float32)
    w1 = 0.1 * jax.random.normal(keys[1], (MID, C, 3, 3), dtype=jnp.float32)
    b1 = 0.1 * jax.random.normal(keys[2], (MID,), dtype=jnp.float32)
    w2 = 0.1 * jax.random.normal(keys[3], (MID, C, 5, 5), dtype=jnp.float32)
    b2 = 0.1 * jax.random.normal(keys[4], (MID,), dtype=jnp.float32)
    w3 = 0.1 * jax.random.normal(keys[5], (MID, C, 7, 7), dtype=jnp.float32)
    b3 = 0.1 * jax.random.normal(keys[6], (MID,), dtype=jnp.float32)
    wrw = 0.1 * jax.random.normal(keys[7], (1, 3 * MID, 1, 1), dtype=jnp.float32)
    brw = 0.1 * jax.random.normal(keys[8], (1,), dtype=jnp.float32)

    ref = jax.block_until_ready(
        context_aware_reference(x, w1, b1, w2, b2, w3, b3, wrw, brw))

    # 1) f32 compute path: strict algorithmic check against the f32 reference.
    out_f32 = jax.block_until_ready(
        context_aware_pallas(x, w1, b1, w2, b2, w3, b3, wrw, brw,
                             compute_dtype=jnp.float32))
    if not bool(jnp.allclose(out_f32, ref, atol=1e-3, rtol=1e-3)):
        raise AssertionError(
            "f32 path mismatch, max abs diff = "
            f"{float(jnp.max(jnp.abs(out_f32 - ref)))}")

    # 2) bf16 staging/weights (default, per perf review).  Compared against a
    #    reference whose conv inputs/weights/biases are rounded to bf16 the same
    #    way; residual differences are f32 accumulation order plus the final x*s
    #    multiply using full-precision x in the kernel (<= 2^-9 relative).
    def r16(a):
        return a.astype(jnp.bfloat16).astype(jnp.float32)

    out_bf16 = jax.block_until_ready(
        context_aware_pallas(x, w1, b1, w2, b2, w3, b3, wrw, brw))
    ref_bf16 = context_aware_reference(r16(x), r16(w1), r16(b1), r16(w2), r16(b2),
                                       r16(w3), r16(b3), wrw, brw)
    if not bool(jnp.allclose(out_bf16, ref_bf16, atol=5e-3, rtol=5e-3)):
        raise AssertionError(
            "bf16 path mismatch, max abs diff = "
            f"{float(jnp.max(jnp.abs(out_bf16 - ref_bf16)))}")

    print("KERNEL_OK")
</pallas_src>

<mosaic_0001>
module attributes {stable_mosaic.version = 11 : i64} {
  func.func @_context_aware_kernel(%arg0: i32, %arg1: memref<1x32x256xf32, #tpu.memory_space<vmem>>, %arg2: memref<384x1576xf32, #tpu.memory_space<vmem>>, %arg3: memref<1x384xf32, #tpu.memory_space<vmem>>, %arg4: memref<1xf32, #tpu.memory_space<smem>>, %arg5: memref<1x32x256xf32, #tpu.memory_space<vmem>>, %arg6: memref<32x512xf32, #tpu.memory_space<vmem>>, %arg7: memref<1576x256xf32, #tpu.memory_space<vmem>>) attributes {dimension_semantics = [#tpu.dimension_semantics<parallel>], iteration_bounds = array<i64: 2>, scalar_prefetch = 0 : i64, scratch_operands = 2 : i64, tpu.core_type = #tpu.core_type<tc>, window_params = [{transform_indices = @transform_0, window_bounds = array<i64: 1, 32, 256>}, {pipeline_mode = #tpu.pipeline_mode<synchronous>, transform_indices = @transform_1, window_bounds = array<i64: 384, 1576>}, {pipeline_mode = #tpu.pipeline_mode<synchronous>, transform_indices = @transform_2, window_bounds = array<i64: 1, 384>}, {transform_indices = @transform_3, window_bounds = array<i64: 1>}, {transform_indices = @transform_4, window_bounds = array<i64: 1, 32, 256>}]} {
    %c0 = arith.constant 0 : index
    %c0_0 = arith.constant 0 : index
    %c0_1 = arith.constant 0 : index
    %0 = vector.load %arg1[%c0, %c0_0, %c0_1] : memref<1x32x256xf32, #tpu.memory_space<vmem>>, vector<1x32x256xf32>
    %1 = vector.shape_cast %0 : vector<1x32x256xf32> to vector<32x256xf32>
    %cst = arith.constant 0.000000e+00 : f32
    %2 = vector.broadcast %cst : f32 to vector<32x128xf32>
    %c0_2 = arith.constant 0 : index
    %c0_3 = arith.constant 0 : index
    %3 = vector.load %arg6[%c0_2, %c0_3] : memref<32x512xf32, #tpu.memory_space<vmem>>, vector<32x128xf32>
    tpu.vector_store %arg6[%c0_2, %c0_3], %2 {strides = array<i32>} : memref<32x512xf32, #tpu.memory_space<vmem>>, vector<32x128xf32>,
    %c0_4 = arith.constant 0 : index
    %c384 = arith.constant 384 : index
    %4 = vector.load %arg6[%c0_4, %c384] : memref<32x512xf32, #tpu.memory_space<vmem>>, vector<32x128xf32>
    tpu.vector_store %arg6[%c0_4, %c384], %2 {strides = array<i32>} : memref<32x512xf32, #tpu.memory_space<vmem>>, vector<32x128xf32>,
    %c0_5 = arith.constant 0 : index
    %c128 = arith.constant 128 : index
    %5 = vector.load %arg6[%c0_5, %c128] : memref<32x512xf32, #tpu.memory_space<vmem>>, vector<32x256xf32>
    tpu.vector_store %arg6[%c0_5, %c128], %1 {strides = array<i32>} : memref<32x512xf32, #tpu.memory_space<vmem>>, vector<32x256xf32>,
    %6 = tpu.iota {dimensions = array<i32: 1>} : vector<1x256xi32>
    %c16_i32 = arith.constant 16 : i32
    %c0_i32 = arith.constant 0 : i32
    %7 = arith.cmpi eq, %c16_i32, %c0_i32 : i32
    %c1_i32 = arith.constant 1 : i32
    %8 = arith.select %7, %c1_i32, %c16_i32 : i32
    %9 = vector.broadcast %8 : i32 to vector<1x256xi32>
    %10 = arith.remsi %6, %9 : vector<1x256xi32>
    %c0_i32_6 = arith.constant 0 : i32
    %11 = vector.broadcast %c0_i32_6 : i32 to vector<1x256xi32>
    %12 = arith.cmpi ne, %10, %11 : vector<1x256xi32>
    %c0_i32_7 = arith.constant 0 : i32
    %13 = vector.broadcast %c0_i32_7 : i32 to vector<1x256xi32>
    %14 = arith.cmpi slt, %10, %13 : vector<1x256xi32>
    %c0_i32_8 = arith.constant 0 : i32
    %15 = arith.cmpi slt, %8, %c0_i32_8 : i32
    %16 = vector.broadcast %15 : i1 to vector<1x256xi1>
    %17 = vector.broadcast %16 : vector<1x256xi1> to vector<1x256xi1>
    %18 = arith.xori %14, %17 : vector<1x256xi1>
    %19 = arith.andi %18, %12 : vector<1x256xi1>
    %20 = vector.broadcast %8 : i32 to vector<1x256xi32>
    %21 = arith.addi %10, %20 : vector<1x256xi32>
    %22 = arith.select %19, %21, %10 : vector<1x256xi1>, vector<1x256xi32>
    %c-3_i32 = arith.constant -3 : i32
    %23 = vector.broadcast %c-3_i32 : i32 to vector<1x256xi32>
    %24 = arith.addi %22, %23 : vector<1x256xi32>
    %c0_i32_9 = arith.constant 0 : i32
    %25 = vector.broadcast %c0_i32_9 : i32 to vector<1x256xi32>
    %26 = arith.cmpi sge, %24, %25 : vector<1x256xi32>
    %c-3_i32_10 = arith.constant -3 : i32
    %27 = vector.broadcast %c-3_i32_10 : i32 to vector<1x256xi32>
    %28 = arith.addi %22, %27 : vector<1x256xi32>
    %c16_i32_11 = arith.constant 16 : i32
    %29 = vector.broadcast %c16_i32_11 : i32 to vector<1x256xi32>
    %30 = arith.cmpi slt, %28, %29 : vector<1x256xi32>
    %31 = arith.andi %26, %30 : vector<1x256xi1>
    %c-2_i32 = arith.constant -2 : i32
    %32 = vector.broadcast %c-2_i32 : i32 to vector<1x256xi32>
    %33 = arith.addi %22, %32 : vector<1x256xi32>
    %c0_i32_12 = arith.constant 0 : i32
    %34 = vector.broadcast %c0_i32_12 : i32 to vector<1x256xi32>
    %35 = arith.cmpi sge, %33, %34 : vector<1x256xi32>
    %c-2_i32_13 = arith.constant -2 : i32
    %36 = vector.broadcast %c-2_i32_13 : i32 to vector<1x256xi32>
    %37 = arith.addi %22, %36 : vector<1x256xi32>
    %c16_i32_14 = arith.constant 16 : i32
    %38 = vector.broadcast %c16_i32_14 : i32 to vector<1x256xi32>
    %39 = arith.cmpi slt, %37, %38 : vector<1x256xi32>
    %40 = arith.andi %35, %39 : vector<1x256xi1>
    %c-1_i32 = arith.constant -1 : i32
    %41 = vector.broadcast %c-1_i32 : i32 to vector<1x256xi32>
    %42 = arith.addi %22, %41 : vector<1x256xi32>
    %c0_i32_15 = arith.constant 0 : i32
    %43 = vector.broadcast %c0_i32_15 : i32 to vector<1x256xi32>
    %44 = arith.cmpi sge, %42, %43 : vector<1x256xi32>
    %c-1_i32_16 = arith.constant -1 : i32
    %45 = vector.broadcast %c-1_i32_16 : i32 to vector<1x256xi32>
    %46 = arith.addi %22, %45 : vector<1x256xi32>
    %c16_i32_17 = arith.constant 16 : i32
    %47 = vector.broadcast %c16_i32_17 : i32 to vector<1x256xi32>
    %48 = arith.cmpi slt, %46, %47 : vector<1x256xi32>
    %49 = arith.andi %44, %48 : vector<1x256xi1>
    %c1_i32_18 = arith.constant 1 : i32
    %50 = vector.broadcast %c1_i32_18 : i32 to vector<1x256xi32>
    %51 = arith.addi %22, %50 : vector<1x256xi32>
    %c0_i32_19 = arith.constant 0 : i32
    %52 = vector.broadcast %c0_i32_19 : i32 to vector<1x256xi32>
    %53 = arith.cmpi sge, %51, %52 : vector<1x256xi32>
    %c1_i32_20 = arith.constant 1 : i32
    %54 = vector.broadcast %c1_i32_20 : i32 to vector<1x256xi32>
    %55 = arith.addi %22, %54 : vector<1x256xi32>
    %c16_i32_21 = arith.constant 16 : i32
    %56 = vector.broadcast %c16_i32_21 : i32 to vector<1x256xi32>
    %57 = arith.cmpi slt, %55, %56 : vector<1x256xi32>
    %58 = arith.andi %53, %57 : vector<1x256xi1>
    %c2_i32 = arith.constant 2 : i32
    %59 = vector.broadcast %c2_i32 : i32 to vector<1x256xi32>
    %60 = arith.addi %22, %59 : vector<1x256xi32>
    %c0_i32_22 = arith.constant 0 : i32
    %61 = vector.broadcast %c0_i32_22 : i32 to vector<1x256xi32>
    %62 = arith.cmpi sge, %60, %61 : vector<1x256xi32>
    %c2_i32_23 = arith.constant 2 : i32
    %63 = vector.broadcast %c2_i32_23 : i32 to vector<1x256xi32>
    %64 = arith.addi %22, %63 : vector<1x256xi32>
    %c16_i32_24 = arith.constant 16 : i32
    %65 = vector.broadcast %c16_i32_24 : i32 to vector<1x256xi32>
    %66 = arith.cmpi slt, %64, %65 : vector<1x256xi32>
    %67 = arith.andi %62, %66 : vector<1x256xi1>
    %c3_i32 = arith.constant 3 : i32
    %68 = vector.broadcast %c3_i32 : i32 to vector<1x256xi32>
    %69 = arith.addi %22, %68 : vector<1x256xi32>
    %c0_i32_25 = arith.constant 0 : i32
    %70 = vector.broadcast %c0_i32_25 : i32 to vector<1x256xi32>
    %71 = arith.cmpi sge, %69, %70 : vector<1x256xi32>
    %c3_i32_26 = arith.constant 3 : i32
    %72 = vector.broadcast %c3_i32_26 : i32 to vector<1x256xi32>
    %73 = arith.addi %22, %72 : vector<1x256xi32>
    %c16_i32_27 = arith.constant 16 : i32
    %74 = vector.broadcast %c16_i32_27 : i32 to vector<1x256xi32>
    %75 = arith.cmpi slt, %73, %74 : vector<1x256xi32>
    %76 = arith.andi %71, %75 : vector<1x256xi1>
    %c0_28 = arith.constant 0 : index
    %c77 = arith.constant 77 : index
    %77 = vector.load %arg6[%c0_28, %c77] : memref<32x512xf32, #tpu.memory_space<vmem>>, vector<32x256xf32>
    %cst_29 = arith.constant 0.000000e+00 : f32
    %78 = vector.shape_cast %31 : vector<1x256xi1> to vector<1x256xi1>
    %79 = vector.broadcast %78 : vector<1x256xi1> to vector<32x256xi1>
    %80 = vector.broadcast %cst_29 : f32 to vector<32x256xf32>
    %81 = arith.select %79, %77, %80 : vector<32x256xi1>, vector<32x256xf32>
    %c0_30 = arith.constant 0 : index
    %c0_31 = arith.constant 0 : index
    %82 = vector.load %arg7[%c0_30, %c0_31] : memref<1576x256xf32, #tpu.memory_space<vmem>>, vector<32x256xf32>
    tpu.vector_store %arg7[%c0_30, %c0_31], %81 {strides = array<i32>} : memref<1576x256xf32, #tpu.memory_space<vmem>>, vector<32x256xf32>,
    %c0_32 = arith.constant 0 : index
    %c78 = arith.constant 78 : index
    %83 = vector.load %arg6[%c0_32, %c78] : memref<32x512xf32, #tpu.memory_space<vmem>>, vector<32x256xf32>
    %cst_33 = arith.constant 0.000000e+00 : f32
    %84 = vector.shape_cast %40 : vector<1x256xi1> to vector<1x256xi1>
    %85 = vector.broadcast %84 : vector<1x256xi1> to vector<32x256xi1>
    %86 = vector.broadcast %cst_33 : f32 to vector<32x256xf32>
    %87 = arith.select %85, %83, %86 : vector<32x256xi1>, vector<32x256xf32>
    %c32 = arith.constant 32 : index
    %c0_34 = arith.constant 0 : index
    %88 = vector.load %arg7[%c32, %c0_34] : memref<1576x256xf32, #tpu.memory_space<vmem>>, vector<32x256xf32>
    tpu.vector_store %arg7[%c32, %c0_34], %87 {strides = array<i32>} : memref<1576x256xf32, #tpu.memory_space<vmem>>, vector<32x256xf32>,
    %c0_35 = arith.constant 0 : index
    %c79 = arith.constant 79 : index
    %89 = vector.load %arg6[%c0_35, %c79] : memref<32x512xf32, #tpu.memory_space<vmem>>, vector<32x256xf32>
    %cst_36 = arith.constant 0.000000e+00 : f32
    %90 = vector.shape_cast %49 : vector<1x256xi1> to vector<1x256xi1>
    %91 = vector.broadcast %90 : vector<1x256xi1> to vector<32x256xi1>
    %92 = vector.broadcast %cst_36 : f32 to vector<32x256xf32>
    %93 = arith.select %91, %89, %92 : vector<32x256xi1>, vector<32x256xf32>
    %c64 = arith.constant 64 : index
    %c0_37 = arith.constant 0 : index
    %94 = vector.load %arg7[%c64, %c0_37] : memref<1576x256xf32, #tpu.memory_space<vmem>>, vector<32x256xf32>
    tpu.vector_store %arg7[%c64, %c0_37], %93 {strides = array<i32>} : memref<1576x256xf32, #tpu.memory_space<vmem>>, vector<32x256xf32>,
    %c0_38 = arith.constant 0 : index
    %c80 = arith.constant 80 : index
    %95 = vector.load %arg6[%c0_38, %c80] : memref<32x512xf32, #tpu.memory_space<vmem>>, vector<32x256xf32>
    %c96 = arith.constant 96 : index
    %c0_39 = arith.constant 0 : index
    %96 = vector.load %arg7[%c96, %c0_39] : memref<1576x256xf32, #tpu.memory_space<vmem>>, vector<32x256xf32>
    tpu.vector_store %arg7[%c96, %c0_39], %95 {strides = array<i32>} : memref<1576x256xf32, #tpu.memory_space<vmem>>, vector<32x256xf32>,
    %c0_40 = arith.constant 0 : index
    %c81 = arith.constant 81 : index
    %97 = vector.load %arg6[%c0_40, %c81] : memref<32x512xf32, #tpu.memory_space<vmem>>, vector<32x256xf32>
    %cst_41 = arith.constant 0.000000e+00 : f32
    %98 = vector.shape_cast %58 : vector<1x256xi1> to vector<1x256xi1>
    %99 = vector.broadcast %98 : vector<1x256xi1> to vector<32x256xi1>
    %100 = vector.broadcast %cst_41 : f32 to vector<32x256xf32>
    %101 = arith.select %99, %97, %100 : vector<32x256xi1>, vector<32x256xf32>
    %c128_42 = arith.constant 128 : index
    %c0_43 = arith.constant 0 : index
    %102 = vector.load %arg7[%c128_42, %c0_43] : memref<1576x256xf32, #tpu.memory_space<vmem>>, vector<32x256xf32>
    tpu.vector_store %arg7[%c128_42, %c0_43], %101 {strides = array<i32>} : memref<1576x256xf32, #tpu.memory_space<vmem>>, vector<32x256xf32>,
    %c0_44 = arith.constant 0 : index
    %c82 = arith.constant 82 : index
    %103 = vector.load %arg6[%c0_44, %c82] : memref<32x512xf32, #tpu.memory_space<vmem>>, vector<32x256xf32>
    %cst_45 = arith.constant 0.000000e+00 : f32
    %104 = vector.shape_cast %67 : vector<1x256xi1> to vector<1x256xi1>
    %105 = vector.broadcast %104 : vector<1x256xi1> to vector<32x256xi1>
    %106 = vector.broadcast %cst_45 : f32 to vector<32x256xf32>
    %107 = arith.select %105, %103, %106 : vector<32x256xi1>, vector<32x256xf32>
    %c160 = arith.constant 160 : index
    %c0_46 = arith.constant 0 : index
    %108 = vector.load %arg7[%c160, %c0_46] : memref<1576x256xf32, #tpu.memory_space<vmem>>, vector<32x256xf32>
    tpu.vector_store %arg7[%c160, %c0_46], %107 {strides = array<i32>} : memref<1576x256xf32, #tpu.memory_space<vmem>>, vector<32x256xf32>,
    %c0_47 = arith.constant 0 : index
    %c83 = arith.constant 83 : index
    %109 = vector.load %arg6[%c0_47, %c83] : memref<32x512xf32, #tpu.memory_space<vmem>>, vector<32x256xf32>
    %cst_48 = arith.constant 0.000000e+00 : f32
    %110 = vector.shape_cast %76 : vector<1x256xi1> to vector<1x256xi1>
    %111 = vector.broadcast %110 : vector<1x256xi1> to vector<32x256xi1>
    %112 = vector.broadcast %cst_48 : f32 to vector<32x256xf32>
    %113 = arith.select %111, %109, %112 : vector<32x256xi1>, vector<32x256xf32>
    %c192 = arith.constant 192 : index
    %c0_49 = arith.constant 0 : index
    %114 = vector.load %arg7[%c192, %c0_49] : memref<1576x256xf32, #tpu.memory_space<vmem>>, vector<32x256xf32>
    tpu.vector_store %arg7[%c192, %c0_49], %113 {strides = array<i32>} : memref<1576x256xf32, #tpu.memory_space<vmem>>, vector<32x256xf32>,
    %c0_50 = arith.constant 0 : index
    %c93 = arith.constant 93 : index
    %115 = vector.load %arg6[%c0_50, %c93] : memref<32x512xf32, #tpu.memory_space<vmem>>, vector<32x256xf32>
    %cst_51 = arith.constant 0.000000e+00 : f32
    %116 = vector.shape_cast %31 : vector<1x256xi1> to vector<1x256xi1>
    %117 = vector.broadcast %116 : vector<1x256xi1> to vector<32x256xi1>
    %118 = vector.broadcast %cst_51 : f32 to vector<32x256xf32>
    %119 = arith.select %117, %115, %118 : vector<32x256xi1>, vector<32x256xf32>
    %c224 = arith.constant 224 : index
    %c0_52 = arith.constant 0 : index
    %120 = vector.load %arg7[%c224, %c0_52] : memref<1576x256xf32, #tpu.memory_space<vmem>>, vector<32x256xf32>
    tpu.vector_store %arg7[%c224, %c0_52], %119 {strides = array<i32>} : memref<1576x256xf32, #tpu.memory_space<vmem>>, vector<32x256xf32>,
    %c0_53 = arith.constant 0 : index
    %c94 = arith.constant 94 : index
    %121 = vector.load %arg6[%c0_53, %c94] : memref<32x512xf32, #tpu.memory_space<vmem>>, vector<32x256xf32>
    %cst_54 = arith.constant 0.000000e+00 : f32
    %122 = vector.shape_cast %40 : vector<1x256xi1> to vector<1x256xi1>
    %123 = vector.broadcast %122 : vector<1x256xi1> to vector<32x256xi1>
    %124 = vector.broadcast %cst_54 : f32 to vector<32x256xf32>
    %125 = arith.select %123, %121, %124 : vector<32x256xi1>, vector<32x256xf32>
    %c256 = arith.constant 256 : index
    %c0_55 = arith.constant 0 : index
    %126 = vector.load %arg7[%c256, %c0_55] : memref<1576x256xf32, #tpu.memory_space<vmem>>, vector<32x256xf32>
    tpu.vector_store %arg7[%c256, %c0_55], %125 {strides = array<i32>} : memref<1576x256xf32, #tpu.memory_space<vmem>>, vector<32x256xf32>,
    %c0_56 = arith.constant 0 : index
    %c95 = arith.constant 95 : index
    %127 = vector.load %arg6[%c0_56, %c95] : memref<32x512xf32, #tpu.memory_space<vmem>>, vector<32x256xf32>
    %cst_57 = arith.constant 0.000000e+00 : f32
    %128 = vector.shape_cast %49 : vector<1x256xi1> to vector<1x256xi1>
    %129 = vector.broadcast %128 : vector<1x256xi1> to vector<32x256xi1>
    %130 = vector.broadcast %cst_57 : f32 to vector<32x256xf32>
    %131 = arith.select %129, %127, %130 : vector<32x256xi1>, vector<32x256xf32>
    %c288 = arith.constant 288 : index
    %c0_58 = arith.constant 0 : index
    %132 = vector.load %arg7[%c288, %c0_58] : memref<1576x256xf32, #tpu.memory_space<vmem>>, vector<32x256xf32>
    tpu.vector_store %arg7[%c288, %c0_58], %131 {strides = array<i32>} : memref<1576x256xf32, #tpu.memory_space<vmem>>, vector<32x256xf32>,
    %c0_59 = arith.constant 0 : index
    %c96_60 = arith.constant 96 : index
    %133 = vector.load %arg6[%c0_59, %c96_60] : memref<32x512xf32, #tpu.memory_space<vmem>>, vector<32x256xf32>
    %c320 = arith.constant 320 : index
    %c0_61 = arith.constant 0 : index
    %134 = vector.load %arg7[%c320, %c0_61] : memref<1576x256xf32, #tpu.memory_space<vmem>>, vector<32x256xf32>
    tpu.vector_store %arg7[%c320, %c0_61], %133 {strides = array<i32>} : memref<1576x256xf32, #tpu.memory_space<vmem>>, vector<32x256xf32>,
    %c0_62 = arith.constant 0 : index
    %c97 = arith.constant 97 : index
    %135 = vector.load %arg6[%c0_62, %c97] : memref<32x512xf32, #tpu.memory_space<vmem>>, vector<32x256xf32>
    %cst_63 = arith.constant 0.000000e+00 : f32
    %136 = vector.shape_cast %58 : vector<1x256xi1> to vector<1x256xi1>
    %137 = vector.broadcast %136 : vector<1x256xi1> to vector<32x256xi1>
    %138 = vector.broadcast %cst_63 : f32 to vector<32x256xf32>
    %139 = arith.select %137, %135, %138 : vector<32x256xi1>, vector<32x256xf32>
    %c352 = arith.constant 352 : index
    %c0_64 = arith.constant 0 : index
    %140 = vector.load %arg7[%c352, %c0_64] : memref<1576x256xf32, #tpu.memory_space<vmem>>, vector<32x256xf32>
    tpu.vector_store %arg7[%c352, %c0_64], %139 {strides = array<i32>} : memref<1576x256xf32, #tpu.memory_space<vmem>>, vector<32x256xf32>,
    %c0_65 = arith.constant 0 : index
    %c98 = arith.constant 98 : index
    %141 = vector.load %arg6[%c0_65, %c98] : memref<32x512xf32, #tpu.memory_space<vmem>>, vector<32x256xf32>
    %cst_66 = arith.constant 0.000000e+00 : f32
    %142 = vector.shape_cast %67 : vector<1x256xi1> to vector<1x256xi1>
    %143 = vector.broadcast %142 : vector<1x256xi1> to vector<32x256xi1>
    %144 = vector.broadcast %cst_66 : f32 to vector<32x256xf32>
    %145 = arith.select %143, %141, %144 : vector<32x256xi1>, vector<32x256xf32>
    %c384_67 = arith.constant 384 : index
    %c0_68 = arith.constant 0 : index
    %146 = vector.load %arg7[%c384_67, %c0_68] : memref<1576x256xf32, #tpu.memory_space<vmem>>, vector<32x256xf32>
    tpu.vector_store %arg7[%c384_67, %c0_68], %145 {strides = array<i32>} : memref<1576x256xf32, #tpu.memory_space<vmem>>, vector<32x256xf32>,
    %c0_69 = arith.constant 0 : index
    %c99 = arith.constant 99 : index
    %147 = vector.load %arg6[%c0_69, %c99] : memref<32x512xf32, #tpu.memory_space<vmem>>, vector<32x256xf32>
    %cst_70 = arith.constant 0.000000e+00 : f32
    %148 = vector.shape_cast %76 : vector<1x256xi1> to vector<1x256xi1>
    %149 = vector.broadcast %148 : vector<1x256xi1> to vector<32x256xi1>
    %150 = vector.broadcast %cst_70 : f32 to vector<32x256xf32>
    %151 = arith.select %149, %147, %150 : vector<32x256xi1>, vector<32x256xf32>
    %c416 = arith.constant 416 : index
    %c0_71 = arith.constant 0 : index
    %152 = vector.load %arg7[%c416, %c0_71] : memref<1576x256xf32, #tpu.memory_space<vmem>>, vector<32x256xf32>
    tpu.vector_store %arg7[%c416, %c0_71], %151 {strides = array<i32>} : memref<1576x256xf32, #tpu.memory_space<vmem>>, vector<32x256xf32>,
    %c0_72 = arith.constant 0 : index
    %c109 = arith.constant 109 : index
    %153 = vector.load %arg6[%c0_72, %c109] : memref<32x512xf32, #tpu.memory_space<vmem>>, vector<32x256xf32>
    %cst_73 = arith.constant 0.000000e+00 : f32
    %154 = vector.shape_cast %31 : vector<1x256xi1> to vector<1x256xi1>
    %155 = vector.broadcast %154 : vector<1x256xi1> to vector<32x256xi1>
    %156 = vector.broadcast %cst_73 : f32 to vector<32x256xf32>
    %157 = arith.select %155, %153, %156 : vector<32x256xi1>, vector<32x256xf32>
    %c448 = arith.constant 448 : index
    %c0_74 = arith.constant 0 : index
    %158 = vector.load %arg7[%c448, %c0_74] : memref<1576x256xf32, #tpu.memory_space<vmem>>, vector<32x256xf32>
    tpu.vector_store %arg7[%c448, %c0_74], %157 {strides = array<i32>} : memref<1576x256xf32, #tpu.memory_space<vmem>>, vector<32x256xf32>,
    %c0_75 = arith.constant 0 : index
    %c110 = arith.constant 110 : index
    %159 = vector.load %arg6[%c0_75, %c110] : memref<32x512xf32, #tpu.memory_space<vmem>>, vector<32x256xf32>
    %cst_76 = arith.constant 0.000000e+00 : f32
    %160 = vector.shape_cast %40 : vector<1x256xi1> to vector<1x256xi1>
    %161 = vector.broadcast %160 : vector<1x256xi1> to vector<32x256xi1>
    %162 = vector.broadcast %cst_76 : f32 to vector<32x256xf32>
    %163 = arith.select %161, %159, %162 : vector<32x256xi1>, vector<32x256xf32>
    %c480 = arith.constant 480 : index
    %c0_77 = arith.constant 0 : index
    %164 = vector.load %arg7[%c480, %c0_77] : memref<1576x256xf32, #tpu.memory_space<vmem>>, vector<32x256xf32>
    tpu.vector_store %arg7[%c480, %c0_77], %163 {strides = array<i32>} : memref<1576x256xf32, #tpu.memory_space<vmem>>, vector<32x256xf32>,
    %c0_78 = arith.constant 0 : index
    %c111 = arith.constant 111 : index
    %165 = vector.load %arg6[%c0_78, %c111] : memref<32x512xf32, #tpu.memory_space<vmem>>, vector<32x256xf32>
    %cst_79 = arith.constant 0.000000e+00 : f32
    %166 = vector.shape_cast %49 : vector<1x256xi1> to vector<1x256xi1>
    %167 = vector.broadcast %166 : vector<1x256xi1> to vector<32x256xi1>
    %168 = vector.broadcast %cst_79 : f32 to vector<32x256xf32>
    %169 = arith.select %167, %165, %168 : vector<32x256xi1>, vector<32x256xf32>
    %c512 = arith.constant 512 : index
    %c0_80 = arith.constant 0 : index
    %170 = vector.load %arg7[%c512, %c0_80] : memref<1576x256xf32, #tpu.memory_space<vmem>>, vector<32x256xf32>
    tpu.vector_store %arg7[%c512, %c0_80], %169 {strides = array<i32>} : memref<1576x256xf32, #tpu.memory_space<vmem>>, vector<32x256xf32>,
    %c0_81 = arith.constant 0 : index
    %c112 = arith.constant 112 : index
    %171 = vector.load %arg6[%c0_81, %c112] : memref<32x512xf32, #tpu.memory_space<vmem>>, vector<32x256xf32>
    %c544 = arith.constant 544 : index
    %c0_82 = arith.constant 0 : index
    %172 = vector.load %arg7[%c544, %c0_82] : memref<1576x256xf32, #tpu.memory_space<vmem>>, vector<32x256xf32>
    tpu.vector_store %arg7[%c544, %c0_82], %171 {strides = array<i32>} : memref<1576x256xf32, #tpu.memory_space<vmem>>, vector<32x256xf32>,
    %c0_83 = arith.constant 0 : index
    %c113 = arith.constant 113 : index
    %173 = vector.load %arg6[%c0_83, %c113] : memref<32x512xf32, #tpu.memory_space<vmem>>, vector<32x256xf32>
    %cst_84 = arith.constant 0.000000e+00 : f32
    %174 = vector.shape_cast %58 : vector<1x256xi1> to vector<1x256xi1>
    %175 = vector.broadcast %174 : vector<1x256xi1> to vector<32x256xi1>
    %176 = vector.broadcast %cst_84 : f32 to vector<32x256xf32>
    %177 = arith.select %175, %173, %176 : vector<32x256xi1>, vector<32x256xf32>
    %c576 = arith.constant 576 : index
    %c0_85 = arith.constant 0 : index
    %178 = vector.load %arg7[%c576, %c0_85] : memref<1576x256xf32, #tpu.memory_space<vmem>>, vector<32x256xf32>
    tpu.vector_store %arg7[%c576, %c0_85], %177 {strides = array<i32>} : memref<1576x256xf32, #tpu.memory_space<vmem>>, vector<32x256xf32>,
    %c0_86 = arith.constant 0 : index
    %c114 = arith.constant 114 : index
    %179 = vector.load %arg6[%c0_86, %c114] : memref<32x512xf32, #tpu.memory_space<vmem>>, vector<32x256xf32>
    %cst_87 = arith.constant 0.000000e+00 : f32
    %180 = vector.shape_cast %67 : vector<1x256xi1> to vector<1x256xi1>
    %181 = vector.broadcast %180 : vector<1x256xi1> to vector<32x256xi1>
    %182 = vector.broadcast %cst_87 : f32 to vector<32x256xf32>
    %183 = arith.select %181, %179, %182 : vector<32x256xi1>, vector<32x256xf32>
    %c608 = arith.constant 608 : index
    %c0_88 = arith.constant 0 : index
    %184 = vector.load %arg7[%c608, %c0_88] : memref<1576x256xf32, #tpu.memory_space<vmem>>, vector<32x256xf32>
    tpu.vector_store %arg7[%c608, %c0_88], %183 {strides = array<i32>} : memref<1576x256xf32, #tpu.memory_space<vmem>>, vector<32x256xf32>,
    %c0_89 = arith.constant 0 : index
    %c115 = arith.constant 115 : index
    %185 = vector.load %arg6[%c0_89, %c115] : memref<32x512xf32, #tpu.memory_space<vmem>>, vector<32x256xf32>
    %cst_90 = arith.constant 0.000000e+00 : f32
    %186 = vector.shape_cast %76 : vector<1x256xi1> to vector<1x256xi1>
    %187 = vector.broadcast %186 : vector<1x256xi1> to vector<32x256xi1>
    %188 = vector.broadcast %cst_90 : f32 to vector<32x256xf32>
    %189 = arith.select %187, %185, %188 : vector<32x256xi1>, vector<32x256xf32>
    %c640 = arith.constant 640 : index
    %c0_91 = arith.constant 0 : index
    %190 = vector.load %arg7[%c640, %c0_91] : memref<1576x256xf32, #tpu.memory_space<vmem>>, vector<32x256xf32>
    tpu.vector_store %arg7[%c640, %c0_91], %189 {strides = array<i32>} : memref<1576x256xf32, #tpu.memory_space<vmem>>, vector<32x256xf32>,
    %c0_92 = arith.constant 0 : index
    %c125 = arith.constant 125 : index
    %191 = vector.load %arg6[%c0_92, %c125] : memref<32x512xf32, #tpu.memory_space<vmem>>, vector<32x256xf32>
    %cst_93 = arith.constant 0.000000e+00 : f32
    %192 = vector.shape_cast %31 : vector<1x256xi1> to vector<1x256xi1>
    %193 = vector.broadcast %192 : vector<1x256xi1> to vector<32x256xi1>
    %194 = vector.broadcast %cst_93 : f32 to vector<32x256xf32>
    %195 = arith.select %193, %191, %194 : vector<32x256xi1>, vector<32x256xf32>
    %c672 = arith.constant 672 : index
    %c0_94 = arith.constant 0 : index
    %196 = vector.load %arg7[%c672, %c0_94] : memref<1576x256xf32, #tpu.memory_space<vmem>>, vector<32x256xf32>
    tpu.vector_store %arg7[%c672, %c0_94], %195 {strides = array<i32>} : memref<1576x256xf32, #tpu.memory_space<vmem>>, vector<32x256xf32>,
    %c0_95 = arith.constant 0 : index
    %c126 = arith.constant 126 : index
    %197 = vector.load %arg6[%c0_95, %c126] : memref<32x512xf32, #tpu.memory_space<vmem>>, vector<32x256xf32>
    %cst_96 = arith.constant 0.000000e+00 : f32
    %198 = vector.shape_cast %40 : vector<1x256xi1> to vector<1x256xi1>
    %199 = vector.broadcast %198 : vector<1x256xi1> to vector<32x256xi1>
    %200 = vector.broadcast %cst_96 : f32 to vector<32x256xf32>
    %201 = arith.select %199, %197, %200 : vector<32x256xi1>, vector<32x256xf32>
    %c704 = arith.constant 704 : index
    %c0_97 = arith.constant 0 : index
    %202 = vector.load %arg7[%c704, %c0_97] : memref<1576x256xf32, #tpu.memory_space<vmem>>, vector<32x256xf32>
    tpu.vector_store %arg7[%c704, %c0_97], %201 {strides = array<i32>} : memref<1576x256xf32, #tpu.memory_space<vmem>>, vector<32x256xf32>,
    %c0_98 = arith.constant 0 : index
    %c127 = arith.constant 127 : index
    %203 = vector.load %arg6[%c0_98, %c127] : memref<32x512xf32, #tpu.memory_space<vmem>>, vector<32x256xf32>
    %cst_99 = arith.constant 0.000000e+00 : f32
    %204 = vector.shape_cast %49 : vector<1x256xi1> to vector<1x256xi1>
    %205 = vector.broadcast %204 : vector<1x256xi1> to vector<32x256xi1>
    %206 = vector.broadcast %cst_99 : f32 to vector<32x256xf32>
    %207 = arith.select %205, %203, %206 : vector<32x256xi1>, vector<32x256xf32>
    %c736 = arith.constant 736 : index
    %c0_100 = arith.constant 0 : index
    %208 = vector.load %arg7[%c736, %c0_100] : memref<1576x256xf32, #tpu.memory_space<vmem>>, vector<32x256xf32>
    tpu.vector_store %arg7[%c736, %c0_100], %207 {strides = array<i32>} : memref<1576x256xf32, #tpu.memory_space<vmem>>, vector<32x256xf32>,
    %c0_101 = arith.constant 0 : index
    %c128_102 = arith.constant 128 : index
    %209 = vector.load %arg6[%c0_101, %c128_102] : memref<32x512xf32, #tpu.memory_space<vmem>>, vector<32x256xf32>
    %c768 = arith.constant 768 : index
    %c0_103 = arith.constant 0 : index
    %210 = vector.load %arg7[%c768, %c0_103] : memref<1576x256xf32, #tpu.memory_space<vmem>>, vector<32x256xf32>
    tpu.vector_store %arg7[%c768, %c0_103], %209 {strides = array<i32>} : memref<1576x256xf32, #tpu.memory_space<vmem>>, vector<32x256xf32>,
    %c0_104 = arith.constant 0 : index
    %c129 = arith.constant 129 : index
    %211 = vector.load %arg6[%c0_104, %c129] : memref<32x512xf32, #tpu.memory_space<vmem>>, vector<32x256xf32>
    %cst_105 = arith.constant 0.000000e+00 : f32
    %212 = vector.shape_cast %58 : vector<1x256xi1> to vector<1x256xi1>
    %213 = vector.broadcast %212 : vector<1x256xi1> to vector<32x256xi1>
    %214 = vector.broadcast %cst_105 : f32 to vector<32x256xf32>
    %215 = arith.select %213, %211, %214 : vector<32x256xi1>, vector<32x256xf32>
    %c800 = arith.constant 800 : index
    %c0_106 = arith.constant 0 : index
    %216 = vector.load %arg7[%c800, %c0_106] : memref<1576x256xf32, #tpu.memory_space<vmem>>, vector<32x256xf32>
    tpu.vector_store %arg7[%c800, %c0_106], %215 {strides = array<i32>} : memref<1576x256xf32, #tpu.memory_space<vmem>>, vector<32x256xf32>,
    %c0_107 = arith.constant 0 : index
    %c130 = arith.constant 130 : index
    %217 = vector.load %arg6[%c0_107, %c130] : memref<32x512xf32, #tpu.memory_space<vmem>>, vector<32x256xf32>
    %cst_108 = arith.constant 0.000000e+00 : f32
    %218 = vector.shape_cast %67 : vector<1x256xi1> to vector<1x256xi1>
    %219 = vector.broadcast %218 : vector<1x256xi1> to vector<32x256xi1>
    %220 = vector.broadcast %cst_108 : f32 to vector<32x256xf32>
    %221 = arith.select %219, %217, %220 : vector<32x256xi1>, vector<32x256xf32>
    %c832 = arith.constant 832 : index
    %c0_109 = arith.constant 0 : index
    %222 = vector.load %arg7[%c832, %c0_109] : memref<1576x256xf32, #tpu.memory_space<vmem>>, vector<32x256xf32>
    tpu.vector_store %arg7[%c832, %c0_109], %221 {strides = array<i32>} : memref<1576x256xf32, #tpu.memory_space<vmem>>, vector<32x256xf32>,
    %c0_110 = arith.constant 0 : index
    %c131 = arith.constant 131 : index
    %223 = vector.load %arg6[%c0_110, %c131] : memref<32x512xf32, #tpu.memory_space<vmem>>, vector<32x256xf32>
    %cst_111 = arith.constant 0.000000e+00 : f32
    %224 = vector.shape_cast %76 : vector<1x256xi1> to vector<1x256xi1>
    %225 = vector.broadcast %224 : vector<1x256xi1> to vector<32x256xi1>
    %226 = vector.broadcast %cst_111 : f32 to vector<32x256xf32>
    %227 = arith.select %225, %223, %226 : vector<32x256xi1>, vector<32x256xf32>
    %c864 = arith.constant 864 : index
    %c0_112 = arith.constant 0 : index
    %228 = vector.load %arg7[%c864, %c0_112] : memref<1576x256xf32, #tpu.memory_space<vmem>>, vector<32x256xf32>
    tpu.vector_store %arg7[%c864, %c0_112], %227 {strides = array<i32>} : memref<1576x256xf32, #tpu.memory_space<vmem>>, vector<32x256xf32>,
    %c0_113 = arith.constant 0 : index
    %c141 = arith.constant 141 : index
    %229 = vector.load %arg6[%c0_113, %c141] : memref<32x512xf32, #tpu.memory_space<vmem>>, vector<32x256xf32>
    %cst_114 = arith.constant 0.000000e+00 : f32
    %230 = vector.shape_cast %31 : vector<1x256xi1> to vector<1x256xi1>
    %231 = vector.broadcast %230 : vector<1x256xi1> to vector<32x256xi1>
    %232 = vector.broadcast %cst_114 : f32 to vector<32x256xf32>
    %233 = arith.select %231, %229, %232 : vector<32x256xi1>, vector<32x256xf32>
    %c896 = arith.constant 896 : index
    %c0_115 = arith.constant 0 : index
    %234 = vector.load %arg7[%c896, %c0_115] : memref<1576x256xf32, #tpu.memory_space<vmem>>, vector<32x256xf32>
    tpu.vector_store %arg7[%c896, %c0_115], %233 {strides = array<i32>} : memref<1576x256xf32, #tpu.memory_space<vmem>>, vector<32x256xf32>,
    %c0_116 = arith.constant 0 : index
    %c142 = arith.constant 142 : index
    %235 = vector.load %arg6[%c0_116, %c142] : memref<32x512xf32, #tpu.memory_space<vmem>>, vector<32x256xf32>
    %cst_117 = arith.constant 0.000000e+00 : f32
    %236 = vector.shape_cast %40 : vector<1x256xi1> to vector<1x256xi1>
    %237 = vector.broadcast %236 : vector<1x256xi1> to vector<32x256xi1>
    %238 = vector.broadcast %cst_117 : f32 to vector<32x256xf32>
    %239 = arith.select %237, %235, %238 : vector<32x256xi1>, vector<32x256xf32>
    %c928 = arith.constant 928 : index
    %c0_118 = arith.constant 0 : index
    %240 = vector.load %arg7[%c928, %c0_118] : memref<1576x256xf32, #tpu.memory_space<vmem>>, vector<32x256xf32>
    tpu.vector_store %arg7[%c928, %c0_118], %239 {strides = array<i32>} : memref<1576x256xf32, #tpu.memory_space<vmem>>, vector<32x256xf32>,
    %c0_119 = arith.constant 0 : index
    %c143 = arith.constant 143 : index
    %241 = vector.load %arg6[%c0_119, %c143] : memref<32x512xf32, #tpu.memory_space<vmem>>, vector<32x256xf32>
    %cst_120 = arith.constant 0.000000e+00 : f32
    %242 = vector.shape_cast %49 : vector<1x256xi1> to vector<1x256xi1>
    %243 = vector.broadcast %242 : vector<1x256xi1> to vector<32x256xi1>
    %244 = vector.broadcast %cst_120 : f32 to vector<32x256xf32>
    %245 = arith.select %243, %241, %244 : vector<32x256xi1>, vector<32x256xf32>
    %c960 = arith.constant 960 : index
    %c0_121 = arith.constant 0 : index
    %246 = vector.load %arg7[%c960, %c0_121] : memref<1576x256xf32, #tpu.memory_space<vmem>>, vector<32x256xf32>
    tpu.vector_store %arg7[%c960, %c0_121], %245 {strides = array<i32>} : memref<1576x256xf32, #tpu.memory_space<vmem>>, vector<32x256xf32>,
    %c0_122 = arith.constant 0 : index
    %c144 = arith.constant 144 : index
    %247 = vector.load %arg6[%c0_122, %c144] : memref<32x512xf32, #tpu.memory_space<vmem>>, vector<32x256xf32>
    %c992 = arith.constant 992 : index
    %c0_123 = arith.constant 0 : index
    %248 = vector.load %arg7[%c992, %c0_123] : memref<1576x256xf32, #tpu.memory_space<vmem>>, vector<32x256xf32>
    tpu.vector_store %arg7[%c992, %c0_123], %247 {strides = array<i32>} : memref<1576x256xf32, #tpu.memory_space<vmem>>, vector<32x256xf32>,
    %c0_124 = arith.constant 0 : index
    %c145 = arith.constant 145 : index
    %249 = vector.load %arg6[%c0_124, %c145] : memref<32x512xf32, #tpu.memory_space<vmem>>, vector<32x256xf32>
    %cst_125 = arith.constant 0.000000e+00 : f32
    %250 = vector.shape_cast %58 : vector<1x256xi1> to vector<1x256xi1>
    %251 = vector.broadcast %250 : vector<1x256xi1> to vector<32x256xi1>
    %252 = vector.broadcast %cst_125 : f32 to vector<32x256xf32>
    %253 = arith.select %251, %249, %252 : vector<32x256xi1>, vector<32x256xf32>
    %c1024 = arith.constant 1024 : index
    %c0_126 = arith.constant 0 : index
    %254 = vector.load %arg7[%c1024, %c0_126] : memref<1576x256xf32, #tpu.memory_space<vmem>>, vector<32x256xf32>
    tpu.vector_store %arg7[%c1024, %c0_126], %253 {strides = array<i32>} : memref<1576x256xf32, #tpu.memory_space<vmem>>, vector<32x256xf32>,
    %c0_127 = arith.constant 0 : index
    %c146 = arith.constant 146 : index
    %255 = vector.load %arg6[%c0_127, %c146] : memref<32x512xf32, #tpu.memory_space<vmem>>, vector<32x256xf32>
    %cst_128 = arith.constant 0.000000e+00 : f32
    %256 = vector.shape_cast %67 : vector<1x256xi1> to vector<1x256xi1>
    %257 = vector.broadcast %256 : vector<1x256xi1> to vector<32x256xi1>
    %258 = vector.broadcast %cst_128 : f32 to vector<32x256xf32>
    %259 = arith.select %257, %255, %258 : vector<32x256xi1>, vector<32x256xf32>
    %c1056 = arith.constant 1056 : index
    %c0_129 = arith.constant 0 : index
    %260 = vector.load %arg7[%c1056, %c0_129] : memref<1576x256xf32, #tpu.memory_space<vmem>>, vector<32x256xf32>
    tpu.vector_store %arg7[%c1056, %c0_129], %259 {strides = array<i32>} : memref<1576x256xf32, #tpu.memory_space<vmem>>, vector<32x256xf32>,
    %c0_130 = arith.constant 0 : index
    %c147 = arith.constant 147 : index
    %261 = vector.load %arg6[%c0_130, %c147] : memref<32x512xf32, #tpu.memory_space<vmem>>, vector<32x256xf32>
    %cst_131 = arith.constant 0.000000e+00 : f32
    %262 = vector.shape_cast %76 : vector<1x256xi1> to vector<1x256xi1>
    %263 = vector.broadcast %262 : vector<1x256xi1> to vector<32x256xi1>
    %264 = vector.broadcast %cst_131 : f32 to vector<32x256xf32>
    %265 = arith.select %263, %261, %264 : vector<32x256xi1>, vector<32x256xf32>
    %c1088 = arith.constant 1088 : index
    %c0_132 = arith.constant 0 : index
    %266 = vector.load %arg7[%c1088, %c0_132] : memref<1576x256xf32, #tpu.memory_space<vmem>>, vector<32x256xf32>
    tpu.vector_store %arg7[%c1088, %c0_132], %265 {strides = array<i32>} : memref<1576x256xf32, #tpu.memory_space<vmem>>, vector<32x256xf32>,
    %c0_133 = arith.constant 0 : index
    %c157 = arith.constant 157 : index
    %267 = vector.load %arg6[%c0_133, %c157] : memref<32x512xf32, #tpu.memory_space<vmem>>, vector<32x256xf32>
    %cst_134 = arith.constant 0.000000e+00 : f32
    %268 = vector.shape_cast %31 : vector<1x256xi1> to vector<1x256xi1>
    %269 = vector.broadcast %268 : vector<1x256xi1> to vector<32x256xi1>
    %270 = vector.broadcast %cst_134 : f32 to vector<32x256xf32>
    %271 = arith.select %269, %267, %270 : vector<32x256xi1>, vector<32x256xf32>
    %c1120 = arith.constant 1120 : index
    %c0_135 = arith.constant 0 : index
    %272 = vector.load %arg7[%c1120, %c0_135] : memref<1576x256xf32, #tpu.memory_space<vmem>>, vector<32x256xf32>
    tpu.vector_store %arg7[%c1120, %c0_135], %271 {strides = array<i32>} : memref<1576x256xf32, #tpu.memory_space<vmem>>, vector<32x256xf32>,
    %c0_136 = arith.constant 0 : index
    %c158 = arith.constant 158 : index
    %273 = vector.load %arg6[%c0_136, %c158] : memref<32x512xf32, #tpu.memory_space<vmem>>, vector<32x256xf32>
    %cst_137 = arith.constant 0.000000e+00 : f32
    %274 = vector.shape_cast %40 : vector<1x256xi1> to vector<1x256xi1>
    %275 = vector.broadcast %274 : vector<1x256xi1> to vector<32x256xi1>
    %276 = vector.broadcast %cst_137 : f32 to vector<32x256xf32>
    %277 = arith.select %275, %273, %276 : vector<32x256xi1>, vector<32x256xf32>
    %c1152 = arith.constant 1152 : index
    %c0_138 = arith.constant 0 : index
    %278 = vector.load %arg7[%c1152, %c0_138] : memref<1576x256xf32, #tpu.memory_space<vmem>>, vector<32x256xf32>
    tpu.vector_store %arg7[%c1152, %c0_138], %277 {strides = array<i32>} : memref<1576x256xf32, #tpu.memory_space<vmem>>, vector<32x256xf32>,
    %c0_139 = arith.constant 0 : index
    %c159 = arith.constant 159 : index
    %279 = vector.load %arg6[%c0_139, %c159] : memref<32x512xf32, #tpu.memory_space<vmem>>, vector<32x256xf32>
    %cst_140 = arith.constant 0.000000e+00 : f32
    %280 = vector.shape_cast %49 : vector<1x256xi1> to vector<1x256xi1>
    %281 = vector.broadcast %280 : vector<1x256xi1> to vector<32x256xi1>
    %282 = vector.broadcast %cst_140 : f32 to vector<32x256xf32>
    %283 = arith.select %281, %279, %282 : vector<32x256xi1>, vector<32x256xf32>
    %c1184 = arith.constant 1184 : index
    %c0_141 = arith.constant 0 : index
    %284 = vector.load %arg7[%c1184, %c0_141] : memref<1576x256xf32, #tpu.memory_space<vmem>>, vector<32x256xf32>
    tpu.vector_store %arg7[%c1184, %c0_141], %283 {strides = array<i32>} : memref<1576x256xf32, #tpu.memory_space<vmem>>, vector<32x256xf32>,
    %c0_142 = arith.constant 0 : index
    %c160_143 = arith.constant 160 : index
    %285 = vector.load %arg6[%c0_142, %c160_143] : memref<32x512xf32, #tpu.memory_space<vmem>>, vector<32x256xf32>
    %c1216 = arith.constant 1216 : index
    %c0_144 = arith.constant 0 : index
    %286 = vector.load %arg7[%c1216, %c0_144] : memref<1576x256xf32, #tpu.memory_space<vmem>>, vector<32x256xf32>
    tpu.vector_store %arg7[%c1216, %c0_144], %285 {strides = array<i32>} : memref<1576x256xf32, #tpu.memory_space<vmem>>, vector<32x256xf32>,
    %c0_145 = arith.constant 0 : index
    %c161 = arith.constant 161 : index
    %287 = vector.load %arg6[%c0_145, %c161] : memref<32x512xf32, #tpu.memory_space<vmem>>, vector<32x256xf32>
    %cst_146 = arith.constant 0.000000e+00 : f32
    %288 = vector.shape_cast %58 : vector<1x256xi1> to vector<1x256xi1>
    %289 = vector.broadcast %288 : vector<1x256xi1> to vector<32x256xi1>
    %290 = vector.broadcast %cst_146 : f32 to vector<32x256xf32>
    %291 = arith.select %289, %287, %290 : vector<32x256xi1>, vector<32x256xf32>
    %c1248 = arith.constant 1248 : index
    %c0_147 = arith.constant 0 : index
    %292 = vector.load %arg7[%c1248, %c0_147] : memref<1576x256xf32, #tpu.memory_space<vmem>>, vector<32x256xf32>
    tpu.vector_store %arg7[%c1248, %c0_147], %291 {strides = array<i32>} : memref<1576x256xf32, #tpu.memory_space<vmem>>, vector<32x256xf32>,
    %c0_148 = arith.constant 0 : index
    %c162 = arith.constant 162 : index
    %293 = vector.load %arg6[%c0_148, %c162] : memref<32x512xf32, #tpu.memory_space<vmem>>, vector<32x256xf32>
    %cst_149 = arith.constant 0.000000e+00 : f32
    %294 = vector.shape_cast %67 : vector<1x256xi1> to vector<1x256xi1>
    %295 = vector.broadcast %294 : vector<1x256xi1> to vector<32x256xi1>
    %296 = vector.broadcast %cst_149 : f32 to vector<32x256xf32>
    %297 = arith.select %295, %293, %296 : vector<32x256xi1>, vector<32x256xf32>
    %c1280 = arith.constant 1280 : index
    %c0_150 = arith.constant 0 : index
    %298 = vector.load %arg7[%c1280, %c0_150] : memref<1576x256xf32, #tpu.memory_space<vmem>>, vector<32x256xf32>
    tpu.vector_store %arg7[%c1280, %c0_150], %297 {strides = array<i32>} : memref<1576x256xf32, #tpu.memory_space<vmem>>, vector<32x256xf32>,
    %c0_151 = arith.constant 0 : index
    %c163 = arith.constant 163 : index
    %299 = vector.load %arg6[%c0_151, %c163] : memref<32x512xf32, #tpu.memory_space<vmem>>, vector<32x256xf32>
    %cst_152 = arith.constant 0.000000e+00 : f32
    %300 = vector.shape_cast %76 : vector<1x256xi1> to vector<1x256xi1>
    %301 = vector.broadcast %300 : vector<1x256xi1> to vector<32x256xi1>
    %302 = vector.broadcast %cst_152 : f32 to vector<32x256xf32>
    %303 = arith.select %301, %299, %302 : vector<32x256xi1>, vector<32x256xf32>
    %c1312 = arith.constant 1312 : index
    %c0_153 = arith.constant 0 : index
    %304 = vector.load %arg7[%c1312, %c0_153] : memref<1576x256xf32, #tpu.memory_space<vmem>>, vector<32x256xf32>
    tpu.vector_store %arg7[%c1312, %c0_153], %303 {strides = array<i32>} : memref<1576x256xf32, #tpu.memory_space<vmem>>, vector<32x256xf32>,
    %c0_154 = arith.constant 0 : index
    %c173 = arith.constant 173 : index
    %305 = vector.load %arg6[%c0_154, %c173] : memref<32x512xf32, #tpu.memory_space<vmem>>, vector<32x256xf32>
    %cst_155 = arith.constant 0.000000e+00 : f32
    %306 = vector.shape_cast %31 : vector<1x256xi1> to vector<1x256xi1>
    %307 = vector.broadcast %306 : vector<1x256xi1> to vector<32x256xi1>
    %308 = vector.broadcast %cst_155 : f32 to vector<32x256xf32>
    %309 = arith.select %307, %305, %308 : vector<32x256xi1>, vector<32x256xf32>
    %c1344 = arith.constant 1344 : index
    %c0_156 = arith.constant 0 : index
    %310 = vector.load %arg7[%c1344, %c0_156] : memref<1576x256xf32, #tpu.memory_space<vmem>>, vector<32x256xf32>
    tpu.vector_store %arg7[%c1344, %c0_156], %309 {strides = array<i32>} : memref<1576x256xf32, #tpu.memory_space<vmem>>, vector<32x256xf32>,
    %c0_157 = arith.constant 0 : index
    %c174 = arith.constant 174 : index
    %311 = vector.load %arg6[%c0_157, %c174] : memref<32x512xf32, #tpu.memory_space<vmem>>, vector<32x256xf32>
    %cst_158 = arith.constant 0.000000e+00 : f32
    %312 = vector.shape_cast %40 : vector<1x256xi1> to vector<1x256xi1>
    %313 = vector.broadcast %312 : vector<1x256xi1> to vector<32x256xi1>
    %314 = vector.broadcast %cst_158 : f32 to vector<32x256xf32>
    %315 = arith.select %313, %311, %314 : vector<32x256xi1>, vector<32x256xf32>
    %c1376 = arith.constant 1376 : index
    %c0_159 = arith.constant 0 : index
    %316 = vector.load %arg7[%c1376, %c0_159] : memref<1576x256xf32, #tpu.memory_space<vmem>>, vector<32x256xf32>
    tpu.vector_store %arg7[%c1376, %c0_159], %315 {strides = array<i32>} : memref<1576x256xf32, #tpu.memory_space<vmem>>, vector<32x256xf32>,
    %c0_160 = arith.constant 0 : index
    %c175 = arith.constant 175 : index
    %317 = vector.load %arg6[%c0_160, %c175] : memref<32x512xf32, #tpu.memory_space<vmem>>, vector<32x256xf32>
    %cst_161 = arith.constant 0.000000e+00 : f32
    %318 = vector.shape_cast %49 : vector<1x256xi1> to vector<1x256xi1>
    %319 = vector.broadcast %318 : vector<1x256xi1> to vector<32x256xi1>
    %320 = vector.broadcast %cst_161 : f32 to vector<32x256xf32>
    %321 = arith.select %319, %317, %320 : vector<32x256xi1>, vector<32x256xf32>
    %c1408 = arith.constant 1408 : index
    %c0_162 = arith.constant 0 : index
    %322 = vector.load %arg7[%c1408, %c0_162] : memref<1576x256xf32, #tpu.memory_space<vmem>>, vector<32x256xf32>
    tpu.vector_store %arg7[%c1408, %c0_162], %321 {strides = array<i32>} : memref<1576x256xf32, #tpu.memory_space<vmem>>, vector<32x256xf32>,
    %c0_163 = arith.constant 0 : index
    %c176 = arith.constant 176 : index
    %323 = vector.load %arg6[%c0_163, %c176] : memref<32x512xf32, #tpu.memory_space<vmem>>, vector<32x256xf32>
    %c1440 = arith.constant 1440 : index
    %c0_164 = arith.constant 0 : index
    %324 = vector.load %arg7[%c1440, %c0_164] : memref<1576x256xf32, #tpu.memory_space<vmem>>, vector<32x256xf32>
    tpu.vector_store %arg7[%c1440, %c0_164], %323 {strides = array<i32>} : memref<1576x256xf32, #tpu.memory_space<vmem>>, vector<32x256xf32>,
    %c0_165 = arith.constant 0 : index
    %c177 = arith.constant 177 : index
    %325 = vector.load %arg6[%c0_165, %c177] : memref<32x512xf32, #tpu.memory_space<vmem>>, vector<32x256xf32>
    %cst_166 = arith.constant 0.000000e+00 : f32
    %326 = vector.shape_cast %58 : vector<1x256xi1> to vector<1x256xi1>
    %327 = vector.broadcast %326 : vector<1x256xi1> to vector<32x256xi1>
    %328 = vector.broadcast %cst_166 : f32 to vector<32x256xf32>
    %329 = arith.select %327, %325, %328 : vector<32x256xi1>, vector<32x256xf32>
    %c1472 = arith.constant 1472 : index
    %c0_167 = arith.constant 0 : index
    %330 = vector.load %arg7[%c1472, %c0_167] : memref<1576x256xf32, #tpu.memory_space<vmem>>, vector<32x256xf32>
    tpu.vector_store %arg7[%c1472, %c0_167], %329 {strides = array<i32>} : memref<1576x256xf32, #tpu.memory_space<vmem>>, vector<32x256xf32>,
    %c0_168 = arith.constant 0 : index
    %c178 = arith.constant 178 : index
    %331 = vector.load %arg6[%c0_168, %c178] : memref<32x512xf32, #tpu.memory_space<vmem>>, vector<32x256xf32>
    %cst_169 = arith.constant 0.000000e+00 : f32
    %332 = vector.shape_cast %67 : vector<1x256xi1> to vector<1x256xi1>
    %333 = vector.broadcast %332 : vector<1x256xi1> to vector<32x256xi1>
    %334 = vector.broadcast %cst_169 : f32 to vector<32x256xf32>
    %335 = arith.select %333, %331, %334 : vector<32x256xi1>, vector<32x256xf32>
    %c1504 = arith.constant 1504 : index
    %c0_170 = arith.constant 0 : index
    %336 = vector.load %arg7[%c1504, %c0_170] : memref<1576x256xf32, #tpu.memory_space<vmem>>, vector<32x256xf32>
    tpu.vector_store %arg7[%c1504, %c0_170], %335 {strides = array<i32>} : memref<1576x256xf32, #tpu.memory_space<vmem>>, vector<32x256xf32>,
    %c0_171 = arith.constant 0 : index
    %c179 = arith.constant 179 : index
    %337 = vector.load %arg6[%c0_171, %c179] : memref<32x512xf32, #tpu.memory_space<vmem>>, vector<32x256xf32>
    %cst_172 = arith.constant 0.000000e+00 : f32
    %338 = vector.shape_cast %76 : vector<1x256xi1> to vector<1x256xi1>
    %339 = vector.broadcast %338 : vector<1x256xi1> to vector<32x256xi1>
    %340 = vector.broadcast %cst_172 : f32 to vector<32x256xf32>
    %341 = arith.select %339, %337, %340 : vector<32x256xi1>, vector<32x256xf32>
    %c1536 = arith.constant 1536 : index
    %c0_173 = arith.constant 0 : index
    %342 = vector.load %arg7[%c1536, %c0_173] : memref<1576x256xf32, #tpu.memory_space<vmem>>, vector<32x256xf32>
    tpu.vector_store %arg7[%c1536, %c0_173], %341 {strides = array<i32>} : memref<1576x256xf32, #tpu.memory_space<vmem>>, vector<32x256xf32>,
    %343 = tpu.iota {dimensions = array<i32: 0>} : vector<8x256xi32>
    %c0_i32_174 = arith.constant 0 : i32
    %344 = vector.broadcast %c0_i32_174 : i32 to vector<8x256xi32>
    %345 = arith.cmpi eq, %343, %344 : vector<8x256xi32>
    %cst_175 = arith.constant 1.000000e+00 : f32
    %cst_176 = arith.constant 0.000000e+00 : f32
    %346 = vector.broadcast %cst_175 : f32 to vector<8x256xf32>
    %347 = vector.broadcast %cst_176 : f32 to vector<8x256xf32>
    %348 = arith.select %345, %346, %347 : vector<8x256xi1>, vector<8x256xf32>
    %c1568 = arith.constant 1568 : index
    %c0_177 = arith.constant 0 : index
    %349 = vector.load %arg7[%c1568, %c0_177] : memref<1576x256xf32, #tpu.memory_space<vmem>>, vector<8x256xf32>
    tpu.vector_store %arg7[%c1568, %c0_177], %348 {strides = array<i32>} : memref<1576x256xf32, #tpu.memory_space<vmem>>, vector<8x256xf32>,
    %c0_178 = arith.constant 0 : index
    %c0_179 = arith.constant 0 : index
    %350 = vector.load %arg2[%c0_178, %c0_179] : memref<384x1576xf32, #tpu.memory_space<vmem>>, vector<384x1576xf32>
    %c0_180 = arith.constant 0 : index
    %c0_181 = arith.constant 0 : index
    %351 = vector.load %arg7[%c0_180, %c0_181] : memref<1576x256xf32, #tpu.memory_space<vmem>>, vector<1576x256xf32>
    %cst_182 = arith.constant dense<0.000000e+00> : vector<384x256xf32>
    %352 = tpu.matmul %350, %351, %cst_182 {dimension_numbers = #tpu.dot_dimension_numbers<[1], [0], [0], [1], [0, 0, 1, 1], [], []>} : vector<384x1576xf32>, vector<1576x256xf32>, vector<384x256xf32> -> vector<384x256xf32>
    %cst_183 = arith.constant 0.000000e+00 : f32
    %353 = vector.broadcast %cst_183 : f32 to vector<384x256xf32>
    %354 = arith.maximumf %352, %353 : vector<384x256xf32>
    %c0_184 = arith.constant 0 : index
    %c0_185 = arith.constant 0 : index
    %355 = vector.load %arg3[%c0_184, %c0_185] : memref<1x384xf32, #tpu.memory_space<vmem>>, vector<1x384xf32>
    %cst_186 = arith.constant dense<0.000000e+00> : vector<1x256xf32>
    %356 = tpu.matmul %355, %354, %cst_186 {dimension_numbers = #tpu.dot_dimension_numbers<[1], [0], [0], [1], [0, 0, 1, 1], [], []>} : vector<1x384xf32>, vector<384x256xf32>, vector<1x256xf32> -> vector<1x256xf32>
    %c0_187 = arith.constant 0 : index
    %357 = memref.load %arg4[%c0_187] : memref<1xf32, #tpu.memory_space<smem>>
    %358 = vector.broadcast %357 : f32 to vector<1x256xf32>
    %359 = arith.addf %356, %358 : vector<1x256xf32>
    %360 = arith.negf %359 : vector<1x256xf32>
    %361 = math.exp %360 : vector<1x256xf32>
    %cst_188 = arith.constant 1.000000e+00 : f32
    %362 = vector.broadcast %cst_188 : f32 to vector<1x256xf32>
    %363 = arith.addf %362, %361 : vector<1x256xf32>
    %364 = arith.divf %362, %363 : vector<1x256xf32>
    %365 = vector.broadcast %364 : vector<1x256xf32> to vector<32x256xf32>
    %366 = arith.mulf %1, %365 : vector<32x256xf32>
    %c0_189 = arith.constant 0 : index
    %c0_190 = arith.constant 0 : index
    %c0_191 = arith.constant 0 : index
    %367 = vector.load %arg5[%c0_189, %c0_190, %c0_191] : memref<1x32x256xf32, #tpu.memory_space<vmem>>, vector<1x32x256xf32>
    %368 = vector.shape_cast %367 : vector<1x32x256xf32> to vector<32x256xf32>
    %369 = vector.shape_cast %366 : vector<32x256xf32> to vector<1x32x256xf32>
    tpu.vector_store %arg5[%c0_189, %c0_190, %c0_191], %369 {strides = array<i32>} : memref<1x32x256xf32, #tpu.memory_space<vmem>>, vector<1x32x256xf32>,
    return
  }
  func.func @transform_0(%arg0: i32) -> (i32, i32, i32) {
    %c0_i32 = arith.constant 0 : i32
    %c0_i32_0 = arith.constant 0 : i32
    %c0_i32_1 = arith.constant 0 : i32
    return %arg0, %c0_i32, %c0_i32_0 : i32, i32, i32
  }
  func.func @transform_1(%arg0: i32) -> (i32, i32) {
    %c0_i32 = arith.constant 0 : i32
    %c0_i32_0 = arith.constant 0 : i32
    %c0_i32_1 = arith.constant 0 : i32
    return %c0_i32, %c0_i32_0 : i32, i32
  }
  func.func @transform_2(%arg0: i32) -> (i32, i32) {
    %c0_i32 = arith.constant 0 : i32
    %c0_i32_0 = arith.constant 0 : i32
    %c0_i32_1 = arith.constant 0 : i32
    return %c0_i32, %c0_i32_0 : i32, i32
  }
  func.func @transform_3(%arg0: i32) -> i32 {
    %c0_i32 = arith.constant 0 : i32
    %c0_i32_0 = arith.constant 0 : i32
    return %c0_i32 : i32
  }
  func.func @transform_4(%arg0: i32) -> (i32, i32, i32) {
    %c0_i32 = arith.constant 0 : i32
    %c0_i32_0 = arith.constant 0 : i32
    %c0_i32_1 = arith.constant 0 : i32
    return %arg0, %c0_i32, %c0_i32_0 : i32, i32, i32
  }
}

</mosaic_0001>

<bundles_post_ra>
// kernel: tpu_custom_call.1
= control target key start
LH: loop header
LB: loop body
LE: loop exit
PB: predicated region body
PF: predicated region fallthrough
CT: control target
= control target key end

     0   :  { %s15604_s0 = inlined_call_operand.vmem [shape: f32[2,32,256], index: 0, kind: input, shape index: {}]   ;;  %s15605_s1 = inlined_call_operand.vmem [shape: f32[384,1576], index: 1, kind: input, shape index: {}]   ;;  %s15606_s2 = inlined_call_operand.vmem [shape: f32[1,384], index: 2, kind: input, shape index: {}]   ;;  %s15607_s3 = inlined_call_operand.<no memory space> [shape: f32[1], index: 3, kind: input, shape index: {}]   ;;  %s15608_s4 = inlined_call_operand.hbm [shape: f32[2,32,256], index: 4, kind: output, shape index: {}]  }
   0x1   :  { %9 = sst [smem:[#allocation4]] %s15607_s3 }
   0x2   :  { %10 = vsyncpa [#allocation6], 0 }
   0x3   :  { %12 = vsyncpa [#allocation6 + $0x1], 0  ;;  %s11577_s17 = smov 0   ;;  %s11579_s18 = smov 0  }
   0x4   :  { %s11581_s19 = smov 0   ;;  %s11583_s20 = smov 0  }
   0x5 LB: > { %s11598_s3 = sadd.s32 4294967295, %s11495_s20   ;;  %s8185_s21 = sadd.s32 4294967294, %s11495_s20   ;;  %s11495_s20 = sphi %s11583_s20, %s15714_s20   ;;  %s11491_s19 = sphi %s11581_s19, %s15713_s19   ;;  %s11487_s18 = sphi %s11579_s18, %s15712_s18   ;;  %s11483_s17 = sphi %s11577_s17, %s15711_s17  }
   0x6   : > { %s11602_s22 = sadd.s32 1, %s11495_s20   ;;  %s114_s23 = sadd.s32 1, %s11491_s19 }
   0x7   : > { %s111_s24 = ssub.s32 %s11495_s20, %s11602_s22  ;;  %p124_p0 = scmp.ne.s32.totalorder %s11491_s19, %s11487_s18 }
   0x8   : > { %p112_p1 = scmp.eq.s32.totalorder %s111_s24, 0  ;;  %p125_p2 = scmp.eq.s32.totalorder %s11598_s3, 1 }
   0x9   : > { %p130_p3 = scmp.ne.s32.totalorder %s11487_s18, %s11483_s17  ;;  %p131_p4 = scmp.eq.s32.totalorder %s8185_s21, 1 }
   0xa   : > { %s11613_s25 = scalar_select %p112_p1, %s11491_s19, %s114_s23  }
   0xb   : > { %p11615_p5 = por %p125_p2, %p124_p0  ;;  %p11619_p6 = por %p131_p4, %p130_p3 }
   0xc   : > { %p8188_p7 = scmp.ge.s32.totalorder %s11495_s20, 1  ;;  %p166_p8 = scmp.lt.s32.totalorder %s11495_s20, 3 }
   0xe   : > { %p167_p9 = pnand %p8188_p7, %p166_p8 }
  0x10   : > { %170 = sbr.rel (%p167_p9) target bundleno = 1489 (0x5d1), region = 36 }
  0x17   : > { %p192_p10 = scmp.lt.s32.totalorder %s11598_s3, 1  ;;  %v15612_v3 = vmov 0.0   ;;  %s11498_s7 = smov 127   ;;  %v15609_v23 = vlaneseq  ;;  %vm2304_vm0 = vcmask 1039360   ;;  %vm2385_vm5 = vcmask 1031168   ;;  %v4570_v56 = vld [vmem:[%s15605_s1 + $0xc20] sm:$0xff] }
  0x18   : > { %s11499_s8 = smov 126   ;;  %s11500_s9 = smov 125   ;;  %vm2466_vm10 = vcmask 1022976   ;;  %vm2547_vm15 = vcmask 941056   ;;  %v11546_v48 = vmov 1.0  }
  0x19   : > { %s193_s28 = scalar_select %p192_p10, %s11598_s3, 1  ;;  %v222_v24 = vand.u32 127, %v15609_v23 }
  0x1a   : > { %s11501_s10 = smov 115   ;;  %s11502_s11 = smov 51  }
  0x1b   : > { %s8247_s29 = sshll.u32 %s193_s28, 6  ;;  %s11503_s12 = smov 114   ;;  %v223_v25 = vadd.s32 128, %v222_v24  ;;  %v11735_v27 = vand.u32 15, %v222_v24 }
  0x1c   : > { %s11630_s6 = scalar_lea.vmem %s15604_s0, %s8247_s29  ;;  %s11504_s13 = smov 50  }
  0x1d   : > { %v198_v0 = vld [vmem:[%s11630_s6 + $0x8] sm:$0xff]  ;;  %v197_v1 = vld [vmem:[%s11630_s6] sm:$0xff]  ;;  %v199_v2 = vld [vmem:[%s11630_s6 + $0x10] sm:$0xff]  ;;  %s11505_s14 = smov 113   ;;  %s11506_s15 = smov 49   ;;  %v11733_v26 = vand.u32 15, %v223_v25 }
  0x1e   : > { %v11636_v4 = vpack.i.bf16 %v15612_v3, %v198_v0  ;;  %v11638_v5 = vpack.i.bf16 %v199_v2, %v197_v1  ;;  %v200_v6 = vld [vmem:[%s11630_s6 + $0x18] sm:$0xff]  ;;  %v202_v7 = vld [vmem:[%s11630_s6 + $0x28] sm:$0xff]  ;;  %v201_v11 = vld [vmem:[%s11630_s6 + $0x20] sm:$0xff]  ;;  %v11666_v16 = vpack.c.bf16 %v199_v2, %v197_v1  ;;  %v11692_v19 = vpack.i.bf16 %v198_v0, %v197_v1  ;;  %s11507_s16 = smov 112   ;;  %s11508_s21 = smov 48  }
  0x1f   : > { %v11645_v8 = vpack.i.bf16 %v15612_v3, %v200_v6  ;;  %v11648_v9 = vpack.i.bf16 %v15612_v3, %v202_v7  ;;  %v204_v10 = vld [vmem:[%s11630_s6 + $0x38] sm:$0xff]  ;;  %v203_v12 = vld [vmem:[%s11630_s6 + $0x30] sm:$0xff]  ;;  %v11664_v15 = vpack.c.bf16 %v200_v6, %v198_v0  ;;  %v11694_v20 = vpack.i.bf16 %v200_v6, %v199_v2  ;;  %s11509_s23 = smov 47   ;;  %s11510_s24 = smov 46  }
  0x20   : > { %9946 = vrot.lane.b32.xlu0 %v11636_v4, %s11498_s7  ;;  %9956 = vrot.lane.b32.xlu1 %v11638_v5, %s11498_s7  ;;  %v11656_v13 = vpack.i.bf16 %v15612_v3, %v204_v10  ;;  %v11658_v14 = vpack.i.bf16 %v203_v12, %v201_v11  ;;  %v11668_v17 = vpack.c.bf16 %v204_v10, %v202_v7  ;;  %v273_v30 = vadd.s32 1, %v11733_v26  ;;  %s11511_s30 = smov 45   ;;  %s11512_s5 = smov 35  }
  0x21   : > { %8864 = vmatprep.subr.bf16.mxu0 %v11664_v15  ;;  %v11672_v18 = vpack.c.bf16 %v203_v12, %v201_v11  ;;  %v11702_v21 = vpack.i.bf16 %v202_v7, %v201_v11  ;;  %v11704_v22 = vpack.i.bf16 %v204_v10, %v203_v12  ;;  %v272_v31 = vadd.s32 1, %v11735_v27  ;;  %s11537_s29 = smov 17   ;;  %s189_s28 = sand.u32 1, %s11487_s18  }
  0x22   : > { %8866 = vmatpush1.bf16.msra.mxu0 %v11666_v16  ;;  %vm277_vm1 = vcmp.lt.s32.totalorder %v273_v30, 16  ;;  %v281_v51 = vadd.s32 2, %v11733_v26  ;;  %v280_v1 = vadd.s32 2, %v11735_v27 }
  0x23   : > { %8868 = vmatprep.subr.bf16.mxu0 %v11668_v17  ;;  %vm276_vm2 = vcmp.lt.s32.totalorder %v272_v31, 16  ;;  %vm11751_vm3 = vmpackc.low %vm277_vm1, %vm277_vm1 }
  0x24   : > { %9951 = vrot.lane.b32.xlu0 %v11645_v8, %s11498_s7  ;;  %9961 = vrot.lane.b32.xlu1 %v11648_v9, %s11498_s7  ;;  %vm11760_vm4 = vmpackc.low %vm276_vm2, %vm276_vm2  ;;  %vm285_vm6 = vcmp.lt.s32.totalorder %v281_v51, 16  ;;  %vm284_vm8 = vcmp.lt.s32.totalorder %v280_v1, 16 }
  0x25   : > { %vm11795_vm7 = vmpackc.low %vm285_vm6, %vm285_vm6  ;;  %vm348_vm6 = vcmask 416768  }
  0x26   : > { %8870 = vmatpush1.bf16.msra.mxu0 %v11672_v18  ;;  %vm11810_vm9 = vmpackc.low %vm284_vm8, %vm284_vm8  ;;  %vm2628_vm8 = vcmask 932864  }
  0x28   : > { %9966 = vrot.lane.b32.xlu0 %v11656_v13, %s11498_s7  ;;  %9971 = vrot.lane.b32.xlu1 %v11658_v14, %s11498_s7  ;;  %s11527_s7 = smov 19  }
  0x2c   : > { %9976 = vrot.lane.b32.xlu0 %v11636_v4, %s11499_s8  ;;  %9981 = vrot.lane.b32.xlu1 %v11645_v8, %s11499_s8 }
  0x30   : > { %9986 = vrot.lane.b32.xlu0 %v11638_v5, %s11499_s8  ;;  %9991 = vrot.lane.b32.xlu1 %v11648_v9, %s11499_s8 }
  0x34   : > { %9996 = vrot.lane.b32.xlu0 %v11656_v13, %s11499_s8  ;;  %10001 = vrot.lane.b32.xlu1 %v11658_v14, %s11499_s8  ;;  %s11531_s8 = smov 83  }
  0x38   : > { %10006 = vrot.lane.b32.xlu0 %v11636_v4, %s11500_s9  ;;  %10011 = vrot.lane.b32.xlu1 %v11645_v8, %s11500_s9 }
  0x3c   : > { %10016 = vrot.lane.b32.xlu0 %v11638_v5, %s11500_s9  ;;  %10021 = vrot.lane.b32.xlu1 %v11648_v9, %s11500_s9 }
  0x40   : > { %10026 = vrot.lane.b32.xlu0 %v11656_v13, %s11500_s9  ;;  %10031 = vrot.lane.b32.xlu1 %v11658_v14, %s11500_s9  ;;  %s11513_s9 = smov 111  }
  0x44   : > { %10036 = vrot.lane.b32.xlu0 %v11636_v4, %s11501_s10  ;;  %10041 = vrot.lane.b32.xlu1 %v11645_v8, %s11501_s10 }
  0x48   : > { %10046 = vrot.lane.b32.xlu0 %v11638_v5, %s11501_s10  ;;  %10051 = vrot.lane.b32.xlu1 %v11648_v9, %s11501_s10 }
  0x4c   : > { %10056 = vrot.lane.b32.xlu0 %v11656_v13, %s11501_s10  ;;  %10061 = vrot.lane.b32.xlu1 %v11658_v14, %s11501_s10  ;;  %s11514_s10 = smov 110  }
  0x50   : > { %10066 = vrot.lane.b32.xlu0 %v11692_v19, %s11502_s11  ;;  %10071 = vrot.lane.b32.xlu1 %v11694_v20, %s11502_s11 }
  0x54   : > { %10076 = vrot.lane.b32.xlu0 %v11636_v4, %s11503_s12  ;;  %10081 = vrot.lane.b32.xlu1 %v11645_v8, %s11503_s12 }
  0x58   : > { %10086 = vrot.lane.b32.xlu0 %v15612_v3, %s11502_s11  ;;  %10091 = vrot.lane.b32.xlu1 %v11638_v5, %s11503_s12 }
  0x5c   : > { %10096 = vrot.lane.b32.xlu0 %v11702_v21, %s11502_s11  ;;  %10101 = vrot.lane.b32.xlu1 %v11704_v22, %s11502_s11 }
  0x60   : > { %10106 = vrot.lane.b32.xlu0 %v11648_v9, %s11503_s12  ;;  %10111 = vrot.lane.b32.xlu1 %v11656_v13, %s11503_s12 }
  0x64   : > { %10116 = vrot.lane.b32.xlu0 %v15612_v3, %s11502_s11  ;;  %10121 = vrot.lane.b32.xlu1 %v11658_v14, %s11503_s12  ;;  %s11515_s11 = smov 109   ;;  %s11516_s12 = smov 99  }
  0x68   : > { %10126 = vrot.lane.b32.xlu0 %v11692_v19, %s11504_s13  ;;  %10131 = vrot.lane.b32.xlu1 %v11694_v20, %s11504_s13 }
  0x6c   : > { %10136 = vrot.lane.b32.xlu0 %v11636_v4, %s11505_s14  ;;  %10141 = vrot.lane.b32.xlu1 %v11645_v8, %s11505_s14 }
  0x70   : > { %10146 = vrot.lane.b32.xlu0 %v15612_v3, %s11504_s13  ;;  %10151 = vrot.lane.b32.xlu1 %v11638_v5, %s11505_s14 }
  0x74   : > { %10156 = vrot.lane.b32.xlu0 %v11702_v21, %s11504_s13  ;;  %10161 = vrot.lane.b32.xlu1 %v11704_v22, %s11504_s13 }
  0x78   : > { %10166 = vrot.lane.b32.xlu0 %v11648_v9, %s11505_s14  ;;  %10171 = vrot.lane.b32.xlu1 %v11656_v13, %s11505_s14 }
  0x7c   : > { %10176 = vrot.lane.b32.xlu0 %v15612_v3, %s11504_s13  ;;  %10181 = vrot.lane.b32.xlu1 %v11658_v14, %s11505_s14  ;;  %s11517_s13 = smov 98   ;;  %s11519_s14 = smov 96  }
  0x80   : > { %10186 = vrot.lane.b32.xlu0 %v11692_v19, %s11506_s15  ;;  %10191 = vrot.lane.b32.xlu1 %v11694_v20, %s11506_s15 }
  0x84   : > { %10196 = vrot.lane.b32.xlu0 %v11636_v4, %s11507_s16  ;;  %10201 = vrot.lane.b32.xlu1 %v11645_v8, %s11507_s16 }
  0x88   : > { %10206 = vrot.lane.b32.xlu0 %v15612_v3, %s11506_s15  ;;  %10211 = vrot.lane.b32.xlu1 %v11638_v5, %s11507_s16 }
  0x8c   : > { %10216 = vrot.lane.b32.xlu0 %v11702_v21, %s11506_s15  ;;  %10221 = vrot.lane.b32.xlu1 %v11704_v22, %s11506_s15 }
  0x90   : > { %10226 = vrot.lane.b32.xlu0 %v11648_v9, %s11507_s16  ;;  %10231 = vrot.lane.b32.xlu1 %v11656_v13, %s11507_s16 }
  0x92   : > { %v9947_v28 = vpop.permute.xlu0 %9946  ;;  %v9957_v29 = vpop.permute.xlu1 %9956 }
  0x93   : > { %v9949_v32 = vunpack.i.h.bf16 %v9947_v28  ;;  %v9948_v33 = vunpack.i.l.bf16 %v9947_v28  ;;  %v9958_v34 = vunpack.i.l.bf16 %v9957_v29  ;;  %v9959_v37 = vunpack.i.h.bf16 %v9957_v29  ;;  %v4264_v28 = vld [vmem:[%s15605_s1 + $0x290] sm:$0xff] }
  0x94   : > { %10236 = vrot.lane.b32.xlu0 %v15612_v3, %s11506_s15  ;;  %10241 = vrot.lane.b32.xlu1 %v11658_v14, %s11507_s16  ;;  %s11532_s15 = smov 82  }
  0x95   : > { %v2306_v40 = vsel %vm2304_vm0, %v9948_v33, %v9949_v32  ;;  %v2305_v41 = vsel %vm2304_vm0, %v9958_v34, %v9948_v33 }
  0x96   : > { %v9952_v35 = vpop.permute.xlu0 %9951  ;;  %v9962_v36 = vpop.permute.xlu1 %9961 }
  0x97   : > { %v9954_v38 = vunpack.i.h.bf16 %v9952_v35  ;;  %v9953_v39 = vunpack.i.l.bf16 %v9952_v35  ;;  %v9964_v44 = vunpack.i.h.bf16 %v9962_v36  ;;  %v9963_v45 = vunpack.i.l.bf16 %v9962_v36 }
  0x98   : > { %10246 = vrot.lane.b32.xlu0 %v11692_v19, %s11508_s21  ;;  %10251 = vrot.lane.b32.xlu1 %v11694_v20, %s11508_s21 }
  0x99   : > { %v2307_v42 = vsel %vm2304_vm0, %v9959_v37, %v9953_v39  ;;  %v2308_v43 = vsel %vm2304_vm0, %v9953_v39, %v9954_v38  ;;  %v2310_v57 = vsel %vm2304_vm0, %v9963_v45, %v9964_v44  ;;  %v4596_v38 = vld [vmem:[%s15605_s1 + $0xcf0] sm:$0xff] }
  0x9a   : > { %v9967_v46 = vpop.permute.xlu0 %9966  ;;  %v9972_v47 = vpop.permute.xlu1 %9971  ;;  %v11755_v49 = vpack.c.bf16 %v2308_v43, %v2306_v40  ;;  %v11757_v50 = vpack.c.bf16 %v2307_v42, %v2305_v41  ;;  %v289_v40 = vadd.s32 3, %v11733_v26 }
  0x9b   : > { %v9969_v52 = vunpack.i.h.bf16 %v9967_v46  ;;  %v9968_v53 = vunpack.i.l.bf16 %v9967_v46  ;;  %v9974_v54 = vunpack.i.h.bf16 %v9972_v47  ;;  %v9973_v55 = vunpack.i.l.bf16 %v9972_v47 }
  0x9c   : > { %10256 = vrot.lane.b32.xlu0 %v15612_v3, %s11508_s21  ;;  %10261 = vrot.lane.b32.xlu1 %v11702_v21, %s11508_s21  ;;  %vm293_vm11 = vcmp.lt.s32.totalorder %v289_v40, 16 }
  0x9d   : > { %v2312_v58 = vsel %vm2304_vm0, %v9968_v53, %v9969_v52  ;;  %v2311_v59 = vsel %vm2304_vm0, %v9974_v54, %v9968_v53  ;;  %v2309_v60 = vsel %vm2304_vm0, %v9973_v55, %v9963_v45  ;;  %8873 = vmatprep.subr.msk.bf16.mxu0 %vm11751_vm3, %v11755_v49  ;;  %vm11845_vm12 = vmpackc.low %vm293_vm11, %vm293_vm11 }
  0x9e   : > { %8876 = vmatpush1.bf16.msk.msra.mxu0 %vm11760_vm4, %v11757_v50  ;;  %v9977_v61 = vpop.permute.xlu0 %9976  ;;  %v9982_v62 = vpop.permute.xlu1 %9981  ;;  %v11778_v63 = vpack.c.bf16 %v2312_v58, %v2310_v57  ;;  %v11780_v0 = vpack.c.bf16 %v2311_v59, %v2309_v60  ;;  %v288_v57 = vadd.s32 3, %v11735_v27 }
  0x9f   : > { %v9979_v2 = vunpack.i.h.bf16 %v9977_v61  ;;  %v9978_v6 = vunpack.i.l.bf16 %v9977_v61  ;;  %v9984_v7 = vunpack.i.h.bf16 %v9982_v62  ;;  %v9983_v10 = vunpack.i.l.bf16 %v9982_v62 }
  0xa0   : > { %10266 = vrot.lane.b32.xlu0 %v11704_v22, %s11508_s21  ;;  %10271 = vrot.lane.b32.xlu1 %v15612_v3, %s11508_s21  ;;  %vm292_vm13 = vcmp.lt.s32.totalorder %v288_v57, 16  ;;  %v248_v57 = vadd.s32 4294967293, %v11735_v27  ;;  %s11523_s21 = smov 32  }
  0xa1   : > { %v2387_v11 = vsel %vm2385_vm5, %v9978_v6, %v9979_v2  ;;  %v2389_v12 = vsel %vm2385_vm5, %v9983_v10, %v9984_v7  ;;  %8879 = vmatprep.subr.msk.bf16.mxu0 %vm11751_vm3, %v11778_v63  ;;  %vm11860_vm14 = vmpackc.low %vm292_vm13, %vm292_vm13  ;;  %v4290_v7 = vld [vmem:[%s15605_s1 + $0x360] sm:$0xff] }
  0xa2   : > { %8882 = vmatpush1.bf16.msk.msra.mxu0 %vm11760_vm4, %v11780_v0  ;;  %v9987_v24 = vpop.permute.xlu0 %9986  ;;  %v9992_v25 = vpop.permute.xlu1 %9991  ;;  %v11799_v29 = vpack.c.bf16 %v2389_v12, %v2387_v11  ;;  %vm250_vm2 = vcmp.ge.s32.totalorder %v248_v57, 0 }
  0xa3   : > { %v9989_v30 = vunpack.i.h.bf16 %v9987_v24  ;;  %v9988_v31 = vunpack.i.l.bf16 %v9987_v24  ;;  %v9994_v34 = vunpack.i.h.bf16 %v9992_v25  ;;  %v9993_v35 = vunpack.i.l.bf16 %v9992_v25 }
  0xa4   : > { %10276 = vrot.lane.b32.xlu0 %v11692_v19, %s11509_s23  ;;  %10281 = vrot.lane.b32.xlu1 %v11694_v20, %s11509_s23 }
  0xa5   : > { %v2386_v32 = vsel %vm2385_vm5, %v9988_v31, %v9978_v6  ;;  %v2388_v33 = vsel %vm2385_vm5, %v9989_v30, %v9983_v10  ;;  %8885 = vmatprep.subr.msk.bf16.mxu0 %vm11795_vm7, %v11799_v29  ;;  %v2391_v45 = vsel %vm2385_vm5, %v9993_v35, %v9994_v34  ;;  %v4622_v34 = vld [vmem:[%s15605_s1 + $0xdc0] sm:$0xff] }
  0xa6   : > { %v9997_v36 = vpop.permute.xlu0 %9996  ;;  %v10002_v37 = vpop.permute.xlu1 %10001  ;;  %v11814_v39 = vpack.c.bf16 %v2388_v33, %v2386_v32 }
  0xa7   : > { %v9999_v41 = vunpack.i.h.bf16 %v9997_v36  ;;  %v9998_v42 = vunpack.i.l.bf16 %v9997_v36  ;;  %v10004_v43 = vunpack.i.h.bf16 %v10002_v37  ;;  %v10003_v44 = vunpack.i.l.bf16 %v10002_v37 }
  0xa8   : > { %10286 = vrot.lane.b32.xlu0 %v15612_v3, %s11509_s23  ;;  %10291 = vrot.lane.b32.xlu1 %v11702_v21, %s11509_s23  ;;  %v249_v36 = vadd.s32 4294967293, %v11733_v26 }
  0xa9   : > { %v2393_v46 = vsel %vm2385_vm5, %v9998_v42, %v9999_v41  ;;  %v2392_v47 = vsel %vm2385_vm5, %v10004_v43, %v9998_v42  ;;  %v2390_v51 = vsel %vm2385_vm5, %v10003_v44, %v9993_v35  ;;  %8888 = vmatpush1.bf16.msk.msra.mxu0 %vm11810_vm9, %v11814_v39  ;;  %vm11915_vm5 = vmpackc.low %vm250_vm2, %vm250_vm2  ;;  %vm2709_vm2 = vcmask 924672  }
  0xaa   : > { %v10007_v52 = vpop.permute.xlu0 %10006  ;;  %v10012_v53 = vpop.permute.xlu1 %10011  ;;  %v11828_v54 = vpack.c.bf16 %v2393_v46, %v2391_v45  ;;  %v11830_v55 = vpack.c.bf16 %v2392_v47, %v2390_v51  ;;  %vm251_vm0 = vcmp.ge.s32.totalorder %v249_v36, 0 }
  0xab   : > { %v10009_v58 = vunpack.i.h.bf16 %v10007_v52  ;;  %v10008_v59 = vunpack.i.l.bf16 %v10007_v52  ;;  %v10014_v60 = vunpack.i.h.bf16 %v10012_v53  ;;  %v10013_v61 = vunpack.i.l.bf16 %v10012_v53  ;;  %vm11900_vm1 = vmpackc.low %vm251_vm0, %vm251_vm0 }
  0xac   : > { %10296 = vrot.lane.b32.xlu0 %v11704_v22, %s11509_s23  ;;  %10301 = vrot.lane.b32.xlu1 %v15612_v3, %s11509_s23  ;;  %vm433_vm0 = vcmask 408576   ;;  %s11518_s23 = smov 97  }
  0xad   : > { %v2468_v62 = vsel %vm2466_vm10, %v10008_v59, %v10009_v58  ;;  %v2470_v1 = vsel %vm2466_vm10, %v10013_v61, %v10014_v60  ;;  %8891 = vmatprep.subr.msk.bf16.mxu0 %vm11795_vm7, %v11828_v54 }
  0xae   : > { %8894 = vmatpush1.bf16.msk.msra.mxu0 %vm11810_vm9, %v11830_v55  ;;  %v10017_v2 = vpop.permute.xlu0 %10016  ;;  %v10022_v6 = vpop.permute.xlu1 %10021  ;;  %v11849_v10 = vpack.c.bf16 %v2470_v1, %v2468_v62  ;;  %v4189_v62 = vld [vmem:[%s15605_s1 + $0x38] sm:$0xff] }
  0xaf   : > { %v10019_v11 = vunpack.i.h.bf16 %v10017_v2  ;;  %v10018_v12 = vunpack.i.l.bf16 %v10017_v2  ;;  %v10024_v30 = vunpack.i.h.bf16 %v10022_v6  ;;  %v10023_v31 = vunpack.i.l.bf16 %v10022_v6  ;;  %6468 = vmatprep.mubr.f32.mxu0 %v4189_v62 }
  0xb0   : > { %10306 = vrot.lane.b32.xlu0 %v11692_v19, %s11510_s24  ;;  %10311 = vrot.lane.b32.xlu1 %v11694_v20, %s11510_s24 }
  0xb1   : > { %v2467_v24 = vsel %vm2466_vm10, %v10018_v12, %v10008_v59  ;;  %v2469_v25 = vsel %vm2466_vm10, %v10019_v11, %v10013_v61  ;;  %8897 = vmatprep.subr.msk.bf16.mxu0 %vm11845_vm12, %v11849_v10  ;;  %v2472_v43 = vsel %vm2466_vm10, %v10023_v31, %v10024_v30  ;;  %v4316_v12 = vld [vmem:[%s15605_s1 + $0x430] sm:$0xff] }
  0xb2   : > { %v10027_v32 = vpop.permute.xlu0 %10026  ;;  %v10032_v33 = vpop.permute.xlu1 %10031  ;;  %v11864_v35 = vpack.c.bf16 %v2469_v25, %v2467_v24 }
  0xb3   : > { %v10029_v37 = vunpack.i.h.bf16 %v10027_v32  ;;  %v10028_v40 = vunpack.i.l.bf16 %v10027_v32  ;;  %v10034_v41 = vunpack.i.h.bf16 %v10032_v33  ;;  %v10033_v42 = vunpack.i.l.bf16 %v10032_v33 }
  0xb4   : > { %10316 = vrot.lane.b32.xlu0 %v15612_v3, %s11510_s24  ;;  %10321 = vrot.lane.b32.xlu1 %v11702_v21, %s11510_s24 }
  0xb5   : > { %v2474_v44 = vsel %vm2466_vm10, %v10028_v40, %v10029_v37  ;;  %v2473_v45 = vsel %vm2466_vm10, %v10034_v41, %v10028_v40  ;;  %v2471_v46 = vsel %vm2466_vm10, %v10033_v42, %v10023_v31  ;;  %8900 = vmatpush1.bf16.msk.msra.mxu0 %vm11860_vm14, %v11864_v35  ;;  %v4648_v41 = vld [vmem:[%s15605_s1 + $0xe90] sm:$0xff] }
  0xb6   : > { %v10037_v47 = vpop.permute.xlu0 %10036  ;;  %v10042_v51 = vpop.permute.xlu1 %10041  ;;  %v11878_v52 = vpack.c.bf16 %v2474_v44, %v2472_v43  ;;  %v11880_v53 = vpack.c.bf16 %v2473_v45, %v2471_v46 }
  0xb7   : > { %v10039_v58 = vunpack.i.h.bf16 %v10037_v47  ;;  %v10038_v59 = vunpack.i.l.bf16 %v10037_v47  ;;  %v10044_v60 = vunpack.i.h.bf16 %v10042_v51  ;;  %v10043_v61 = vunpack.i.l.bf16 %v10042_v51 }
  0xb8   : > { %15648 = vst [vmem:[#allocation8_spill] sm:$0xff] %v11880_v53  ;;  %10326 = vrot.lane.b32.xlu0 %v11704_v22, %s11510_s24  ;;  %10331 = vrot.lane.b32.xlu1 %v15612_v3, %s11510_s24  ;;  %s11522_s24 = smov 33  }
  0xb9   : > { %v2549_v1 = vsel %vm2547_vm15, %v10038_v59, %v10039_v58  ;;  %v2551_v2 = vsel %vm2547_vm15, %v10043_v61, %v10044_v60  ;;  %8903 = vmatprep.subr.msk.bf16.mxu0 %vm11845_vm12, %v11878_v52 }
  0xba   : > { %8906 = vmatpush1.bf16.msk.msra.mxu0 %vm11860_vm14, %v11880_v53  ;;  %v10047_v6 = vpop.permute.xlu0 %10046  ;;  %v10052_v11 = vpop.permute.xlu1 %10051  ;;  %v11904_v24 = vpack.c.bf16 %v2551_v2, %v2549_v1  ;;  %v257_v1 = vadd.s32 4294967294, %v11733_v26 }
  0xbb   : > { %v10049_v25 = vunpack.i.h.bf16 %v10047_v6  ;;  %v10048_v30 = vunpack.i.l.bf16 %v10047_v6  ;;  %v10054_v33 = vunpack.i.h.bf16 %v10052_v11  ;;  %v10053_v36 = vunpack.i.l.bf16 %v10052_v11 }
  0xbc   : > { %15651 = vst [vmem:[#allocation9_spill] sm:$0xff] %v11904_v24  ;;  %10336 = vrot.lane.b32.xlu0 %v11692_v19, %s11511_s30  ;;  %10341 = vrot.lane.b32.xlu1 %v11694_v20, %s11511_s30  ;;  %vm259_vm10 = vcmp.ge.s32.totalorder %v257_v1, 0 }
  0xbd   : > { %v2548_v31 = vsel %vm2547_vm15, %v10048_v30, %v10038_v59  ;;  %v2550_v32 = vsel %vm2547_vm15, %v10049_v25, %v10043_v61  ;;  %8909 = vmatprep.subr.msk.bf16.mxu0 %vm11900_vm1, %v11904_v24  ;;  %v2553_v47 = vsel %vm2547_vm15, %v10053_v36, %v10054_v33  ;;  %vm11958_vm11 = vmpackc.low %vm259_vm10, %vm259_vm10 }
  0xbe   : > { %v10057_v37 = vpop.permute.xlu0 %10056  ;;  %v10062_v40 = vpop.permute.xlu1 %10061  ;;  %v11919_v42 = vpack.c.bf16 %v2550_v32, %v2548_v31 }
  0xbf   : > { %v10059_v43 = vunpack.i.h.bf16 %v10057_v37  ;;  %v10058_v44 = vunpack.i.l.bf16 %v10057_v37  ;;  %v10064_v45 = vunpack.i.h.bf16 %v10062_v40  ;;  %v10063_v46 = vunpack.i.l.bf16 %v10062_v40 }
  0xc0   : > { %15654 = vst [vmem:[#allocation10_spill] sm:$0xff] %v11919_v42  ;;  %10346 = vrot.lane.b32.xlu0 %v15612_v3, %s11511_s30  ;;  %10351 = vrot.lane.b32.xlu1 %v11702_v21, %s11511_s30  ;;  %v256_v37 = vadd.s32 4294967294, %v11735_v27 }
  0xc1   : > { %v2555_v51 = vsel %vm2547_vm15, %v10058_v44, %v10059_v43  ;;  %v2554_v57 = vsel %vm2547_vm15, %v10064_v45, %v10058_v44  ;;  %v2552_v58 = vsel %vm2547_vm15, %v10063_v46, %v10053_v36  ;;  %8912 = vmatpush1.bf16.msk.msra.mxu0 %vm11915_vm5, %v11919_v42 }
  0xc2   : > { %v10067_v59 = vpop.permute.xlu0 %10066  ;;  %v10072_v60 = vpop.permute.xlu1 %10071  ;;  %v11932_v61 = vpack.c.bf16 %v2555_v51, %v2553_v47  ;;  %v11934_v62 = vpack.c.bf16 %v2554_v57, %v2552_v58  ;;  %vm258_vm13 = vcmp.ge.s32.totalorder %v256_v37, 0  ;;  %v4342_v58 = vld [vmem:[%s15605_s1 + $0x500] sm:$0xff] }
  0xc3   : > { %v10069_v2 = vunpack.i.h.bf16 %v10067_v59  ;;  %v10068_v6 = vunpack.i.l.bf16 %v10067_v59  ;;  %v10074_v11 = vunpack.i.h.bf16 %v10072_v60  ;;  %v10073_v25 = vunpack.i.l.bf16 %v10072_v60  ;;  %vm11980_vm15 = vmpackc.low %vm258_vm13, %vm258_vm13 }
  0xc4   : > { %15655 = vst [vmem:[#allocation11_spill] sm:$0xff] %v11932_v61  ;;  %15656 = vst [vmem:[#allocation12_spill] sm:$0xff] %v11934_v62  ;;  %10356 = vrot.lane.b32.xlu0 %v11704_v22, %s11511_s30  ;;  %10361 = vrot.lane.b32.xlu1 %v15612_v3, %s11511_s30  ;;  %s11535_s30 = smov 79  }
  0xc5   : > { %8915 = vmatprep.subr.msk.bf16.mxu0 %vm11900_vm1, %v11932_v61  ;;  %v350_v30 = vsel %vm348_vm6, %v10068_v6, %v10069_v2  ;;  %v352_v31 = vsel %vm348_vm6, %v10073_v25, %v10074_v11  ;;  %v4183_v2 = vld [vmem:[%s15605_s1 + $0x8] sm:$0xff] }
  0xc6   : > { %8918 = vmatpush1.bf16.msk.msra.mxu0 %vm11915_vm5, %v11934_v62  ;;  %v10077_v32 = vpop.permute.xlu0 %10076  ;;  %v10082_v33 = vpop.permute.xlu1 %10081  ;;  %v8587_v36 = vpack.c.bf16 %v352_v31, %v350_v30  ;;  %5409 = vmatprep.mubr.f32.mxu1 %v4183_v2 }
  0xc7   : > { %v10079_v40 = vunpack.i.h.bf16 %v10077_v32  ;;  %v10078_v43 = vunpack.i.l.bf16 %v10077_v32  ;;  %v10084_v44 = vunpack.i.h.bf16 %v10082_v33  ;;  %v10083_v45 = vunpack.i.l.bf16 %v10082_v33 }
  0xc8   : > { %10366 = vrot.lane.b32.xlu0 %v11692_v19, %s11512_s5  ;;  %10371 = vrot.lane.b32.xlu1 %v11694_v20, %s11512_s5 }
  0xc9   : > { %v2630_v46 = vsel %vm2628_vm8, %v10078_v43, %v10079_v40  ;;  %v2632_v47 = vsel %vm2628_vm8, %v10083_v45, %v10084_v44  ;;  %8589 = vmatprep.subr.msk.bf16.mxu1 %vm11900_vm1, %v8587_v36  ;;  %v4674_v44 = vld [vmem:[%s15605_s1 + $0xf60] sm:$0xff] }
  0xca   : > { %v10087_v51 = vpop.permute.xlu0 %10086  ;;  %v10092_v57 = vpop.permute.xlu1 %10091  ;;  %v11962_v59 = vpack.c.bf16 %v2632_v47, %v2630_v46 }
  0xcb   : > { %v10089_v19 = vunpack.i.h.bf16 %v10087_v51  ;;  %v10088_v60 = vunpack.i.l.bf16 %v10087_v51  ;;  %v10094_v1 = vunpack.i.h.bf16 %v10092_v57  ;;  %v10093_v20 = vunpack.i.l.bf16 %v10092_v57 }
  0xcc   : > { %15659 = vst [vmem:[#allocation13_spill] sm:$0xff] %v11962_v59  ;;  %10376 = vrot.lane.b32.xlu0 %v15612_v3, %s11512_s5  ;;  %10381 = vrot.lane.b32.xlu1 %v11702_v21, %s11512_s5 }
  0xcd   : > { %v2629_v11 = vsel %vm2628_vm8, %v10093_v20, %v10078_v43  ;;  %v2631_v30 = vsel %vm2628_vm8, %v10094_v1, %v10083_v45  ;;  %8921 = vmatprep.subr.msk.bf16.mxu0 %vm11958_vm11, %v11962_v59  ;;  %v349_v31 = vsel %vm348_vm6, %v10088_v60, %v10068_v6  ;;  %v351_v32 = vsel %vm348_vm6, %v10089_v19, %v10073_v25 }
  0xce   : > { %v10097_v33 = vpop.permute.xlu0 %10096  ;;  %v10102_v36 = vpop.permute.xlu1 %10101  ;;  %v8590_v40 = vpack.c.bf16 %v351_v32, %v349_v31  ;;  %v11984_v21 = vpack.c.bf16 %v2631_v30, %v2629_v11 }
  0xcf   : > { %v10099_v43 = vunpack.i.h.bf16 %v10097_v33  ;;  %v10098_v45 = vunpack.i.l.bf16 %v10097_v33  ;;  %v10104_v46 = vunpack.i.h.bf16 %v10102_v36  ;;  %v10103_v47 = vunpack.i.l.bf16 %v10102_v36 }
  0xd0   : > { %15662 = vst [vmem:[#allocation14_spill] sm:$0xff] %v11984_v21  ;;  %10386 = vrot.lane.b32.xlu0 %v11704_v22, %s11512_s5  ;;  %10391 = vrot.lane.b32.xlu1 %v15612_v3, %s11512_s5  ;;  %s11521_s5 = smov 34  }
  0xd1   : > { %v354_v6 = vsel %vm348_vm6, %v10098_v45, %v10099_v43  ;;  %v356_v25 = vsel %vm348_vm6, %v10103_v47, %v10104_v46  ;;  %8592 = vmatpush1.bf16.msk.msra.mxu1 %vm11915_vm5, %v8590_v40  ;;  %8924 = vmatpush1.bf16.msk.msra.mxu0 %vm11980_vm15, %v11984_v21 }
  0xd2   : > { %v10107_v37 = vpop.permute.xlu0 %10106  ;;  %v10112_v51 = vpop.permute.xlu1 %10111  ;;  %v8593_v57 = vpack.c.bf16 %v356_v25, %v354_v6 }
  0xd3   : > { %v10109_v19 = vunpack.i.h.bf16 %v10107_v37  ;;  %v10108_v60 = vunpack.i.l.bf16 %v10107_v37  ;;  %v10114_v22 = vunpack.i.h.bf16 %v10112_v51  ;;  %v10113_v1 = vunpack.i.l.bf16 %v10112_v51 }
  0xd4   : > { %10396 = vrot.lane.b32.xlu0 %v11636_v4, %s11513_s9  ;;  %10401 = vrot.lane.b32.xlu1 %v11645_v8, %s11513_s9 }
  0xd5   : > { %v2634_v20 = vsel %vm2628_vm8, %v10108_v60, %v10109_v19  ;;  %v2636_v2 = vsel %vm2628_vm8, %v10113_v1, %v10114_v22  ;;  %8595 = vmatprep.subr.msk.bf16.mxu1 %vm11900_vm1, %v8593_v57  ;;  %v265_v22 = vadd.s32 4294967295, %v11733_v26 }
  0xd6   : > { %v10117_v11 = vpop.permute.xlu0 %10116  ;;  %v10122_v30 = vpop.permute.xlu1 %10121  ;;  %v12005_v31 = vpack.c.bf16 %v2636_v2, %v2634_v20 }
  0xd7   : > { %v10119_v32 = vunpack.i.h.bf16 %v10117_v11  ;;  %v10118_v33 = vunpack.i.l.bf16 %v10117_v11  ;;  %v10124_v36 = vunpack.i.h.bf16 %v10122_v30  ;;  %v10123_v40 = vunpack.i.l.bf16 %v10122_v30 }
  0xd8   : > { %15663 = vst [vmem:[#allocation15_spill] sm:$0xff] %v12005_v31  ;;  %10406 = vrot.lane.b32.xlu0 %v11638_v5, %s11513_s9  ;;  %10411 = vrot.lane.b32.xlu1 %v11648_v9, %s11513_s9 }
  0xd9   : > { %v353_v43 = vsel %vm348_vm6, %v10118_v33, %v10098_v45  ;;  %v355_v46 = vsel %vm348_vm6, %v10119_v32, %v10103_v47  ;;  %v2633_v6 = vsel %vm2628_vm8, %v10123_v40, %v10108_v60  ;;  %v2635_v25 = vsel %vm2628_vm8, %v10124_v36, %v10113_v1  ;;  %8927 = vmatprep.subr.msk.bf16.mxu0 %vm11958_vm11, %v12005_v31 }
  0xda   : > { %v10127_v37 = vpop.permute.xlu0 %10126  ;;  %v10132_v51 = vpop.permute.xlu1 %10131  ;;  %v8596_v57 = vpack.c.bf16 %v355_v46, %v353_v43  ;;  %v12018_v19 = vpack.c.bf16 %v2635_v25, %v2633_v6  ;;  %vm267_vm6 = vcmp.ge.s32.totalorder %v265_v22, 0  ;;  %v264_v32 = vadd.s32 4294967295, %v11735_v27 }
  0xdb   : > { %v10129_v20 = vunpack.i.h.bf16 %v10127_v37  ;;  %v10128_v45 = vunpack.i.l.bf16 %v10127_v37  ;;  %v10134_v2 = vunpack.i.h.bf16 %v10132_v51  ;;  %v10133_v47 = vunpack.i.l.bf16 %v10132_v51  ;;  %vm12041_vm8 = vmpackc.low %vm267_vm6, %vm267_vm6  ;;  %v4368_v37 = vld [vmem:[%s15605_s1 + $0x5d0] sm:$0xff] }
  0xdc   : > { %15664 = vst [vmem:[#allocation16_spill] sm:$0xff] %v12018_v19  ;;  %10416 = vrot.lane.b32.xlu0 %v11656_v13, %s11513_s9  ;;  %10421 = vrot.lane.b32.xlu1 %v11658_v14, %s11513_s9  ;;  %vm266_vm10 = vcmp.ge.s32.totalorder %v264_v32, 0  ;;  %vm518_vm6 = vcmask 400384   ;;  %s11530_s9 = smov 93  }
  0xdd   : > { %v435_v60 = vsel %vm433_vm0, %v10128_v45, %v10129_v20  ;;  %v437_v1 = vsel %vm433_vm0, %v10133_v47, %v10134_v2  ;;  %8598 = vmatpush1.bf16.msk.msra.mxu1 %vm11915_vm5, %v8596_v57  ;;  %8930 = vmatpush1.bf16.msk.msra.mxu0 %vm11980_vm15, %v12018_v19  ;;  %vm12058_vm13 = vmpackc.low %vm266_vm10, %vm266_vm10  ;;  %vm676_vm10 = vcmask 384000  }
  0xde   : > { %v10137_v26 = vpop.permute.xlu0 %10136  ;;  %v10142_v11 = vpop.permute.xlu1 %10141  ;;  %v8599_v30 = vpack.c.bf16 %v437_v1, %v435_v60 }
  0xdf   : > { %v10139_v33 = vunpack.i.h.bf16 %v10137_v26  ;;  %v10138_v36 = vunpack.i.l.bf16 %v10137_v26  ;;  %v10144_v40 = vunpack.i.h.bf16 %v10142_v11  ;;  %v10143_v43 = vunpack.i.l.bf16 %v10142_v11 }
  0xe0   : > { %10426 = vrot.lane.b32.xlu0 %v11636_v4, %s11514_s10  ;;  %10431 = vrot.lane.b32.xlu1 %v11645_v8, %s11514_s10 }
  0xe1   : > { %v2711_v46 = vsel %vm2709_vm2, %v10138_v36, %v10139_v33  ;;  %v2713_v6 = vsel %vm2709_vm2, %v10143_v43, %v10144_v40  ;;  %8601 = vmatprep.subr.msk.bf16.mxu1 %vm11958_vm11, %v8599_v30  ;;  %v4700_v30 = vld [vmem:[%s15605_s1 + $0x1030] sm:$0xff] }
  0xe2   : > { %v10147_v25 = vpop.permute.xlu0 %10146  ;;  %v10152_v27 = vpop.permute.xlu1 %10151  ;;  %v12045_v51 = vpack.c.bf16 %v2713_v6, %v2711_v46 }
  0xe3   : > { %v10149_v4 = vunpack.i.h.bf16 %v10147_v25  ;;  %v10148_v57 = vunpack.i.l.bf16 %v10147_v25  ;;  %v10154_v22 = vunpack.i.h.bf16 %v10152_v27  ;;  %v10153_v8 = vunpack.i.l.bf16 %v10152_v27 }
  0xe4   : > { %15667 = vst [vmem:[#allocation17_spill] sm:$0xff] %v12045_v51  ;;  %10436 = vrot.lane.b32.xlu0 %v11638_v5, %s11514_s10  ;;  %10441 = vrot.lane.b32.xlu1 %v11648_v9, %s11514_s10 }
  0xe5   : > { %v434_v20 = vsel %vm433_vm0, %v10148_v57, %v10128_v45  ;;  %v436_v2 = vsel %vm433_vm0, %v10149_v4, %v10133_v47  ;;  %v2710_v60 = vsel %vm2709_vm2, %v10153_v8, %v10138_v36  ;;  %v2712_v1 = vsel %vm2709_vm2, %v10154_v22, %v10143_v43  ;;  %8933 = vmatprep.subr.msk.bf16.mxu0 %vm12041_vm8, %v12045_v51  ;;  %v12069_v36 = vld [vmem:[%s11630_s6 + $0x8] sm:$0xff]  ;;  %v12076_v43 = vld [vmem:[%s11630_s6 + $0x18] sm:$0xff] }
  0xe6   : > { %v10157_v26 = vpop.permute.xlu0 %10156  ;;  %v10162_v11 = vpop.permute.xlu1 %10161  ;;  %v8602_v5 = vpack.c.bf16 %v436_v2, %v434_v20  ;;  %v12062_v9 = vpack.c.bf16 %v2712_v1, %v2710_v60  ;;  %v12073_v40 = vpack.i.bf16 %v15612_v3, %v12069_v36  ;;  %v12080_v46 = vpack.i.bf16 %v15612_v3, %v12076_v43  ;;  %v12094_v20 = vld [vmem:[%s11630_s6] sm:$0xff]  ;;  %v12097_v2 = vld [vmem:[%s11630_s6 + $0x10] sm:$0xff]  ;;  %v12104_v1 = vld [vmem:[%s11630_s6 + $0x28] sm:$0xff] }
  0xe7   : > { %v10159_v45 = vunpack.i.h.bf16 %v10157_v26  ;;  %v10158_v47 = vunpack.i.l.bf16 %v10157_v26  ;;  %v10164_v32 = vunpack.i.h.bf16 %v10162_v11  ;;  %v10163_v33 = vunpack.i.l.bf16 %v10162_v11 }
  0xe8   : > { %15670 = vst [vmem:[#allocation18_spill] sm:$0xff] %v12062_v9  ;;  %10446 = vrot.lane.b32.xlu0 %v11656_v13, %s11514_s10  ;;  %10451 = vrot.lane.b32.xlu1 %v11658_v14, %s11514_s10  ;;  %v12101_v60 = vpack.i.bf16 %v12097_v2, %v12094_v20  ;;  %v12108_v26 = vpack.i.bf16 %v15612_v3, %v12104_v1  ;;  %s11520_s10 = smov 95  }
  0xe9   : > { %v439_v6 = vsel %vm433_vm0, %v10158_v47, %v10159_v45  ;;  %v441_v13 = vsel %vm433_vm0, %v10163_v33, %v10164_v32  ;;  %8604 = vmatpush1.bf16.msk.msra.mxu1 %vm11980_vm15, %v8602_v5  ;;  %8936 = vmatpush1.bf16.msk.msra.mxu0 %vm12058_vm13, %v12062_v9 }
  0xea   : > { %v10167_v14 = vpop.permute.xlu0 %10166  ;;  %v10172_v25 = vpop.permute.xlu1 %10171  ;;  %v8605_v27 = vpack.c.bf16 %v441_v13, %v439_v6 }
  0xeb   : > { %v10169_v4 = vunpack.i.h.bf16 %v10167_v14  ;;  %v10168_v57 = vunpack.i.l.bf16 %v10167_v14  ;;  %v10174_v22 = vunpack.i.h.bf16 %v10172_v25  ;;  %v10173_v8 = vunpack.i.l.bf16 %v10172_v25 }
  0xec   : > { %10456 = vrot.lane.b32.xlu0 %v12073_v40, %s11515_s11  ;;  %10461 = vrot.lane.b32.xlu1 %v12080_v46, %s11515_s11 }
  0xed   : > { %v2715_v11 = vsel %vm2709_vm2, %v10168_v57, %v10169_v4  ;;  %v2717_v5 = vsel %vm2709_vm2, %v10173_v8, %v10174_v22  ;;  %8607 = vmatprep.subr.msk.bf16.mxu1 %vm11958_vm11, %v8605_v27  ;;  %v12121_v4 = vld [vmem:[%s11630_s6 + $0x38] sm:$0xff]  ;;  %v12128_v27 = vld [vmem:[%s11630_s6 + $0x20] sm:$0xff] }
  0xee   : > { %v10177_v45 = vpop.permute.xlu0 %10176  ;;  %v10182_v32 = vpop.permute.xlu1 %10181  ;;  %v12114_v6 = vpack.c.bf16 %v2717_v5, %v2715_v11  ;;  %v12125_v22 = vpack.i.bf16 %v15612_v3, %v12121_v4  ;;  %v12131_v11 = vld [vmem:[%s11630_s6 + $0x30] sm:$0xff] }
  0xef   : > { %v10179_v13 = vunpack.i.h.bf16 %v10177_v45  ;;  %v10178_v14 = vunpack.i.l.bf16 %v10177_v45  ;;  %v10184_v25 = vunpack.i.h.bf16 %v10182_v32  ;;  %v10183_v23 = vunpack.i.l.bf16 %v10182_v32 }
  0xf0   : > { %15671 = vst [vmem:[#allocation19_spill] sm:$0xff] %v12114_v6  ;;  %10466 = vrot.lane.b32.xlu0 %v12101_v60, %s11515_s11  ;;  %10471 = vrot.lane.b32.xlu1 %v12108_v26, %s11515_s11  ;;  %v12135_v5 = vpack.i.bf16 %v12131_v11, %v12128_v27 }
  0xf1   : > { %v438_v45 = vsel %vm433_vm0, %v10178_v14, %v10158_v47  ;;  %v440_v32 = vsel %vm433_vm0, %v10179_v13, %v10163_v33  ;;  %v2714_v9 = vsel %vm2709_vm2, %v10183_v23, %v10168_v57  ;;  %v2716_v51 = vsel %vm2709_vm2, %v10184_v25, %v10173_v8  ;;  %8939 = vmatprep.subr.msk.bf16.mxu0 %vm12041_vm8, %v12114_v6 }
  0xf2   : > { %v10187_v3 = vpop.permute.xlu0 %10186  ;;  %v10192_v19 = vpop.permute.xlu1 %10191  ;;  %v8608_v31 = vpack.c.bf16 %v440_v32, %v438_v45  ;;  %v12144_v21 = vpack.c.bf16 %v2716_v51, %v2714_v9  ;;  %vm2790_vm0 = vcmask 916480   ;;  %vm599_vm2 = vcmask 392192  }
  0xf3   : > { %v10189_v59 = vunpack.i.h.bf16 %v10187_v3  ;;  %v10188_v62 = vunpack.i.l.bf16 %v10187_v3  ;;  %v10194_v61 = vunpack.i.h.bf16 %v10192_v19  ;;  %v10193_v47 = vunpack.i.l.bf16 %v10192_v19 }
  0xf4   : > { %15672 = vst [vmem:[#allocation20_spill] sm:$0xff] %v12144_v21  ;;  %10476 = vrot.lane.b32.xlu0 %v12125_v22, %s11515_s11  ;;  %10481 = vrot.lane.b32.xlu1 %v12135_v5, %s11515_s11 }
  0xf5   : > { %v520_v23 = vsel %vm518_vm6, %v10188_v62, %v10189_v59  ;;  %v522_v33 = vsel %vm518_vm6, %v10193_v47, %v10194_v61  ;;  %8610 = vmatpush1.bf16.msk.msra.mxu1 %vm11980_vm15, %v8608_v31  ;;  %8942 = vmatpush1.bf16.msk.msra.mxu0 %vm12058_vm13, %v12144_v21 }
  0xf6   : > { %v10197_v3 = vpop.permute.xlu0 %10196  ;;  %v10202_v51 = vpop.permute.xlu1 %10201  ;;  %v8611_v19 = vpack.c.bf16 %v522_v33, %v520_v23 }
  0xf7   : > { %v10199_v9 = vunpack.i.h.bf16 %v10197_v3  ;;  %v10198_v57 = vunpack.i.l.bf16 %v10197_v3  ;;  %v10204_v8 = vunpack.i.h.bf16 %v10202_v51  ;;  %v10203_v13 = vunpack.i.l.bf16 %v10202_v51 }
  0xf8   : > { %10486 = vrot.lane.b32.xlu0 %v12073_v40, %s11516_s12  ;;  %10491 = vrot.lane.b32.xlu1 %v12080_v46, %s11516_s12 }
  0xf9   : > { %8613 = vmatprep.subr.msk.bf16.mxu1 %vm12041_vm8, %v8611_v19  ;;  %v2792_v61 = vsel %vm2790_vm0, %v10198_v57, %v10199_v9  ;;  %v2794_v59 = vsel %vm2790_vm0, %v10203_v13, %v10204_v8 }
  0xfa   : > { %v10207_v31 = vpop.permute.xlu0 %10206  ;;  %v10212_v14 = vpop.permute.xlu1 %10211  ;;  %v12163_v25 = vpack.c.bf16 %v2794_v59, %v2792_v61 }
  0xfb   : > { %v10209_v45 = vunpack.i.h.bf16 %v10207_v31  ;;  %v10208_v32 = vunpack.i.l.bf16 %v10207_v31  ;;  %v10214_v23 = vunpack.i.h.bf16 %v10212_v14  ;;  %v10213_v33 = vunpack.i.l.bf16 %v10212_v14 }
  0xfc   : > { %15673 = vst [vmem:[#allocation21_spill] sm:$0xff] %v12163_v25  ;;  %10496 = vrot.lane.b32.xlu0 %v12101_v60, %s11516_s12  ;;  %10501 = vrot.lane.b32.xlu1 %v12108_v26, %s11516_s12 }
  0xfd   : > { %v519_v3 = vsel %vm518_vm6, %v10208_v32, %v10188_v62  ;;  %v521_v51 = vsel %vm518_vm6, %v10209_v45, %v10193_v47  ;;  %8944 = vmatprep.subr.bf16.mxu0 %v12163_v25  ;;  %v2791_v19 = vsel %vm2790_vm0, %v10213_v33, %v10198_v57  ;;  %v2793_v9 = vsel %vm2790_vm0, %v10214_v23, %v10203_v13 }
  0xfe   : > { %v10217_v8 = vpop.permute.xlu0 %10216  ;;  %v10222_v61 = vpop.permute.xlu1 %10221  ;;  %v8614_v59 = vpack.c.bf16 %v521_v51, %v519_v3  ;;  %v12172_v31 = vpack.c.bf16 %v2793_v9, %v2791_v19 }
  0xff   : > { %v10219_v14 = vunpack.i.h.bf16 %v10217_v8  ;;  %v10218_v21 = vunpack.i.l.bf16 %v10217_v8  ;;  %v10224_v6 = vunpack.i.h.bf16 %v10222_v61  ;;  %v10223_v42 = vunpack.i.l.bf16 %v10222_v61 }
 0x100   : > { %15674 = vst [vmem:[#allocation22_spill] sm:$0xff] %v12172_v31  ;;  %10506 = vrot.lane.b32.xlu0 %v12125_v22, %s11516_s12  ;;  %10511 = vrot.lane.b32.xlu1 %v12135_v5, %s11516_s12  ;;  %s11525_s12 = smov 30  }
 0x101   : > { %v524_v62 = vsel %vm518_vm6, %v10218_v21, %v10219_v14  ;;  %v526_v47 = vsel %vm518_vm6, %v10223_v42, %v10224_v6  ;;  %8616 = vmatpush1.bf16.msk.msra.mxu1 %vm12058_vm13, %v8614_v59  ;;  %8946 = vmatpush1.bf16.msra.mxu0 %v12172_v31 }
 0x102   : > { %v10227_v57 = vpop.permute.xlu0 %10226  ;;  %v10232_v13 = vpop.permute.xlu1 %10231  ;;  %v8617_v45 = vpack.c.bf16 %v526_v47, %v524_v62 }
 0x103   : > { %v10229_v32 = vunpack.i.h.bf16 %v10227_v57  ;;  %v10228_v23 = vunpack.i.l.bf16 %v10227_v57  ;;  %v10234_v33 = vunpack.i.h.bf16 %v10232_v13  ;;  %v10233_v3 = vunpack.i.l.bf16 %v10232_v13 }
 0x104   : > { %10516 = vrot.lane.b32.xlu0 %v12073_v40, %s11517_s13  ;;  %10521 = vrot.lane.b32.xlu1 %v12080_v46, %s11517_s13 }
 0x105   : > { %8619 = vmatprep.subr.msk.bf16.mxu1 %vm12041_vm8, %v8617_v45  ;;  %v2796_v6 = vsel %vm2790_vm0, %v10228_v23, %v10229_v32  ;;  %v2798_v51 = vsel %vm2790_vm0, %v10233_v3, %v10234_v33 }
 0x106   : > { %v10237_v19 = vpop.permute.xlu0 %10236  ;;  %v10242_v9 = vpop.permute.xlu1 %10241  ;;  %v12187_v8 = vpack.c.bf16 %v2798_v51, %v2796_v6 }
 0x107   : > { %v10239_v61 = vunpack.i.h.bf16 %v10237_v19  ;;  %v10238_v59 = vunpack.i.l.bf16 %v10237_v19  ;;  %v10244_v14 = vunpack.i.h.bf16 %v10242_v9  ;;  %v10243_v62 = vunpack.i.l.bf16 %v10242_v9 }
 0x108   : > { %15675 = vst [vmem:[#allocation23_spill] sm:$0xff] %v12187_v8  ;;  %10526 = vrot.lane.b32.xlu0 %v12101_v60, %s11517_s13  ;;  %10531 = vrot.lane.b32.xlu1 %v12108_v26, %s11517_s13 }
 0x109   : > { %v523_v47 = vsel %vm518_vm6, %v10238_v59, %v10218_v21  ;;  %v525_v57 = vsel %vm518_vm6, %v10239_v61, %v10223_v42  ;;  %8948 = vmatprep.subr.bf16.mxu0 %v12187_v8  ;;  %v2795_v13 = vsel %vm2790_vm0, %v10243_v62, %v10228_v23  ;;  %v2797_v45 = vsel %vm2790_vm0, %v10244_v14, %v10233_v3  ;;  %v4188_v59 = vld [vmem:[%s15605_s1 + $0x30] sm:$0xff] }
 0x10a   : > { %v10247_v32 = vpop.permute.xlu0 %10246  ;;  %v10252_v33 = vpop.permute.xlu1 %10251  ;;  %v8620_v6 = vpack.c.bf16 %v525_v57, %v523_v47  ;;  %v12196_v51 = vpack.c.bf16 %v2797_v45, %v2795_v13  ;;  %v4202_v47 = vld [vmem:[%s15605_s1 + $0xa0] sm:$0xff]  ;;  %vm761_vm6 = vcmask 375808   ;;  %vm846_vm0 = vcmask 367616  }
 0x10b   : > { %v10249_v19 = vunpack.i.h.bf16 %v10247_v32  ;;  %v10248_v9 = vunpack.i.l.bf16 %v10247_v32  ;;  %v10254_v31 = vunpack.i.h.bf16 %v10252_v33  ;;  %v10253_v25 = vunpack.i.l.bf16 %v10252_v33 }
 0x10c   : > { %15676 = vst [vmem:[#allocation24_spill] sm:$0xff] %v12196_v51  ;;  %10536 = vrot.lane.b32.xlu0 %v12125_v22, %s11517_s13  ;;  %10541 = vrot.lane.b32.xlu1 %v12135_v5, %s11517_s13  ;;  %s11538_s13 = smov 16  }
 0x10d   : > { %8622 = vmatpush1.bf16.msk.msra.mxu1 %vm12058_vm13, %v8620_v6  ;;  %8950 = vmatpush1.bf16.msra.mxu0 %v12196_v51  ;;  %v601_v42 = vsel %vm599_vm2, %v10248_v9, %v10249_v19  ;;  %v603_v21 = vsel %vm599_vm2, %v10253_v25, %v10254_v31  ;;  %v4201_v19 = vld [vmem:[%s15605_s1 + $0x98] sm:$0xff] }
 0x10e   : > { %v10257_v23 = vpop.permute.xlu0 %10256  ;;  %v10262_v3 = vpop.permute.xlu1 %10261  ;;  %v8623_v61 = vpack.c.bf16 %v603_v21, %v601_v42 }
 0x10f   : > { %v10259_v14 = vunpack.i.h.bf16 %v10257_v23  ;;  %v10258_v62 = vunpack.i.l.bf16 %v10257_v23  ;;  %v10264_v57 = vunpack.i.h.bf16 %v10262_v3  ;;  %v10263_v13 = vunpack.i.l.bf16 %v10262_v3 }
 0x110   : > { %10546 = vrot.lane.b32.xlu0 %v12073_v40, %s11518_s23  ;;  %10551 = vrot.lane.b32.xlu1 %v12080_v46, %s11518_s23 }
 0x111   : > { %8624 = vmatprep.subr.bf16.mxu1 %v8623_v61  ;;  %v600_v31 = vsel %vm599_vm2, %v10258_v62, %v10248_v9  ;;  %v602_v45 = vsel %vm599_vm2, %v10259_v14, %v10253_v25  ;;  %6469 = vmatmul.mubr.f32.vlgmr.msra.gmra.mrb[0].mxu0 %v4188_v59  ;;  %v4215_v61 = vld [vmem:[%s15605_s1 + $0x108] sm:$0xff]  ;;  %v605_v25 = vsel %vm599_vm2, %v10263_v13, %v10264_v57 }
 0x112   : > { %v10267_v32 = vpop.permute.xlu0 %10266  ;;  %v10272_v33 = vpop.permute.xlu1 %10271  ;;  %v8625_v6 = vpack.c.bf16 %v602_v45, %v600_v31  ;;  %6474 = vmatprep.mubr.f32.mxu0 %v4202_v47 }
 0x113   : > { %v10269_v42 = vunpack.i.h.bf16 %v10267_v32  ;;  %v10268_v21 = vunpack.i.l.bf16 %v10267_v32  ;;  %v10274_v23 = vunpack.i.h.bf16 %v10272_v33  ;;  %v10273_v3 = vunpack.i.l.bf16 %v10272_v33  ;;  %v4214_v32 = vld [vmem:[%s15605_s1 + $0x100] sm:$0xff] }
 0x114   : > { %10556 = vrot.lane.b32.xlu0 %v12101_v60, %s11518_s23  ;;  %10561 = vrot.lane.b32.xlu1 %v12108_v26, %s11518_s23 }
 0x115   : > { %8626 = vmatpush1.bf16.msra.mxu1 %v8625_v6  ;;  %v607_v9 = vsel %vm599_vm2, %v10268_v21, %v10269_v42  ;;  %v604_v59 = vsel %vm599_vm2, %v10273_v3, %v10263_v13  ;;  %v606_v14 = vsel %vm599_vm2, %v10274_v23, %v10268_v21  ;;  %6475 = vmatmul.mubr.f32.gmra.mrb[2].mxu0 %v4201_v19  ;;  %v4228_v13 = vld [vmem:[%s15605_s1 + $0x170] sm:$0xff]  ;;  %vm927_vm2 = vcmask 285696  }
 0x116   : > { %v10277_v62 = vpop.permute.xlu0 %10276  ;;  %v10282_v47 = vpop.permute.xlu1 %10281  ;;  %v8627_v31 = vpack.c.bf16 %v607_v9, %v605_v25  ;;  %v8629_v45 = vpack.c.bf16 %v606_v14, %v604_v59  ;;  %6480 = vmatprep.mubr.f32.mxu0 %v4215_v61  ;;  %v4227_v61 = vld [vmem:[%s15605_s1 + $0x168] sm:$0xff]  ;;  %v4241_v59 = vld [vmem:[%s15605_s1 + $0x1d8] sm:$0xff] }
 0x117   : > { %v10279_v33 = vunpack.i.h.bf16 %v10277_v62  ;;  %v10278_v57 = vunpack.i.l.bf16 %v10277_v62  ;;  %v10284_v6 = vunpack.i.h.bf16 %v10282_v47  ;;  %v10283_v51 = vunpack.i.l.bf16 %v10282_v47 }
 0x118   : > { %10566 = vrot.lane.b32.xlu0 %v12125_v22, %s11518_s23  ;;  %10571 = vrot.lane.b32.xlu1 %v12135_v5, %s11518_s23  ;;  %s11526_s23 = smov 29  }
 0x119   : > { %v678_v19 = vsel %vm676_vm10, %v10278_v57, %v10279_v33  ;;  %v680_v42 = vsel %vm676_vm10, %v10283_v51, %v10284_v6  ;;  %8628 = vmatprep.subr.bf16.mxu1 %v8627_v31  ;;  %6481 = vmatmul.mubr.f32.gmra.mrb[4].mxu0 %v4214_v32  ;;  %v4240_v6 = vld [vmem:[%s15605_s1 + $0x1d0] sm:$0xff] }
 0x11a   : > { %8630 = vmatpush1.bf16.msra.mxu1 %v8629_v45  ;;  %v10287_v21 = vpop.permute.xlu0 %10286  ;;  %v10292_v23 = vpop.permute.xlu1 %10291  ;;  %v8631_v3 = vpack.c.bf16 %v680_v42, %v678_v19  ;;  %6486 = vmatprep.mubr.f32.mxu0 %v4228_v13 }
 0x11b   : > { %v10289_v25 = vunpack.i.h.bf16 %v10287_v21  ;;  %v10288_v9 = vunpack.i.l.bf16 %v10287_v21  ;;  %v10294_v14 = vunpack.i.h.bf16 %v10292_v23  ;;  %v10293_v62 = vunpack.i.l.bf16 %v10292_v23 }
 0x11c   : > { %10576 = vrot.lane.b32.xlu0 %v12073_v40, %s11519_s14  ;;  %10581 = vrot.lane.b32.xlu1 %v12080_v46, %s11519_s14 }
 0x11d   : > { %v677_v47 = vsel %vm676_vm10, %v10288_v9, %v10278_v57  ;;  %v679_v31 = vsel %vm676_vm10, %v10289_v25, %v10283_v51  ;;  %8633 = vmatprep.subr.msk.bf16.mxu1 %vm11751_vm3, %v8631_v3  ;;  %6487 = vmatmul.mubr.f32.gmra.mrb[6].mxu0 %v4227_v61  ;;  %v4254_v51 = vld [vmem:[%s15605_s1 + $0x240] sm:$0xff]  ;;  %v682_v57 = vsel %vm676_vm10, %v10293_v62, %v10294_v14 }
 0x11e   : > { %v10297_v45 = vpop.permute.xlu0 %10296  ;;  %v10302_v32 = vpop.permute.xlu1 %10301  ;;  %v8634_v33 = vpack.c.bf16 %v679_v31, %v677_v47  ;;  %6492 = vmatprep.mubr.f32.mxu0 %v4241_v59  ;;  %v4253_v47 = vld [vmem:[%s15605_s1 + $0x238] sm:$0xff] }
 0x11f   : > { %v10299_v13 = vunpack.i.h.bf16 %v10297_v45  ;;  %v10298_v19 = vunpack.i.l.bf16 %v10297_v45  ;;  %v10304_v42 = vunpack.i.h.bf16 %v10302_v32  ;;  %v10303_v21 = vunpack.i.l.bf16 %v10302_v32 }
 0x120   : > { %10586 = vrot.lane.b32.xlu0 %v12101_v60, %s11519_s14  ;;  %10591 = vrot.lane.b32.xlu1 %v12108_v26, %s11519_s14 }
 0x121   : > { %v684_v23 = vsel %vm676_vm10, %v10298_v19, %v10299_v13  ;;  %v683_v3 = vsel %vm676_vm10, %v10304_v42, %v10298_v19  ;;  %v681_v61 = vsel %vm676_vm10, %v10303_v21, %v10293_v62  ;;  %8636 = vmatpush1.bf16.msk.msra.mxu1 %vm11760_vm4, %v8634_v33  ;;  %6493 = vmatmul.mubr.f32.gmra.mrb[8].mxu0 %v4240_v6  ;;  %v4267_v62 = vld [vmem:[%s15605_s1 + $0x2a8] sm:$0xff]  ;;  %vm2863_vm10 = vcmask 908288  }
 0x122   : > { %v10307_v25 = vpop.permute.xlu0 %10306  ;;  %v10312_v9 = vpop.permute.xlu1 %10311  ;;  %v8637_v59 = vpack.c.bf16 %v684_v23, %v682_v57  ;;  %v8640_v14 = vpack.c.bf16 %v683_v3, %v681_v61  ;;  %6498 = vmatprep.mubr.f32.mxu0 %v4254_v51  ;;  %v4266_v51 = vld [vmem:[%s15605_s1 + $0x2a0] sm:$0xff]  ;;  %v4280_v3 = vld [vmem:[%s15605_s1 + $0x310] sm:$0xff] }
 0x123   : > { %v10309_v31 = vunpack.i.h.bf16 %v10307_v25  ;;  %v10308_v45 = vunpack.i.l.bf16 %v10307_v25  ;;  %v10314_v32 = vunpack.i.h.bf16 %v10312_v9  ;;  %v10313_v13 = vunpack.i.l.bf16 %v10312_v9 }
 0x124   : > { %10596 = vrot.lane.b32.xlu0 %v12125_v22, %s11519_s14  ;;  %10601 = vrot.lane.b32.xlu1 %v12135_v5, %s11519_s14  ;;  %s11534_s14 = smov 80  }
 0x125   : > { %v763_v33 = vsel %vm761_vm6, %v10308_v45, %v10309_v31  ;;  %v765_v6 = vsel %vm761_vm6, %v10313_v13, %v10314_v32  ;;  %8639 = vmatprep.subr.msk.bf16.mxu1 %vm11751_vm3, %v8637_v59  ;;  %6499 = vmatmul.mubr.f32.gmra.mrb[10].mxu0 %v4253_v47  ;;  %v4279_v32 = vld [vmem:[%s15605_s1 + $0x308] sm:$0xff] }
 0x126   : > { %8642 = vmatpush1.bf16.msk.msra.mxu1 %vm11760_vm4, %v8640_v14  ;;  %v10317_v19 = vpop.permute.xlu0 %10316  ;;  %v10322_v42 = vpop.permute.xlu1 %10321  ;;  %v8643_v21 = vpack.c.bf16 %v765_v6, %v763_v33  ;;  %6504 = vmatprep.mubr.f32.mxu0 %v4267_v62 }
 0x127   : > { %v10319_v57 = vunpack.i.h.bf16 %v10317_v19  ;;  %v10318_v23 = vunpack.i.l.bf16 %v10317_v19  ;;  %v10324_v61 = vunpack.i.h.bf16 %v10322_v42  ;;  %v10323_v25 = vunpack.i.l.bf16 %v10322_v42 }
 0x128   : > { %10606 = vrot.lane.b32.xlu0 %v12073_v40, %s11520_s10  ;;  %10611 = vrot.lane.b32.xlu1 %v12080_v46, %s11520_s10 }
 0x129   : > { %v762_v9 = vsel %vm761_vm6, %v10318_v23, %v10308_v45  ;;  %v764_v59 = vsel %vm761_vm6, %v10319_v57, %v10313_v13  ;;  %8645 = vmatprep.subr.msk.bf16.mxu1 %vm11795_vm7, %v8643_v21  ;;  %6505 = vmatmul.mubr.f32.gmra.mrb[12].mxu0 %v4266_v51  ;;  %v4293_v45 = vld [vmem:[%s15605_s1 + $0x378] sm:$0xff]  ;;  %v767_v13 = vsel %vm761_vm6, %v10323_v25, %v10324_v61 }
 0x12a   : > { %v10327_v14 = vpop.permute.xlu0 %10326  ;;  %v10332_v47 = vpop.permute.xlu1 %10331  ;;  %v8646_v31 = vpack.c.bf16 %v764_v59, %v762_v9  ;;  %6510 = vmatprep.mubr.f32.mxu0 %v4280_v3  ;;  %v12331_v59 = vpack.i.bf16 %v12069_v36, %v12094_v20  ;;  %v4305_v36 = vld [vmem:[%s15605_s1 + $0x3d8] sm:$0xff] }
 0x12b   : > { %v10329_v40 = vunpack.i.h.bf16 %v10327_v14  ;;  %v10328_v62 = vunpack.i.l.bf16 %v10327_v14  ;;  %v10334_v33 = vunpack.i.h.bf16 %v10332_v47  ;;  %v10333_v46 = vunpack.i.l.bf16 %v10332_v47 }
 0x12c   : > { %10616 = vrot.lane.b32.xlu0 %v12101_v60, %s11520_s10  ;;  %10621 = vrot.lane.b32.xlu1 %v12108_v26, %s11520_s10  ;;  %v4292_v60 = vld [vmem:[%s15605_s1 + $0x370] sm:$0xff]  ;;  %v12335_v14 = vpack.i.bf16 %v12076_v43, %v12097_v2  ;;  %v4319_v2 = vld [vmem:[%s15605_s1 + $0x448] sm:$0xff] }
 0x12d   : > { %v769_v6 = vsel %vm761_vm6, %v10328_v62, %v10329_v40  ;;  %v768_v19 = vsel %vm761_vm6, %v10334_v33, %v10328_v62  ;;  %v766_v42 = vsel %vm761_vm6, %v10333_v46, %v10323_v25  ;;  %8648 = vmatpush1.bf16.msk.msra.mxu1 %vm11810_vm9, %v8646_v31  ;;  %6511 = vmatmul.mubr.f32.gmra.mrb[14].mxu0 %v4279_v32  ;;  %v4306_v25 = vld [vmem:[%s15605_s1 + $0x3e0] sm:$0xff]  ;;  %vm2944_vm6 = vcmask 900096  }
 0x12e   : > { %v10337_v21 = vpop.permute.xlu0 %10336  ;;  %v10342_v51 = vpop.permute.xlu1 %10341  ;;  %v8649_v57 = vpack.c.bf16 %v769_v6, %v767_v13  ;;  %v8652_v23 = vpack.c.bf16 %v768_v19, %v766_v42  ;;  %6516 = vmatprep.mubr.f32.mxu0 %v4293_v45  ;;  %v12355_v33 = vpack.i.bf16 %v12104_v1, %v12128_v27  ;;  %v4318_v42 = vld [vmem:[%s15605_s1 + $0x440] sm:$0xff] }
 0x12f   : > { %v10339_v26 = vunpack.i.h.bf16 %v10337_v21  ;;  %v10338_v3 = vunpack.i.l.bf16 %v10337_v21  ;;  %v10344_v61 = vunpack.i.h.bf16 %v10342_v51  ;;  %v10343_v9 = vunpack.i.l.bf16 %v10342_v51 }
 0x130   : > { %10626 = vrot.lane.b32.xlu0 %v12125_v22, %s11520_s10  ;;  %10631 = vrot.lane.b32.xlu1 %v12135_v5, %s11520_s10 }
 0x131   : > { %v848_v47 = vsel %vm846_vm0, %v10338_v3, %v10339_v26  ;;  %v850_v31 = vsel %vm846_vm0, %v10343_v9, %v10344_v61  ;;  %8651 = vmatprep.subr.msk.bf16.mxu1 %vm11795_vm7, %v8649_v57  ;;  %6517 = vmatmul.mubr.f32.gmra.mrb[16].mxu0 %v4292_v60  ;;  %v15677_v26 = vmov 0.0  }
 0x132   : > { %8654 = vmatpush1.bf16.msk.msra.mxu1 %vm11810_vm9, %v8652_v23  ;;  %v10347_v22 = vpop.permute.xlu0 %10346  ;;  %v10352_v5 = vpop.permute.xlu1 %10351  ;;  %v8655_v32 = vpack.c.bf16 %v850_v31, %v848_v47  ;;  %6522 = vmatprep.mubr.f32.mxu0 %v4306_v25  ;;  %v4332_v23 = vld [vmem:[%s15605_s1 + $0x4b0] sm:$0xff] }
 0x133   : > { %v10349_v43 = vunpack.i.h.bf16 %v10347_v22  ;;  %v10348_v20 = vunpack.i.l.bf16 %v10347_v22  ;;  %v10354_v40 = vunpack.i.h.bf16 %v10352_v5  ;;  %v10353_v62 = vunpack.i.l.bf16 %v10352_v5 }
 0x134   : > { %10636 = vrot.lane.b32.xlu0 %v12331_v59, %s11521_s5  ;;  %10641 = vrot.lane.b32.xlu1 %v12335_v14, %s11521_s5 }
 0x135   : > { %v847_v46 = vsel %vm846_vm0, %v10348_v20, %v10338_v3  ;;  %v849_v45 = vsel %vm846_vm0, %v10349_v43, %v10343_v9  ;;  %8657 = vmatprep.subr.msk.bf16.mxu1 %vm11845_vm12, %v8655_v32  ;;  %6523 = vmatmul.mubr.f32.gmra.mrb[18].mxu0 %v4305_v36  ;;  %v852_v60 = vsel %vm846_vm0, %v10353_v62, %v10354_v40  ;;  %v4345_v20 = vld [vmem:[%s15605_s1 + $0x518] sm:$0xff] }
 0x136   : > { %v10357_v13 = vpop.permute.xlu0 %10356  ;;  %v10362_v6 = vpop.permute.xlu1 %10361  ;;  %v8658_v19 = vpack.c.bf16 %v849_v45, %v847_v46  ;;  %6528 = vmatprep.mubr.f32.mxu0 %v4319_v2  ;;  %v12374_v3 = vpack.i.bf16 %v12121_v4, %v12131_v11  ;;  %v4331_v4 = vld [vmem:[%s15605_s1 + $0x4a8] sm:$0xff] }
 0x137   : > { %v10359_v21 = vunpack.i.h.bf16 %v10357_v13  ;;  %v10358_v51 = vunpack.i.l.bf16 %v10357_v13  ;;  %v10364_v1 = vunpack.i.h.bf16 %v10362_v6  ;;  %v10363_v57 = vunpack.i.l.bf16 %v10362_v6  ;;  %v4344_v13 = vld [vmem:[%s15605_s1 + $0x510] sm:$0xff] }
 0x138   : > { %10646 = vrot.lane.b32.xlu0 %v15677_v26, %s11521_s5  ;;  %10651 = vrot.lane.b32.xlu1 %v12355_v33, %s11521_s5 }
 0x139   : > { %v854_v61 = vsel %vm846_vm0, %v10358_v51, %v10359_v21  ;;  %v853_v9 = vsel %vm846_vm0, %v10364_v1, %v10358_v51  ;;  %v851_v25 = vsel %vm846_vm0, %v10363_v57, %v10353_v62  ;;  %8660 = vmatpush1.bf16.msk.msra.mxu1 %vm11860_vm14, %v8658_v19  ;;  %6529 = vmatmul.mubr.f32.gmra.mrb[20].mxu0 %v4318_v42  ;;  %v4358_v42 = vld [vmem:[%s15605_s1 + $0x580] sm:$0xff]  ;;  %vm3025_vm0 = vcmask 891904  }
 0x13a   : > { %v10367_v47 = vpop.permute.xlu0 %10366  ;;  %v10372_v31 = vpop.permute.xlu1 %10371  ;;  %v8661_v22 = vpack.c.bf16 %v854_v61, %v852_v60  ;;  %v8664_v5 = vpack.c.bf16 %v853_v9, %v851_v25  ;;  %6534 = vmatprep.mubr.f32.mxu0 %v4332_v23  ;;  %v4357_v9 = vld [vmem:[%s15605_s1 + $0x578] sm:$0xff] }
 0x13b   : > { %v10369_v11 = vunpack.i.h.bf16 %v10367_v47  ;;  %v10368_v32 = vunpack.i.l.bf16 %v10367_v47  ;;  %v10374_v36 = vunpack.i.h.bf16 %v10372_v31  ;;  %v10373_v43 = vunpack.i.l.bf16 %v10372_v31 }
 0x13c   : > { %10656 = vrot.lane.b32.xlu0 %v12374_v3, %s11521_s5  ;;  %10661 = vrot.lane.b32.xlu1 %v15677_v26, %s11521_s5  ;;  %s11524_s5 = smov 31  }
 0x13d   : > { %v929_v2 = vsel %vm927_vm2, %v10368_v32, %v10369_v11  ;;  %v931_v40 = vsel %vm927_vm2, %v10373_v43, %v10374_v36  ;;  %8663 = vmatprep.subr.msk.bf16.mxu1 %vm11845_vm12, %v8661_v22  ;;  %6535 = vmatmul.mubr.f32.gmra.mrb[22].mxu0 %v4331_v4 }
 0x13e   : > { %8666 = vmatpush1.bf16.msk.msra.mxu1 %vm11860_vm14, %v8664_v5  ;;  %v10377_v62 = vpop.permute.xlu0 %10376  ;;  %v10382_v46 = vpop.permute.xlu1 %10381  ;;  %v8667_v45 = vpack.c.bf16 %v931_v40, %v929_v2  ;;  %6540 = vmatprep.mubr.f32.mxu0 %v4345_v20  ;;  %v4371_v5 = vld [vmem:[%s15605_s1 + $0x5e8] sm:$0xff] }
 0x13f   : > { %v10379_v6 = vunpack.i.h.bf16 %v10377_v62  ;;  %v10378_v19 = vunpack.i.l.bf16 %v10377_v62  ;;  %v10384_v21 = vunpack.i.h.bf16 %v10382_v46  ;;  %v10383_v51 = vunpack.i.l.bf16 %v10382_v46  ;;  %v4370_v62 = vld [vmem:[%s15605_s1 + $0x5e0] sm:$0xff] }
 0x140   : > { %10666 = vrot.lane.b32.xlu0 %v12331_v59, %s11522_s24  ;;  %10671 = vrot.lane.b32.xlu1 %v12335_v14, %s11522_s24 }
 0x141   : > { %v928_v1 = vsel %vm927_vm2, %v10378_v19, %v10368_v32  ;;  %v930_v57 = vsel %vm927_vm2, %v10379_v6, %v10373_v43  ;;  %8669 = vmatprep.subr.msk.bf16.mxu1 %vm11900_vm1, %v8667_v45  ;;  %6541 = vmatmul.mubr.f32.gmra.mrb[24].mxu0 %v4344_v13  ;;  %v933_v4 = vsel %vm927_vm2, %v10383_v51, %v10384_v21  ;;  %v4384_v19 = vld [vmem:[%s15605_s1 + $0x650] sm:$0xff] }
 0x142   : > { %v10387_v23 = vpop.permute.xlu0 %10386  ;;  %v10392_v60 = vpop.permute.xlu1 %10391  ;;  %v8670_v61 = vpack.c.bf16 %v930_v57, %v928_v1  ;;  %6546 = vmatprep.mubr.f32.mxu0 %v4358_v42  ;;  %v4182_v57 = vld [vmem:[%s15605_s1] sm:$0xff] }
 0x143   : > { %v10389_v25 = vunpack.i.h.bf16 %v10387_v23  ;;  %v10388_v47 = vunpack.i.l.bf16 %v10387_v23  ;;  %v10394_v31 = vunpack.i.h.bf16 %v10392_v60  ;;  %v10393_v22 = vunpack.i.l.bf16 %v10392_v60 }
 0x144   : > { %10676 = vrot.lane.b32.xlu0 %v15677_v26, %s11522_s24  ;;  %10681 = vrot.lane.b32.xlu1 %v12355_v33, %s11522_s24 }
 0x145   : > { %v935_v11 = vsel %vm927_vm2, %v10388_v47, %v10389_v25  ;;  %v934_v32 = vsel %vm927_vm2, %v10394_v31, %v10388_v47  ;;  %v932_v36 = vsel %vm927_vm2, %v10393_v22, %v10383_v51  ;;  %8672 = vmatpush1.bf16.msk.msra.mxu1 %vm11915_vm5, %v8670_v61  ;;  %6547 = vmatmul.mubr.f32.gmra.mrb[26].mxu0 %v4357_v9  ;;  %v4196_v9 = vld [vmem:[%s15605_s1 + $0x70] sm:$0xff]  ;;  %v4383_v25 = vld [vmem:[%s15605_s1 + $0x648] sm:$0xff]  ;;  %v4397_v22 = vld [vmem:[%s15605_s1 + $0x6b8] sm:$0xff]  ;;  %vm3106_vm2 = vcmask 809984  }
 0x146   : > { %v10397_v43 = vpop.permute.xlu0 %10396  ;;  %v10402_v20 = vpop.permute.xlu1 %10401  ;;  %v8673_v2 = vpack.c.bf16 %v935_v11, %v933_v4  ;;  %v8676_v40 = vpack.c.bf16 %v934_v32, %v932_v36  ;;  %6552 = vmatprep.mubr.f32.mxu0 %v4371_v5 }
 0x147   : > { %v10399_v46 = vunpack.i.h.bf16 %v10397_v43  ;;  %v10398_v45 = vunpack.i.l.bf16 %v10397_v43  ;;  %v10404_v13 = vunpack.i.h.bf16 %v10402_v20  ;;  %v10403_v6 = vunpack.i.l.bf16 %v10402_v20  ;;  %v4195_v43 = vld [vmem:[%s15605_s1 + $0x68] sm:$0xff] }
 0x148   : > { %10686 = vrot.lane.b32.xlu0 %v12374_v3, %s11522_s24  ;;  %10691 = vrot.lane.b32.xlu1 %v15677_v26, %s11522_s24  ;;  %s7913_s24 = sld [smem:[#allocation4]] }
 0x149   : > { %v2865_v42 = vsel %vm2863_vm10, %v10398_v45, %v10399_v46  ;;  %v2867_v21 = vsel %vm2863_vm10, %v10403_v6, %v10404_v13  ;;  %8675 = vmatprep.subr.msk.bf16.mxu1 %vm11900_vm1, %v8673_v2  ;;  %6553 = vmatmul.mubr.f32.gmra.mrb[28].mxu0 %v4370_v62  ;;  %v4209_v46 = vld [vmem:[%s15605_s1 + $0xd8] sm:$0xff] }
 0x14a   : > { %8678 = vmatpush1.bf16.msk.msra.mxu1 %vm11915_vm5, %v8676_v40  ;;  %v10407_v51 = vpop.permute.xlu0 %10406  ;;  %v10412_v1 = vpop.permute.xlu1 %10411  ;;  %v8951_v23 = vpack.c.bf16 %v2867_v21, %v2865_v42  ;;  %6558 = vmatprep.mubr.f32.mxu0 %v4384_v19 }
 0x14b   : > { %v10409_v60 = vunpack.i.h.bf16 %v10407_v51  ;;  %v10408_v61 = vunpack.i.l.bf16 %v10407_v51  ;;  %v10414_v47 = vunpack.i.h.bf16 %v10412_v1  ;;  %v10413_v31 = vunpack.i.l.bf16 %v10412_v1 }
 0x14c   : > { %10696 = vrot.lane.b32.xlu0 %v12331_v59, %s11523_s21  ;;  %10701 = vrot.lane.b32.xlu1 %v12335_v14, %s11523_s21 }
 0x14d   : > { %v2864_v5 = vsel %vm2863_vm10, %v10408_v61, %v10398_v45  ;;  %v2866_v4 = vsel %vm2863_vm10, %v10409_v60, %v10403_v6  ;;  %5410 = vmatmul.mubr.f32.vlgmr.msra.gmra.mrb[0].mxu1 %v4182_v57  ;;  %8953 = vmatprep.subr.msk.bf16.mxu0 %vm11751_vm3, %v8951_v23  ;;  %v4396_v45 = vld [vmem:[%s15605_s1 + $0x6b0] sm:$0xff]  ;;  %v2869_v13 = vsel %vm2863_vm10, %v10413_v31, %v10414_v47  ;;  %v4410_v6 = vld [vmem:[%s15605_s1 + $0x720] sm:$0xff] }
 0x14e   : > { %v8954_v11 = vpack.c.bf16 %v2866_v4, %v2864_v5  ;;  %v10417_v32 = vpop.permute.xlu0 %10416  ;;  %v10422_v36 = vpop.permute.xlu1 %10421  ;;  %5415 = vmatprep.mubr.f32.mxu1 %v4196_v9  ;;  %6559 = vmatmul.mubr.f32.gmra.mrb[30].mxu0 %v4383_v25  ;;  %v4222_v47 = vld [vmem:[%s15605_s1 + $0x140] sm:$0xff] }
 0x14f   : > { %v10419_v20 = vunpack.i.h.bf16 %v10417_v32  ;;  %v10418_v2 = vunpack.i.l.bf16 %v10417_v32  ;;  %v10424_v40 = vunpack.i.h.bf16 %v10422_v36  ;;  %v10423_v62 = vunpack.i.l.bf16 %v10422_v36  ;;  %6564 = vmatprep.mubr.f32.mxu0 %v4397_v22 }
 0x150   : > { %10706 = vrot.lane.b32.xlu0 %v15677_v26, %s11523_s21  ;;  %10711 = vrot.lane.b32.xlu1 %v12355_v33, %s11523_s21  ;;  %v4208_v33 = vld [vmem:[%s15605_s1 + $0xd0] sm:$0xff] }
 0x151   : > { %v2871_v19 = vsel %vm2863_vm10, %v10418_v2, %v10419_v20  ;;  %v2870_v42 = vsel %vm2863_vm10, %v10424_v40, %v10418_v2  ;;  %v2868_v21 = vsel %vm2863_vm10, %v10423_v62, %v10413_v31  ;;  %5416 = vmatmul.mubr.f32.gmra.mrb[2].mxu1 %v4195_v43  ;;  %8956 = vmatpush1.bf16.msk.msra.mxu0 %vm11760_vm4, %v8954_v11  ;;  %v4409_v31 = vld [vmem:[%s15605_s1 + $0x718] sm:$0xff]  ;;  %v4235_v20 = vld [vmem:[%s15605_s1 + $0x1a8] sm:$0xff]  ;;  %vm3187_vm10 = vcmask 801792  }
 0x152   : > { %v8960_v51 = vpack.c.bf16 %v2870_v42, %v2868_v21  ;;  %v10427_v1 = vpop.permute.xlu0 %10426  ;;  %v10432_v57 = vpop.permute.xlu1 %10431  ;;  %5421 = vmatprep.mubr.f32.mxu1 %v4209_v46  ;;  %v8957_v23 = vpack.c.bf16 %v2871_v19, %v2869_v13  ;;  %6565 = vmatmul.mubr.f32.gmra.mrb[32].mxu0 %v4396_v45  ;;  %v4221_v11 = vld [vmem:[%s15605_s1 + $0x138] sm:$0xff]  ;;  %v4423_v2 = vld [vmem:[%s15605_s1 + $0x788] sm:$0xff]  ;;  %v4422_v13 = vld [vmem:[%s15605_s1 + $0x780] sm:$0xff] }
 0x153   : > { %v10429_v60 = vunpack.i.h.bf16 %v10427_v1  ;;  %v10428_v61 = vunpack.i.l.bf16 %v10427_v1  ;;  %v10434_v9 = vunpack.i.h.bf16 %v10432_v57  ;;  %v10433_v25 = vunpack.i.l.bf16 %v10432_v57  ;;  %6570 = vmatprep.mubr.f32.mxu0 %v4410_v6  ;;  %v12518_v46 = vld [vmem:[%s11630_s6 + $0x28] sm:$0xff] }
 0x154   : > { %10716 = vrot.lane.b32.xlu0 %v12374_v3, %s11523_s21  ;;  %10721 = vrot.lane.b32.xlu1 %v15677_v26, %s11523_s21  ;;  %v10740_v45 = vpack.i.bf16 %v12518_v46, %v12128_v27  ;;  %v4234_v27 = vld [vmem:[%s15605_s1 + $0x1a0] sm:$0xff]  ;;  %s11540_s21 = smov 14  }
 0x155   : > { %v2946_v22 = vsel %vm2944_vm6, %v10428_v61, %v10429_v60  ;;  %v2948_v5 = vsel %vm2944_vm6, %v10433_v25, %v10434_v9  ;;  %5422 = vmatmul.mubr.f32.gmra.mrb[4].mxu1 %v4208_v33  ;;  %8959 = vmatprep.subr.msk.bf16.mxu0 %vm11751_vm3, %v8957_v23  ;;  %v4248_v33 = vld [vmem:[%s15605_s1 + $0x210] sm:$0xff] }
 0x156   : > { %8962 = vmatpush1.bf16.msk.msra.mxu0 %vm11760_vm4, %v8960_v51  ;;  %v10437_v3 = vpop.permute.xlu0 %10436  ;;  %v10442_v4 = vpop.permute.xlu1 %10441  ;;  %5427 = vmatprep.mubr.f32.mxu1 %v4222_v47  ;;  %v8963_v32 = vpack.c.bf16 %v2948_v5, %v2946_v22  ;;  %v4436_v23 = vld [vmem:[%s15605_s1 + $0x7f0] sm:$0xff]  ;;  %v4435_v47 = vld [vmem:[%s15605_s1 + $0x7e8] sm:$0xff] }
 0x157   : > { %v10439_v36 = vunpack.i.h.bf16 %v10437_v3  ;;  %v10438_v43 = vunpack.i.l.bf16 %v10437_v3  ;;  %6571 = vmatmul.mubr.f32.gmra.mrb[34].mxu0 %v4409_v31  ;;  %v10444_v40 = vunpack.i.h.bf16 %v10442_v4  ;;  %v10443_v62 = vunpack.i.l.bf16 %v10442_v4  ;;  %v12546_v9 = vld [vmem:[%s11630_s6 + $0x30] sm:$0xff] }
 0x158   : > { %10726 = vrot.lane.b32.xlu0 %v12331_v59, %s11524_s5  ;;  %10731 = vrot.lane.b32.xlu1 %v12335_v14, %s11524_s5 }
 0x159   : > { %v2945_v6 = vsel %vm2944_vm6, %v10438_v43, %v10428_v61  ;;  %v2947_v19 = vsel %vm2944_vm6, %v10439_v36, %v10433_v25  ;;  %5428 = vmatmul.mubr.f32.gmra.mrb[6].mxu1 %v4221_v11  ;;  %8965 = vmatprep.subr.msk.bf16.mxu0 %vm11795_vm7, %v8963_v32  ;;  %v2950_v60 = vsel %vm2944_vm6, %v10443_v62, %v10444_v40  ;;  %v12543_v61 = vld [vmem:[%s11630_s6 + $0x38] sm:$0xff]  ;;  %v4247_v32 = vld [vmem:[%s15605_s1 + $0x208] sm:$0xff] }
 0x15a   : > { %v8966_v59 = vpack.c.bf16 %v2947_v19, %v2945_v6  ;;  %v10447_v14 = vpop.permute.xlu0 %10446  ;;  %v10452_v42 = vpop.permute.xlu1 %10451  ;;  %5433 = vmatprep.mubr.f32.mxu1 %v4235_v20  ;;  %6576 = vmatprep.mubr.f32.mxu0 %v4423_v2  ;;  %v12550_v25 = vpack.i.bf16 %v12543_v61, %v12546_v9  ;;  %v12581_v19 = vld [vmem:[%s11630_s6 + $0x10] sm:$0xff] }
 0x15b   : > { %v10449_v21 = vunpack.i.h.bf16 %v10447_v14  ;;  %v10448_v51 = vunpack.i.l.bf16 %v10447_v14  ;;  %v10454_v1 = vunpack.i.h.bf16 %v10452_v42  ;;  %v10453_v57 = vunpack.i.l.bf16 %v10452_v42  ;;  %6577 = vmatmul.mubr.f32.gmra.mrb[36].mxu0 %v4422_v13  ;;  %v12574_v13 = vld [vmem:[%s11630_s6] sm:$0xff]  ;;  %v4449_v42 = vld [vmem:[%s15605_s1 + $0x858] sm:$0xff] }
 0x15c   : > { %10736 = vrot.lane.b32.xlu0 %v15677_v26, %s11524_s5  ;;  %10741 = vrot.lane.b32.xlu1 %v10740_v45, %s11524_s5  ;;  %v12571_v45 = vld [vmem:[%s11630_s6 + $0x8] sm:$0xff] }
 0x15d   : > { %v2952_v31 = vsel %vm2944_vm6, %v10448_v51, %v10449_v21  ;;  %v2951_v22 = vsel %vm2944_vm6, %v10454_v1, %v10448_v51  ;;  %v2949_v5 = vsel %vm2944_vm6, %v10453_v57, %v10443_v62  ;;  %5434 = vmatmul.mubr.f32.gmra.mrb[8].mxu1 %v4234_v27  ;;  %8968 = vmatpush1.bf16.msk.msra.mxu0 %vm11810_vm9, %v8966_v59  ;;  %v4261_v62 = vld [vmem:[%s15605_s1 + $0x278] sm:$0xff]  ;;  %v4260_v57 = vld [vmem:[%s15605_s1 + $0x270] sm:$0xff]  ;;  %vm3268_vm6 = vcmask 793600  }
 0x15e   : > { %v8972_v3 = vpack.c.bf16 %v2951_v22, %v2949_v5  ;;  %v10457_v4 = vpop.permute.xlu0 %10456  ;;  %v10462_v11 = vpop.permute.xlu1 %10461  ;;  %5439 = vmatprep.mubr.f32.mxu1 %v4248_v33  ;;  %v8969_v36 = vpack.c.bf16 %v2952_v31, %v2950_v60  ;;  %6582 = vmatprep.mubr.f32.mxu0 %v4436_v23  ;;  %v12578_v6 = vpack.i.bf16 %v12571_v45, %v12574_v13  ;;  %v12584_v59 = vld [vmem:[%s11630_s6 + $0x18] sm:$0xff]  ;;  %v4448_v31 = vld [vmem:[%s15605_s1 + $0x850] sm:$0xff] }
 0x15f   : > { %v10459_v43 = vunpack.i.h.bf16 %v10457_v4  ;;  %v10458_v20 = vunpack.i.l.bf16 %v10457_v4  ;;  %v10464_v2 = vunpack.i.h.bf16 %v10462_v11  ;;  %v10463_v40 = vunpack.i.l.bf16 %v10462_v11  ;;  %6583 = vmatmul.mubr.f32.gmra.mrb[38].mxu0 %v4435_v47  ;;  %v4274_v47 = vld [vmem:[%s15605_s1 + $0x2e0] sm:$0xff] }
 0x160   : > { %10746 = vrot.lane.b32.xlu0 %v12550_v25, %s11524_s5  ;;  %10751 = vrot.lane.b32.xlu1 %v15677_v26, %s11524_s5  ;;  %v12588_v14 = vpack.i.bf16 %v12584_v59, %v12581_v19  ;;  %v4462_v11 = vld [vmem:[%s15605_s1 + $0x8c0] sm:$0xff]  ;;  %s11533_s5 = smov 81  }
 0x161   : > { %v3027_v27 = vsel %vm3025_vm0, %v10458_v20, %v10459_v43  ;;  %v3029_v21 = vsel %vm3025_vm0, %v10463_v40, %v10464_v2  ;;  %5440 = vmatmul.mubr.f32.gmra.mrb[10].mxu1 %v4247_v32  ;;  %8971 = vmatprep.subr.msk.bf16.mxu0 %vm11795_vm7, %v8969_v36 }
 0x162   : > { %8974 = vmatpush1.bf16.msk.msra.mxu0 %vm11810_vm9, %v8972_v3  ;;  %v10467_v51 = vpop.permute.xlu0 %10466  ;;  %v10472_v1 = vpop.permute.xlu1 %10471  ;;  %5445 = vmatprep.mubr.f32.mxu1 %v4261_v62  ;;  %v8975_v33 = vpack.c.bf16 %v3029_v21, %v3027_v27  ;;  %v12613_v3 = vld [vmem:[%s11630_s6 + $0x20] sm:$0xff] }
 0x163   : > { %v10469_v23 = vunpack.i.h.bf16 %v10467_v51  ;;  %v10468_v60 = vunpack.i.l.bf16 %v10467_v51  ;;  %6588 = vmatprep.mubr.f32.mxu0 %v4449_v42  ;;  %v10474_v22 = vunpack.i.h.bf16 %v10472_v1  ;;  %v10473_v5 = vunpack.i.l.bf16 %v10472_v1  ;;  %v4273_v42 = vld [vmem:[%s15605_s1 + $0x2d8] sm:$0xff] }
 0x164   : > { %10756 = vrot.lane.b32.xlu0 %v12578_v6, %s11525_s12  ;;  %10761 = vrot.lane.b32.xlu1 %v12588_v14, %s11525_s12  ;;  %v12617_v4 = vpack.i.bf16 %v12518_v46, %v12613_v3 }
 0x165   : > { %v3026_v32 = vsel %vm3025_vm0, %v10468_v60, %v10458_v20  ;;  %v3028_v36 = vsel %vm3025_vm0, %v10469_v23, %v10463_v40  ;;  %5446 = vmatmul.mubr.f32.gmra.mrb[12].mxu1 %v4260_v57  ;;  %8977 = vmatprep.subr.msk.bf16.mxu0 %vm11845_vm12, %v8975_v33  ;;  %v4287_v20 = vld [vmem:[%s15605_s1 + $0x348] sm:$0xff]  ;;  %v4461_v40 = vld [vmem:[%s15605_s1 + $0x8b8] sm:$0xff]  ;;  %v3031_v57 = vsel %vm3025_vm0, %v10473_v5, %v10474_v22 }
 0x166   : > { %v8978_v43 = vpack.c.bf16 %v3028_v36, %v3026_v32  ;;  %v10477_v2 = vpop.permute.xlu0 %10476  ;;  %v10482_v62 = vpop.permute.xlu1 %10481  ;;  %5451 = vmatprep.mubr.f32.mxu1 %v4274_v47  ;;  %6589 = vmatmul.mubr.f32.gmra.mrb[40].mxu0 %v4448_v31  ;;  %v4475_v33 = vld [vmem:[%s15605_s1 + $0x928] sm:$0xff]  ;;  %v4286_v32 = vld [vmem:[%s15605_s1 + $0x340] sm:$0xff] }
 0x167   : > { %v10479_v27 = vunpack.i.h.bf16 %v10477_v2  ;;  %v10478_v21 = vunpack.i.l.bf16 %v10477_v2  ;;  %v10484_v51 = vunpack.i.h.bf16 %v10482_v62  ;;  %v10483_v1 = vunpack.i.l.bf16 %v10482_v62  ;;  %6594 = vmatprep.mubr.f32.mxu0 %v4462_v11 }
 0x168   : > { %10766 = vrot.lane.b32.xlu0 %v15677_v26, %s11525_s12  ;;  %10771 = vrot.lane.b32.xlu1 %v12617_v4, %s11525_s12 }
 0x169   : > { %v3033_v23 = vsel %vm3025_vm0, %v10478_v21, %v10479_v27  ;;  %v3032_v60 = vsel %vm3025_vm0, %v10484_v51, %v10478_v21  ;;  %v3030_v47 = vsel %vm3025_vm0, %v10483_v1, %v10473_v5  ;;  %5452 = vmatmul.mubr.f32.gmra.mrb[14].mxu1 %v4273_v42  ;;  %8980 = vmatpush1.bf16.msk.msra.mxu0 %vm11860_vm14, %v8978_v43  ;;  %v4300_v5 = vld [vmem:[%s15605_s1 + $0x3b0] sm:$0xff]  ;;  %v4474_v43 = vld [vmem:[%s15605_s1 + $0x920] sm:$0xff]  ;;  %vm3349_vm0 = vcmask 785408  }
 0x16a   : > { %v8984_v31 = vpack.c.bf16 %v3032_v60, %v3030_v47  ;;  %v10487_v22 = vpop.permute.xlu0 %10486  ;;  %v10492_v11 = vpop.permute.xlu1 %10491  ;;  %5457 = vmatprep.mubr.f32.mxu1 %v4287_v20  ;;  %v8981_v36 = vpack.c.bf16 %v3033_v23, %v3031_v57  ;;  %6595 = vmatmul.mubr.f32.gmra.mrb[42].mxu0 %v4461_v40  ;;  %v4299_v40 = vld [vmem:[%s15605_s1 + $0x3a8] sm:$0xff]  ;;  %v4313_v60 = vld [vmem:[%s15605_s1 + $0x418] sm:$0xff]  ;;  %v4488_v47 = vld [vmem:[%s15605_s1 + $0x990] sm:$0xff] }
 0x16b   : > { %v10489_v2 = vunpack.i.h.bf16 %v10487_v22  ;;  %v10488_v62 = vunpack.i.l.bf16 %v10487_v22  ;;  %v10494_v27 = vunpack.i.h.bf16 %v10492_v11  ;;  %v10493_v21 = vunpack.i.l.bf16 %v10492_v11  ;;  %6600 = vmatprep.mubr.f32.mxu0 %v4475_v33  ;;  %v4487_v11 = vld [vmem:[%s15605_s1 + $0x988] sm:$0xff] }
 0x16c   : > { %10776 = vrot.lane.b32.xlu0 %v12550_v25, %s11525_s12  ;;  %10781 = vrot.lane.b32.xlu1 %v15677_v26, %s11525_s12  ;;  %s11528_s12 = smov 18  }
 0x16d   : > { %v3108_v42 = vsel %vm3106_vm2, %v10488_v62, %v10489_v2  ;;  %v3110_v51 = vsel %vm3106_vm2, %v10493_v21, %v10494_v27  ;;  %5458 = vmatmul.mubr.f32.gmra.mrb[16].mxu1 %v4286_v32  ;;  %8983 = vmatprep.subr.msk.bf16.mxu0 %vm11845_vm12, %v8981_v36 }
 0x16e   : > { %8986 = vmatpush1.bf16.msk.msra.mxu0 %vm11860_vm14, %v8984_v31  ;;  %v10497_v1 = vpop.permute.xlu0 %10496  ;;  %v10502_v20 = vpop.permute.xlu1 %10501  ;;  %5463 = vmatprep.mubr.f32.mxu1 %v4300_v5  ;;  %v8987_v57 = vpack.c.bf16 %v3110_v51, %v3108_v42 }
 0x16f   : > { %v10499_v33 = vunpack.i.h.bf16 %v10497_v1  ;;  %v10498_v23 = vunpack.i.l.bf16 %v10497_v1  ;;  %6601 = vmatmul.mubr.f32.gmra.mrb[44].mxu0 %v4474_v43  ;;  %v10504_v31 = vunpack.i.h.bf16 %v10502_v20  ;;  %v10503_v22 = vunpack.i.l.bf16 %v10502_v20  ;;  %v4312_v43 = vld [vmem:[%s15605_s1 + $0x410] sm:$0xff] }
 0x170   : > { %10786 = vrot.lane.b32.xlu0 %v12578_v6, %s11526_s23  ;;  %10791 = vrot.lane.b32.xlu1 %v12588_v14, %s11526_s23 }
 0x171   : > { %v3107_v32 = vsel %vm3106_vm2, %v10498_v23, %v10488_v62  ;;  %v3109_v36 = vsel %vm3106_vm2, %v10499_v33, %v10493_v21  ;;  %5464 = vmatmul.mubr.f32.gmra.mrb[18].mxu1 %v4299_v40  ;;  %8989 = vmatprep.subr.msk.bf16.mxu0 %vm11900_vm1, %v8987_v57  ;;  %v4326_v62 = vld [vmem:[%s15605_s1 + $0x480] sm:$0xff]  ;;  %v4501_v21 = vld [vmem:[%s15605_s1 + $0x9f8] sm:$0xff]  ;;  %v3112_v40 = vsel %vm3106_vm2, %v10503_v22, %v10504_v31  ;;  %v4500_v57 = vld [vmem:[%s15605_s1 + $0x9f0] sm:$0xff] }
 0x172   : > { %v8990_v2 = vpack.c.bf16 %v3109_v36, %v3107_v32  ;;  %v10507_v27 = vpop.permute.xlu0 %10506  ;;  %v10512_v5 = vpop.permute.xlu1 %10511  ;;  %5469 = vmatprep.mubr.f32.mxu1 %v4313_v60  ;;  %6606 = vmatprep.mubr.f32.mxu0 %v4488_v47  ;;  %v4325_v32 = vld [vmem:[%s15605_s1 + $0x478] sm:$0xff] }
 0x173   : > { %v10509_v42 = vunpack.i.h.bf16 %v10507_v27  ;;  %v10508_v51 = vunpack.i.l.bf16 %v10507_v27  ;;  %v10514_v1 = vunpack.i.h.bf16 %v10512_v5  ;;  %v10513_v20 = vunpack.i.l.bf16 %v10512_v5  ;;  %6607 = vmatmul.mubr.f32.gmra.mrb[46].mxu0 %v4487_v11 }
 0x174   : > { %10796 = vrot.lane.b32.xlu0 %v15677_v26, %s11526_s23  ;;  %10801 = vrot.lane.b32.xlu1 %v12617_v4, %s11526_s23 }
 0x175   : > { %v3114_v33 = vsel %vm3106_vm2, %v10508_v51, %v10509_v42  ;;  %v3113_v23 = vsel %vm3106_vm2, %v10514_v1, %v10508_v51  ;;  %v3111_v60 = vsel %vm3106_vm2, %v10513_v20, %v10503_v22  ;;  %5470 = vmatmul.mubr.f32.gmra.mrb[20].mxu1 %v4312_v43  ;;  %8992 = vmatpush1.bf16.msk.msra.mxu0 %vm11915_vm5, %v8990_v2  ;;  %v4339_v22 = vld [vmem:[%s15605_s1 + $0x4e8] sm:$0xff]  ;;  %v4514_v2 = vld [vmem:[%s15605_s1 + $0xa60] sm:$0xff]  ;;  %vm3422_vm2 = vcmask 777216  }
 0x176   : > { %v8996_v47 = vpack.c.bf16 %v3113_v23, %v3111_v60  ;;  %v10517_v31 = vpop.permute.xlu0 %10516  ;;  %v10522_v11 = vpop.permute.xlu1 %10521  ;;  %5475 = vmatprep.mubr.f32.mxu1 %v4326_v62  ;;  %v8993_v36 = vpack.c.bf16 %v3114_v33, %v3112_v40  ;;  %6612 = vmatprep.mubr.f32.mxu0 %v4501_v21  ;;  %v4338_v21 = vld [vmem:[%s15605_s1 + $0x4e0] sm:$0xff]  ;;  %v4352_v23 = vld [vmem:[%s15605_s1 + $0x550] sm:$0xff]  ;;  %v4513_v60 = vld [vmem:[%s15605_s1 + $0xa58] sm:$0xff] }
 0x177   : > { %v10519_v27 = vunpack.i.h.bf16 %v10517_v31  ;;  %v10518_v5 = vunpack.i.l.bf16 %v10517_v31  ;;  %v10524_v42 = vunpack.i.h.bf16 %v10522_v11  ;;  %v10523_v51 = vunpack.i.l.bf16 %v10522_v11  ;;  %6613 = vmatmul.mubr.f32.gmra.mrb[48].mxu0 %v4500_v57  ;;  %v4527_v11 = vld [vmem:[%s15605_s1 + $0xac8] sm:$0xff] }
 0x178   : > { %10806 = vrot.lane.b32.xlu0 %v12550_v25, %s11526_s23  ;;  %10811 = vrot.lane.b32.xlu1 %v15677_v26, %s11526_s23  ;;  %s11544_s23 = smov 1  }
 0x179   : > { %v3189_v43 = vsel %vm3187_vm10, %v10518_v5, %v10519_v27  ;;  %v3191_v1 = vsel %vm3187_vm10, %v10523_v51, %v10524_v42  ;;  %5476 = vmatmul.mubr.f32.gmra.mrb[22].mxu1 %v4325_v32  ;;  %8995 = vmatprep.subr.msk.bf16.mxu0 %vm11900_vm1, %v8993_v36 }
 0x17a   : > { %8998 = vmatpush1.bf16.msk.msra.mxu0 %vm11915_vm5, %v8996_v47  ;;  %v10527_v20 = vpop.permute.xlu0 %10526  ;;  %v10532_v62 = vpop.permute.xlu1 %10531  ;;  %5481 = vmatprep.mubr.f32.mxu1 %v4339_v22  ;;  %v8999_v40 = vpack.c.bf16 %v3191_v1, %v3189_v43 }
 0x17b   : > { %v10529_v57 = vunpack.i.h.bf16 %v10527_v20  ;;  %v10528_v33 = vunpack.i.l.bf16 %v10527_v20  ;;  %6618 = vmatprep.mubr.f32.mxu0 %v4514_v2  ;;  %v10534_v47 = vunpack.i.h.bf16 %v10532_v62  ;;  %v10533_v31 = vunpack.i.l.bf16 %v10532_v62  ;;  %v4351_v2 = vld [vmem:[%s15605_s1 + $0x548] sm:$0xff] }
 0x17c   : > { %10816 = vrot.lane.b32.xlu0 %v12578_v6, %s11527_s7  ;;  %10821 = vrot.lane.b32.xlu1 %v12588_v14, %s11527_s7 }
 0x17d   : > { %v3188_v32 = vsel %vm3187_vm10, %v10528_v33, %v10518_v5  ;;  %v3190_v36 = vsel %vm3187_vm10, %v10529_v57, %v10523_v51  ;;  %5482 = vmatmul.mubr.f32.gmra.mrb[24].mxu1 %v4338_v21  ;;  %9001 = vmatprep.subr.msk.bf16.mxu0 %vm11958_vm11, %v8999_v40  ;;  %v4365_v5 = vld [vmem:[%s15605_s1 + $0x5b8] sm:$0xff]  ;;  %v4526_v51 = vld [vmem:[%s15605_s1 + $0xac0] sm:$0xff]  ;;  %v3193_v21 = vsel %vm3187_vm10, %v10533_v31, %v10534_v47  ;;  %v4540_v40 = vld [vmem:[%s15605_s1 + $0xb30] sm:$0xff] }
 0x17e   : > { %v9002_v27 = vpack.c.bf16 %v3190_v36, %v3188_v32  ;;  %v10537_v42 = vpop.permute.xlu0 %10536  ;;  %v10542_v22 = vpop.permute.xlu1 %10541  ;;  %5487 = vmatprep.mubr.f32.mxu1 %v4352_v23  ;;  %6619 = vmatmul.mubr.f32.gmra.mrb[50].mxu0 %v4513_v60  ;;  %v4364_v32 = vld [vmem:[%s15605_s1 + $0x5b0] sm:$0xff] }
 0x17f   : > { %v10539_v43 = vunpack.i.h.bf16 %v10537_v42  ;;  %v10538_v1 = vunpack.i.l.bf16 %v10537_v42  ;;  %v10544_v20 = vunpack.i.h.bf16 %v10542_v22  ;;  %v10543_v62 = vunpack.i.l.bf16 %v10542_v22  ;;  %6624 = vmatprep.mubr.f32.mxu0 %v4527_v11 }
 0x180   : > { %10826 = vrot.lane.b32.xlu0 %v15677_v26, %s11527_s7  ;;  %10831 = vrot.lane.b32.xlu1 %v12617_v4, %s11527_s7 }
 0x181   : > { %v3195_v57 = vsel %vm3187_vm10, %v10538_v1, %v10539_v43  ;;  %v3194_v33 = vsel %vm3187_vm10, %v10544_v20, %v10538_v1  ;;  %v3192_v23 = vsel %vm3187_vm10, %v10543_v62, %v10533_v31  ;;  %5488 = vmatmul.mubr.f32.gmra.mrb[26].mxu1 %v4351_v2  ;;  %9004 = vmatpush1.bf16.msk.msra.mxu0 %vm11980_vm15, %v9002_v27  ;;  %v4378_v31 = vld [vmem:[%s15605_s1 + $0x620] sm:$0xff]  ;;  %v4539_v27 = vld [vmem:[%s15605_s1 + $0xb28] sm:$0xff]  ;;  %vm1008_vm10 = vcmask 277504  }
 0x182   : > { %v9008_v60 = vpack.c.bf16 %v3194_v33, %v3192_v23  ;;  %v10547_v47 = vpop.permute.xlu0 %10546  ;;  %v10552_v11 = vpop.permute.xlu1 %10551  ;;  %5493 = vmatprep.mubr.f32.mxu1 %v4365_v5  ;;  %v9005_v36 = vpack.c.bf16 %v3195_v57, %v3193_v21  ;;  %6625 = vmatmul.mubr.f32.gmra.mrb[52].mxu0 %v4526_v51  ;;  %v4377_v51 = vld [vmem:[%s15605_s1 + $0x618] sm:$0xff]  ;;  %v4391_v33 = vld [vmem:[%s15605_s1 + $0x688] sm:$0xff] }
 0x183   : > { %v10549_v42 = vunpack.i.h.bf16 %v10547_v47  ;;  %v10548_v22 = vunpack.i.l.bf16 %v10547_v47  ;;  %v10554_v43 = vunpack.i.h.bf16 %v10552_v11  ;;  %v10553_v1 = vunpack.i.l.bf16 %v10552_v11  ;;  %6630 = vmatprep.mubr.f32.mxu0 %v4540_v40  ;;  %v4553_v23 = vld [vmem:[%s15605_s1 + $0xb98] sm:$0xff]  ;;  %v4552_v11 = vld [vmem:[%s15605_s1 + $0xb90] sm:$0xff] }
 0x184   : > { %10836 = vrot.lane.b32.xlu0 %v12550_v25, %s11527_s7  ;;  %10841 = vrot.lane.b32.xlu1 %v15677_v26, %s11527_s7  ;;  %s11539_s7 = smov 15  }
 0x185   : > { %v3270_v2 = vsel %vm3268_vm6, %v10548_v22, %v10549_v42  ;;  %v3272_v20 = vsel %vm3268_vm6, %v10553_v1, %v10554_v43  ;;  %5494 = vmatmul.mubr.f32.gmra.mrb[28].mxu1 %v4364_v32  ;;  %9007 = vmatprep.subr.msk.bf16.mxu0 %vm11958_vm11, %v9005_v36 }
 0x186   : > { %9010 = vmatpush1.bf16.msk.msra.mxu0 %vm11980_vm15, %v9008_v60  ;;  %v10557_v62 = vpop.permute.xlu0 %10556  ;;  %v10562_v5 = vpop.permute.xlu1 %10561  ;;  %5499 = vmatprep.mubr.f32.mxu1 %v4378_v31  ;;  %v9011_v21 = vpack.c.bf16 %v3272_v20, %v3270_v2 }
 0x187   : > { %v10559_v40 = vunpack.i.h.bf16 %v10557_v62  ;;  %v10558_v57 = vunpack.i.l.bf16 %v10557_v62  ;;  %6631 = vmatmul.mubr.f32.gmra.mrb[54].mxu0 %v4539_v27  ;;  %v10564_v60 = vunpack.i.h.bf16 %v10562_v5  ;;  %v10563_v47 = vunpack.i.l.bf16 %v10562_v5 }
 0x188   : > { %10846 = vrot.lane.b32.xlu0 %v12578_v6, %s11528_s12  ;;  %10851 = vrot.lane.b32.xlu1 %v12588_v14, %s11528_s12  ;;  %v4390_v6 = vld [vmem:[%s15605_s1 + $0x680] sm:$0xff] }
 0x189   : > { %v3269_v32 = vsel %vm3268_vm6, %v10558_v57, %v10548_v22  ;;  %v3271_v36 = vsel %vm3268_vm6, %v10559_v40, %v10553_v1  ;;  %5500 = vmatmul.mubr.f32.gmra.mrb[30].mxu1 %v4377_v51  ;;  %9013 = vmatprep.subr.msk.bf16.mxu0 %vm12041_vm8, %v9011_v21  ;;  %v4404_v22 = vld [vmem:[%s15605_s1 + $0x6f0] sm:$0xff]  ;;  %v4191_v1 = vld [vmem:[%s15605_s1 + $0x48] sm:$0xff]  ;;  %v3274_v62 = vsel %vm3268_vm6, %v10563_v47, %v10564_v60 }
 0x18a   : > { %v9014_v42 = vpack.c.bf16 %v3271_v36, %v3269_v32  ;;  %v10567_v43 = vpop.permute.xlu0 %10566  ;;  %v10572_v31 = vpop.permute.xlu1 %10571  ;;  %5505 = vmatprep.mubr.f32.mxu1 %v4391_v33  ;;  %6636 = vmatprep.mubr.f32.mxu0 %v4553_v23  ;;  %v4403_v23 = vld [vmem:[%s15605_s1 + $0x6e8] sm:$0xff] }
 0x18b   : > { %v10569_v14 = vunpack.i.h.bf16 %v10567_v43  ;;  %v10568_v27 = vunpack.i.l.bf16 %v10567_v43  ;;  %v10574_v2 = vunpack.i.h.bf16 %v10572_v31  ;;  %v10573_v20 = vunpack.i.l.bf16 %v10572_v31  ;;  %6637 = vmatmul.mubr.f32.gmra.mrb[56].mxu0 %v4552_v11 }
 0x18c   : > { %10856 = vrot.lane.b32.xlu0 %v15677_v26, %s11528_s12  ;;  %10861 = vrot.lane.b32.xlu1 %v12617_v4, %s11528_s12  ;;  %v12844_v43 = vpack.i.bf16 %v15677_v26, %v12584_v59 }
 0x18d   : > { %v3276_v5 = vsel %vm3268_vm6, %v10568_v27, %v10569_v14  ;;  %v3275_v51 = vsel %vm3268_vm6, %v10574_v2, %v10568_v27  ;;  %v3273_v21 = vsel %vm3268_vm6, %v10573_v20, %v10563_v47  ;;  %5506 = vmatmul.mubr.f32.gmra.mrb[32].mxu1 %v4390_v6  ;;  %9016 = vmatpush1.bf16.msk.msra.mxu0 %vm12058_vm13, %v9014_v42  ;;  %v4417_v47 = vld [vmem:[%s15605_s1 + $0x758] sm:$0xff]  ;;  %v4430_v20 = vld [vmem:[%s15605_s1 + $0x7c0] sm:$0xff]  ;;  %vm1089_vm6 = vcmask 269312  }
 0x18e   : > { %v9020_v40 = vpack.c.bf16 %v3275_v51, %v3273_v21  ;;  %v10577_v57 = vpop.permute.xlu0 %10576  ;;  %v10582_v33 = vpop.permute.xlu1 %10581  ;;  %5511 = vmatprep.mubr.f32.mxu1 %v4404_v22  ;;  %v9017_v60 = vpack.c.bf16 %v3276_v5, %v3274_v62  ;;  %6821 = vmatprep.mubr.f32.mxu0 %v4191_v1  ;;  %v12840_v42 = vpack.i.bf16 %v15677_v26, %v12571_v45  ;;  %v4416_v45 = vld [vmem:[%s15605_s1 + $0x750] sm:$0xff] }
 0x18f   : > { %v10579_v4 = vunpack.i.h.bf16 %v10577_v57  ;;  %v10578_v11 = vunpack.i.l.bf16 %v10577_v57  ;;  %v10584_v32 = vunpack.i.h.bf16 %v10582_v33  ;;  %v10583_v36 = vunpack.i.l.bf16 %v10582_v33  ;;  %v4429_v33 = vld [vmem:[%s15605_s1 + $0x7b8] sm:$0xff] }
 0x190   : > { %10866 = vrot.lane.b32.xlu0 %v12550_v25, %s11528_s12  ;;  %10871 = vrot.lane.b32.xlu1 %v15677_v26, %s11528_s12  ;;  %s11529_s12 = smov 94   ;;  %v12864_v62 = vpack.i.bf16 %v12581_v19, %v12574_v13  ;;  %v12868_v5 = vpack.i.bf16 %v15677_v26, %v12518_v46  ;;  %v4443_v46 = vld [vmem:[%s15605_s1 + $0x828] sm:$0xff] }
 0x191   : > { %5512 = vmatmul.mubr.f32.gmra.mrb[34].mxu1 %v4403_v23  ;;  %9019 = vmatprep.subr.msk.bf16.mxu0 %vm12041_vm8, %v9017_v60  ;;  %v3351_v31 = vsel %vm3349_vm0, %v10578_v11, %v10579_v4  ;;  %v3353_v6 = vsel %vm3349_vm0, %v10583_v36, %v10584_v32  ;;  %v12888_v32 = vpack.i.bf16 %v12546_v9, %v12613_v3 }
 0x192   : > { %9022 = vmatpush1.bf16.msk.msra.mxu0 %vm12058_vm13, %v9020_v40  ;;  %v10587_v25 = vpop.permute.xlu0 %10586  ;;  %v10592_v14 = vpop.permute.xlu1 %10591  ;;  %5517 = vmatprep.mubr.f32.mxu1 %v4417_v47  ;;  %v9023_v59 = vpack.c.bf16 %v3353_v6, %v3351_v31 }
 0x193   : > { %v10589_v27 = vunpack.i.h.bf16 %v10587_v25  ;;  %v10588_v2 = vunpack.i.l.bf16 %v10587_v25  ;;  %v10594_v22 = vunpack.i.h.bf16 %v10592_v14  ;;  %v10593_v1 = vunpack.i.l.bf16 %v10592_v14 }
 0x194   : > { %10876 = vrot.lane.b32.xlu0 %v12840_v42, %s11529_s12  ;;  %10881 = vrot.lane.b32.xlu1 %v12844_v43, %s11529_s12 }
 0x195   : > { %v3350_v51 = vsel %vm3349_vm0, %v10588_v2, %v10578_v11  ;;  %v3352_v21 = vsel %vm3349_vm0, %v10589_v27, %v10583_v36  ;;  %5518 = vmatmul.mubr.f32.gmra.mrb[36].mxu1 %v4416_v45  ;;  %9024 = vmatprep.subr.bf16.mxu0 %v9023_v59  ;;  %v12884_v11 = vpack.i.bf16 %v15677_v26, %v12543_v61  ;;  %v4442_v61 = vld [vmem:[%s15605_s1 + $0x820] sm:$0xff] }
 0x196   : > { %v10597_v40 = vpop.permute.xlu0 %10596  ;;  %v10602_v57 = vpop.permute.xlu1 %10601  ;;  %5523 = vmatprep.mubr.f32.mxu1 %v4430_v20  ;;  %v9025_v23 = vpack.c.bf16 %v3352_v21, %v3350_v51  ;;  %v3355_v36 = vsel %vm3349_vm0, %v10593_v1, %v10594_v22  ;;  %v4456_v22 = vld [vmem:[%s15605_s1 + $0x890] sm:$0xff] }
 0x197   : > { %v10599_v13 = vunpack.i.h.bf16 %v10597_v40  ;;  %v10598_v19 = vunpack.i.l.bf16 %v10597_v40  ;;  %v10604_v60 = vunpack.i.h.bf16 %v10602_v57  ;;  %v10603_v4 = vunpack.i.l.bf16 %v10602_v57  ;;  %v4455_v57 = vld [vmem:[%s15605_s1 + $0x888] sm:$0xff] }
 0x198   : > { %10886 = vrot.lane.b32.xlu0 %v12864_v62, %s11529_s12  ;;  %10891 = vrot.lane.b32.xlu1 %v12868_v5, %s11529_s12 }
 0x199   : > { %v3356_v47 = vsel %vm3349_vm0, %v10604_v60, %v10598_v19  ;;  %v3354_v31 = vsel %vm3349_vm0, %v10603_v4, %v10593_v1  ;;  %5524 = vmatmul.mubr.f32.gmra.mrb[38].mxu1 %v4429_v33  ;;  %9026 = vmatpush1.bf16.msra.mxu0 %v9025_v23  ;;  %v3357_v6 = vsel %vm3349_vm0, %v10598_v19, %v10599_v13  ;;  %v4469_v19 = vld [vmem:[%s15605_s1 + $0x8f8] sm:$0xff]  ;;  %vm1170_vm0 = vcmask 261120  }
 0x19a   : > { %v10607_v25 = vpop.permute.xlu0 %10606  ;;  %v10612_v14 = vpop.permute.xlu1 %10611  ;;  %5529 = vmatprep.mubr.f32.mxu1 %v4443_v46  ;;  %v9027_v9 = vpack.c.bf16 %v3357_v6, %v3355_v36  ;;  %v9029_v45 = vpack.c.bf16 %v3356_v47, %v3354_v31 }
 0x19b   : > { %v10609_v59 = vunpack.i.h.bf16 %v10607_v25  ;;  %v10608_v27 = vunpack.i.l.bf16 %v10607_v25  ;;  %v10614_v2 = vunpack.i.h.bf16 %v10612_v14  ;;  %v10613_v20 = vunpack.i.l.bf16 %v10612_v14  ;;  %v4468_v25 = vld [vmem:[%s15605_s1 + $0x8f0] sm:$0xff] }
 0x19c   : > { %10896 = vrot.lane.b32.xlu0 %v12884_v11, %s11529_s12  ;;  %10901 = vrot.lane.b32.xlu1 %v12888_v32, %s11529_s12  ;;  %s11536_s12 = smov 78  }
 0x19d   : > { %v3424_v1 = vsel %vm3422_vm2, %v10608_v27, %v10609_v59  ;;  %v3426_v51 = vsel %vm3422_vm2, %v10613_v20, %v10614_v2  ;;  %5530 = vmatmul.mubr.f32.gmra.mrb[40].mxu1 %v4442_v61  ;;  %9028 = vmatprep.subr.bf16.mxu0 %v9027_v9  ;;  %v4482_v59 = vld [vmem:[%s15605_s1 + $0x960] sm:$0xff] }
 0x19e   : > { %9030 = vmatpush1.bf16.msra.mxu0 %v9029_v45  ;;  %v10617_v21 = vpop.permute.xlu0 %10616  ;;  %v10622_v40 = vpop.permute.xlu1 %10621  ;;  %5535 = vmatprep.mubr.f32.mxu1 %v4456_v22  ;;  %v9031_v33 = vpack.c.bf16 %v3426_v51, %v3424_v1 }
 0x19f   : > { %v10619_v23 = vunpack.i.h.bf16 %v10617_v21  ;;  %v10618_v13 = vunpack.i.l.bf16 %v10617_v21  ;;  %v10624_v60 = vunpack.i.h.bf16 %v10622_v40  ;;  %v10623_v4 = vunpack.i.l.bf16 %v10622_v40  ;;  %v4481_v40 = vld [vmem:[%s15605_s1 + $0x958] sm:$0xff] }
 0x1a0   : > { %10906 = vrot.lane.b32.xlu0 %v12840_v42, %s11530_s9  ;;  %10911 = vrot.lane.b32.xlu1 %v12844_v43, %s11530_s9 }
 0x1a1   : > { %v3423_v46 = vsel %vm3422_vm2, %v10618_v13, %v10608_v27  ;;  %v3425_v36 = vsel %vm3422_vm2, %v10619_v23, %v10613_v20  ;;  %5536 = vmatmul.mubr.f32.gmra.mrb[42].mxu1 %v4455_v57  ;;  %9033 = vmatprep.subr.msk.bf16.mxu0 %vm11751_vm3, %v9031_v33  ;;  %v3428_v27 = vsel %vm3422_vm2, %v10623_v4, %v10624_v60  ;;  %v4495_v60 = vld [vmem:[%s15605_s1 + $0x9c8] sm:$0xff] }
 0x1a2   : > { %v9034_v47 = vpack.c.bf16 %v3425_v36, %v3423_v46  ;;  %v10627_v31 = vpop.permute.xlu0 %10626  ;;  %v10632_v6 = vpop.permute.xlu1 %10631  ;;  %5541 = vmatprep.mubr.f32.mxu1 %v4469_v19 }
 0x1a3   : > { %v10629_v14 = vunpack.i.h.bf16 %v10627_v31  ;;  %v10628_v61 = vunpack.i.l.bf16 %v10627_v31  ;;  %v10634_v9 = vunpack.i.h.bf16 %v10632_v6  ;;  %v10633_v45 = vunpack.i.l.bf16 %v10632_v6  ;;  %v4494_v31 = vld [vmem:[%s15605_s1 + $0x9c0] sm:$0xff] }
 0x1a4   : > { %10916 = vrot.lane.b32.xlu0 %v12864_v62, %s11530_s9  ;;  %10921 = vrot.lane.b32.xlu1 %v12868_v5, %s11530_s9 }
 0x1a5   : > { %v3430_v2 = vsel %vm3422_vm2, %v10628_v61, %v10629_v14  ;;  %v3429_v20 = vsel %vm3422_vm2, %v10634_v9, %v10628_v61  ;;  %v3427_v22 = vsel %vm3422_vm2, %v10633_v45, %v10623_v4  ;;  %5542 = vmatmul.mubr.f32.gmra.mrb[44].mxu1 %v4468_v25  ;;  %9036 = vmatpush1.bf16.msk.msra.mxu0 %vm11760_vm4, %v9034_v47  ;;  %v4190_v61 = vld [vmem:[%s15605_s1 + $0x40] sm:$0xff]  ;;  %v4508_v9 = vld [vmem:[%s15605_s1 + $0xa30] sm:$0xff]  ;;  %vm1243_vm2 = vcmask 252928  }
 0x1a6   : > { %v9040_v1 = vpack.c.bf16 %v3429_v20, %v3427_v22  ;;  %v10637_v51 = vpop.permute.xlu0 %10636  ;;  %v10642_v21 = vpop.permute.xlu1 %10641  ;;  %5547 = vmatprep.mubr.f32.mxu1 %v4482_v59  ;;  %v9037_v57 = vpack.c.bf16 %v3430_v2, %v3428_v27  ;;  %v4204_v45 = vld [vmem:[%s15605_s1 + $0xb0] sm:$0xff] }
 0x1a7   : > { %v10639_v33 = vunpack.i.h.bf16 %v10637_v51  ;;  %v10638_v23 = vunpack.i.l.bf16 %v10637_v51  ;;  %v10644_v13 = vunpack.i.h.bf16 %v10642_v21  ;;  %v10643_v19 = vunpack.i.l.bf16 %v10642_v21  ;;  %v4507_v21 = vld [vmem:[%s15605_s1 + $0xa28] sm:$0xff] }
 0x1a8   : > { %10926 = vrot.lane.b32.xlu0 %v12884_v11, %s11530_s9  ;;  %10931 = vrot.lane.b32.xlu1 %v12888_v32, %s11530_s9  ;;  %s8189_s9 = sshll.u32 %s189_s28, 6 }
 0x1a9   : > { %v1010_v4 = vsel %vm1008_vm10, %v10638_v23, %v10639_v33  ;;  %v1012_v46 = vsel %vm1008_vm10, %v10643_v19, %v10644_v13  ;;  %5548 = vmatmul.mubr.f32.gmra.mrb[46].mxu1 %v4481_v40  ;;  %9039 = vmatprep.subr.msk.bf16.mxu0 %vm11751_vm3, %v9037_v57  ;;  %v4203_v13 = vld [vmem:[%s15605_s1 + $0xa8] sm:$0xff] }
 0x1aa   : > { %9042 = vmatpush1.bf16.msk.msra.mxu0 %vm11760_vm4, %v9040_v1  ;;  %v10647_v36 = vpop.permute.xlu0 %10646  ;;  %v10652_v47 = vpop.permute.xlu1 %10651  ;;  %5553 = vmatprep.mubr.f32.mxu1 %v4495_v60  ;;  %v8679_v6 = vpack.c.bf16 %v1012_v46, %v1010_v4  ;;  %v4217_v60 = vld [vmem:[%s15605_s1 + $0x118] sm:$0xff] }
 0x1ab   : > { %v10649_v25 = vunpack.i.h.bf16 %v10647_v36  ;;  %v10648_v14 = vunpack.i.l.bf16 %v10647_v36  ;;  %v10654_v2 = vunpack.i.h.bf16 %v10652_v47  ;;  %v10653_v20 = vunpack.i.l.bf16 %v10652_v47 }
 0x1ac   : > { %10936 = vrot.lane.b32.xlu0 %v12840_v42, %s11531_s8  ;;  %10941 = vrot.lane.b32.xlu1 %v12844_v43, %s11531_s8 }
 0x1ad   : > { %v1009_v59 = vsel %vm1008_vm10, %v10648_v14, %v10638_v23  ;;  %v1011_v27 = vsel %vm1008_vm10, %v10649_v25, %v10643_v19  ;;  %5554 = vmatmul.mubr.f32.gmra.mrb[48].mxu1 %v4494_v31  ;;  %8681 = vmatprep.subr.msk.bf16.mxu1 %vm11958_vm11, %v8679_v6  ;;  %v4521_v19 = vld [vmem:[%s15605_s1 + $0xa98] sm:$0xff]  ;;  %v1014_v4 = vsel %vm1008_vm10, %v10653_v20, %v10654_v2  ;;  %v4520_v25 = vld [vmem:[%s15605_s1 + $0xa90] sm:$0xff]  ;;  %v4534_v2 = vld [vmem:[%s15605_s1 + $0xb00] sm:$0xff] }
 0x1ae   : > { %v8682_v22 = vpack.c.bf16 %v1011_v27, %v1009_v59  ;;  %6822 = vmatmul.mubr.f32.vlgmr.msra.gmra.mrb[0].mxu0 %v4190_v61  ;;  %v10657_v1 = vpop.permute.xlu0 %10656  ;;  %v10662_v51 = vpop.permute.xlu1 %10661  ;;  %5559 = vmatprep.mubr.f32.mxu1 %v4508_v9  ;;  %v4216_v27 = vld [vmem:[%s15605_s1 + $0x110] sm:$0xff] }
 0x1af   : > { %v10659_v40 = vunpack.i.h.bf16 %v10657_v1  ;;  %v10658_v57 = vunpack.i.l.bf16 %v10657_v1  ;;  %v10664_v33 = vunpack.i.h.bf16 %v10662_v51  ;;  %v10663_v23 = vunpack.i.l.bf16 %v10662_v51  ;;  %6827 = vmatprep.mubr.f32.mxu0 %v4204_v45  ;;  %v4533_v51 = vld [vmem:[%s15605_s1 + $0xaf8] sm:$0xff] }
 0x1b0   : > { %10946 = vrot.lane.b32.xlu0 %v12864_v62, %s11531_s8  ;;  %10951 = vrot.lane.b32.xlu1 %v12868_v5, %s11531_s8 }
 0x1b1   : > { %v1016_v46 = vsel %vm1008_vm10, %v10658_v57, %v10659_v40  ;;  %v1015_v36 = vsel %vm1008_vm10, %v10664_v33, %v10658_v57  ;;  %v1013_v47 = vsel %vm1008_vm10, %v10663_v23, %v10653_v20  ;;  %5560 = vmatmul.mubr.f32.gmra.mrb[50].mxu1 %v4507_v21  ;;  %v4230_v20 = vld [vmem:[%s15605_s1 + $0x180] sm:$0xff]  ;;  %v4229_v33 = vld [vmem:[%s15605_s1 + $0x178] sm:$0xff]  ;;  %v4547_v23 = vld [vmem:[%s15605_s1 + $0xb68] sm:$0xff]  ;;  %vm1324_vm10 = vcmask 244736  }
 0x1b2   : > { %v8688_v31 = vpack.c.bf16 %v1015_v36, %v1013_v47  ;;  %8684 = vmatpush1.bf16.msk.msra.mxu1 %vm11980_vm15, %v8682_v22  ;;  %6828 = vmatmul.mubr.f32.gmra.mrb[2].mxu0 %v4203_v13  ;;  %v10667_v5 = vpop.permute.xlu0 %10666  ;;  %v10672_v6 = vpop.permute.xlu1 %10671  ;;  %v8685_v14 = vpack.c.bf16 %v1016_v46, %v1014_v4  ;;  %v4243_v13 = vld [vmem:[%s15605_s1 + $0x1e8] sm:$0xff] }
 0x1b3   : > { %v10669_v61 = vunpack.i.h.bf16 %v10667_v5  ;;  %v10668_v9 = vunpack.i.l.bf16 %v10667_v5  ;;  %v10674_v45 = vunpack.i.h.bf16 %v10672_v6  ;;  %v10673_v59 = vunpack.i.l.bf16 %v10672_v6  ;;  %5565 = vmatprep.mubr.f32.mxu1 %v4521_v19  ;;  %6833 = vmatprep.mubr.f32.mxu0 %v4217_v60  ;;  %v13033_v19 = vld [vmem:[%s11630_s6 + $0x28] sm:$0xff]  ;;  %v4546_v5 = vld [vmem:[%s15605_s1 + $0xb60] sm:$0xff] }
 0x1b4   : > { %10956 = vrot.lane.b32.xlu0 %v12884_v11, %s11531_s8  ;;  %10961 = vrot.lane.b32.xlu1 %v12888_v32, %s11531_s8  ;;  %v13037_v60 = vpack.i.bf16 %v15677_v26, %v13033_v19 }
 0x1b5   : > { %v1091_v22 = vsel %vm1089_vm6, %v10668_v9, %v10669_v61  ;;  %v1093_v1 = vsel %vm1089_vm6, %v10673_v59, %v10674_v45  ;;  %5566 = vmatmul.mubr.f32.gmra.mrb[52].mxu1 %v4520_v25  ;;  %8687 = vmatprep.subr.msk.bf16.mxu1 %vm11958_vm11, %v8685_v14  ;;  %v4560_v45 = vld [vmem:[%s15605_s1 + $0xbd0] sm:$0xff] }
 0x1b6   : > { %6834 = vmatmul.mubr.f32.gmra.mrb[4].mxu0 %v4216_v27  ;;  %8690 = vmatpush1.bf16.msk.msra.mxu1 %vm11980_vm15, %v8688_v31  ;;  %v10677_v11 = vpop.permute.xlu0 %10676  ;;  %v10682_v32 = vpop.permute.xlu1 %10681  ;;  %v8691_v21 = vpack.c.bf16 %v1093_v1, %v1091_v22  ;;  %v13060_v27 = vld [vmem:[%s11630_s6 + $0x38] sm:$0xff] }
 0x1b7   : > { %v10679_v40 = vunpack.i.h.bf16 %v10677_v11  ;;  %v10678_v57 = vunpack.i.l.bf16 %v10677_v11  ;;  %5571 = vmatprep.mubr.f32.mxu1 %v4534_v2  ;;  %6839 = vmatprep.mubr.f32.mxu0 %v4230_v20  ;;  %v10684_v36 = vunpack.i.h.bf16 %v10682_v32  ;;  %v10683_v47 = vunpack.i.l.bf16 %v10682_v32  ;;  %v13067_v20 = vld [vmem:[%s11630_s6 + $0x30] sm:$0xff] }
 0x1b8   : > { %10966 = vrot.lane.b32.xlu0 %v12840_v42, %s11532_s15  ;;  %10971 = vrot.lane.b32.xlu1 %v12844_v43, %s11532_s15  ;;  %v13064_v2 = vpack.i.bf16 %v15677_v26, %v13060_v27 }
 0x1b9   : > { %v1090_v4 = vsel %vm1089_vm6, %v10678_v57, %v10668_v9  ;;  %v1092_v46 = vsel %vm1089_vm6, %v10679_v40, %v10673_v59  ;;  %5572 = vmatmul.mubr.f32.gmra.mrb[54].mxu1 %v4533_v51  ;;  %8693 = vmatprep.subr.msk.bf16.mxu1 %vm12041_vm8, %v8691_v21  ;;  %v4242_v9 = vld [vmem:[%s15605_s1 + $0x1e0] sm:$0xff]  ;;  %v4256_v59 = vld [vmem:[%s15605_s1 + $0x250] sm:$0xff]  ;;  %v1095_v22 = vsel %vm1089_vm6, %v10683_v47, %v10684_v36  ;;  %v4573_v36 = vld [vmem:[%s15605_s1 + $0xc38] sm:$0xff] }
 0x1ba   : > { %v8694_v42 = vpack.c.bf16 %v1092_v46, %v1090_v4  ;;  %6840 = vmatmul.mubr.f32.gmra.mrb[6].mxu0 %v4229_v33  ;;  %v10687_v43 = vpop.permute.xlu0 %10686  ;;  %v10692_v31 = vpop.permute.xlu1 %10691  ;;  %5577 = vmatprep.mubr.f32.mxu1 %v4547_v23  ;;  %v4255_v46 = vld [vmem:[%s15605_s1 + $0x248] sm:$0xff] }
 0x1bb   : > { %v10689_v6 = vunpack.i.h.bf16 %v10687_v43  ;;  %v10688_v25 = vunpack.i.l.bf16 %v10687_v43  ;;  %v10694_v14 = vunpack.i.h.bf16 %v10692_v31  ;;  %v10693_v61 = vunpack.i.l.bf16 %v10692_v31  ;;  %6845 = vmatprep.mubr.f32.mxu0 %v4243_v13  ;;  %v13100_v31 = vld [vmem:[%s11630_s6 + $0x18] sm:$0xff] }
 0x1bc   : > { %10976 = vrot.lane.b32.xlu0 %v12864_v62, %s11532_s15  ;;  %10981 = vrot.lane.b32.xlu1 %v13037_v60, %s11532_s15  ;;  %v10990_v62 = vpack.i.bf16 %v13067_v20, %v12613_v3  ;;  %v4559_v3 = vld [vmem:[%s15605_s1 + $0xbc8] sm:$0xff] }
 0x1bd   : > { %v1097_v1 = vsel %vm1089_vm6, %v10688_v25, %v10689_v6  ;;  %v1096_v11 = vsel %vm1089_vm6, %v10694_v14, %v10688_v25  ;;  %v1094_v32 = vsel %vm1089_vm6, %v10693_v61, %v10683_v47  ;;  %5578 = vmatmul.mubr.f32.gmra.mrb[56].mxu1 %v4546_v5  ;;  %v4269_v47 = vld [vmem:[%s15605_s1 + $0x2b8] sm:$0xff]  ;;  %v13104_v5 = vpack.i.bf16 %v15677_v26, %v13100_v31 }
 0x1be   : > { %v8700_v51 = vpack.c.bf16 %v1096_v11, %v1094_v32  ;;  %8696 = vmatpush1.bf16.msk.msra.mxu1 %vm12058_vm13, %v8694_v42  ;;  %6846 = vmatmul.mubr.f32.gmra.mrb[8].mxu0 %v4242_v9  ;;  %v10697_v21 = vpop.permute.xlu0 %10696  ;;  %v10702_v40 = vpop.permute.xlu1 %10701  ;;  %v8697_v57 = vpack.c.bf16 %v1097_v1, %v1095_v22  ;;  %v13093_v42 = vld [vmem:[%s11630_s6 + $0x8] sm:$0xff]  ;;  %v4572_v9 = vld [vmem:[%s15605_s1 + $0xc30] sm:$0xff]  ;;  %v4586_v1 = vld [vmem:[%s15605_s1 + $0xca0] sm:$0xff]  ;;  %vm1405_vm6 = vcmask 236544  }
 0x1bf   : > { %v10699_v33 = vunpack.i.h.bf16 %v10697_v21  ;;  %v10698_v23 = vunpack.i.l.bf16 %v10697_v21  ;;  %v10704_v13 = vunpack.i.h.bf16 %v10702_v40  ;;  %v10703_v4 = vunpack.i.l.bf16 %v10702_v40  ;;  %5583 = vmatprep.mubr.f32.mxu1 %v4560_v45  ;;  %6851 = vmatprep.mubr.f32.mxu0 %v4256_v59  ;;  %v4268_v22 = vld [vmem:[%s15605_s1 + $0x2b0] sm:$0xff]  ;;  %v4282_v11 = vld [vmem:[%s15605_s1 + $0x320] sm:$0xff] }
 0x1c0   : > { %10986 = vrot.lane.b32.xlu0 %v13064_v2, %s11532_s15  ;;  %10991 = vrot.lane.b32.xlu1 %v10990_v62, %s11532_s15  ;;  %v13097_v43 = vpack.i.bf16 %v15677_v26, %v13093_v42  ;;  %v13129_v32 = vld [vmem:[%s11630_s6] sm:$0xff]  ;;  %s11542_s15 = smov 3  }
 0x1c1   : > { %5584 = vmatmul.mubr.f32.gmra.mrb[58].mxu1 %v4559_v3  ;;  %8699 = vmatprep.subr.msk.bf16.mxu1 %vm12041_vm8, %v8697_v57  ;;  %v1172_v6 = vsel %vm1170_vm0, %v10698_v23, %v10699_v33  ;;  %v1174_v25 = vsel %vm1170_vm0, %v10703_v4, %v10704_v13 }
 0x1c2   : > { %6852 = vmatmul.mubr.f32.gmra.mrb[10].mxu0 %v4255_v46  ;;  %8702 = vmatpush1.bf16.msk.msra.mxu1 %vm12058_vm13, %v8700_v51  ;;  %v10707_v14 = vpop.permute.xlu0 %10706  ;;  %v10712_v61 = vpop.permute.xlu1 %10711  ;;  %v8703_v45 = vpack.c.bf16 %v1174_v25, %v1172_v6  ;;  %v13132_v51 = vld [vmem:[%s11630_s6 + $0x10] sm:$0xff] }
 0x1c3   : > { %v10709_v59 = vunpack.i.h.bf16 %v10707_v14  ;;  %v10708_v62 = vunpack.i.l.bf16 %v10707_v14  ;;  %5589 = vmatprep.mubr.f32.mxu1 %v4573_v36  ;;  %6857 = vmatprep.mubr.f32.mxu0 %v4269_v47  ;;  %v13136_v21 = vpack.i.bf16 %v13132_v51, %v13129_v32  ;;  %v10714_v57 = vunpack.i.h.bf16 %v10712_v61  ;;  %v4585_v36 = vld [vmem:[%s15605_s1 + $0xc98] sm:$0xff] }
 0x1c4   : > { %10996 = vrot.lane.b32.xlu0 %v13097_v43, %s11533_s5  ;;  %11001 = vrot.lane.b32.xlu1 %v13104_v5, %s11533_s5  ;;  %v10713_v33 = vunpack.i.l.bf16 %v10712_v61  ;;  %v4599_v61 = vld [vmem:[%s15605_s1 + $0xd08] sm:$0xff] }
 0x1c5   : > { %v1171_v40 = vsel %vm1170_vm0, %v10708_v62, %v10698_v23  ;;  %v1173_v3 = vsel %vm1170_vm0, %v10709_v59, %v10703_v4  ;;  %5590 = vmatmul.mubr.f32.gmra.mrb[60].mxu1 %v4572_v9  ;;  %8704 = vmatprep.subr.bf16.mxu1 %v8703_v45  ;;  %v4281_v4 = vld [vmem:[%s15605_s1 + $0x318] sm:$0xff]  ;;  %v4295_v9 = vld [vmem:[%s15605_s1 + $0x388] sm:$0xff]  ;;  %v13157_v45 = vld [vmem:[%s11630_s6 + $0x20] sm:$0xff] }
 0x1c6   : > { %6858 = vmatmul.mubr.f32.gmra.mrb[12].mxu0 %v4268_v22  ;;  %v10717_v13 = vpop.permute.xlu0 %10716  ;;  %v10722_v46 = vpop.permute.xlu1 %10721  ;;  %5595 = vmatprep.mubr.f32.mxu1 %v4586_v1  ;;  %v8705_v47 = vpack.c.bf16 %v1173_v3, %v1171_v40  ;;  %v13161_v59 = vpack.i.bf16 %v13067_v20, %v13157_v45  ;;  %v1176_v1 = vsel %vm1170_vm0, %v10713_v33, %v10714_v57  ;;  %v4294_v57 = vld [vmem:[%s15605_s1 + $0x380] sm:$0xff] }
 0x1c7   : > { %v10719_v6 = vunpack.i.h.bf16 %v10717_v13  ;;  %v10718_v25 = vunpack.i.l.bf16 %v10717_v13  ;;  %v10724_v14 = vunpack.i.h.bf16 %v10722_v46  ;;  %v10723_v23 = vunpack.i.l.bf16 %v10722_v46  ;;  %6863 = vmatprep.mubr.f32.mxu0 %v4282_v11  ;;  %v4598_v13 = vld [vmem:[%s15605_s1 + $0xd00] sm:$0xff] }
 0x1c8   : > { %11006 = vrot.lane.b32.xlu0 %v13136_v21, %s11533_s5  ;;  %11011 = vrot.lane.b32.xlu1 %v13037_v60, %s11533_s5 }
 0x1c9   : > { %v1177_v62 = vsel %vm1170_vm0, %v10724_v14, %v10718_v25  ;;  %v1175_v22 = vsel %vm1170_vm0, %v10723_v23, %v10713_v33  ;;  %5596 = vmatmul.mubr.f32.gmra.mrb[62].mxu1 %v4585_v36  ;;  %v1178_v11 = vsel %vm1170_vm0, %v10718_v25, %v10719_v6  ;;  %v4612_v33 = vld [vmem:[%s15605_s1 + $0xd70] sm:$0xff]  ;;  %vm1486_vm0 = vcmask 154624  }
 0x1ca   : > { %8706 = vmatpush1.bf16.msra.mxu1 %v8705_v47  ;;  %6864 = vmatmul.mubr.f32.gmra.mrb[14].mxu0 %v4281_v4  ;;  %v10727_v40 = vpop.permute.xlu0 %10726  ;;  %v10732_v3 = vpop.permute.xlu1 %10731  ;;  %v8707_v46 = vpack.c.bf16 %v1178_v11, %v1176_v1  ;;  %v8709_v8 = vpack.c.bf16 %v1177_v62, %v1175_v22  ;;  %v4308_v36 = vld [vmem:[%s15605_s1 + $0x3f0] sm:$0xff] }
 0x1cb   : > { %v10729_v24 = vunpack.i.h.bf16 %v10727_v40  ;;  %v10728_v14 = vunpack.i.l.bf16 %v10727_v40  ;;  %v10734_v53 = vunpack.i.h.bf16 %v10732_v3  ;;  %v10733_v23 = vunpack.i.l.bf16 %v10732_v3  ;;  %5601 = vmatprep.mubr.f32.mxu1 %v4599_v61  ;;  %6869 = vmatprep.mubr.f32.mxu0 %v4295_v9  ;;  %v4611_v61 = vld [vmem:[%s15605_s1 + $0xd68] sm:$0xff] }
 0x1cc   : > { %11016 = vrot.lane.b32.xlu0 %v13064_v2, %s11533_s5  ;;  %11021 = vrot.lane.b32.xlu1 %v13161_v59, %s11533_s5  ;;  %s11543_s5 = smov 2  }
 0x1cd   : > { %v1245_v47 = vsel %vm1243_vm2, %v10728_v14, %v10729_v24  ;;  %v1247_v6 = vsel %vm1243_vm2, %v10733_v23, %v10734_v53  ;;  %5602 = vmatmul.mubr.f32.gmra.mrb[64].mxu1 %v4598_v13  ;;  %8708 = vmatprep.subr.bf16.mxu1 %v8707_v46  ;;  %v4307_v24 = vld [vmem:[%s15605_s1 + $0x3e8] sm:$0xff]  ;;  %v4625_v53 = vld [vmem:[%s15605_s1 + $0xdd8] sm:$0xff] }
 0x1ce   : > { %6870 = vmatmul.mubr.f32.gmra.mrb[16].mxu0 %v4294_v57  ;;  %8710 = vmatpush1.bf16.msra.mxu1 %v8709_v8  ;;  %v10737_v25 = vpop.permute.xlu0 %10736  ;;  %v10742_v4 = vpop.permute.xlu1 %10741  ;;  %v8711_v9 = vpack.c.bf16 %v1247_v6, %v1245_v47  ;;  %v4321_v8 = vld [vmem:[%s15605_s1 + $0x458] sm:$0xff] }
 0x1cf   : > { %v10739_v62 = vunpack.i.h.bf16 %v10737_v25  ;;  %v10738_v22 = vunpack.i.l.bf16 %v10737_v25  ;;  %5607 = vmatprep.mubr.f32.mxu1 %v4612_v33  ;;  %6875 = vmatprep.mubr.f32.mxu0 %v4308_v36  ;;  %v10744_v40 = vunpack.i.h.bf16 %v10742_v4  ;;  %v10743_v3 = vunpack.i.l.bf16 %v10742_v4  ;;  %v4624_v33 = vld [vmem:[%s15605_s1 + $0xdd0] sm:$0xff]  ;;  %v4638_v25 = vld [vmem:[%s15605_s1 + $0xe40] sm:$0xff] }
 0x1d0   : > { %11026 = vrot.lane.b32.xlu0 %v13097_v43, %s11534_s14  ;;  %11031 = vrot.lane.b32.xlu1 %v13104_v5, %s11534_s14  ;;  %v4334_v4 = vld [vmem:[%s15605_s1 + $0x4c0] sm:$0xff] }
 0x1d1   : > { %v1244_v1 = vsel %vm1243_vm2, %v10738_v22, %v10728_v14  ;;  %v1246_v11 = vsel %vm1243_vm2, %v10739_v62, %v10733_v23  ;;  %5608 = vmatmul.mubr.f32.gmra.mrb[66].mxu1 %v4611_v61  ;;  %8713 = vmatprep.subr.msk.bf16.mxu1 %vm11751_vm3, %v8711_v9  ;;  %v4320_v23 = vld [vmem:[%s15605_s1 + $0x450] sm:$0xff]  ;;  %v1249_v61 = vsel %vm1243_vm2, %v10743_v3, %v10744_v40 }
 0x1d2   : > { %v8714_v13 = vpack.c.bf16 %v1246_v11, %v1244_v1  ;;  %6876 = vmatmul.mubr.f32.gmra.mrb[18].mxu0 %v4307_v24  ;;  %v10747_v46 = vpop.permute.xlu0 %10746  ;;  %v10752_v57 = vpop.permute.xlu1 %10751  ;;  %5613 = vmatprep.mubr.f32.mxu1 %v4625_v53  ;;  %v4637_v1 = vld [vmem:[%s15605_s1 + $0xe38] sm:$0xff] }
 0x1d3   : > { %v10749_v36 = vunpack.i.h.bf16 %v10747_v46  ;;  %v10748_v47 = vunpack.i.l.bf16 %v10747_v46  ;;  %v10754_v14 = vunpack.i.h.bf16 %v10752_v57  ;;  %v10753_v6 = vunpack.i.l.bf16 %v10752_v57  ;;  %6881 = vmatprep.mubr.f32.mxu0 %v4321_v8 }
 0x1d4   : > { %11036 = vrot.lane.b32.xlu0 %v13136_v21, %s11534_s14  ;;  %11041 = vrot.lane.b32.xlu1 %v13037_v60, %s11534_s14 }
 0x1d5   : > { %v1251_v9 = vsel %vm1243_vm2, %v10748_v47, %v10749_v36  ;;  %v1250_v62 = vsel %vm1243_vm2, %v10754_v14, %v10748_v47  ;;  %v1248_v22 = vsel %vm1243_vm2, %v10753_v6, %v10743_v3  ;;  %5614 = vmatmul.mubr.f32.gmra.mrb[68].mxu1 %v4624_v33  ;;  %v4333_v3 = vld [vmem:[%s15605_s1 + $0x4b8] sm:$0xff]  ;;  %v4347_v33 = vld [vmem:[%s15605_s1 + $0x528] sm:$0xff]  ;;  %vm1567_vm2 = vcmask 146432  }
 0x1d6   : > { %v8720_v24 = vpack.c.bf16 %v1250_v62, %v1248_v22  ;;  %8716 = vmatpush1.bf16.msk.msra.mxu1 %vm11760_vm4, %v8714_v13  ;;  %6882 = vmatmul.mubr.f32.gmra.mrb[20].mxu0 %v4320_v23  ;;  %v10757_v53 = vpop.permute.xlu0 %10756  ;;  %v10762_v8 = vpop.permute.xlu1 %10761  ;;  %v8717_v11 = vpack.c.bf16 %v1251_v9, %v1249_v61  ;;  %v4651_v13 = vld [vmem:[%s15605_s1 + $0xea8] sm:$0xff]  ;;  %v4346_v62 = vld [vmem:[%s15605_s1 + $0x520] sm:$0xff]  ;;  %v4664_v22 = vld [vmem:[%s15605_s1 + $0xf10] sm:$0xff] }
 0x1d7   : > { %v10759_v40 = vunpack.i.h.bf16 %v10757_v53  ;;  %v10758_v46 = vunpack.i.l.bf16 %v10757_v53  ;;  %v10764_v57 = vunpack.i.h.bf16 %v10762_v8  ;;  %v10763_v36 = vunpack.i.l.bf16 %v10762_v8  ;;  %5619 = vmatprep.mubr.f32.mxu1 %v4638_v25  ;;  %6887 = vmatprep.mubr.f32.mxu0 %v4334_v4  ;;  %v4650_v25 = vld [vmem:[%s15605_s1 + $0xea0] sm:$0xff] }
 0x1d8   : > { %11046 = vrot.lane.b32.xlu0 %v13064_v2, %s11534_s14  ;;  %11051 = vrot.lane.b32.xlu1 %v13161_v59, %s11534_s14 }
 0x1d9   : > { %v1326_v47 = vsel %vm1324_vm10, %v10758_v46, %v10759_v40  ;;  %v1328_v14 = vsel %vm1324_vm10, %v10763_v36, %v10764_v57  ;;  %5620 = vmatmul.mubr.f32.gmra.mrb[70].mxu1 %v4637_v1  ;;  %8719 = vmatprep.subr.msk.bf16.mxu1 %vm11751_vm3, %v8717_v11 }
 0x1da   : > { %6888 = vmatmul.mubr.f32.gmra.mrb[22].mxu0 %v4333_v3  ;;  %8722 = vmatpush1.bf16.msk.msra.mxu1 %vm11760_vm4, %v8720_v24  ;;  %v10767_v6 = vpop.permute.xlu0 %10766  ;;  %v10772_v23 = vpop.permute.xlu1 %10771  ;;  %v8723_v4 = vpack.c.bf16 %v1328_v14, %v1326_v47  ;;  %v4360_v24 = vld [vmem:[%s15605_s1 + $0x590] sm:$0xff] }
 0x1db   : > { %v10769_v61 = vunpack.i.h.bf16 %v10767_v6  ;;  %v10768_v9 = vunpack.i.l.bf16 %v10767_v6  ;;  %5625 = vmatprep.mubr.f32.mxu1 %v4651_v13  ;;  %6893 = vmatprep.mubr.f32.mxu0 %v4347_v33  ;;  %v10774_v1 = vunpack.i.h.bf16 %v10772_v23  ;;  %v10773_v11 = vunpack.i.l.bf16 %v10772_v23  ;;  %v4663_v13 = vld [vmem:[%s15605_s1 + $0xf08] sm:$0xff]  ;;  %v4677_v6 = vld [vmem:[%s15605_s1 + $0xf78] sm:$0xff] }
 0x1dc   : > { %11056 = vrot.lane.b32.xlu0 %v13097_v43, %s11535_s30  ;;  %11061 = vrot.lane.b32.xlu1 %v13104_v5, %s11535_s30  ;;  %v4373_v23 = vld [vmem:[%s15605_s1 + $0x5f8] sm:$0xff] }
 0x1dd   : > { %v1325_v53 = vsel %vm1324_vm10, %v10768_v9, %v10758_v46  ;;  %v1327_v8 = vsel %vm1324_vm10, %v10769_v61, %v10763_v36  ;;  %5626 = vmatmul.mubr.f32.gmra.mrb[72].mxu1 %v4650_v25  ;;  %8725 = vmatprep.subr.msk.bf16.mxu1 %vm11795_vm7, %v8723_v4  ;;  %v4359_v36 = vld [vmem:[%s15605_s1 + $0x588] sm:$0xff]  ;;  %v1330_v25 = vsel %vm1324_vm10, %v10773_v11, %v10774_v1 }
 0x1de   : > { %v8726_v40 = vpack.c.bf16 %v1327_v8, %v1325_v53  ;;  %6894 = vmatmul.mubr.f32.gmra.mrb[24].mxu0 %v4346_v62  ;;  %v10777_v57 = vpop.permute.xlu0 %10776  ;;  %v10782_v3 = vpop.permute.xlu1 %10781  ;;  %5631 = vmatprep.mubr.f32.mxu1 %v4664_v22  ;;  %v4676_v53 = vld [vmem:[%s15605_s1 + $0xf70] sm:$0xff] }
 0x1df   : > { %v10779_v33 = vunpack.i.h.bf16 %v10777_v57  ;;  %v10778_v47 = vunpack.i.l.bf16 %v10777_v57  ;;  %v10784_v46 = vunpack.i.h.bf16 %v10782_v3  ;;  %v10783_v14 = vunpack.i.l.bf16 %v10782_v3  ;;  %6899 = vmatprep.mubr.f32.mxu0 %v4360_v24 }
 0x1e0   : > { %11066 = vrot.lane.b32.xlu0 %v13136_v21, %s11535_s30  ;;  %11071 = vrot.lane.b32.xlu1 %v13037_v60, %s11535_s30 }
 0x1e1   : > { %v1332_v4 = vsel %vm1324_vm10, %v10778_v47, %v10779_v33  ;;  %v1331_v61 = vsel %vm1324_vm10, %v10784_v46, %v10778_v47  ;;  %v1329_v9 = vsel %vm1324_vm10, %v10783_v14, %v10773_v11  ;;  %5632 = vmatmul.mubr.f32.gmra.mrb[74].mxu1 %v4663_v13  ;;  %v4372_v11 = vld [vmem:[%s15605_s1 + $0x5f0] sm:$0xff]  ;;  %v4386_v13 = vld [vmem:[%s15605_s1 + $0x660] sm:$0xff]  ;;  %vm3503_vm10 = vcmask 769024  }
 0x1e2   : > { %v8732_v62 = vpack.c.bf16 %v1331_v61, %v1329_v9  ;;  %8728 = vmatpush1.bf16.msk.msra.mxu1 %vm11810_vm9, %v8726_v40  ;;  %6900 = vmatmul.mubr.f32.gmra.mrb[26].mxu0 %v4359_v36  ;;  %v10787_v22 = vpop.permute.xlu0 %10786  ;;  %v10792_v24 = vpop.permute.xlu1 %10791  ;;  %v8729_v8 = vpack.c.bf16 %v1332_v4, %v1330_v25  ;;  %v4690_v40 = vld [vmem:[%s15605_s1 + $0xfe0] sm:$0xff]  ;;  %v4385_v61 = vld [vmem:[%s15605_s1 + $0x658] sm:$0xff]  ;;  %v4703_v9 = vld [vmem:[%s15605_s1 + $0x1048] sm:$0xff] }
 0x1e3   : > { %v10789_v1 = vunpack.i.h.bf16 %v10787_v22  ;;  %v10788_v57 = vunpack.i.l.bf16 %v10787_v22  ;;  %v10794_v3 = vunpack.i.h.bf16 %v10792_v24  ;;  %v10793_v33 = vunpack.i.l.bf16 %v10792_v24  ;;  %5637 = vmatprep.mubr.f32.mxu1 %v4677_v6  ;;  %6905 = vmatprep.mubr.f32.mxu0 %v4373_v23  ;;  %v4689_v6 = vld [vmem:[%s15605_s1 + $0xfd8] sm:$0xff] }
 0x1e4   : > { %11076 = vrot.lane.b32.xlu0 %v13064_v2, %s11535_s30  ;;  %11081 = vrot.lane.b32.xlu1 %v13161_v59, %s11535_s30  ;;  %s11541_s30 = smov 13  }
 0x1e5   : > { %v1407_v47 = vsel %vm1405_vm6, %v10788_v57, %v10789_v1  ;;  %v1409_v46 = vsel %vm1405_vm6, %v10793_v33, %v10794_v3  ;;  %5638 = vmatmul.mubr.f32.gmra.mrb[76].mxu1 %v4676_v53  ;;  %8731 = vmatprep.subr.msk.bf16.mxu1 %vm11795_vm7, %v8729_v8 }
 0x1e6   : > { %6906 = vmatmul.mubr.f32.gmra.mrb[28].mxu0 %v4372_v11  ;;  %8734 = vmatpush1.bf16.msk.msra.mxu1 %vm11810_vm9, %v8732_v62  ;;  %v10797_v14 = vpop.permute.xlu0 %10796  ;;  %v10802_v36 = vpop.permute.xlu1 %10801  ;;  %v8735_v23 = vpack.c.bf16 %v1409_v46, %v1407_v47  ;;  %v4399_v62 = vld [vmem:[%s15605_s1 + $0x6c8] sm:$0xff]  ;;  %v4716_v47 = vld [vmem:[%s15605_s1 + $0x10b0] sm:$0xff] }
 0x1e7   : > { %v10799_v25 = vunpack.i.h.bf16 %v10797_v14  ;;  %v10798_v4 = vunpack.i.l.bf16 %v10797_v14  ;;  %5643 = vmatprep.mubr.f32.mxu1 %v4690_v40  ;;  %6911 = vmatprep.mubr.f32.mxu0 %v4386_v13  ;;  %v10804_v53 = vunpack.i.h.bf16 %v10802_v36  ;;  %v10803_v8 = vunpack.i.l.bf16 %v10802_v36  ;;  %v4412_v46 = vld [vmem:[%s15605_s1 + $0x730] sm:$0xff] }
 0x1e8   : > { %11086 = vrot.lane.b32.xlu0 %v13097_v43, %s11536_s12  ;;  %11091 = vrot.lane.b32.xlu1 %v13104_v5, %s11536_s12  ;;  %v4702_v5 = vld [vmem:[%s15605_s1 + $0x1040] sm:$0xff] }
 0x1e9   : > { %v1406_v22 = vsel %vm1405_vm6, %v10798_v4, %v10788_v57  ;;  %v1408_v24 = vsel %vm1405_vm6, %v10799_v25, %v10793_v33  ;;  %5644 = vmatmul.mubr.f32.gmra.mrb[78].mxu1 %v4689_v6  ;;  %8737 = vmatprep.subr.msk.bf16.mxu1 %vm11845_vm12, %v8735_v23  ;;  %v4398_v33 = vld [vmem:[%s15605_s1 + $0x6c0] sm:$0xff]  ;;  %v1411_v14 = vsel %vm1405_vm6, %v10803_v8, %v10804_v53  ;;  %v4715_v4 = vld [vmem:[%s15605_s1 + $0x10a8] sm:$0xff] }
 0x1ea   : > { %v8738_v1 = vpack.c.bf16 %v1408_v24, %v1406_v22  ;;  %6912 = vmatmul.mubr.f32.gmra.mrb[30].mxu0 %v4385_v61  ;;  %v10807_v43 = vpop.permute.xlu0 %10806  ;;  %v10812_v3 = vpop.permute.xlu1 %10811  ;;  %5649 = vmatprep.mubr.f32.mxu1 %v4703_v9  ;;  %v4411_v53 = vld [vmem:[%s15605_s1 + $0x728] sm:$0xff] }
 0x1eb   : > { %v10809_v11 = vunpack.i.h.bf16 %v10807_v43  ;;  %v10808_v40 = vunpack.i.l.bf16 %v10807_v43  ;;  %v10814_v57 = vunpack.i.h.bf16 %v10812_v3  ;;  %v10813_v13 = vunpack.i.l.bf16 %v10812_v3  ;;  %6917 = vmatprep.mubr.f32.mxu0 %v4399_v62 }
 0x1ec   : > { %11096 = vrot.lane.b32.xlu0 %v13136_v21, %s11536_s12  ;;  %11101 = vrot.lane.b32.xlu1 %v13037_v60, %s11536_s12  ;;  %v13373_v43 = vpack.i.bf16 %v13093_v42, %v13129_v32  ;;  %v13377_v3 = vpack.i.bf16 %v13100_v31, %v13132_v51  ;;  %v4728_v42 = vld [vmem:[%s15605_s1 + $0x1110] sm:$0xff] }
 0x1ed   : > { %v1413_v36 = vsel %vm1405_vm6, %v10808_v40, %v10809_v11  ;;  %v1412_v6 = vsel %vm1405_vm6, %v10814_v57, %v10808_v40  ;;  %v1410_v23 = vsel %vm1405_vm6, %v10813_v13, %v10803_v8  ;;  %5650 = vmatmul.mubr.f32.gmra.mrb[80].mxu1 %v4702_v5  ;;  %v4729_v8 = vld [vmem:[%s15605_s1 + $0x1118] sm:$0xff]  ;;  %v4424_v40 = vld [vmem:[%s15605_s1 + $0x790] sm:$0xff]  ;;  %v4742_v57 = vld [vmem:[%s15605_s1 + $0x1180] sm:$0xff]  ;;  %vm3584_vm6 = vcmask 760832  }
 0x1ee   : > { %v8744_v21 = vpack.c.bf16 %v1412_v6, %v1410_v23  ;;  %8740 = vmatpush1.bf16.msk.msra.mxu1 %vm11860_vm14, %v8738_v1  ;;  %6918 = vmatmul.mubr.f32.gmra.mrb[32].mxu0 %v4398_v33  ;;  %v10817_v60 = vpop.permute.xlu0 %10816  ;;  %v10822_v25 = vpop.permute.xlu1 %10821  ;;  %v8741_v61 = vpack.c.bf16 %v1413_v36, %v1411_v14  ;;  %v4425_v1 = vld [vmem:[%s15605_s1 + $0x798] sm:$0xff]  ;;  %v4438_v13 = vld [vmem:[%s15605_s1 + $0x800] sm:$0xff]  ;;  %v13403_v33 = vpack.i.bf16 %v13033_v19, %v13157_v45 }
 0x1ef   : > { %v10819_v9 = vunpack.i.h.bf16 %v10817_v60  ;;  %v10818_v62 = vunpack.i.l.bf16 %v10817_v60  ;;  %v10824_v22 = vunpack.i.h.bf16 %v10822_v25  ;;  %v10823_v24 = vunpack.i.l.bf16 %v10822_v25  ;;  %5655 = vmatprep.mubr.f32.mxu1 %v4716_v47  ;;  %6923 = vmatprep.mubr.f32.mxu0 %v4412_v46  ;;  %v4741_v19 = vld [vmem:[%s15605_s1 + $0x1178] sm:$0xff] }
 0x1f0   : > { %11106 = vrot.lane.b32.xlu0 %v13064_v2, %s11536_s12  ;;  %11111 = vrot.lane.b32.xlu1 %v13161_v59, %s11536_s12 }
 0x1f1   : > { %v1488_v2 = vsel %vm1486_vm0, %v10818_v62, %v10819_v9  ;;  %v1490_v59 = vsel %vm1486_vm0, %v10823_v24, %v10824_v22  ;;  %5656 = vmatmul.mubr.f32.gmra.mrb[82].mxu1 %v4715_v4  ;;  %8743 = vmatprep.subr.msk.bf16.mxu1 %vm11845_vm12, %v8741_v61  ;;  %v4437_v9 = vld [vmem:[%s15605_s1 + $0x7f8] sm:$0xff]  ;;  %v4451_v22 = vld [vmem:[%s15605_s1 + $0x868] sm:$0xff] }
 0x1f2   : > { %6924 = vmatmul.mubr.f32.gmra.mrb[34].mxu0 %v4411_v53  ;;  %8746 = vmatpush1.bf16.msk.msra.mxu1 %vm11860_vm14, %v8744_v21  ;;  %v10827_v5 = vpop.permute.xlu0 %10826  ;;  %v10832_v11 = vpop.permute.xlu1 %10831  ;;  %v8747_v31 = vpack.c.bf16 %v1490_v59, %v1488_v2 }
 0x1f3   : > { %v10829_v32 = vunpack.i.h.bf16 %v10827_v5  ;;  %v10828_v51 = vunpack.i.l.bf16 %v10827_v5  ;;  %5661 = vmatprep.mubr.f32.mxu1 %v4729_v8  ;;  %6929 = vmatprep.mubr.f32.mxu0 %v4425_v1  ;;  %v10834_v14 = vunpack.i.h.bf16 %v10832_v11  ;;  %v10833_v36 = vunpack.i.l.bf16 %v10832_v11 }
 0x1f4   : > { %11116 = vrot.lane.b32.xlu0 %v13373_v43, %s11537_s29  ;;  %11121 = vrot.lane.b32.xlu1 %v13377_v3, %s11537_s29 }
 0x1f5   : > { %v1487_v47 = vsel %vm1486_vm0, %v10828_v51, %v10818_v62  ;;  %v1489_v46 = vsel %vm1486_vm0, %v10829_v32, %v10823_v24  ;;  %5662 = vmatmul.mubr.f32.gmra.mrb[84].mxu1 %v4728_v42  ;;  %8749 = vmatprep.subr.msk.bf16.mxu1 %vm11900_vm1, %v8747_v31  ;;  %v4755_v62 = vld [vmem:[%s15605_s1 + $0x11e8] sm:$0xff]  ;;  %v13427_v24 = vpack.i.bf16 %v13060_v27, %v13067_v20  ;;  %v4754_v27 = vld [vmem:[%s15605_s1 + $0x11e0] sm:$0xff] }
 0x1f6   : > { %v8750_v6 = vpack.c.bf16 %v1489_v46, %v1487_v47  ;;  %6930 = vmatmul.mubr.f32.gmra.mrb[36].mxu0 %v4424_v40  ;;  %v10837_v23 = vpop.permute.xlu0 %10836  ;;  %v10842_v21 = vpop.permute.xlu1 %10841  ;;  %5667 = vmatprep.mubr.f32.mxu1 %v4742_v57  ;;  %v1492_v53 = vsel %vm1486_vm0, %v10833_v36, %v10834_v14  ;;  %v4450_v40 = vld [vmem:[%s15605_s1 + $0x860] sm:$0xff]  ;;  %v4768_v57 = vld [vmem:[%s15605_s1 + $0x1250] sm:$0xff] }
 0x1f7   : > { %v10839_v60 = vunpack.i.h.bf16 %v10837_v23  ;;  %v10838_v25 = vunpack.i.l.bf16 %v10837_v23  ;;  %v10844_v4 = vunpack.i.h.bf16 %v10842_v21  ;;  %v10843_v61 = vunpack.i.l.bf16 %v10842_v21  ;;  %6935 = vmatprep.mubr.f32.mxu0 %v4438_v13  ;;  %v4464_v13 = vld [vmem:[%s15605_s1 + $0x8d0] sm:$0xff] }
 0x1f8   : > { %11126 = vrot.lane.b32.xlu0 %v15677_v26, %s11537_s29  ;;  %11131 = vrot.lane.b32.xlu1 %v13403_v33, %s11537_s29 }
 0x1f9   : > { %v1494_v8 = vsel %vm1486_vm0, %v10838_v25, %v10839_v60  ;;  %v1493_v1 = vsel %vm1486_vm0, %v10844_v4, %v10838_v25  ;;  %v1491_v2 = vsel %vm1486_vm0, %v10843_v61, %v10833_v36  ;;  %5668 = vmatmul.mubr.f32.gmra.mrb[86].mxu1 %v4741_v19  ;;  %v4463_v60 = vld [vmem:[%s15605_s1 + $0x8c8] sm:$0xff]  ;;  %v4781_v25 = vld [vmem:[%s15605_s1 + $0x12b8] sm:$0xff]  ;;  %vm3665_vm0 = vcmask 678912  }
 0x1fa   : > { %v8756_v59 = vpack.c.bf16 %v1493_v1, %v1491_v2  ;;  %8752 = vmatpush1.bf16.msk.msra.mxu1 %vm11915_vm5, %v8750_v6  ;;  %6936 = vmatmul.mubr.f32.gmra.mrb[38].mxu0 %v4437_v9  ;;  %v10847_v5 = vpop.permute.xlu0 %10846  ;;  %v10852_v11 = vpop.permute.xlu1 %10851  ;;  %v8753_v20 = vpack.c.bf16 %v1494_v8, %v1492_v53  ;;  %v4767_v6 = vld [vmem:[%s15605_s1 + $0x1248] sm:$0xff]  ;;  %v4477_v4 = vld [vmem:[%s15605_s1 + $0x938] sm:$0xff]  ;;  %v4780_v2 = vld [vmem:[%s15605_s1 + $0x12b0] sm:$0xff] }
 0x1fb   : > { %v10849_v42 = vunpack.i.h.bf16 %v10847_v5  ;;  %v10848_v31 = vunpack.i.l.bf16 %v10847_v5  ;;  %v10854_v32 = vunpack.i.h.bf16 %v10852_v11  ;;  %v10853_v51 = vunpack.i.l.bf16 %v10852_v11  ;;  %5673 = vmatprep.mubr.f32.mxu1 %v4755_v62  ;;  %6941 = vmatprep.mubr.f32.mxu0 %v4451_v22 }
 0x1fc   : > { %11136 = vrot.lane.b32.xlu0 %v13427_v24, %s11537_s29  ;;  %11141 = vrot.lane.b32.xlu1 %v15677_v26, %s11537_s29 }
 0x1fd   : > { %v1569_v47 = vsel %vm1567_vm2, %v10848_v31, %v10849_v42  ;;  %v1571_v46 = vsel %vm1567_vm2, %v10853_v51, %v10854_v32  ;;  %5674 = vmatmul.mubr.f32.gmra.mrb[88].mxu1 %v4754_v27  ;;  %8755 = vmatprep.subr.msk.bf16.mxu1 %vm11900_vm1, %v8753_v20  ;;  %v4476_v20 = vld [vmem:[%s15605_s1 + $0x930] sm:$0xff]  ;;  %v4794_v42 = vld [vmem:[%s15605_s1 + $0x1320] sm:$0xff] }
 0x1fe   : > { %6942 = vmatmul.mubr.f32.gmra.mrb[40].mxu0 %v4450_v40  ;;  %8758 = vmatpush1.bf16.msk.msra.mxu1 %vm11915_vm5, %v8756_v59  ;;  %v10857_v14 = vpop.permute.xlu0 %10856  ;;  %v10862_v36 = vpop.permute.xlu1 %10861  ;;  %v8759_v23 = vpack.c.bf16 %v1571_v46, %v1569_v47 }
 0x1ff   : > { %v10859_v21 = vunpack.i.h.bf16 %v10857_v14  ;;  %v10858_v19 = vunpack.i.l.bf16 %v10857_v14  ;;  %5679 = vmatprep.mubr.f32.mxu1 %v4768_v57  ;;  %6947 = vmatprep.mubr.f32.mxu0 %v4464_v13  ;;  %v10864_v62 = vunpack.i.h.bf16 %v10862_v36  ;;  %v10863_v22 = vunpack.i.l.bf16 %v10862_v36  ;;  %v4793_v14 = vld [vmem:[%s15605_s1 + $0x1318] sm:$0xff] }
 0x200   : > { %11146 = vrot.lane.b32.xlu0 %v13373_v43, %s11538_s13  ;;  %11151 = vrot.lane.b32.xlu1 %v13377_v3, %s11538_s13 }
 0x201   : > { %v1568_v61 = vsel %vm1567_vm2, %v10858_v19, %v10848_v31  ;;  %v1570_v9 = vsel %vm1567_vm2, %v10859_v21, %v10853_v51  ;;  %5680 = vmatmul.mubr.f32.gmra.mrb[90].mxu1 %v4767_v6  ;;  %8761 = vmatprep.subr.msk.bf16.mxu1 %vm11958_vm11, %v8759_v23  ;;  %v4490_v31 = vld [vmem:[%s15605_s1 + $0x9a0] sm:$0xff]  ;;  %v1573_v32 = vsel %vm1567_vm2, %v10863_v22, %v10864_v62 }
 0x202   : > { %v8762_v53 = vpack.c.bf16 %v1570_v9, %v1568_v61  ;;  %6948 = vmatmul.mubr.f32.gmra.mrb[42].mxu0 %v4463_v60  ;;  %v10867_v8 = vpop.permute.xlu0 %10866  ;;  %v10872_v1 = vpop.permute.xlu1 %10871  ;;  %5685 = vmatprep.mubr.f32.mxu1 %v4781_v25  ;;  %v4489_v60 = vld [vmem:[%s15605_s1 + $0x998] sm:$0xff] }
 0x203   : > { %v10869_v59 = vunpack.i.h.bf16 %v10867_v8  ;;  %v10868_v5 = vunpack.i.l.bf16 %v10867_v8  ;;  %v10874_v11 = vunpack.i.h.bf16 %v10872_v1  ;;  %v10873_v27 = vunpack.i.l.bf16 %v10872_v1  ;;  %6953 = vmatprep.mubr.f32.mxu0 %v4477_v4  ;;  %v4185_v25 = vld [vmem:[%s15605_s1 + $0x18] sm:$0xff]  ;;  %v4503_v4 = vld [vmem:[%s15605_s1 + $0xa08] sm:$0xff] }
 0x204   : > { %11156 = vrot.lane.b32.xlu0 %v15677_v26, %s11538_s13  ;;  %11161 = vrot.lane.b32.xlu1 %v13403_v33, %s11538_s13 }
 0x205   : > { %v1575_v51 = vsel %vm1567_vm2, %v10868_v5, %v10869_v59  ;;  %v1574_v40 = vsel %vm1567_vm2, %v10874_v11, %v10868_v5  ;;  %v1572_v57 = vsel %vm1567_vm2, %v10873_v27, %v10863_v22  ;;  %5686 = vmatmul.mubr.f32.gmra.mrb[92].mxu1 %v4780_v2  ;;  %v4502_v59 = vld [vmem:[%s15605_s1 + $0xa00] sm:$0xff]  ;;  %vm3746_vm2 = vcmask 670720  }
 0x206   : > { %v8768_v13 = vpack.c.bf16 %v1574_v40, %v1572_v57  ;;  %8764 = vmatpush1.bf16.msk.msra.mxu1 %vm11980_vm15, %v8762_v53  ;;  %6954 = vmatmul.mubr.f32.gmra.mrb[44].mxu0 %v4476_v20  ;;  %v10877_v47 = vpop.permute.xlu0 %10876  ;;  %v10882_v46 = vpop.permute.xlu1 %10881  ;;  %v8765_v36 = vpack.c.bf16 %v1575_v51, %v1573_v32  ;;  %v4184_v53 = vld [vmem:[%s15605_s1 + $0x10] sm:$0xff]  ;;  %v4198_v5 = vld [vmem:[%s15605_s1 + $0x80] sm:$0xff]  ;;  %v4197_v57 = vld [vmem:[%s15605_s1 + $0x78] sm:$0xff] }
 0x207   : > { %v10879_v6 = vunpack.i.h.bf16 %v10877_v47  ;;  %v10878_v23 = vunpack.i.l.bf16 %v10877_v47  ;;  %v10884_v21 = vunpack.i.h.bf16 %v10882_v46  ;;  %v10883_v19 = vunpack.i.l.bf16 %v10882_v46  ;;  %5691 = vmatprep.mubr.f32.mxu1 %v4794_v42  ;;  %6959 = vmatprep.mubr.f32.mxu0 %v4490_v31  ;;  %v4516_v20 = vld [vmem:[%s15605_s1 + $0xa70] sm:$0xff] }
 0x208   : > { %11166 = vrot.lane.b32.xlu0 %v13427_v24, %s11538_s13  ;;  %11171 = vrot.lane.b32.xlu1 %v15677_v26, %s11538_s13 }
 0x209   : > { %v3505_v61 = vsel %vm3503_vm10, %v10878_v23, %v10879_v6  ;;  %v3507_v9 = vsel %vm3503_vm10, %v10883_v19, %v10884_v21  ;;  %5692 = vmatmul.mubr.f32.gmra.mrb[94].mxu1 %v4793_v14  ;;  %8767 = vmatprep.subr.msk.bf16.mxu1 %vm11958_vm11, %v8765_v36  ;;  %v4515_v36 = vld [vmem:[%s15605_s1 + $0xa68] sm:$0xff]  ;;  %v4529_v21 = vld [vmem:[%s15605_s1 + $0xad8] sm:$0xff] }
 0x20a   : > { %6960 = vmatmul.mubr.f32.gmra.mrb[46].mxu0 %v4489_v60  ;;  %8770 = vmatpush1.bf16.msk.msra.mxu1 %vm11980_vm15, %v8768_v13  ;;  %v10887_v62 = vpop.permute.xlu0 %10886  ;;  %v10892_v22 = vpop.permute.xlu1 %10891  ;;  %v9043_v8 = vpack.c.bf16 %v3507_v9, %v3505_v61  ;;  %v4211_v6 = vld [vmem:[%s15605_s1 + $0xe8] sm:$0xff] }
 0x20b   : > { %v10889_v1 = vunpack.i.h.bf16 %v10887_v62  ;;  %v10888_v2 = vunpack.i.l.bf16 %v10887_v62  ;;  %5762 = vmatprep.mubr.f32.mxu1 %v4185_v25  ;;  %6965 = vmatprep.mubr.f32.mxu0 %v4503_v4  ;;  %v10894_v11 = vunpack.i.h.bf16 %v10892_v22  ;;  %v10893_v27 = vunpack.i.l.bf16 %v10892_v22  ;;  %v4210_v62 = vld [vmem:[%s15605_s1 + $0xe0] sm:$0xff] }
 0x20c   : > { %11176 = vrot.lane.b32.xlu0 %v13373_v43, %s11539_s7  ;;  %11181 = vrot.lane.b32.xlu1 %v13377_v3, %s11539_s7 }
 0x20d   : > { %v3504_v42 = vsel %vm3503_vm10, %v10888_v2, %v10878_v23  ;;  %v3506_v31 = vsel %vm3503_vm10, %v10889_v1, %v10883_v19  ;;  %5763 = vmatmul.mubr.f32.vlgmr.msra.gmra.mrb[0].mxu1 %v4184_v53  ;;  %9045 = vmatprep.subr.msk.bf16.mxu0 %vm11795_vm7, %v9043_v8  ;;  %v3509_v23 = vsel %vm3503_vm10, %v10893_v27, %v10894_v11  ;;  %v4528_v2 = vld [vmem:[%s15605_s1 + $0xad0] sm:$0xff] }
 0x20e   : > { %v9046_v32 = vpack.c.bf16 %v3506_v31, %v3504_v42  ;;  %6966 = vmatmul.mubr.f32.gmra.mrb[48].mxu0 %v4502_v59  ;;  %v10897_v51 = vpop.permute.xlu0 %10896  ;;  %v10902_v40 = vpop.permute.xlu1 %10901  ;;  %5768 = vmatprep.mubr.f32.mxu1 %v4198_v5  ;;  %v4224_v59 = vld [vmem:[%s15605_s1 + $0x150] sm:$0xff]  ;;  %v4542_v5 = vld [vmem:[%s15605_s1 + $0xb40] sm:$0xff]  ;;  %v4223_v31 = vld [vmem:[%s15605_s1 + $0x148] sm:$0xff] }
 0x20f   : > { %v10899_v13 = vunpack.i.h.bf16 %v10897_v51  ;;  %v10898_v47 = vunpack.i.l.bf16 %v10897_v51  ;;  %v10904_v46 = vunpack.i.h.bf16 %v10902_v40  ;;  %v10903_v14 = vunpack.i.l.bf16 %v10902_v40  ;;  %6971 = vmatprep.mubr.f32.mxu0 %v4516_v20  ;;  %v4541_v40 = vld [vmem:[%s15605_s1 + $0xb38] sm:$0xff] }
 0x210   : > { %11186 = vrot.lane.b32.xlu0 %v15677_v26, %s11539_s7  ;;  %11191 = vrot.lane.b32.xlu1 %v13403_v33, %s11539_s7 }
 0x211   : > { %v3511_v19 = vsel %vm3503_vm10, %v10898_v47, %v10899_v13  ;;  %v3510_v60 = vsel %vm3503_vm10, %v10904_v46, %v10898_v47  ;;  %v3508_v25 = vsel %vm3503_vm10, %v10903_v14, %v10893_v27  ;;  %5769 = vmatmul.mubr.f32.gmra.mrb[2].mxu1 %v4197_v57  ;;  %9048 = vmatpush1.bf16.msk.msra.mxu0 %vm11810_vm9, %v9046_v32  ;;  %v4237_v57 = vld [vmem:[%s15605_s1 + $0x1b8] sm:$0xff]  ;;  %v4555_v46 = vld [vmem:[%s15605_s1 + $0xba8] sm:$0xff]  ;;  %vm3827_vm10 = vcmask 662528  }
 0x212   : > { %v9049_v4 = vpack.c.bf16 %v3511_v19, %v3509_v23  ;;  %v9052_v61 = vpack.c.bf16 %v3510_v60, %v3508_v25  ;;  %6972 = vmatmul.mubr.f32.gmra.mrb[50].mxu0 %v4515_v36  ;;  %v10907_v9 = vpop.permute.xlu0 %10906  ;;  %v10912_v33 = vpop.permute.xlu1 %10911  ;;  %5774 = vmatprep.mubr.f32.mxu1 %v4211_v6  ;;  %v13602_v14 = vld [vmem:[%s11630_s6 + $0x28] sm:$0xff]  ;;  %v4236_v19 = vld [vmem:[%s15605_s1 + $0x1b0] sm:$0xff] }
 0x213   : > { %v10909_v22 = vunpack.i.h.bf16 %v10907_v9  ;;  %v10908_v53 = vunpack.i.l.bf16 %v10907_v9  ;;  %v10914_v8 = vunpack.i.h.bf16 %v10912_v33  ;;  %v10913_v1 = vunpack.i.l.bf16 %v10912_v33  ;;  %6977 = vmatprep.mubr.f32.mxu0 %v4529_v21  ;;  %v4250_v9 = vld [vmem:[%s15605_s1 + $0x220] sm:$0xff] }
 0x214   : > { %11196 = vrot.lane.b32.xlu0 %v13427_v24, %s11539_s7  ;;  %11201 = vrot.lane.b32.xlu1 %v15677_v26, %s11539_s7  ;;  %v11220_v36 = vpack.i.bf16 %v13602_v14, %v13157_v45  ;;  %s15562_s7 = scalar_lea.sflag [#allocation6], %s189_s28 }
 0x215   : > { %v3586_v11 = vsel %vm3584_vm6, %v10908_v53, %v10909_v22  ;;  %v3588_v27 = vsel %vm3584_vm6, %v10913_v1, %v10914_v8  ;;  %5775 = vmatmul.mubr.f32.gmra.mrb[4].mxu1 %v4210_v62  ;;  %9051 = vmatprep.subr.msk.bf16.mxu0 %vm11795_vm7, %v9049_v4  ;;  %v4568_v62 = vld [vmem:[%s15605_s1 + $0xc10] sm:$0xff]  ;;  %v13627_v22 = vld [vmem:[%s11630_s6 + $0x38] sm:$0xff] }
 0x216   : > { %v9055_v20 = vpack.c.bf16 %v3588_v27, %v3586_v11  ;;  %6978 = vmatmul.mubr.f32.gmra.mrb[52].mxu0 %v4528_v2  ;;  %v10917_v42 = vpop.permute.xlu0 %10916  ;;  %v10922_v24 = vpop.permute.xlu1 %10921  ;;  %5780 = vmatprep.mubr.f32.mxu1 %v4224_v59 }
 0x217   : > { %9054 = vmatpush1.bf16.msk.msra.mxu0 %vm11810_vm9, %v9052_v61  ;;  %v10919_v32 = vunpack.i.h.bf16 %v10917_v42  ;;  %v10918_v51 = vunpack.i.l.bf16 %v10917_v42  ;;  %6983 = vmatprep.mubr.f32.mxu0 %v4542_v5  ;;  %v10924_v13 = vunpack.i.h.bf16 %v10922_v24  ;;  %v10923_v47 = vunpack.i.l.bf16 %v10922_v24  ;;  %v4554_v61 = vld [vmem:[%s15605_s1 + $0xba0] sm:$0xff]  ;;  %v4249_v42 = vld [vmem:[%s15605_s1 + $0x218] sm:$0xff] }
 0x218   : > { %11206 = vrot.lane.b32.xlu0 %v13373_v43, %s11540_s21  ;;  %11211 = vrot.lane.b32.xlu1 %v13377_v3, %s11540_s21 }
 0x219   : > { %v3585_v6 = vsel %vm3584_vm6, %v10918_v51, %v10908_v53  ;;  %v3587_v23 = vsel %vm3584_vm6, %v10919_v32, %v10913_v1  ;;  %5781 = vmatmul.mubr.f32.gmra.mrb[6].mxu1 %v4223_v31  ;;  %9057 = vmatprep.subr.msk.bf16.mxu0 %vm11845_vm12, %v9055_v20  ;;  %v3590_v33 = vsel %vm3584_vm6, %v10923_v47, %v10924_v13  ;;  %v13630_v53 = vld [vmem:[%s11630_s6 + $0x30] sm:$0xff]  ;;  %v4581_v13 = vld [vmem:[%s15605_s1 + $0xc78] sm:$0xff] }
 0x21a   : > { %v9058_v43 = vpack.c.bf16 %v3587_v23, %v3585_v6  ;;  %6984 = vmatmul.mubr.f32.gmra.mrb[54].mxu0 %v4541_v40  ;;  %v10927_v3 = vpop.permute.xlu0 %10926  ;;  %v10932_v21 = vpop.permute.xlu1 %10931  ;;  %5786 = vmatprep.mubr.f32.mxu1 %v4237_v57  ;;  %v13634_v8 = vpack.i.bf16 %v13627_v22, %v13630_v53  ;;  %v4567_v40 = vld [vmem:[%s15605_s1 + $0xc08] sm:$0xff]  ;;  %v13668_v6 = vld [vmem:[%s11630_s6 + $0x10] sm:$0xff]  ;;  %v13671_v23 = vld [vmem:[%s11630_s6 + $0x18] sm:$0xff] }
 0x21b   : > { %v10929_v45 = vunpack.i.h.bf16 %v10927_v3  ;;  %v10928_v60 = vunpack.i.l.bf16 %v10927_v3  ;;  %v10934_v25 = vunpack.i.h.bf16 %v10932_v21  ;;  %v10933_v4 = vunpack.i.l.bf16 %v10932_v21  ;;  %6989 = vmatprep.mubr.f32.mxu0 %v4555_v46  ;;  %v4263_v57 = vld [vmem:[%s15605_s1 + $0x288] sm:$0xff]  ;;  %v13661_v46 = vld [vmem:[%s11630_s6] sm:$0xff] }
 0x21c   : > { %11216 = vrot.lane.b32.xlu0 %v15677_v26, %s11540_s21  ;;  %11221 = vrot.lane.b32.xlu1 %v11220_v36, %s11540_s21 }
 0x21d   : > { %v3592_v1 = vsel %vm3584_vm6, %v10928_v60, %v10929_v45  ;;  %v3591_v2 = vsel %vm3584_vm6, %v10934_v25, %v10928_v60  ;;  %v3589_v59 = vsel %vm3584_vm6, %v10933_v4, %v10923_v47  ;;  %5787 = vmatmul.mubr.f32.gmra.mrb[8].mxu1 %v4236_v19  ;;  %9060 = vmatpush1.bf16.msk.msra.mxu0 %vm11860_vm14, %v9058_v43  ;;  %v13658_v47 = vld [vmem:[%s11630_s6 + $0x8] sm:$0xff]  ;;  %v4262_v25 = vld [vmem:[%s15605_s1 + $0x280] sm:$0xff]  ;;  %vm3908_vm6 = vcmask 654336  }
 0x21e   : > { %v9061_v5 = vpack.c.bf16 %v3592_v1, %v3590_v33  ;;  %v9064_v11 = vpack.c.bf16 %v3591_v2, %v3589_v59  ;;  %6990 = vmatmul.mubr.f32.gmra.mrb[56].mxu0 %v4554_v61  ;;  %v10937_v27 = vpop.permute.xlu0 %10936  ;;  %v10942_v20 = vpop.permute.xlu1 %10941  ;;  %5792 = vmatprep.mubr.f32.mxu1 %v4250_v9  ;;  %v13665_v36 = vpack.i.bf16 %v13658_v47, %v13661_v46  ;;  %v4580_v9 = vld [vmem:[%s15605_s1 + $0xc70] sm:$0xff]  ;;  %v4594_v2 = vld [vmem:[%s15605_s1 + $0xce0] sm:$0xff] }
 0x21f   : > { %v10939_v24 = vunpack.i.h.bf16 %v10937_v27  ;;  %v10938_v31 = vunpack.i.l.bf16 %v10937_v27  ;;  %v10944_v32 = vunpack.i.h.bf16 %v10942_v20  ;;  %v10943_v51 = vunpack.i.l.bf16 %v10942_v20  ;;  %6995 = vmatprep.mubr.f32.mxu0 %v4568_v62  ;;  %v4276_v33 = vld [vmem:[%s15605_s1 + $0x2f0] sm:$0xff]  ;;  %v13700_v59 = vld [vmem:[%s11630_s6 + $0x20] sm:$0xff] }
 0x220   : > { %11226 = vrot.lane.b32.xlu0 %v13634_v8, %s11540_s21  ;;  %11231 = vrot.lane.b32.xlu1 %v15677_v26, %s11540_s21  ;;  %v13675_v43 = vpack.i.bf16 %v13671_v23, %v13668_v6 }
 0x221   : > { %v3667_v3 = vsel %vm3665_vm0, %v10938_v31, %v10939_v24  ;;  %v3669_v21 = vsel %vm3665_vm0, %v10943_v51, %v10944_v32  ;;  %5793 = vmatmul.mubr.f32.gmra.mrb[10].mxu1 %v4249_v42  ;;  %9063 = vmatprep.subr.msk.bf16.mxu0 %vm11845_vm12, %v9061_v5  ;;  %v13704_v5 = vpack.i.bf16 %v13602_v14, %v13700_v59  ;;  %v4275_v32 = vld [vmem:[%s15605_s1 + $0x2e8] sm:$0xff] }
 0x222   : > { %v9067_v19 = vpack.c.bf16 %v3669_v21, %v3667_v3  ;;  %6996 = vmatmul.mubr.f32.gmra.mrb[58].mxu0 %v4567_v40  ;;  %v10947_v45 = vpop.permute.xlu0 %10946  ;;  %v10952_v60 = vpop.permute.xlu1 %10951  ;;  %5798 = vmatprep.mubr.f32.mxu1 %v4263_v57 }
 0x223   : > { %9066 = vmatpush1.bf16.msk.msra.mxu0 %vm11860_vm14, %v9064_v11  ;;  %v10949_v4 = vunpack.i.h.bf16 %v10947_v45  ;;  %v10948_v61 = vunpack.i.l.bf16 %v10947_v45  ;;  %7001 = vmatprep.mubr.f32.mxu0 %v4581_v13  ;;  %v10954_v62 = vunpack.i.h.bf16 %v10952_v60  ;;  %v10953_v1 = vunpack.i.l.bf16 %v10952_v60 }
 0x224   : > { %11236 = vrot.lane.b32.xlu0 %v13665_v36, %s11541_s30  ;;  %11241 = vrot.lane.b32.xlu1 %v13675_v43, %s11541_s30 }
 0x225   : > { %v3666_v11 = vsel %vm3665_vm0, %v10948_v61, %v10938_v31  ;;  %v3668_v27 = vsel %vm3665_vm0, %v10949_v4, %v10943_v51  ;;  %5799 = vmatmul.mubr.f32.gmra.mrb[12].mxu1 %v4262_v25  ;;  %9069 = vmatprep.subr.msk.bf16.mxu0 %vm11900_vm1, %v9067_v19  ;;  %v4593_v31 = vld [vmem:[%s15605_s1 + $0xcd8] sm:$0xff]  ;;  %v3671_v21 = vsel %vm3665_vm0, %v10953_v1, %v10954_v62  ;;  %v4607_v19 = vld [vmem:[%s15605_s1 + $0xd48] sm:$0xff]  ;;  %v4288_v62 = vld [vmem:[%s15605_s1 + $0x350] sm:$0xff] }
 0x226   : > { %v9070_v20 = vpack.c.bf16 %v3668_v27, %v3666_v11  ;;  %7002 = vmatmul.mubr.f32.gmra.mrb[60].mxu0 %v4580_v9  ;;  %v10957_v42 = vpop.permute.xlu0 %10956  ;;  %v10962_v24 = vpop.permute.xlu1 %10961  ;;  %5804 = vmatprep.mubr.f32.mxu1 %v4276_v33  ;;  %v4289_v51 = vld [vmem:[%s15605_s1 + $0x358] sm:$0xff] }
 0x227   : > { %v10959_v40 = vunpack.i.h.bf16 %v10957_v42  ;;  %v10958_v57 = vunpack.i.l.bf16 %v10957_v42  ;;  %v10964_v13 = vunpack.i.h.bf16 %v10962_v24  ;;  %v10963_v3 = vunpack.i.l.bf16 %v10962_v24  ;;  %7007 = vmatprep.mubr.f32.mxu0 %v4594_v2  ;;  %v4620_v24 = vld [vmem:[%s15605_s1 + $0xdb0] sm:$0xff] }
 0x228   : > { %11246 = vrot.lane.b32.xlu0 %v15677_v26, %s11541_s30  ;;  %11251 = vrot.lane.b32.xlu1 %v13704_v5, %s11541_s30 }
 0x229   : > { %v3673_v45 = vsel %vm3665_vm0, %v10958_v57, %v10959_v40  ;;  %v3672_v60 = vsel %vm3665_vm0, %v10964_v13, %v10958_v57  ;;  %v3670_v25 = vsel %vm3665_vm0, %v10963_v3, %v10953_v1  ;;  %5805 = vmatmul.mubr.f32.gmra.mrb[14].mxu1 %v4275_v32  ;;  %9072 = vmatpush1.bf16.msk.msra.mxu0 %vm11915_vm5, %v9070_v20  ;;  %v4606_v1 = vld [vmem:[%s15605_s1 + $0xd40] sm:$0xff]  ;;  %vm3981_vm0 = vcmask 646144  }
 0x22a   : > { %v9073_v4 = vpack.c.bf16 %v3673_v45, %v3671_v21  ;;  %v9076_v61 = vpack.c.bf16 %v3672_v60, %v3670_v25  ;;  %7008 = vmatmul.mubr.f32.gmra.mrb[62].mxu0 %v4593_v31  ;;  %v10967_v9 = vpop.permute.xlu0 %10966  ;;  %v10972_v33 = vpop.permute.xlu1 %10971  ;;  %5810 = vmatprep.mubr.f32.mxu1 %v4289_v51  ;;  %v4302_v20 = vld [vmem:[%s15605_s1 + $0x3c0] sm:$0xff]  ;;  %v4301_v31 = vld [vmem:[%s15605_s1 + $0x3b8] sm:$0xff]  ;;  %v4315_v45 = vld [vmem:[%s15605_s1 + $0x428] sm:$0xff] }
 0x22b   : > { %v10969_v2 = vunpack.i.h.bf16 %v10967_v9  ;;  %v10968_v11 = vunpack.i.l.bf16 %v10967_v9  ;;  %v10974_v27 = vunpack.i.h.bf16 %v10972_v33  ;;  %v10973_v42 = vunpack.i.l.bf16 %v10972_v33  ;;  %7013 = vmatprep.mubr.f32.mxu0 %v4607_v19  ;;  %v4619_v19 = vld [vmem:[%s15605_s1 + $0xda8] sm:$0xff] }
 0x22c   : > { %11256 = vrot.lane.b32.xlu0 %v13634_v8, %s11541_s30  ;;  %11261 = vrot.lane.b32.xlu1 %v15677_v26, %s11541_s30  ;;  %s11545_s30 = smov 77  }
 0x22d   : > { %v3748_v32 = vsel %vm3746_vm2, %v10968_v11, %v10969_v2  ;;  %v3750_v40 = vsel %vm3746_vm2, %v10973_v42, %v10974_v27  ;;  %5811 = vmatmul.mubr.f32.gmra.mrb[16].mxu1 %v4288_v62  ;;  %9075 = vmatprep.subr.msk.bf16.mxu0 %vm11900_vm1, %v9073_v4  ;;  %v4633_v4 = vld [vmem:[%s15605_s1 + $0xe18] sm:$0xff]  ;;  %v4314_v27 = vld [vmem:[%s15605_s1 + $0x420] sm:$0xff] }
 0x22e   : > { %v9079_v57 = vpack.c.bf16 %v3750_v40, %v3748_v32  ;;  %7014 = vmatmul.mubr.f32.gmra.mrb[64].mxu0 %v4606_v1  ;;  %v10977_v13 = vpop.permute.xlu0 %10976  ;;  %v10982_v3 = vpop.permute.xlu1 %10981  ;;  %5816 = vmatprep.mubr.f32.mxu1 %v4302_v20 }
 0x22f   : > { %9078 = vmatpush1.bf16.msk.msra.mxu0 %vm11915_vm5, %v9076_v61  ;;  %v10979_v51 = vunpack.i.h.bf16 %v10977_v13  ;;  %v10978_v21 = vunpack.i.l.bf16 %v10977_v13  ;;  %7019 = vmatprep.mubr.f32.mxu0 %v4620_v24  ;;  %v10984_v60 = vunpack.i.h.bf16 %v10982_v3  ;;  %v10983_v25 = vunpack.i.l.bf16 %v10982_v3 }
 0x230   : > { %11266 = vrot.lane.b32.xlu0 %v13665_v36, %s11542_s15  ;;  %11271 = vrot.lane.b32.xlu1 %v13675_v43, %s11542_s15 }
 0x231   : > { %v3747_v61 = vsel %vm3746_vm2, %v10978_v21, %v10968_v11  ;;  %v3749_v9 = vsel %vm3746_vm2, %v10979_v51, %v10973_v42  ;;  %5817 = vmatmul.mubr.f32.gmra.mrb[18].mxu1 %v4301_v31  ;;  %9081 = vmatprep.subr.msk.bf16.mxu0 %vm11958_vm11, %v9079_v57  ;;  %v4632_v11 = vld [vmem:[%s15605_s1 + $0xe10] sm:$0xff]  ;;  %v3752_v40 = vsel %vm3746_vm2, %v10983_v25, %v10984_v60  ;;  %v4646_v57 = vld [vmem:[%s15605_s1 + $0xe80] sm:$0xff]  ;;  %v4327_v60 = vld [vmem:[%s15605_s1 + $0x488] sm:$0xff] }
 0x232   : > { %v9082_v33 = vpack.c.bf16 %v3749_v9, %v3747_v61  ;;  %7020 = vmatmul.mubr.f32.gmra.mrb[66].mxu0 %v4619_v19  ;;  %v10987_v62 = vpop.permute.xlu0 %10986  ;;  %v10992_v2 = vpop.permute.xlu1 %10991  ;;  %5822 = vmatprep.mubr.f32.mxu1 %v4315_v45  ;;  %v4328_v42 = vld [vmem:[%s15605_s1 + $0x490] sm:$0xff] }
 0x233   : > { %v10989_v1 = vunpack.i.h.bf16 %v10987_v62  ;;  %v10988_v20 = vunpack.i.l.bf16 %v10987_v62  ;;  %v10994_v24 = vunpack.i.h.bf16 %v10992_v2  ;;  %v10993_v32 = vunpack.i.l.bf16 %v10992_v2  ;;  %7025 = vmatprep.mubr.f32.mxu0 %v4633_v4  ;;  %v4659_v2 = vld [vmem:[%s15605_s1 + $0xee8] sm:$0xff] }
 0x234   : > { %11276 = vrot.lane.b32.xlu0 %v15677_v26, %s11542_s15  ;;  %11281 = vrot.lane.b32.xlu1 %v13704_v5, %s11542_s15 }
 0x235   : > { %v3754_v13 = vsel %vm3746_vm2, %v10988_v20, %v10989_v1  ;;  %v3753_v3 = vsel %vm3746_vm2, %v10994_v24, %v10988_v20  ;;  %v3751_v31 = vsel %vm3746_vm2, %v10993_v32, %v10983_v25  ;;  %5823 = vmatmul.mubr.f32.gmra.mrb[20].mxu1 %v4314_v27  ;;  %9084 = vmatpush1.bf16.msk.msra.mxu0 %vm11980_vm15, %v9082_v33  ;;  %v4645_v25 = vld [vmem:[%s15605_s1 + $0xe78] sm:$0xff]  ;;  %vm4062_vm2 = vcmask 637952  }
 0x236   : > { %v9085_v51 = vpack.c.bf16 %v3754_v13, %v3752_v40  ;;  %v9088_v21 = vpack.c.bf16 %v3753_v3, %v3751_v31  ;;  %7026 = vmatmul.mubr.f32.gmra.mrb[68].mxu0 %v4632_v11  ;;  %v10997_v19 = vpop.permute.xlu0 %10996  ;;  %v11002_v45 = vpop.permute.xlu1 %11001  ;;  %5828 = vmatprep.mubr.f32.mxu1 %v4328_v42  ;;  %v4341_v33 = vld [vmem:[%s15605_s1 + $0x4f8] sm:$0xff]  ;;  %v4340_v11 = vld [vmem:[%s15605_s1 + $0x4f0] sm:$0xff]  ;;  %v4354_v13 = vld [vmem:[%s15605_s1 + $0x560] sm:$0xff] }
 0x237   : > { %v10999_v4 = vunpack.i.h.bf16 %v10997_v19  ;;  %v10998_v61 = vunpack.i.l.bf16 %v10997_v19  ;;  %v11004_v9 = vunpack.i.h.bf16 %v11002_v45  ;;  %v11003_v62 = vunpack.i.l.bf16 %v11002_v45  ;;  %7031 = vmatprep.mubr.f32.mxu0 %v4646_v57  ;;  %v4658_v57 = vld [vmem:[%s15605_s1 + $0xee0] sm:$0xff] }
 0x238   : > { %11286 = vrot.lane.b32.xlu0 %v13634_v8, %s11542_s15  ;;  %11291 = vrot.lane.b32.xlu1 %v15677_v26, %s11542_s15  ;;  %s8248_s15 = sshll.u32 %s11598_s3, 10 }
 0x239   : > { %v3829_v27 = vsel %vm3827_vm10, %v10998_v61, %v10999_v4  ;;  %v3831_v1 = vsel %vm3827_vm10, %v11003_v62, %v11004_v9  ;;  %5829 = vmatmul.mubr.f32.gmra.mrb[22].mxu1 %v4327_v60  ;;  %9087 = vmatprep.subr.msk.bf16.mxu0 %vm11958_vm11, %v9085_v51  ;;  %v4672_v51 = vld [vmem:[%s15605_s1 + $0xf50] sm:$0xff]  ;;  %v4353_v9 = vld [vmem:[%s15605_s1 + $0x558] sm:$0xff]  ;;  %s15552_s8 = scalar_lea.hbm %s15608_s4, %s8248_s15 }
 0x23a   : > { %v9091_v20 = vpack.c.bf16 %v3831_v1, %v3829_v27  ;;  %7032 = vmatmul.mubr.f32.gmra.mrb[70].mxu0 %v4645_v25  ;;  %v11007_v24 = vpop.permute.xlu0 %11006  ;;  %v11012_v32 = vpop.permute.xlu1 %11011  ;;  %5834 = vmatprep.mubr.f32.mxu1 %v4341_v33 }
 0x23b   : > { %9090 = vmatpush1.bf16.msk.msra.mxu0 %vm11980_vm15, %v9088_v21  ;;  %v11009_v42 = vunpack.i.h.bf16 %v11007_v24  ;;  %v11008_v40 = vunpack.i.l.bf16 %v11007_v24  ;;  %7037 = vmatprep.mubr.f32.mxu0 %v4659_v2  ;;  %v11014_v3 = vunpack.i.h.bf16 %v11012_v32  ;;  %v11013_v31 = vunpack.i.l.bf16 %v11012_v32 }
 0x23c   : > { %11296 = vrot.lane.b32.xlu0 %v13665_v36, %s11543_s5  ;;  %11301 = vrot.lane.b32.xlu1 %v13675_v43, %s11543_s5 }
 0x23d   : > { %v3828_v21 = vsel %vm3827_vm10, %v11008_v40, %v10998_v61  ;;  %v3830_v19 = vsel %vm3827_vm10, %v11009_v42, %v11003_v62  ;;  %5835 = vmatmul.mubr.f32.gmra.mrb[24].mxu1 %v4340_v11  ;;  %9093 = vmatprep.subr.msk.bf16.mxu0 %vm12041_vm8, %v9091_v20  ;;  %v4671_v61 = vld [vmem:[%s15605_s1 + $0xf48] sm:$0xff]  ;;  %v3833_v1 = vsel %vm3827_vm10, %v11013_v31, %v11014_v3  ;;  %v4685_v20 = vld [vmem:[%s15605_s1 + $0xfb8] sm:$0xff]  ;;  %v4366_v3 = vld [vmem:[%s15605_s1 + $0x5c0] sm:$0xff] }
 0x23e   : > { %v9094_v45 = vpack.c.bf16 %v3830_v19, %v3828_v21  ;;  %7038 = vmatmul.mubr.f32.gmra.mrb[72].mxu0 %v4658_v57  ;;  %v11017_v60 = vpop.permute.xlu0 %11016  ;;  %v11022_v4 = vpop.permute.xlu1 %11021  ;;  %5840 = vmatprep.mubr.f32.mxu1 %v4354_v13  ;;  %v4367_v62 = vld [vmem:[%s15605_s1 + $0x5c8] sm:$0xff] }
 0x23f   : > { %v11019_v25 = vunpack.i.h.bf16 %v11017_v60  ;;  %v11018_v33 = vunpack.i.l.bf16 %v11017_v60  ;;  %v11024_v2 = vunpack.i.h.bf16 %v11022_v4  ;;  %v11023_v27 = vunpack.i.l.bf16 %v11022_v4  ;;  %7043 = vmatprep.mubr.f32.mxu0 %v4672_v51  ;;  %v4698_v4 = vld [vmem:[%s15605_s1 + $0x1020] sm:$0xff] }
 0x240   : > { %11306 = vrot.lane.b32.xlu0 %v15677_v26, %s11543_s5  ;;  %11311 = vrot.lane.b32.xlu1 %v13704_v5, %s11543_s5 }
 0x241   : > { %v3835_v24 = vsel %vm3827_vm10, %v11018_v33, %v11019_v25  ;;  %v3834_v32 = vsel %vm3827_vm10, %v11024_v2, %v11018_v33  ;;  %v3832_v11 = vsel %vm3827_vm10, %v11023_v27, %v11013_v31  ;;  %5841 = vmatmul.mubr.f32.gmra.mrb[26].mxu1 %v4353_v9  ;;  %9096 = vmatpush1.bf16.msk.msra.mxu0 %vm12058_vm13, %v9094_v45  ;;  %v4684_v31 = vld [vmem:[%s15605_s1 + $0xfb0] sm:$0xff]  ;;  %v4379_v27 = vld [vmem:[%s15605_s1 + $0x628] sm:$0xff]  ;;  %vm1648_vm10 = vcmask 138240  }
 0x242   : > { %v9097_v42 = vpack.c.bf16 %v3835_v24, %v3833_v1  ;;  %v9100_v40 = vpack.c.bf16 %v3834_v32, %v3832_v11  ;;  %7044 = vmatmul.mubr.f32.gmra.mrb[74].mxu0 %v4671_v61  ;;  %v11027_v57 = vpop.permute.xlu0 %11026  ;;  %v11032_v13 = vpop.permute.xlu1 %11031  ;;  %5846 = vmatprep.mubr.f32.mxu1 %v4367_v62  ;;  %v4380_v45 = vld [vmem:[%s15605_s1 + $0x630] sm:$0xff]  ;;  %v4393_v24 = vld [vmem:[%s15605_s1 + $0x698] sm:$0xff] }
 0x243   : > { %v11029_v51 = vunpack.i.h.bf16 %v11027_v57  ;;  %v11028_v21 = vunpack.i.l.bf16 %v11027_v57  ;;  %v11034_v19 = vunpack.i.h.bf16 %v11032_v13  ;;  %v11033_v60 = vunpack.i.l.bf16 %v11032_v13  ;;  %7049 = vmatprep.mubr.f32.mxu0 %v4685_v20  ;;  %v4697_v20 = vld [vmem:[%s15605_s1 + $0x1018] sm:$0xff] }
 0x244   : > { %11316 = vrot.lane.b32.xlu0 %v13634_v8, %s11543_s5  ;;  %11321 = vrot.lane.b32.xlu1 %v15677_v26, %s11543_s5 }
 0x245   : > { %5847 = vmatmul.mubr.f32.gmra.mrb[28].mxu1 %v4366_v3  ;;  %9099 = vmatprep.subr.msk.bf16.mxu0 %vm12041_vm8, %v9097_v42  ;;  %v3910_v9 = vsel %vm3908_vm6, %v11028_v21, %v11029_v51  ;;  %v3912_v25 = vsel %vm3908_vm6, %v11033_v60, %v11034_v19  ;;  %v4711_v42 = vld [vmem:[%s15605_s1 + $0x1088] sm:$0xff] }
 0x246   : > { %7050 = vmatmul.mubr.f32.gmra.mrb[76].mxu0 %v4684_v31  ;;  %v11037_v33 = vpop.permute.xlu0 %11036  ;;  %v11042_v2 = vpop.permute.xlu1 %11041  ;;  %5852 = vmatprep.mubr.f32.mxu1 %v4380_v45  ;;  %v9103_v61 = vpack.c.bf16 %v3912_v25, %v3910_v9 }
 0x247   : > { %9102 = vmatpush1.bf16.msk.msra.mxu0 %vm12058_vm13, %v9100_v40  ;;  %v11039_v62 = vunpack.i.h.bf16 %v11037_v33  ;;  %v11038_v1 = vunpack.i.l.bf16 %v11037_v33  ;;  %7055 = vmatprep.mubr.f32.mxu0 %v4698_v4  ;;  %v11044_v32 = vunpack.i.h.bf16 %v11042_v2  ;;  %v11043_v11 = vunpack.i.l.bf16 %v11042_v2  ;;  %v4724_v4 = vld [vmem:[%s15605_s1 + $0x10f0] sm:$0xff] }
 0x248   : > { %11326 = vrot.lane.b32.xlu0 %v13665_v36, %s11544_s23  ;;  %11331 = vrot.lane.b32.xlu1 %v13675_v43, %s11544_s23  ;;  %v4392_v36 = vld [vmem:[%s15605_s1 + $0x690] sm:$0xff] }
 0x249   : > { %v3909_v40 = vsel %vm3908_vm6, %v11038_v1, %v11028_v21  ;;  %v3911_v57 = vsel %vm3908_vm6, %v11039_v62, %v11033_v60  ;;  %5853 = vmatmul.mubr.f32.gmra.mrb[30].mxu1 %v4379_v27  ;;  %9104 = vmatprep.subr.bf16.mxu0 %v9103_v61  ;;  %v4710_v21 = vld [vmem:[%s15605_s1 + $0x1080] sm:$0xff]  ;;  %v3914_v9 = vsel %vm3908_vm6, %v11043_v11, %v11044_v32 }
 0x24a   : > { %v9105_v13 = vpack.c.bf16 %v3911_v57, %v3909_v40  ;;  %7056 = vmatmul.mubr.f32.gmra.mrb[78].mxu0 %v4697_v20  ;;  %v11047_v3 = vpop.permute.xlu0 %11046  ;;  %v11052_v51 = vpop.permute.xlu1 %11051  ;;  %5858 = vmatprep.mubr.f32.mxu1 %v4393_v24  ;;  %v4406_v60 = vld [vmem:[%s15605_s1 + $0x700] sm:$0xff]  ;;  %v4419_v40 = vld [vmem:[%s15605_s1 + $0x768] sm:$0xff]  ;;  %v4737_v57 = vld [vmem:[%s15605_s1 + $0x1158] sm:$0xff] }
 0x24b   : > { %v11049_v43 = vunpack.i.h.bf16 %v11047_v3  ;;  %v11048_v19 = vunpack.i.l.bf16 %v11047_v3  ;;  %v11054_v31 = vunpack.i.h.bf16 %v11052_v51  ;;  %v11053_v45 = vunpack.i.l.bf16 %v11052_v51  ;;  %7061 = vmatprep.mubr.f32.mxu0 %v4711_v42 }
 0x24c   : > { %11336 = vrot.lane.b32.xlu0 %v15677_v26, %s11544_s23  ;;  %11341 = vrot.lane.b32.xlu1 %v13704_v5, %s11544_s23  ;;  %v4405_v5 = vld [vmem:[%s15605_s1 + $0x6f8] sm:$0xff]  ;;  %v11360_v3 = vpack.i.bf16 %v15677_v26, %v13671_v23  ;;  %v4736_v23 = vld [vmem:[%s15605_s1 + $0x1150] sm:$0xff] }
 0x24d   : > { %v3915_v25 = vsel %vm3908_vm6, %v11054_v31, %v11048_v19  ;;  %v3913_v33 = vsel %vm3908_vm6, %v11053_v45, %v11043_v11  ;;  %5859 = vmatmul.mubr.f32.gmra.mrb[32].mxu1 %v4392_v36  ;;  %9106 = vmatpush1.bf16.msra.mxu0 %v9105_v13  ;;  %v3916_v2 = vsel %vm3908_vm6, %v11048_v19, %v11049_v43  ;;  %v4723_v11 = vld [vmem:[%s15605_s1 + $0x10e8] sm:$0xff]  ;;  %v4418_v31 = vld [vmem:[%s15605_s1 + $0x760] sm:$0xff]  ;;  %vm1729_vm6 = vcmask 130048  }
 0x24e   : > { %v9109_v27 = vpack.c.bf16 %v3915_v25, %v3913_v33  ;;  %7062 = vmatmul.mubr.f32.gmra.mrb[80].mxu0 %v4710_v21  ;;  %v11057_v61 = vpop.permute.xlu0 %11056  ;;  %v11062_v62 = vpop.permute.xlu1 %11061  ;;  %5864 = vmatprep.mubr.f32.mxu1 %v4406_v60  ;;  %v9107_v1 = vpack.c.bf16 %v3916_v2, %v3914_v9  ;;  %v11355_v13 = vpack.i.bf16 %v15677_v26, %v13658_v47  ;;  %v4432_v21 = vld [vmem:[%s15605_s1 + $0x7d0] sm:$0xff]  ;;  %v4750_v9 = vld [vmem:[%s15605_s1 + $0x11c0] sm:$0xff] }
 0x24f   : > { %v11059_v20 = vunpack.i.h.bf16 %v11057_v61  ;;  %v11058_v24 = vunpack.i.l.bf16 %v11057_v61  ;;  %v11064_v32 = vunpack.i.h.bf16 %v11062_v62  ;;  %v11063_v42 = vunpack.i.l.bf16 %v11062_v62  ;;  %7067 = vmatprep.mubr.f32.mxu0 %v4724_v4 }
 0x250   : > { %11346 = vrot.lane.b32.xlu0 %v13634_v8, %s11544_s23  ;;  %11351 = vrot.lane.b32.xlu1 %v15677_v26, %s11544_s23  ;;  %v11365_v25 = vpack.i.bf16 %v13668_v6, %v13661_v46  ;;  %v4431_v46 = vld [vmem:[%s15605_s1 + $0x7c8] sm:$0xff]  ;;  %s191_s23 = scalar_lea.vmem [#allocation5], %s8189_s9 }
 0x251   : > { %v3983_v51 = vsel %vm3981_vm0, %v11058_v24, %v11059_v20  ;;  %v3985_v36 = vsel %vm3981_vm0, %v11063_v42, %v11064_v32  ;;  %5865 = vmatmul.mubr.f32.gmra.mrb[34].mxu1 %v4405_v5  ;;  %9108 = vmatprep.subr.bf16.mxu0 %v9107_v1  ;;  %v4749_v32 = vld [vmem:[%s15605_s1 + $0x11b8] sm:$0xff]  ;;  %s8123_s29 = sshll.u32 %s191_s23, 4  ;;  %s15558_s29 = int_to_ptr.vmem [resolvable:$true] %s8123_s29 }
 0x252   : > { %v9111_v8 = vpack.c.bf16 %v3985_v36, %v3983_v51  ;;  %7068 = vmatmul.mubr.f32.gmra.mrb[82].mxu0 %v4723_v11  ;;  %v11067_v43 = vpop.permute.xlu0 %11066  ;;  %v11072_v19 = vpop.permute.xlu1 %11071  ;;  %5870 = vmatprep.mubr.f32.mxu1 %v4419_v40  ;;  %v4763_v11 = vld [vmem:[%s15605_s1 + $0x1228] sm:$0xff]  ;;  %v11375_v40 = vpack.i.bf16 %v15677_v26, %v13627_v22  ;;  %v4444_v22 = vld [vmem:[%s15605_s1 + $0x830] sm:$0xff]  ;;  %s11433_s10 = scalar_lea.vmem %s15558_s29, 1024 }
 0x253   : > { %9110 = vmatpush1.bf16.msra.mxu0 %v9109_v27  ;;  %v11069_v47 = vunpack.i.h.bf16 %v11067_v43  ;;  %v11068_v45 = vunpack.i.l.bf16 %v11067_v43  ;;  %7073 = vmatprep.mubr.f32.mxu0 %v4737_v57  ;;  %v11074_v60 = vunpack.i.h.bf16 %v11072_v19  ;;  %v11073_v4 = vunpack.i.l.bf16 %v11072_v19  ;;  %p11434_p11 = scmp.ne.s32.totalorder %s15558_s29, %s11433_s10 }
 0x254   : > { %11356 = vrot.lane.b32.xlu0 %v11355_v13, %s11545_s30  ;;  %11361 = vrot.lane.b32.xlu1 %v11360_v3, %s11545_s30  ;;  %v11370_v27 = vpack.i.bf16 %v15677_v26, %v13602_v14  ;;  %v4445_v14 = vld [vmem:[%s15605_s1 + $0x838] sm:$0xff]  ;;  %v11380_v19 = vpack.i.bf16 %v13630_v53, %v13700_v59  ;;  %v4776_v53 = vld [vmem:[%s15605_s1 + $0x1290] sm:$0xff] }
 0x255   : > { %v3982_v33 = vsel %vm3981_vm0, %v11068_v45, %v11058_v24  ;;  %v3984_v2 = vsel %vm3981_vm0, %v11069_v47, %v11063_v42  ;;  %5871 = vmatmul.mubr.f32.gmra.mrb[36].mxu1 %v4418_v31  ;;  %9113 = vmatprep.subr.msk.bf16.mxu0 %vm11751_vm3, %v9111_v8  ;;  %v3987_v42 = vsel %vm3981_vm0, %v11073_v4, %v11074_v60  ;;  %v4458_v60 = vld [vmem:[%s15605_s1 + $0x8a0] sm:$0xff]  ;;  %p11435_p12 = pnand %p11434_p11, %p11615_p5 }
 0x256   : > { %v9114_v61 = vpack.c.bf16 %v3984_v2, %v3982_v33  ;;  %7074 = vmatmul.mubr.f32.gmra.mrb[84].mxu0 %v4736_v23  ;;  %v11077_v62 = vpop.permute.xlu0 %11076  ;;  %v11082_v5 = vpop.permute.xlu1 %11081  ;;  %5876 = vmatprep.mubr.f32.mxu1 %v4432_v21  ;;  %v4762_v21 = vld [vmem:[%s15605_s1 + $0x1220] sm:$0xff]  ;;  %v4457_v2 = vld [vmem:[%s15605_s1 + $0x898] sm:$0xff] }
 0x257   : > { %v11079_v6 = vunpack.i.h.bf16 %v11077_v62  ;;  %v11078_v1 = vunpack.i.l.bf16 %v11077_v62  ;;  %v11084_v20 = vunpack.i.h.bf16 %v11082_v5  ;;  %v11083_v24 = vunpack.i.l.bf16 %v11082_v5  ;;  %7079 = vmatprep.mubr.f32.mxu0 %v4750_v9  ;;  %v4775_v62 = vld [vmem:[%s15605_s1 + $0x1288] sm:$0xff]  ;;  %p11436_p13 = pneg %p11435_p12 }
 0x258   : > { %11366 = vrot.lane.b32.xlu0 %v11365_v25, %s11545_s30  ;;  %9116 = vmatpush1.bf16.msk.msra.mxu0 %vm11760_vm4, %v9114_v61  ;;  %v4471_v5 = vld [vmem:[%s15605_s1 + $0x908] sm:$0xff] }
 0x259   : > { %v3989_v57 = vsel %vm3981_vm0, %v11078_v1, %v11079_v6  ;;  %v3988_v13 = vsel %vm3981_vm0, %v11084_v20, %v11078_v1  ;;  %v3986_v3 = vsel %vm3981_vm0, %v11083_v24, %v11073_v4  ;;  %5877 = vmatmul.mubr.f32.gmra.mrb[38].mxu1 %v4431_v46  ;;  %11371 = vrot.lane.b32.xlu1 %v11370_v27, %s11545_s30  ;;  %v4789_v46 = vld [vmem:[%s15605_s1 + $0x12f8] sm:$0xff]  ;;  %vm1802_vm0 = vcmask 121856  }
 0x25a   : > { %v9117_v51 = vpack.c.bf16 %v3989_v57, %v3987_v42  ;;  %v9120_v36 = vpack.c.bf16 %v3988_v13, %v3986_v3  ;;  %7080 = vmatmul.mubr.f32.gmra.mrb[86].mxu0 %v4749_v32  ;;  %v11087_v8 = vpop.permute.xlu0 %11086  ;;  %v11092_v43 = vpop.permute.xlu1 %11091  ;;  %5882 = vmatprep.mubr.f32.mxu1 %v4445_v14 }
 0x25b   : > { %v11089_v31 = vunpack.i.h.bf16 %v11087_v8  ;;  %v11088_v47 = vunpack.i.l.bf16 %v11087_v8  ;;  %v11094_v45 = vunpack.i.h.bf16 %v11092_v43  ;;  %v11093_v23 = vunpack.i.l.bf16 %v11092_v43  ;;  %7085 = vmatprep.mubr.f32.mxu0 %v4763_v11  ;;  %v4470_v11 = vld [vmem:[%s15605_s1 + $0x900] sm:$0xff] }
 0x25c   : > { %9119 = vmatprep.subr.msk.bf16.mxu0 %vm11751_vm3, %v9117_v51  ;;  %11376 = vrot.lane.b32.xlu0 %v11375_v40, %s11545_s30  ;;  %v4788_v51 = vld [vmem:[%s15605_s1 + $0x12f0] sm:$0xff]  ;;  %v4802_v8 = vld [vmem:[%s15605_s1 + $0x1360] sm:$0xff] }
 0x25d   : > { %v4064_v59 = vsel %vm4062_vm2, %v11088_v47, %v11089_v31  ;;  %v4066_v4 = vsel %vm4062_vm2, %v11093_v23, %v11094_v45  ;;  %5883 = vmatmul.mubr.f32.gmra.mrb[40].mxu1 %v4444_v22  ;;  %9122 = vmatpush1.bf16.msk.msra.mxu0 %vm11760_vm4, %v9120_v36  ;;  %v4484_v36 = vld [vmem:[%s15605_s1 + $0x970] sm:$0xff] }
 0x25e   : > { %v9123_v9 = vpack.c.bf16 %v4066_v4, %v4064_v59  ;;  %7086 = vmatmul.mubr.f32.gmra.mrb[88].mxu0 %v4762_v21  ;;  %v11097_v25 = vpop.permute.xlu0 %11096  ;;  %v11102_v33 = vpop.permute.xlu1 %11101  ;;  %5888 = vmatprep.mubr.f32.mxu1 %v4458_v60  ;;  %v4483_v60 = vld [vmem:[%s15605_s1 + $0x968] sm:$0xff] }
 0x25f   : > { %v11099_v27 = vunpack.i.h.bf16 %v11097_v25  ;;  %v11098_v61 = vunpack.i.l.bf16 %v11097_v25  ;;  %7091 = vmatprep.mubr.f32.mxu0 %v4776_v53  ;;  %11381 = vrot.lane.b32.xlu1 %v11380_v19, %s11545_s30  ;;  %v11104_v20 = vunpack.i.h.bf16 %v11102_v33  ;;  %v11103_v24 = vunpack.i.l.bf16 %v11102_v33  ;;  %v4801_v25 = vld [vmem:[%s15605_s1 + $0x1358] sm:$0xff] }
 0x260   : > { %9125 = vmatprep.subr.msk.bf16.mxu0 %vm11795_vm7, %v9123_v9  ;;  %v4497_v33 = vld [vmem:[%s15605_s1 + $0x9d8] sm:$0xff] }
 0x261   : > { %v4063_v6 = vsel %vm4062_vm2, %v11098_v61, %v11088_v47  ;;  %v4065_v1 = vsel %vm4062_vm2, %v11099_v27, %v11093_v23  ;;  %5889 = vmatmul.mubr.f32.gmra.mrb[42].mxu1 %v4457_v2  ;;  %v4068_v43 = vsel %vm4062_vm2, %v11103_v24, %v11104_v20  ;;  %v4193_v2 = vld [vmem:[%s15605_s1 + $0x58] sm:$0xff] }
 0x262   : > { %v9126_v32 = vpack.c.bf16 %v4065_v1, %v4063_v6  ;;  %7092 = vmatmul.mubr.f32.gmra.mrb[90].mxu0 %v4775_v62  ;;  %v11107_v14 = vpop.permute.xlu0 %11106  ;;  %v11112_v42 = vpop.permute.xlu1 %11111  ;;  %5894 = vmatprep.mubr.f32.mxu1 %v4471_v5  ;;  %v4496_v6 = vld [vmem:[%s15605_s1 + $0x9d0] sm:$0xff] }
 0x263   : > { %v11109_v40 = vunpack.i.h.bf16 %v11107_v14  ;;  %v11108_v57 = vunpack.i.l.bf16 %v11107_v14  ;;  %v11114_v13 = vunpack.i.h.bf16 %v11112_v42  ;;  %v11113_v3 = vunpack.i.l.bf16 %v11112_v42  ;;  %7097 = vmatprep.mubr.f32.mxu0 %v4789_v46  ;;  %v4192_v14 = vld [vmem:[%s15605_s1 + $0x50] sm:$0xff]  ;;  %v4510_v42 = vld [vmem:[%s15605_s1 + $0xa40] sm:$0xff] }
 0x264   : > { %9128 = vmatpush1.bf16.msk.msra.mxu0 %vm11810_vm9, %v9126_v32 }
 0x265   : > { %v4070_v22 = vsel %vm4062_vm2, %v11108_v57, %v11109_v40  ;;  %v4069_v19 = vsel %vm4062_vm2, %v11114_v13, %v11108_v57  ;;  %v4067_v31 = vsel %vm4062_vm2, %v11113_v3, %v11103_v24  ;;  %5895 = vmatmul.mubr.f32.gmra.mrb[44].mxu1 %v4470_v11  ;;  %v4206_v11 = vld [vmem:[%s15605_s1 + $0xc0] sm:$0xff]  ;;  %vm1883_vm2 = vcmask 113664  }
 0x266   : > { %v9129_v47 = vpack.c.bf16 %v4070_v22, %v4068_v43  ;;  %v9132_v45 = vpack.c.bf16 %v4069_v19, %v4067_v31  ;;  %7098 = vmatmul.mubr.f32.gmra.mrb[92].mxu0 %v4788_v51  ;;  %v11117_v23 = vpop.permute.xlu0 %11116  ;;  %v11122_v21 = vpop.permute.xlu1 %11121  ;;  %5900 = vmatprep.mubr.f32.mxu1 %v4484_v36 }
 0x267   : > { %v11119_v53 = vunpack.i.h.bf16 %v11117_v23  ;;  %v11118_v59 = vunpack.i.l.bf16 %v11117_v23  ;;  %v11124_v4 = vunpack.i.h.bf16 %v11122_v21  ;;  %v11123_v9 = vunpack.i.l.bf16 %v11122_v21  ;;  %7103 = vmatprep.mubr.f32.mxu0 %v4802_v8  ;;  %v4509_v8 = vld [vmem:[%s15605_s1 + $0xa38] sm:$0xff]  ;;  %v4219_v23 = vld [vmem:[%s15605_s1 + $0x128] sm:$0xff] }
 0x268   : > { %9131 = vmatprep.subr.msk.bf16.mxu0 %vm11795_vm7, %v9129_v47  ;;  %v4205_v47 = vld [vmem:[%s15605_s1 + $0xb8] sm:$0xff] }
 0x269   : > { %v1650_v27 = vsel %vm1648_vm10, %v11118_v59, %v11119_v53  ;;  %v1652_v61 = vsel %vm1648_vm10, %v11123_v9, %v11124_v4  ;;  %5901 = vmatmul.mubr.f32.gmra.mrb[46].mxu1 %v4483_v60  ;;  %9134 = vmatpush1.bf16.msk.msra.mxu0 %vm11810_vm9, %v9132_v45  ;;  %v4523_v45 = vld [vmem:[%s15605_s1 + $0xaa8] sm:$0xff] }
 0x26a   : > { %v8771_v62 = vpack.c.bf16 %v1652_v61, %v1650_v27  ;;  %7104 = vmatmul.mubr.f32.gmra.mrb[94].mxu0 %v4801_v25  ;;  %v11127_v5 = vpop.permute.xlu0 %11126  ;;  %v11132_v46 = vpop.permute.xlu1 %11131  ;;  %5906 = vmatprep.mubr.f32.mxu1 %v4497_v33  ;;  %v4522_v33 = vld [vmem:[%s15605_s1 + $0xaa0] sm:$0xff] }
 0x26b   : > { %v11129_v1 = vunpack.i.h.bf16 %v11127_v5  ;;  %v11128_v20 = vunpack.i.l.bf16 %v11127_v5  ;;  %v11134_v24 = vunpack.i.h.bf16 %v11132_v46  ;;  %v11133_v32 = vunpack.i.l.bf16 %v11132_v46  ;;  %7174 = vmatprep.mubr.f32.mxu0 %v4193_v2  ;;  %v4218_v5 = vld [vmem:[%s15605_s1 + $0x120] sm:$0xff]  ;;  %v4536_v46 = vld [vmem:[%s15605_s1 + $0xb10] sm:$0xff] }
 0x26c   : > { %8773 = vmatprep.subr.msk.bf16.mxu1 %vm12041_vm8, %v8771_v62 }
 0x26d   : > { %v1649_v40 = vsel %vm1648_vm10, %v11128_v20, %v11118_v59  ;;  %v1651_v57 = vsel %vm1648_vm10, %v11129_v1, %v11123_v9  ;;  %5907 = vmatmul.mubr.f32.gmra.mrb[48].mxu1 %v4496_v6  ;;  %v1654_v3 = vsel %vm1648_vm10, %v11133_v32, %v11134_v24  ;;  %v4232_v6 = vld [vmem:[%s15605_s1 + $0x190] sm:$0xff] }
 0x26e   : > { %v8774_v13 = vpack.c.bf16 %v1651_v57, %v1649_v40  ;;  %7175 = vmatmul.mubr.f32.vlgmr.msra.gmra.mrb[0].mxu0 %v4192_v14  ;;  %v11137_v51 = vpop.permute.xlu0 %11136  ;;  %v11142_v36 = vpop.permute.xlu1 %11141  ;;  %5912 = vmatprep.mubr.f32.mxu1 %v4510_v42  ;;  %v4535_v14 = vld [vmem:[%s15605_s1 + $0xb08] sm:$0xff] }
 0x26f   : > { %v11139_v43 = vunpack.i.h.bf16 %v11137_v51  ;;  %v11138_v22 = vunpack.i.l.bf16 %v11137_v51  ;;  %v11144_v19 = vunpack.i.h.bf16 %v11142_v36  ;;  %v11143_v31 = vunpack.i.l.bf16 %v11142_v36  ;;  %7180 = vmatprep.mubr.f32.mxu0 %v4206_v11  ;;  %v4549_v51 = vld [vmem:[%s15605_s1 + $0xb78] sm:$0xff] }
 0x270   : > { %8776 = vmatpush1.bf16.msk.msra.mxu1 %vm12058_vm13, %v8774_v13  ;;  %v4245_v36 = vld [vmem:[%s15605_s1 + $0x1f8] sm:$0xff] }
 0x271   : > { %v1656_v21 = vsel %vm1648_vm10, %v11138_v22, %v11139_v43  ;;  %v1655_v60 = vsel %vm1648_vm10, %v11144_v19, %v11138_v22  ;;  %v1653_v53 = vsel %vm1648_vm10, %v11143_v31, %v11133_v32  ;;  %5913 = vmatmul.mubr.f32.gmra.mrb[50].mxu1 %v4509_v8  ;;  %vm1964_vm10 = vcmask 105472  }
 0x272   : > { %v8777_v59 = vpack.c.bf16 %v1656_v21, %v1654_v3  ;;  %v8780_v4 = vpack.c.bf16 %v1655_v60, %v1653_v53  ;;  %7181 = vmatmul.mubr.f32.gmra.mrb[2].mxu0 %v4205_v47  ;;  %v11147_v9 = vpop.permute.xlu0 %11146  ;;  %v11152_v25 = vpop.permute.xlu1 %11151  ;;  %5918 = vmatprep.mubr.f32.mxu1 %v4523_v45  ;;  %v4231_v3 = vld [vmem:[%s15605_s1 + $0x188] sm:$0xff]  ;;  %v4548_v47 = vld [vmem:[%s15605_s1 + $0xb70] sm:$0xff] }
 0x273   : > { %v11149_v2 = vunpack.i.h.bf16 %v11147_v9  ;;  %v11148_v27 = vunpack.i.l.bf16 %v11147_v9  ;;  %v11154_v61 = vunpack.i.h.bf16 %v11152_v25  ;;  %v11153_v62 = vunpack.i.l.bf16 %v11152_v25  ;;  %7186 = vmatprep.mubr.f32.mxu0 %v4219_v23  ;;  %v4258_v9 = vld [vmem:[%s15605_s1 + $0x260] sm:$0xff] }
 0x274   : > { %8779 = vmatprep.subr.msk.bf16.mxu1 %vm12041_vm8, %v8777_v59  ;;  %v4244_v59 = vld [vmem:[%s15605_s1 + $0x1f0] sm:$0xff] }
 0x275   : > { %5919 = vmatmul.mubr.f32.gmra.mrb[52].mxu1 %v4522_v33  ;;  %v1731_v1 = vsel %vm1729_vm6, %v11148_v27, %v11149_v2  ;;  %v1733_v20 = vsel %vm1729_vm6, %v11153_v62, %v11154_v61 }
 0x276   : > { %7187 = vmatmul.mubr.f32.gmra.mrb[4].mxu0 %v4218_v5  ;;  %8782 = vmatpush1.bf16.msk.msra.mxu1 %vm12058_vm13, %v8780_v4  ;;  %v11157_v24 = vpop.permute.xlu0 %11156  ;;  %v11162_v32 = vpop.permute.xlu1 %11161  ;;  %v8783_v42 = vpack.c.bf16 %v1733_v20, %v1731_v1  ;;  %v4562_v4 = vld [vmem:[%s15605_s1 + $0xbe0] sm:$0xff]  ;;  %v4561_v5 = vld [vmem:[%s15605_s1 + $0xbd8] sm:$0xff] }
 0x277   : > { %v11159_v11 = vunpack.i.h.bf16 %v11157_v24  ;;  %v11158_v40 = vunpack.i.l.bf16 %v11157_v24  ;;  %v11164_v57 = vunpack.i.h.bf16 %v11162_v32  ;;  %v11163_v13 = vunpack.i.l.bf16 %v11162_v32  ;;  %5924 = vmatprep.mubr.f32.mxu1 %v4536_v46  ;;  %7192 = vmatprep.mubr.f32.mxu0 %v4232_v6  ;;  %v4257_v32 = vld [vmem:[%s15605_s1 + $0x258] sm:$0xff] }
 0x278   : > { %8784 = vmatprep.subr.bf16.mxu1 %v8783_v42  ;;  %v4271_v42 = vld [vmem:[%s15605_s1 + $0x2c8] sm:$0xff] }
 0x279   : > { %v1730_v8 = vsel %vm1729_vm6, %v11158_v40, %v11148_v27  ;;  %v1732_v43 = vsel %vm1729_vm6, %v11159_v11, %v11153_v62  ;;  %5925 = vmatmul.mubr.f32.gmra.mrb[54].mxu1 %v4535_v14  ;;  %v1735_v45 = vsel %vm1729_vm6, %v11163_v13, %v11164_v57  ;;  %v4575_v14 = vld [vmem:[%s15605_s1 + $0xc48] sm:$0xff] }
 0x27a   : > { %v8785_v22 = vpack.c.bf16 %v1732_v43, %v1730_v8  ;;  %7193 = vmatmul.mubr.f32.gmra.mrb[6].mxu0 %v4231_v3  ;;  %v11167_v19 = vpop.permute.xlu0 %11166  ;;  %v11172_v31 = vpop.permute.xlu1 %11171  ;;  %5930 = vmatprep.mubr.f32.mxu1 %v4549_v51  ;;  %v4574_v51 = vld [vmem:[%s15605_s1 + $0xc40] sm:$0xff] }
 0x27b   : > { %v11169_v23 = vunpack.i.h.bf16 %v11167_v19  ;;  %v11168_v21 = vunpack.i.l.bf16 %v11167_v19  ;;  %v11174_v60 = vunpack.i.h.bf16 %v11172_v31  ;;  %v11173_v53 = vunpack.i.l.bf16 %v11172_v31  ;;  %7198 = vmatprep.mubr.f32.mxu0 %v4245_v36  ;;  %v4270_v19 = vld [vmem:[%s15605_s1 + $0x2c0] sm:$0xff]  ;;  %v4588_v31 = vld [vmem:[%s15605_s1 + $0xcb0] sm:$0xff] }
 0x27c   : > { %8786 = vmatpush1.bf16.msra.mxu1 %v8785_v22 }
 0x27d   : > { %v1736_v25 = vsel %vm1729_vm6, %v11174_v60, %v11168_v21  ;;  %v1734_v33 = vsel %vm1729_vm6, %v11173_v53, %v11163_v13  ;;  %5931 = vmatmul.mubr.f32.gmra.mrb[56].mxu1 %v4548_v47  ;;  %v1737_v2 = vsel %vm1729_vm6, %v11168_v21, %v11169_v23  ;;  %v4284_v47 = vld [vmem:[%s15605_s1 + $0x330] sm:$0xff]  ;;  %vm2045_vm6 = vcmask 23552  }
 0x27e   : > { %v8789_v27 = vpack.c.bf16 %v1736_v25, %v1734_v33  ;;  %7199 = vmatmul.mubr.f32.gmra.mrb[8].mxu0 %v4244_v59  ;;  %v11177_v61 = vpop.permute.xlu0 %11176  ;;  %v11182_v62 = vpop.permute.xlu1 %11181  ;;  %5936 = vmatprep.mubr.f32.mxu1 %v4562_v4  ;;  %v8787_v46 = vpack.c.bf16 %v1737_v2, %v1735_v45  ;;  %v4587_v4 = vld [vmem:[%s15605_s1 + $0xca8] sm:$0xff] }
 0x27f   : > { %v11179_v6 = vunpack.i.h.bf16 %v11177_v61  ;;  %v11178_v1 = vunpack.i.l.bf16 %v11177_v61  ;;  %v11184_v20 = vunpack.i.h.bf16 %v11182_v62  ;;  %v11183_v24 = vunpack.i.l.bf16 %v11182_v62  ;;  %7204 = vmatprep.mubr.f32.mxu0 %v4258_v9  ;;  %v4601_v61 = vld [vmem:[%s15605_s1 + $0xd18] sm:$0xff] }
 0x280   : > { %8788 = vmatprep.subr.bf16.mxu1 %v8787_v46  ;;  %v4297_v62 = vld [vmem:[%s15605_s1 + $0x398] sm:$0xff] }
 0x281   : > { %v1804_v11 = vsel %vm1802_vm0, %v11178_v1, %v11179_v6  ;;  %v1806_v40 = vsel %vm1802_vm0, %v11183_v24, %v11184_v20  ;;  %5937 = vmatmul.mubr.f32.gmra.mrb[58].mxu1 %v4561_v5 }
 0x282   : > { %v8791_v57 = vpack.c.bf16 %v1806_v40, %v1804_v11  ;;  %7205 = vmatmul.mubr.f32.gmra.mrb[10].mxu0 %v4257_v32  ;;  %8790 = vmatpush1.bf16.msra.mxu1 %v8789_v27  ;;  %v11187_v13 = vpop.permute.xlu0 %11186  ;;  %v11192_v3 = vpop.permute.xlu1 %11191  ;;  %v4283_v27 = vld [vmem:[%s15605_s1 + $0x328] sm:$0xff] }
 0x283   : > { %v11189_v36 = vunpack.i.h.bf16 %v11187_v13  ;;  %v11188_v8 = vunpack.i.l.bf16 %v11187_v13  ;;  %v11194_v43 = vunpack.i.h.bf16 %v11192_v3  ;;  %v11193_v22 = vunpack.i.l.bf16 %v11192_v3  ;;  %5942 = vmatprep.mubr.f32.mxu1 %v4575_v14  ;;  %7210 = vmatprep.mubr.f32.mxu0 %v4271_v42  ;;  %v4600_v14 = vld [vmem:[%s15605_s1 + $0xd10] sm:$0xff]  ;;  %v4614_v3 = vld [vmem:[%s15605_s1 + $0xd80] sm:$0xff] }
 0x284   : > { %8793 = vmatprep.subr.msk.bf16.mxu1 %vm11751_vm3, %v8791_v57  ;;  %v4296_v13 = vld [vmem:[%s15605_s1 + $0x390] sm:$0xff] }
 0x285   : > { %v1803_v45 = vsel %vm1802_vm0, %v11188_v8, %v11178_v1  ;;  %v1805_v23 = vsel %vm1802_vm0, %v11189_v36, %v11183_v24  ;;  %5943 = vmatmul.mubr.f32.gmra.mrb[60].mxu1 %v4574_v51  ;;  %v1808_v60 = vsel %vm1802_vm0, %v11193_v22, %v11194_v43  ;;  %v4310_v51 = vld [vmem:[%s15605_s1 + $0x400] sm:$0xff] }
 0x286   : > { %v8794_v21 = vpack.c.bf16 %v1805_v23, %v1803_v45  ;;  %7211 = vmatmul.mubr.f32.gmra.mrb[12].mxu0 %v4270_v19  ;;  %v11197_v53 = vpop.permute.xlu0 %11196  ;;  %v11202_v59 = vpop.permute.xlu1 %11201  ;;  %5948 = vmatprep.mubr.f32.mxu1 %v4588_v31  ;;  %v4613_v31 = vld [vmem:[%s15605_s1 + $0xd78] sm:$0xff] }
 0x287   : > { %v11199_v9 = vunpack.i.h.bf16 %v11197_v53  ;;  %v11198_v25 = vunpack.i.l.bf16 %v11197_v53  ;;  %v11204_v33 = vunpack.i.h.bf16 %v11202_v59  ;;  %v11203_v2 = vunpack.i.l.bf16 %v11202_v59  ;;  %7216 = vmatprep.mubr.f32.mxu0 %v4284_v47  ;;  %v4627_v53 = vld [vmem:[%s15605_s1 + $0xde8] sm:$0xff] }
 0x288   : > { %8796 = vmatpush1.bf16.msk.msra.mxu1 %vm11760_vm4, %v8794_v21  ;;  %v4323_v59 = vld [vmem:[%s15605_s1 + $0x468] sm:$0xff] }
 0x289   : > { %v1810_v5 = vsel %vm1802_vm0, %v11198_v25, %v11199_v9  ;;  %v1809_v46 = vsel %vm1802_vm0, %v11204_v33, %v11198_v25  ;;  %v1807_v6 = vsel %vm1802_vm0, %v11203_v2, %v11193_v22  ;;  %5949 = vmatmul.mubr.f32.gmra.mrb[62].mxu1 %v4587_v4  ;;  %vm2126_vm0 = vcmask 15360  }
 0x28a   : > { %v8797_v1 = vpack.c.bf16 %v1810_v5, %v1808_v60  ;;  %v8800_v20 = vpack.c.bf16 %v1809_v46, %v1807_v6  ;;  %7217 = vmatmul.mubr.f32.gmra.mrb[14].mxu0 %v4283_v27  ;;  %v11207_v24 = vpop.permute.xlu0 %11206  ;;  %v11212_v32 = vpop.permute.xlu1 %11211  ;;  %5954 = vmatprep.mubr.f32.mxu1 %v4601_v61  ;;  %v4309_v60 = vld [vmem:[%s15605_s1 + $0x3f8] sm:$0xff]  ;;  %v4626_v61 = vld [vmem:[%s15605_s1 + $0xde0] sm:$0xff] }
 0x28b   : > { %v11209_v42 = vunpack.i.h.bf16 %v11207_v24  ;;  %v11208_v11 = vunpack.i.l.bf16 %v11207_v24  ;;  %v11214_v40 = vunpack.i.h.bf16 %v11212_v32  ;;  %v11213_v57 = vunpack.i.l.bf16 %v11212_v32  ;;  %7222 = vmatprep.mubr.f32.mxu0 %v4297_v62  ;;  %v4336_v24 = vld [vmem:[%s15605_s1 + $0x4d0] sm:$0xff] }
 0x28c   : > { %8799 = vmatprep.subr.msk.bf16.mxu1 %vm11751_vm3, %v8797_v1  ;;  %v4322_v1 = vld [vmem:[%s15605_s1 + $0x460] sm:$0xff] }
 0x28d   : > { %v1885_v36 = vsel %vm1883_vm2, %v11208_v11, %v11209_v42  ;;  %v1887_v8 = vsel %vm1883_vm2, %v11213_v57, %v11214_v40  ;;  %5955 = vmatmul.mubr.f32.gmra.mrb[64].mxu1 %v4600_v14 }
 0x28e   : > { %v8803_v43 = vpack.c.bf16 %v1887_v8, %v1885_v36  ;;  %7223 = vmatmul.mubr.f32.gmra.mrb[16].mxu0 %v4296_v13  ;;  %8802 = vmatpush1.bf16.msk.msra.mxu1 %vm11760_vm4, %v8800_v20  ;;  %v11217_v22 = vpop.permute.xlu0 %11216  ;;  %v11222_v19 = vpop.permute.xlu1 %11221  ;;  %v4640_v20 = vld [vmem:[%s15605_s1 + $0xe50] sm:$0xff] }
 0x28f   : > { %v11219_v47 = vunpack.i.h.bf16 %v11217_v22  ;;  %v11218_v45 = vunpack.i.l.bf16 %v11217_v22  ;;  %v11224_v23 = vunpack.i.h.bf16 %v11222_v19  ;;  %v11223_v21 = vunpack.i.l.bf16 %v11222_v19  ;;  %5960 = vmatprep.mubr.f32.mxu1 %v4614_v3  ;;  %7228 = vmatprep.mubr.f32.mxu0 %v4310_v51  ;;  %v4639_v3 = vld [vmem:[%s15605_s1 + $0xe48] sm:$0xff]  ;;  %v4653_v19 = vld [vmem:[%s15605_s1 + $0xeb8] sm:$0xff] }
 0x290   : > { %8805 = vmatprep.subr.msk.bf16.mxu1 %vm11795_vm7, %v8803_v43  ;;  %v4335_v22 = vld [vmem:[%s15605_s1 + $0x4c8] sm:$0xff] }
 0x291   : > { %v1884_v4 = vsel %vm1883_vm2, %v11218_v45, %v11208_v11  ;;  %v1886_v9 = vsel %vm1883_vm2, %v11219_v47, %v11213_v57  ;;  %5961 = vmatmul.mubr.f32.gmra.mrb[66].mxu1 %v4613_v31  ;;  %v1889_v33 = vsel %vm1883_vm2, %v11223_v21, %v11224_v23  ;;  %v4349_v31 = vld [vmem:[%s15605_s1 + $0x538] sm:$0xff] }
 0x292   : > { %v8806_v25 = vpack.c.bf16 %v1886_v9, %v1884_v4  ;;  %7229 = vmatmul.mubr.f32.gmra.mrb[18].mxu0 %v4309_v60  ;;  %v11227_v2 = vpop.permute.xlu0 %11226  ;;  %v11232_v27 = vpop.permute.xlu1 %11231  ;;  %5966 = vmatprep.mubr.f32.mxu1 %v4627_v53  ;;  %v4652_v53 = vld [vmem:[%s15605_s1 + $0xeb0] sm:$0xff] }
 0x293   : > { %v11229_v62 = vunpack.i.h.bf16 %v11227_v2  ;;  %v11228_v5 = vunpack.i.l.bf16 %v11227_v2  ;;  %v11234_v46 = vunpack.i.h.bf16 %v11232_v27  ;;  %v11233_v6 = vunpack.i.l.bf16 %v11232_v27  ;;  %7234 = vmatprep.mubr.f32.mxu0 %v4323_v59  ;;  %v4666_v2 = vld [vmem:[%s15605_s1 + $0xf20] sm:$0xff] }
 0x294   : > { %8808 = vmatpush1.bf16.msk.msra.mxu1 %vm11810_vm9, %v8806_v25  ;;  %v4362_v27 = vld [vmem:[%s15605_s1 + $0x5a0] sm:$0xff] }
 0x295   : > { %v1891_v32 = vsel %vm1883_vm2, %v11228_v5, %v11229_v62  ;;  %v1890_v14 = vsel %vm1883_vm2, %v11234_v46, %v11228_v5  ;;  %v1888_v42 = vsel %vm1883_vm2, %v11233_v6, %v11223_v21  ;;  %5967 = vmatmul.mubr.f32.gmra.mrb[68].mxu1 %v4626_v61  ;;  %vm2207_vm2 = vcmask 7168  }
 0x296   : > { %v8809_v11 = vpack.c.bf16 %v1891_v32, %v1889_v33  ;;  %v8812_v40 = vpack.c.bf16 %v1890_v14, %v1888_v42  ;;  %7235 = vmatmul.mubr.f32.gmra.mrb[20].mxu0 %v4322_v1  ;;  %v11237_v57 = vpop.permute.xlu0 %11236  ;;  %v11242_v13 = vpop.permute.xlu1 %11241  ;;  %5972 = vmatprep.mubr.f32.mxu1 %v4640_v20  ;;  %v4348_v33 = vld [vmem:[%s15605_s1 + $0x530] sm:$0xff]  ;;  %v4665_v20 = vld [vmem:[%s15605_s1 + $0xf18] sm:$0xff] }
 0x297   : > { %v11239_v51 = vunpack.i.h.bf16 %v11237_v57  ;;  %v11238_v36 = vunpack.i.l.bf16 %v11237_v57  ;;  %v11244_v8 = vunpack.i.h.bf16 %v11242_v13  ;;  %v11243_v43 = vunpack.i.l.bf16 %v11242_v13  ;;  %7240 = vmatprep.mubr.f32.mxu0 %v4336_v24  ;;  %v4375_v57 = vld [vmem:[%s15605_s1 + $0x608] sm:$0xff] }
 0x298   : > { %8811 = vmatprep.subr.msk.bf16.mxu1 %vm11795_vm7, %v8809_v11  ;;  %v4361_v11 = vld [vmem:[%s15605_s1 + $0x598] sm:$0xff] }
 0x299   : > { %v1966_v47 = vsel %vm1964_vm10, %v11238_v36, %v11239_v51  ;;  %v1968_v45 = vsel %vm1964_vm10, %v11243_v43, %v11244_v8  ;;  %5973 = vmatmul.mubr.f32.gmra.mrb[70].mxu1 %v4639_v3 }
 0x29a   : > { %v8815_v23 = vpack.c.bf16 %v1968_v45, %v1966_v47  ;;  %7241 = vmatmul.mubr.f32.gmra.mrb[22].mxu0 %v4335_v22  ;;  %8814 = vmatpush1.bf16.msk.msra.mxu1 %vm11810_vm9, %v8812_v40  ;;  %v11247_v21 = vpop.permute.xlu0 %11246  ;;  %v11252_v60 = vpop.permute.xlu1 %11251  ;;  %v4679_v40 = vld [vmem:[%s15605_s1 + $0xf88] sm:$0xff] }
 0x29b   : > { %v11249_v59 = vunpack.i.h.bf16 %v11247_v21  ;;  %v11248_v4 = vunpack.i.l.bf16 %v11247_v21  ;;  %v11254_v9 = vunpack.i.h.bf16 %v11252_v60  ;;  %v11253_v25 = vunpack.i.l.bf16 %v11252_v60  ;;  %5978 = vmatprep.mubr.f32.mxu1 %v4653_v19  ;;  %7246 = vmatprep.mubr.f32.mxu0 %v4349_v31  ;;  %v4678_v19 = vld [vmem:[%s15605_s1 + $0xf80] sm:$0xff]  ;;  %v4692_v60 = vld [vmem:[%s15605_s1 + $0xff0] sm:$0xff] }
 0x29c   : > { %8817 = vmatprep.subr.msk.bf16.mxu1 %vm11845_vm12, %v8815_v23  ;;  %v4374_v21 = vld [vmem:[%s15605_s1 + $0x600] sm:$0xff] }
 0x29d   : > { %v1965_v61 = vsel %vm1964_vm10, %v11248_v4, %v11238_v36  ;;  %v1967_v62 = vsel %vm1964_vm10, %v11249_v59, %v11243_v43  ;;  %5979 = vmatmul.mubr.f32.gmra.mrb[72].mxu1 %v4652_v53  ;;  %v1970_v46 = vsel %vm1964_vm10, %v11253_v25, %v11254_v9  ;;  %v4388_v53 = vld [vmem:[%s15605_s1 + $0x670] sm:$0xff] }
 0x29e   : > { %v8818_v5 = vpack.c.bf16 %v1967_v62, %v1965_v61  ;;  %7247 = vmatmul.mubr.f32.gmra.mrb[24].mxu0 %v4348_v33  ;;  %v11257_v6 = vpop.permute.xlu0 %11256  ;;  %v11262_v1 = vpop.permute.xlu1 %11261  ;;  %5984 = vmatprep.mubr.f32.mxu1 %v4666_v2  ;;  %v4691_v2 = vld [vmem:[%s15605_s1 + $0xfe8] sm:$0xff] }
 0x29f   : > { %v11259_v24 = vunpack.i.h.bf16 %v11257_v6  ;;  %v11258_v32 = vunpack.i.l.bf16 %v11257_v6  ;;  %v11264_v14 = vunpack.i.h.bf16 %v11262_v1  ;;  %v11263_v42 = vunpack.i.l.bf16 %v11262_v1  ;;  %7252 = vmatprep.mubr.f32.mxu0 %v4362_v27  ;;  %v4705_v6 = vld [vmem:[%s15605_s1 + $0x1058] sm:$0xff] }
 0x2a0   : > { %8820 = vmatpush1.bf16.msk.msra.mxu1 %vm11860_vm14, %v8818_v5  ;;  %v4401_v1 = vld [vmem:[%s15605_s1 + $0x6d8] sm:$0xff] }
 0x2a1   : > { %v1972_v13 = vsel %vm1964_vm10, %v11258_v32, %v11259_v24  ;;  %v1971_v3 = vsel %vm1964_vm10, %v11264_v14, %v11258_v32  ;;  %v1969_v51 = vsel %vm1964_vm10, %v11263_v42, %v11253_v25  ;;  %5985 = vmatmul.mubr.f32.gmra.mrb[74].mxu1 %v4665_v20  ;;  %vm4143_vm10 = vcmask 629760  }
 0x2a2   : > { %v8821_v36 = vpack.c.bf16 %v1972_v13, %v1970_v46  ;;  %v8824_v8 = vpack.c.bf16 %v1971_v3, %v1969_v51  ;;  %7253 = vmatmul.mubr.f32.gmra.mrb[26].mxu0 %v4361_v11  ;;  %v11267_v43 = vpop.permute.xlu0 %11266  ;;  %v11272_v22 = vpop.permute.xlu1 %11271  ;;  %5990 = vmatprep.mubr.f32.mxu1 %v4679_v40  ;;  %v4387_v46 = vld [vmem:[%s15605_s1 + $0x668] sm:$0xff]  ;;  %v4704_v40 = vld [vmem:[%s15605_s1 + $0x1050] sm:$0xff] }
 0x2a3   : > { %v11269_v31 = vunpack.i.h.bf16 %v11267_v43  ;;  %v11268_v47 = vunpack.i.l.bf16 %v11267_v43  ;;  %v11274_v45 = vunpack.i.h.bf16 %v11272_v22  ;;  %v11273_v23 = vunpack.i.l.bf16 %v11272_v22  ;;  %7258 = vmatprep.mubr.f32.mxu0 %v4375_v57  ;;  %v4414_v43 = vld [vmem:[%s15605_s1 + $0x740] sm:$0xff] }
 0x2a4   : > { %8823 = vmatprep.subr.msk.bf16.mxu1 %vm11845_vm12, %v8821_v36  ;;  %v4400_v36 = vld [vmem:[%s15605_s1 + $0x6d0] sm:$0xff] }
 0x2a5   : > { %v2047_v59 = vsel %vm2045_vm6, %v11268_v47, %v11269_v31  ;;  %v2049_v4 = vsel %vm2045_vm6, %v11273_v23, %v11274_v45  ;;  %5991 = vmatmul.mubr.f32.gmra.mrb[76].mxu1 %v4678_v19 }
 0x2a6   : > { %v8827_v9 = vpack.c.bf16 %v2049_v4, %v2047_v59  ;;  %7259 = vmatmul.mubr.f32.gmra.mrb[28].mxu0 %v4374_v21  ;;  %8826 = vmatpush1.bf16.msk.msra.mxu1 %vm11860_vm14, %v8824_v8  ;;  %v11277_v25 = vpop.permute.xlu0 %11276  ;;  %v11282_v33 = vpop.permute.xlu1 %11281  ;;  %v4718_v8 = vld [vmem:[%s15605_s1 + $0x10c0] sm:$0xff] }
 0x2a7   : > { %v11279_v27 = vunpack.i.h.bf16 %v11277_v25  ;;  %v11278_v61 = vunpack.i.l.bf16 %v11277_v25  ;;  %v11284_v62 = vunpack.i.h.bf16 %v11282_v33  ;;  %v11283_v5 = vunpack.i.l.bf16 %v11282_v33  ;;  %5996 = vmatprep.mubr.f32.mxu1 %v4692_v60  ;;  %7264 = vmatprep.mubr.f32.mxu0 %v4388_v53  ;;  %v4717_v60 = vld [vmem:[%s15605_s1 + $0x10b8] sm:$0xff]  ;;  %v4731_v33 = vld [vmem:[%s15605_s1 + $0x1128] sm:$0xff] }
 0x2a8   : > { %8829 = vmatprep.subr.msk.bf16.mxu1 %vm11900_vm1, %v8827_v9  ;;  %v4413_v25 = vld [vmem:[%s15605_s1 + $0x738] sm:$0xff] }
 0x2a9   : > { %v2046_v20 = vsel %vm2045_vm6, %v11278_v61, %v11268_v47  ;;  %v2048_v24 = vsel %vm2045_vm6, %v11279_v27, %v11273_v23  ;;  %5997 = vmatmul.mubr.f32.gmra.mrb[78].mxu1 %v4691_v2  ;;  %v2051_v14 = vsel %vm2045_vm6, %v11283_v5, %v11284_v62  ;;  %v4427_v2 = vld [vmem:[%s15605_s1 + $0x7a8] sm:$0xff] }
 0x2aa   : > { %v8830_v32 = vpack.c.bf16 %v2048_v24, %v2046_v20  ;;  %7265 = vmatmul.mubr.f32.gmra.mrb[30].mxu0 %v4387_v46  ;;  %v11287_v42 = vpop.permute.xlu0 %11286  ;;  %v11292_v11 = vpop.permute.xlu1 %11291  ;;  %6002 = vmatprep.mubr.f32.mxu1 %v4705_v6  ;;  %v4730_v6 = vld [vmem:[%s15605_s1 + $0x1120] sm:$0xff] }
 0x2ab   : > { %v11289_v57 = vunpack.i.h.bf16 %v11287_v42  ;;  %v11288_v13 = vunpack.i.l.bf16 %v11287_v42  ;;  %v11294_v3 = vunpack.i.h.bf16 %v11292_v11  ;;  %v11293_v51 = vunpack.i.l.bf16 %v11292_v11  ;;  %7270 = vmatprep.mubr.f32.mxu0 %v4401_v1  ;;  %v4744_v42 = vld [vmem:[%s15605_s1 + $0x1190] sm:$0xff] }
 0x2ac   : > { %8832 = vmatpush1.bf16.msk.msra.mxu1 %vm11915_vm5, %v8830_v32  ;;  %v4440_v11 = vld [vmem:[%s15605_s1 + $0x810] sm:$0xff] }
 0x2ad   : > { %v2053_v22 = vsel %vm2045_vm6, %v11288_v13, %v11289_v57  ;;  %v2052_v19 = vsel %vm2045_vm6, %v11294_v3, %v11288_v13  ;;  %v2050_v31 = vsel %vm2045_vm6, %v11293_v51, %v11283_v5  ;;  %6003 = vmatmul.mubr.f32.gmra.mrb[80].mxu1 %v4704_v40 }
 0x2ae   : > { %v8833_v47 = vpack.c.bf16 %v2053_v22, %v2051_v14  ;;  %v8836_v45 = vpack.c.bf16 %v2052_v19, %v2050_v31  ;;  %7271 = vmatmul.mubr.f32.gmra.mrb[32].mxu0 %v4400_v36  ;;  %v11297_v23 = vpop.permute.xlu0 %11296  ;;  %v11302_v21 = vpop.permute.xlu1 %11301  ;;  %6008 = vmatprep.mubr.f32.mxu1 %v4718_v8  ;;  %v4426_v14 = vld [vmem:[%s15605_s1 + $0x7a0] sm:$0xff]  ;;  %v4743_v8 = vld [vmem:[%s15605_s1 + $0x1188] sm:$0xff] }
 0x2af   : > { %v11299_v53 = vunpack.i.h.bf16 %v11297_v23  ;;  %v11298_v59 = vunpack.i.l.bf16 %v11297_v23  ;;  %v11304_v4 = vunpack.i.h.bf16 %v11302_v21  ;;  %v11303_v9 = vunpack.i.l.bf16 %v11302_v21  ;;  %7276 = vmatprep.mubr.f32.mxu0 %v4414_v43  ;;  %v4453_v23 = vld [vmem:[%s15605_s1 + $0x878] sm:$0xff] }
 0x2b0   : > { %8835 = vmatprep.subr.msk.bf16.mxu1 %vm11900_vm1, %v8833_v47  ;;  %v4439_v47 = vld [vmem:[%s15605_s1 + $0x808] sm:$0xff] }
 0x2b1   : > { %v2128_v27 = vsel %vm2126_vm0, %v11298_v59, %v11299_v53  ;;  %v2130_v61 = vsel %vm2126_vm0, %v11303_v9, %v11304_v4  ;;  %6009 = vmatmul.mubr.f32.gmra.mrb[82].mxu1 %v4717_v60 }
 0x2b2   : > { %v8839_v62 = vpack.c.bf16 %v2130_v61, %v2128_v27  ;;  %7277 = vmatmul.mubr.f32.gmra.mrb[34].mxu0 %v4413_v25  ;;  %8838 = vmatpush1.bf16.msk.msra.mxu1 %vm11915_vm5, %v8836_v45  ;;  %v11307_v5 = vpop.permute.xlu0 %11306  ;;  %v11312_v46 = vpop.permute.xlu1 %11311  ;;  %v4757_v45 = vld [vmem:[%s15605_s1 + $0x11f8] sm:$0xff] }
 0x2b3   : > { %v11309_v1 = vunpack.i.h.bf16 %v11307_v5  ;;  %v11308_v20 = vunpack.i.l.bf16 %v11307_v5  ;;  %v11314_v24 = vunpack.i.h.bf16 %v11312_v46  ;;  %v11313_v32 = vunpack.i.l.bf16 %v11312_v46  ;;  %6014 = vmatprep.mubr.f32.mxu1 %v4731_v33  ;;  %7282 = vmatprep.mubr.f32.mxu0 %v4427_v2  ;;  %v4756_v33 = vld [vmem:[%s15605_s1 + $0x11f0] sm:$0xff]  ;;  %v4770_v46 = vld [vmem:[%s15605_s1 + $0x1260] sm:$0xff] }
 0x2b4   : > { %8841 = vmatprep.subr.msk.bf16.mxu1 %vm11958_vm11, %v8839_v62  ;;  %v4452_v5 = vld [vmem:[%s15605_s1 + $0x870] sm:$0xff] }
 0x2b5   : > { %v2127_v40 = vsel %vm2126_vm0, %v11308_v20, %v11298_v59  ;;  %v2129_v57 = vsel %vm2126_vm0, %v11309_v1, %v11303_v9  ;;  %6015 = vmatmul.mubr.f32.gmra.mrb[84].mxu1 %v4730_v6  ;;  %v2132_v3 = vsel %vm2126_vm0, %v11313_v32, %v11314_v24  ;;  %v4466_v6 = vld [vmem:[%s15605_s1 + $0x8e0] sm:$0xff] }
 0x2b6   : > { %v8842_v13 = vpack.c.bf16 %v2129_v57, %v2127_v40  ;;  %7283 = vmatmul.mubr.f32.gmra.mrb[36].mxu0 %v4426_v14  ;;  %v11317_v51 = vpop.permute.xlu0 %11316  ;;  %v11322_v36 = vpop.permute.xlu1 %11321  ;;  %6020 = vmatprep.mubr.f32.mxu1 %v4744_v42  ;;  %v4769_v42 = vld [vmem:[%s15605_s1 + $0x1258] sm:$0xff] }
 0x2b7   : > { %v11319_v43 = vunpack.i.h.bf16 %v11317_v51  ;;  %v11318_v22 = vunpack.i.l.bf16 %v11317_v51  ;;  %v11324_v19 = vunpack.i.h.bf16 %v11322_v36  ;;  %v11323_v31 = vunpack.i.l.bf16 %v11322_v36  ;;  %7288 = vmatprep.mubr.f32.mxu0 %v4440_v11  ;;  %v4783_v51 = vld [vmem:[%s15605_s1 + $0x12c8] sm:$0xff] }
 0x2b8   : > { %8844 = vmatpush1.bf16.msk.msra.mxu1 %vm11980_vm15, %v8842_v13  ;;  %v4479_v36 = vld [vmem:[%s15605_s1 + $0x948] sm:$0xff] }
 0x2b9   : > { %v2134_v21 = vsel %vm2126_vm0, %v11318_v22, %v11319_v43  ;;  %v2133_v60 = vsel %vm2126_vm0, %v11324_v19, %v11318_v22  ;;  %v2131_v53 = vsel %vm2126_vm0, %v11323_v31, %v11313_v32  ;;  %6021 = vmatmul.mubr.f32.gmra.mrb[86].mxu1 %v4743_v8 }
 0x2ba   : > { %v8845_v59 = vpack.c.bf16 %v2134_v21, %v2132_v3  ;;  %v8848_v4 = vpack.c.bf16 %v2133_v60, %v2131_v53  ;;  %7289 = vmatmul.mubr.f32.gmra.mrb[38].mxu0 %v4439_v47  ;;  %v11327_v9 = vpop.permute.xlu0 %11326  ;;  %v11332_v25 = vpop.permute.xlu1 %11331  ;;  %6026 = vmatprep.mubr.f32.mxu1 %v4757_v45  ;;  %v4465_v3 = vld [vmem:[%s15605_s1 + $0x8d8] sm:$0xff]  ;;  %v4782_v45 = vld [vmem:[%s15605_s1 + $0x12c0] sm:$0xff] }
 0x2bb   : > { %v11329_v2 = vunpack.i.h.bf16 %v11327_v9  ;;  %v11328_v27 = vunpack.i.l.bf16 %v11327_v9  ;;  %v11334_v61 = vunpack.i.h.bf16 %v11332_v25  ;;  %v11333_v62 = vunpack.i.l.bf16 %v11332_v25  ;;  %7294 = vmatprep.mubr.f32.mxu0 %v4453_v23  ;;  %v4492_v9 = vld [vmem:[%s15605_s1 + $0x9b0] sm:$0xff] }
 0x2bc   : > { %8847 = vmatprep.subr.msk.bf16.mxu1 %vm11958_vm11, %v8845_v59  ;;  %v4478_v59 = vld [vmem:[%s15605_s1 + $0x940] sm:$0xff] }
 0x2bd   : > { %v2209_v1 = vsel %vm2207_vm2, %v11328_v27, %v11329_v2  ;;  %v2211_v20 = vsel %vm2207_vm2, %v11333_v62, %v11334_v61  ;;  %6027 = vmatmul.mubr.f32.gmra.mrb[88].mxu1 %v4756_v33 }
 0x2be   : > { %v8851_v24 = vpack.c.bf16 %v2211_v20, %v2209_v1  ;;  %7295 = vmatmul.mubr.f32.gmra.mrb[40].mxu0 %v4452_v5  ;;  %8850 = vmatpush1.bf16.msk.msra.mxu1 %vm11980_vm15, %v8848_v4  ;;  %v11337_v32 = vpop.permute.xlu0 %11336  ;;  %v11342_v14 = vpop.permute.xlu1 %11341  ;;  %v4796_v4 = vld [vmem:[%s15605_s1 + $0x1330] sm:$0xff] }
 0x2bf   : > { %v11339_v11 = vunpack.i.h.bf16 %v11337_v32  ;;  %v11338_v40 = vunpack.i.l.bf16 %v11337_v32  ;;  %v11344_v57 = vunpack.i.h.bf16 %v11342_v14  ;;  %v11343_v13 = vunpack.i.l.bf16 %v11342_v14  ;;  %6032 = vmatprep.mubr.f32.mxu1 %v4770_v46  ;;  %7300 = vmatprep.mubr.f32.mxu0 %v4466_v6  ;;  %v4795_v46 = vld [vmem:[%s15605_s1 + $0x1328] sm:$0xff] }
 0x2c0   : > { %8853 = vmatprep.subr.msk.bf16.mxu1 %vm12041_vm8, %v8851_v24  ;;  %v4491_v32 = vld [vmem:[%s15605_s1 + $0x9a8] sm:$0xff] }
 0x2c1   : > { %v2208_v8 = vsel %vm2207_vm2, %v11338_v40, %v11328_v27  ;;  %v2210_v43 = vsel %vm2207_vm2, %v11339_v11, %v11333_v62  ;;  %6033 = vmatmul.mubr.f32.gmra.mrb[90].mxu1 %v4769_v42  ;;  %v2213_v19 = vsel %vm2207_vm2, %v11343_v13, %v11344_v57  ;;  %v4187_v14 = vld [vmem:[%s15605_s1 + $0x28] sm:$0xff]  ;;  %v4505_v42 = vld [vmem:[%s15605_s1 + $0xa18] sm:$0xff] }
 0x2c2   : > { %v8854_v22 = vpack.c.bf16 %v2210_v43, %v2208_v8  ;;  %7301 = vmatmul.mubr.f32.gmra.mrb[42].mxu0 %v4465_v3  ;;  %v11347_v31 = vpop.permute.xlu0 %11346  ;;  %v11352_v47 = vpop.permute.xlu1 %11351  ;;  %6038 = vmatprep.mubr.f32.mxu1 %v4783_v51  ;;  %v4186_v3 = vld [vmem:[%s15605_s1 + $0x20] sm:$0xff]  ;;  %v4504_v8 = vld [vmem:[%s15605_s1 + $0xa10] sm:$0xff] }
 0x2c3   : > { %v11349_v23 = vunpack.i.h.bf16 %v11347_v31  ;;  %v11348_v21 = vunpack.i.l.bf16 %v11347_v31  ;;  %v11354_v60 = vunpack.i.h.bf16 %v11352_v47  ;;  %v11353_v53 = vunpack.i.l.bf16 %v11352_v47  ;;  %7306 = vmatprep.mubr.f32.mxu0 %v4479_v36 }
 0x2c4   : > { %8856 = vmatpush1.bf16.msk.msra.mxu1 %vm12058_vm13, %v8854_v22  ;;  %v4200_v22 = vld [vmem:[%s15605_s1 + $0x90] sm:$0xff] }
 0x2c5   : > { %v2215_v25 = vsel %vm2207_vm2, %v11348_v21, %v11349_v23  ;;  %v2214_v33 = vsel %vm2207_vm2, %v11354_v60, %v11348_v21  ;;  %v2212_v2 = vsel %vm2207_vm2, %v11353_v53, %v11343_v13  ;;  %6039 = vmatmul.mubr.f32.gmra.mrb[92].mxu1 %v4782_v45  ;;  %v4517_v53 = vld [vmem:[%s15605_s1 + $0xa78] sm:$0xff] }
 0x2c6   : > { %v8857_v27 = vpack.c.bf16 %v2215_v25, %v2213_v19  ;;  %v8860_v61 = vpack.c.bf16 %v2214_v33, %v2212_v2  ;;  %7307 = vmatmul.mubr.f32.gmra.mrb[44].mxu0 %v4478_v59  ;;  %v11357_v62 = vpop.permute.xlu0 %11356  ;;  %v11362_v5 = vpop.permute.xlu1 %11361  ;;  %6044 = vmatprep.mubr.f32.mxu1 %v4796_v4  ;;  %v4518_v19 = vld [vmem:[%s15605_s1 + $0xa80] sm:$0xff]  ;;  %v4531_v25 = vld [vmem:[%s15605_s1 + $0xae8] sm:$0xff] }
 0x2c7   : > { %v11359_v6 = vunpack.i.h.bf16 %v11357_v62  ;;  %v11358_v1 = vunpack.i.l.bf16 %v11357_v62  ;;  %v11364_v20 = vunpack.i.h.bf16 %v11362_v5  ;;  %v11363_v24 = vunpack.i.l.bf16 %v11362_v5  ;;  %7312 = vmatprep.mubr.f32.mxu0 %v4492_v9 }
 0x2c8   : > { %8859 = vmatprep.subr.msk.bf16.mxu1 %vm12041_vm8, %v8857_v27  ;;  %v15678_v5 = vlaneseq }
 0x2c9   : > { %v4145_v11 = vsel %vm4143_vm10, %v11358_v1, %v11359_v6  ;;  %v4147_v40 = vsel %vm4143_vm10, %v11363_v24, %v11364_v20  ;;  %6045 = vmatmul.mubr.f32.gmra.mrb[94].mxu1 %v4795_v46  ;;  %v4530_v6 = vld [vmem:[%s15605_s1 + $0xae0] sm:$0xff] }
 0x2ca   : > { %v9135_v57 = vpack.c.bf16 %v4147_v40, %v4145_v11  ;;  %7313 = vmatmul.mubr.f32.gmra.mrb[46].mxu0 %v4491_v32  ;;  %8862 = vmatpush1.bf16.msk.msra.mxu1 %vm12058_vm13, %v8860_v61  ;;  %v11367_v13 = vpop.permute.xlu0 %11366  ;;  %v14508_v46 = vshrl.u32 %v15678_v5, 7  ;;  %v4225_v32 = vld [vmem:[%s15605_s1 + $0x158] sm:$0xff]  ;;  %v4556_v11 = vld [vmem:[%s15605_s1 + $0xbb0] sm:$0xff] }
 0x2cb   : > { %v11369_v51 = vunpack.i.h.bf16 %v11367_v13  ;;  %v11368_v36 = vunpack.i.l.bf16 %v11367_v13  ;;  %6115 = vmatprep.mubr.f32.mxu1 %v4187_v14  ;;  %7318 = vmatprep.mubr.f32.mxu0 %v4505_v42  ;;  %v11372_v43 = vpop.permute.xlu1 %11371  ;;  %v4543_v14 = vld [vmem:[%s15605_s1 + $0xb48] sm:$0xff]  ;;  %v4557_v42 = vld [vmem:[%s15605_s1 + $0xbb8] sm:$0xff]  ;;  %v4252_v40 = vld [vmem:[%s15605_s1 + $0x230] sm:$0xff] }
 0x2cc   : > { %9243 = vmatprep.subr.bf16.mxu1 %v11664_v15  ;;  %9137 = vmatprep.subr.msk.bf16.mxu0 %vm11845_vm12, %v9135_v57  ;;  %v11374_v31 = vunpack.i.h.bf16 %v11372_v43  ;;  %v11373_v47 = vunpack.i.l.bf16 %v11372_v43  ;;  %v4199_v15 = vld [vmem:[%s15605_s1 + $0x88] sm:$0xff]  ;;  %15679 = vst [vmem:[#allocation25_spill] sm:$0xff] %v14508_v46  ;;  %vm4178_vm6 = vcmp.eq.s32.totalorder %v14508_v46, 0  ;;  %v4265_v57 = vld [vmem:[%s15605_s1 + $0x298] sm:$0xff]  ;;  %v4278_v13 = vld [vmem:[%s15605_s1 + $0x300] sm:$0xff] }
 0x2cd   : > { %v4144_v45 = vsel %vm4143_vm10, %v11368_v36, %v11358_v1  ;;  %v4146_v23 = vsel %vm4143_vm10, %v11369_v51, %v11363_v24  ;;  %6116 = vmatmul.mubr.f32.vlgmr.msra.gmra.mrb[0].mxu1 %v4186_v3  ;;  %v4291_v3 = vld [vmem:[%s15605_s1 + $0x368] sm:$0xff]  ;;  %v15680_v51 = vld [vmem:[#allocation8_spill] sm:$0xff]  ;;  %v4608_v36 = vld [vmem:[%s15605_s1 + $0xd50] sm:$0xff] }
 0x2ce   : > { %v9138_v21 = vpack.c.bf16 %v4146_v23, %v4144_v45  ;;  %7319 = vmatmul.mubr.f32.gmra.mrb[48].mxu0 %v4504_v8  ;;  %9259 = vmatpush1.bf16.msra.mxu1 %v11666_v16  ;;  %v11377_v60 = vpop.permute.xlu0 %11376  ;;  %v4149_v59 = vsel %vm4143_vm10, %v11373_v47, %v11374_v31  ;;  %v4213_v16 = vld [vmem:[%s15605_s1 + $0xf8] sm:$0xff]  ;;  %v4304_v8 = vld [vmem:[%s15605_s1 + $0x3d0] sm:$0xff]  ;;  %v4635_v45 = vld [vmem:[%s15605_s1 + $0xe28] sm:$0xff] }
 0x2cf   : > { %6121 = vmatprep.mubr.f32.mxu1 %v4200_v22  ;;  %7324 = vmatprep.mubr.f32.mxu0 %v4518_v19  ;;  %v11379_v4 = vunpack.i.h.bf16 %v11377_v60  ;;  %v11378_v9 = vunpack.i.l.bf16 %v11377_v60  ;;  %v15682_v43 = vld [vmem:[#allocation10_spill] sm:$0xff]  ;;  %v4303_v22 = vld [vmem:[%s15605_s1 + $0x3c8] sm:$0xff]  ;;  %v15683_v19 = vld [vmem:[#allocation11_spill] sm:$0xff] }
 0x2d0   : > { %9244 = vmatprep.subr.bf16.mxu1 %v11668_v17  ;;  %9140 = vmatpush1.bf16.msk.msra.mxu0 %vm11860_vm14, %v9138_v21  ;;  %v4212_v17 = vld [vmem:[%s15605_s1 + $0xf0] sm:$0xff]  ;;  %v4621_v31 = vld [vmem:[%s15605_s1 + $0xdb8] sm:$0xff]  ;;  %v15684_v23 = vld [vmem:[#allocation12_spill] sm:$0xff] }
 0x2d1   : > { %6122 = vmatmul.mubr.f32.gmra.mrb[2].mxu1 %v4199_v15  ;;  %v4151_v33 = vsel %vm4143_vm10, %v11378_v9, %v11379_v4  ;;  %v11382_v2 = vpop.permute.xlu1 %11381  ;;  %v15685_v21 = vld [vmem:[#allocation13_spill] sm:$0xff]  ;;  %v4634_v15 = vld [vmem:[%s15605_s1 + $0xe20] sm:$0xff]  ;;  %v15687_v4 = vld [vmem:[#allocation15_spill] sm:$0xff] }
 0x2d2   : > { %7325 = vmatmul.mubr.f32.gmra.mrb[50].mxu0 %v4517_v53  ;;  %9260 = vmatpush1.bf16.msra.mxu1 %v11672_v18  ;;  %v9141_v27 = vpack.c.bf16 %v4151_v33, %v4149_v59  ;;  %v11384_v61 = vunpack.i.h.bf16 %v11382_v2  ;;  %v11383_v62 = vunpack.i.l.bf16 %v11382_v2  ;;  %v4226_v18 = vld [vmem:[%s15605_s1 + $0x160] sm:$0xff]  ;;  %v15686_v53 = vld [vmem:[#allocation14_spill] sm:$0xff]  ;;  %v4329_v59 = vld [vmem:[%s15605_s1 + $0x498] sm:$0xff] }
 0x2d3   : > { %9245 = vmatprep.subr.msk.bf16.mxu1 %vm11751_vm3, %v11755_v49  ;;  %6127 = vmatprep.mubr.f32.mxu1 %v4213_v16  ;;  %v4544_v49 = vld [vmem:[%s15605_s1 + $0xb50] sm:$0xff]  ;;  %v4330_v60 = vld [vmem:[%s15605_s1 + $0x4a0] sm:$0xff]  ;;  %v4343_v16 = vld [vmem:[%s15605_s1 + $0x508] sm:$0xff] }
 0x2d4   : > { %7330 = vmatprep.mubr.f32.mxu0 %v4531_v25  ;;  %v4150_v1 = vsel %vm4143_vm10, %v11384_v61, %v11378_v9  ;;  %v4148_v20 = vsel %vm4143_vm10, %v11383_v62, %v11373_v47  ;;  %9143 = vmatprep.subr.msk.bf16.mxu0 %vm11845_vm12, %v9141_v27  ;;  %v4317_v47 = vld [vmem:[%s15605_s1 + $0x438] sm:$0xff]  ;;  %v4647_v9 = vld [vmem:[%s15605_s1 + $0xe88] sm:$0xff]  ;;  %v15688_v33 = vld [vmem:[#allocation16_spill] sm:$0xff] }
 0x2d5   : > { %6128 = vmatmul.mubr.f32.gmra.mrb[4].mxu1 %v4212_v17  ;;  %v9144_v24 = vpack.c.bf16 %v4150_v1, %v4148_v20  ;;  %v4661_v25 = vld [vmem:[%s15605_s1 + $0xef8] sm:$0xff]  ;;  %v15689_v2 = vld [vmem:[#allocation17_spill] sm:$0xff]  ;;  %v4660_v17 = vld [vmem:[%s15605_s1 + $0xef0] sm:$0xff] }
 0x2d6   : > { %7331 = vmatmul.mubr.f32.gmra.mrb[52].mxu0 %v4530_v6  ;;  %9261 = vmatpush1.bf16.msk.msra.mxu1 %vm11760_vm4, %v11757_v50  ;;  %v4239_v50 = vld [vmem:[%s15605_s1 + $0x1c8] sm:$0xff]  ;;  %v4356_v27 = vld [vmem:[%s15605_s1 + $0x570] sm:$0xff]  ;;  %v15691_v5 = vld [vmem:[#allocation19_spill] sm:$0xff] }
 0x2d7   : > { %9246 = vmatprep.subr.msk.bf16.mxu1 %vm11751_vm3, %v11778_v63  ;;  %6133 = vmatprep.mubr.f32.mxu1 %v4226_v18  ;;  %v4238_v63 = vld [vmem:[%s15605_s1 + $0x1c0] sm:$0xff]  ;;  %v15690_v61 = vld [vmem:[#allocation18_spill] sm:$0xff]  ;;  %v4355_v62 = vld [vmem:[%s15605_s1 + $0x568] sm:$0xff]  ;;  %vm5200_vm3 = vcmask 326656  }
 0x2d8   : > { %7336 = vmatprep.mubr.f32.mxu0 %v4544_v49  ;;  %9146 = vmatpush1.bf16.msk.msra.mxu0 %vm11860_vm14, %v9144_v24  ;;  %v4673_v6 = vld [vmem:[%s15605_s1 + $0xf58] sm:$0xff]  ;;  %v4687_v1 = vld [vmem:[%s15605_s1 + $0xfc8] sm:$0xff]  ;;  %v15692_v20 = vld [vmem:[#allocation20_spill] sm:$0xff] }
 0x2d9   : > { %6134 = vmatmul.mubr.f32.gmra.mrb[6].mxu1 %v4225_v32  ;;  %8585 = vmatprep.subr.msk.mxu0 %vm4178_vm6, %v11546_v48  ;;  %v4369_v18 = vld [vmem:[%s15605_s1 + $0x5d8] sm:$0xff]  ;;  %v15693_v49 = vld [vmem:[#allocation21_spill] sm:$0xff]  ;;  %v4686_v24 = vld [vmem:[%s15605_s1 + $0xfc0] sm:$0xff] }
 0x2da   : > { %7337 = vmatmul.mubr.f32.gmra.mrb[54].mxu0 %v4543_v14  ;;  %9262 = vmatpush1.bf16.msk.msra.mxu1 %vm11760_vm4, %v11780_v0  ;;  %v4251_v0 = vld [vmem:[%s15605_s1 + $0x228] sm:$0xff]  ;;  %v4382_v32 = vld [vmem:[%s15605_s1 + $0x640] sm:$0xff]  ;;  %v15694_v14 = vld [vmem:[#allocation22_spill] sm:$0xff] }
 0x2db   : > { %9247 = vmatprep.subr.msk.bf16.mxu1 %vm11795_vm7, %v11799_v29  ;;  %6139 = vmatprep.mubr.f32.mxu1 %v4239_v50  ;;  %v4569_v29 = vld [vmem:[%s15605_s1 + $0xc18] sm:$0xff] }
 0x2dc   : > { %7342 = vmatprep.mubr.f32.mxu0 %v4557_v42  ;;  %8586 = vmatpush1.msk.msra.mxu0 %vm4178_vm6, %v11546_v48  ;;  %v4381_v50 = vld [vmem:[%s15605_s1 + $0x638] sm:$0xff]  ;;  %v4699_v48 = vld [vmem:[%s15605_s1 + $0x1028] sm:$0xff] }
 0x2dd   : > { %6140 = vmatmul.mubr.f32.gmra.mrb[8].mxu1 %v4238_v63  ;;  %v15695_v42 = vld [vmem:[#allocation23_spill] sm:$0xff]  ;;  %v4395_v63 = vld [vmem:[%s15605_s1 + $0x6a8] sm:$0xff] }
 0x2de   : > { %7343 = vmatmul.mubr.f32.gmra.mrb[56].mxu0 %v4556_v11  ;;  %9263 = vmatpush1.bf16.msk.msra.mxu1 %vm11810_vm9, %v11814_v39  ;;  %v4583_v39 = vld [vmem:[%s15605_s1 + $0xc88] sm:$0xff]  ;;  %v4713_v11 = vld [vmem:[%s15605_s1 + $0x1098] sm:$0xff] }
 0x2df   : > { %9248 = vmatprep.subr.msk.bf16.mxu1 %vm11795_vm7, %v11828_v54  ;;  %6145 = vmatprep.mubr.f32.mxu1 %v4252_v40  ;;  %v4582_v54 = vld [vmem:[%s15605_s1 + $0xc80] sm:$0xff] }
 0x2e0   : > { %7348 = vmatprep.mubr.f32.mxu0 %v4570_v56  ;;  %v15696_v40 = vld [vmem:[#allocation24_spill] sm:$0xff] }
 0x2e1   : > { %6146 = vmatmul.mubr.f32.gmra.mrb[10].mxu1 %v4251_v0  ;;  %v4394_v56 = vld [vmem:[%s15605_s1 + $0x6a0] sm:$0xff]  ;;  %v4712_v0 = vld [vmem:[%s15605_s1 + $0x1090] sm:$0xff] }
 0x2e2   : > { %7349 = vmatmul.mubr.f32.gmra.mrb[58].mxu0 %v4569_v29  ;;  %9264 = vmatpush1.bf16.msk.msra.mxu1 %vm11810_vm9, %v11830_v55  ;;  %v4277_v55 = vld [vmem:[%s15605_s1 + $0x2f8] sm:$0xff]  ;;  %v4408_v29 = vld [vmem:[%s15605_s1 + $0x710] sm:$0xff] }
 0x2e3   : > { %9249 = vmatprep.subr.msk.bf16.mxu1 %vm11845_vm12, %v11849_v10  ;;  %6151 = vmatprep.mubr.f32.mxu1 %v4265_v57  ;;  %v4595_v10 = vld [vmem:[%s15605_s1 + $0xce8] sm:$0xff]  ;;  %v4726_v57 = vld [vmem:[%s15605_s1 + $0x1100] sm:$0xff] }
 0x2e4   : > { %7354 = vmatprep.mubr.f32.mxu0 %v4583_v39  ;;  %v4407_v39 = vld [vmem:[%s15605_s1 + $0x708] sm:$0xff] }
 0x2e5   : > { %6152 = vmatmul.mubr.f32.gmra.mrb[12].mxu1 %v4264_v28  ;;  %v4725_v28 = vld [vmem:[%s15605_s1 + $0x10f8] sm:$0xff] }
 0x2e6   : > { %7355 = vmatmul.mubr.f32.gmra.mrb[60].mxu0 %v4582_v54  ;;  %9265 = vmatpush1.bf16.msk.msra.mxu1 %vm11860_vm14, %v11864_v35  ;;  %v4609_v35 = vld [vmem:[%s15605_s1 + $0xd58] sm:$0xff] }
 0x2e7   : > { %9250 = vmatprep.subr.msk.bf16.mxu1 %vm11845_vm12, %v11878_v52  ;;  %6157 = vmatprep.mubr.f32.mxu1 %v4278_v13  ;;  %v15681_v52 = vld [vmem:[#allocation9_spill] sm:$0xff]  ;;  %v4421_v54 = vld [vmem:[%s15605_s1 + $0x778] sm:$0xff] }
 0x2e8   : > { %7360 = vmatprep.mubr.f32.mxu0 %v4596_v38  ;;  %v4739_v13 = vld [vmem:[%s15605_s1 + $0x1168] sm:$0xff]  ;;  %v4420_v38 = vld [vmem:[%s15605_s1 + $0x770] sm:$0xff] }
 0x2e9   : > { %6158 = vmatmul.mubr.f32.gmra.mrb[14].mxu1 %v4277_v55  ;;  %v4738_v55 = vld [vmem:[%s15605_s1 + $0x1160] sm:$0xff] }
 0x2ea   : > { %7361 = vmatmul.mubr.f32.gmra.mrb[62].mxu0 %v4595_v10  ;;  %9266 = vmatpush1.bf16.msk.msra.mxu1 %vm11860_vm14, %v15680_v51  ;;  %v4434_v10 = vld [vmem:[%s15605_s1 + $0x7e0] sm:$0xff]  ;;  %v4751_v51 = vld [vmem:[%s15605_s1 + $0x11c8] sm:$0xff] }
 0x2eb   : > { %9251 = vmatprep.subr.msk.bf16.mxu1 %vm11900_vm1, %v15681_v52  ;;  %6163 = vmatprep.mubr.f32.mxu1 %v4291_v3  ;;  %v4752_v3 = vld [vmem:[%s15605_s1 + $0x11d0] sm:$0xff]  ;;  %v4765_v52 = vld [vmem:[%s15605_s1 + $0x1238] sm:$0xff] }
 0x2ec   : > { %7366 = vmatprep.mubr.f32.mxu0 %v4609_v35  ;;  %v4433_v35 = vld [vmem:[%s15605_s1 + $0x7d8] sm:$0xff] }
 0x2ed   : > { %6164 = vmatmul.mubr.f32.gmra.mrb[16].mxu1 %v4290_v7  ;;  %v4447_v7 = vld [vmem:[%s15605_s1 + $0x848] sm:$0xff] }
 0x2ee   : > { %7367 = vmatmul.mubr.f32.gmra.mrb[64].mxu0 %v4608_v36  ;;  %9267 = vmatpush1.bf16.msk.msra.mxu1 %vm11915_vm5, %v15682_v43  ;;  %v4446_v36 = vld [vmem:[%s15605_s1 + $0x840] sm:$0xff] }
 0x2ef   : > { %9252 = vmatprep.subr.msk.bf16.mxu1 %vm11900_vm1, %v15683_v19  ;;  %6169 = vmatprep.mubr.f32.mxu1 %v4304_v8  ;;  %v4764_v8 = vld [vmem:[%s15605_s1 + $0x1230] sm:$0xff]  ;;  %v4778_v43 = vld [vmem:[%s15605_s1 + $0x12a0] sm:$0xff]  ;;  %v4777_v19 = vld [vmem:[%s15605_s1 + $0x1298] sm:$0xff] }
 0x2f0   : > { %7372 = vmatprep.mubr.f32.mxu0 %v4622_v34  ;;  %v4460_v34 = vld [vmem:[%s15605_s1 + $0x8b0] sm:$0xff] }
 0x2f1   : > { %6170 = vmatmul.mubr.f32.gmra.mrb[18].mxu1 %v4303_v22  ;;  %v4459_v22 = vld [vmem:[%s15605_s1 + $0x8a8] sm:$0xff] }
 0x2f2   : > { %7373 = vmatmul.mubr.f32.gmra.mrb[66].mxu0 %v4621_v31  ;;  %9268 = vmatpush1.bf16.msk.msra.mxu1 %vm11915_vm5, %v15684_v23  ;;  %v4473_v31 = vld [vmem:[%s15605_s1 + $0x918] sm:$0xff]  ;;  %v4790_v23 = vld [vmem:[%s15605_s1 + $0x1300] sm:$0xff] }
 0x2f3   : > { %9253 = vmatprep.subr.msk.bf16.mxu1 %vm11958_vm11, %v15685_v21  ;;  %6175 = vmatprep.mubr.f32.mxu1 %v4317_v47  ;;  %v4791_v47 = vld [vmem:[%s15605_s1 + $0x1308] sm:$0xff]  ;;  %v4804_v21 = vld [vmem:[%s15605_s1 + $0x1370] sm:$0xff] }
 0x2f4   : > { %7378 = vmatprep.mubr.f32.mxu0 %v4635_v45  ;;  %v4472_v45 = vld [vmem:[%s15605_s1 + $0x910] sm:$0xff] }
 0x2f5   : > { %6176 = vmatmul.mubr.f32.gmra.mrb[20].mxu1 %v4316_v12  ;;  %v4486_v12 = vld [vmem:[%s15605_s1 + $0x980] sm:$0xff] }
 0x2f6   : > { %7379 = vmatmul.mubr.f32.gmra.mrb[68].mxu0 %v4634_v15  ;;  %9269 = vmatpush1.bf16.msk.msra.mxu1 %vm11980_vm15, %v15686_v53  ;;  %v4485_v15 = vld [vmem:[%s15605_s1 + $0x978] sm:$0xff]  ;;  %v4498_v53 = vld [vmem:[%s15605_s1 + $0x9e0] sm:$0xff] }
 0x2f7   : > { %9254 = vmatprep.subr.msk.bf16.mxu1 %vm11958_vm11, %v15687_v4  ;;  %6181 = vmatprep.mubr.f32.mxu1 %v4330_v60  ;;  %v4803_v60 = vld [vmem:[%s15605_s1 + $0x1368] sm:$0xff]  ;;  %v4512_v4 = vld [vmem:[%s15605_s1 + $0xa50] sm:$0xff] }
 0x2f8   : > { %7384 = vmatprep.mubr.f32.mxu0 %v4648_v41  ;;  %v4499_v41 = vld [vmem:[%s15605_s1 + $0x9e8] sm:$0xff] }
 0x2f9   : > { %6182 = vmatmul.mubr.f32.gmra.mrb[22].mxu1 %v4329_v59  ;;  %v4194_v59 = vld [vmem:[%s15605_s1 + $0x60] sm:$0xff] }
 0x2fa   : > { %7385 = vmatmul.mubr.f32.gmra.mrb[70].mxu0 %v4647_v9  ;;  %9270 = vmatpush1.bf16.msk.msra.mxu1 %vm11980_vm15, %v15688_v33  ;;  %v4511_v9 = vld [vmem:[%s15605_s1 + $0xa48] sm:$0xff]  ;;  %v4524_v33 = vld [vmem:[%s15605_s1 + $0xab0] sm:$0xff] }
 0x2fb   : > { %9255 = vmatprep.subr.msk.bf16.mxu1 %vm12041_vm8, %v15689_v2  ;;  %6187 = vmatprep.mubr.f32.mxu1 %v4343_v16  ;;  %v4207_v16 = vld [vmem:[%s15605_s1 + $0xc8] sm:$0xff]  ;;  %v4538_v2 = vld [vmem:[%s15605_s1 + $0xb20] sm:$0xff] }
 0x2fc   : > { %7390 = vmatprep.mubr.f32.mxu0 %v4661_v25  ;;  %v4525_v25 = vld [vmem:[%s15605_s1 + $0xab8] sm:$0xff] }
 0x2fd   : > { %6188 = vmatmul.mubr.f32.gmra.mrb[24].mxu1 %v4342_v58  ;;  %v4220_v58 = vld [vmem:[%s15605_s1 + $0x130] sm:$0xff] }
 0x2fe   : > { %7391 = vmatmul.mubr.f32.gmra.mrb[72].mxu0 %v4660_v17  ;;  %9271 = vmatpush1.bf16.msk.msra.mxu1 %vm12058_vm13, %v15690_v61  ;;  %v4537_v17 = vld [vmem:[%s15605_s1 + $0xb18] sm:$0xff]  ;;  %v4550_v61 = vld [vmem:[%s15605_s1 + $0xb80] sm:$0xff] }
 0x2ff   : > { %9256 = vmatprep.subr.msk.bf16.mxu1 %vm12041_vm8, %v15691_v5  ;;  %6193 = vmatprep.mubr.f32.mxu1 %v4356_v27  ;;  %v4233_v27 = vld [vmem:[%s15605_s1 + $0x198] sm:$0xff]  ;;  %v4564_v5 = vld [vmem:[%s15605_s1 + $0xbf0] sm:$0xff] }
 0x300   : > { %7396 = vmatprep.mubr.f32.mxu0 %v4674_v44  ;;  %v4551_v44 = vld [vmem:[%s15605_s1 + $0xb88] sm:$0xff] }
 0x301   : > { %6194 = vmatmul.mubr.f32.gmra.mrb[26].mxu1 %v4355_v62  ;;  %v4246_v62 = vld [vmem:[%s15605_s1 + $0x200] sm:$0xff] }
 0x302   : > { %7397 = vmatmul.mubr.f32.gmra.mrb[74].mxu0 %v4673_v6  ;;  %9272 = vmatpush1.bf16.msk.msra.mxu1 %vm12058_vm13, %v15692_v20  ;;  %v4563_v6 = vld [vmem:[%s15605_s1 + $0xbe8] sm:$0xff]  ;;  %v4576_v20 = vld [vmem:[%s15605_s1 + $0xc50] sm:$0xff] }
 0x303   : > { %9257 = vmatprep.subr.bf16.mxu1 %v15693_v49  ;;  %6199 = vmatprep.mubr.f32.mxu1 %v4369_v18  ;;  %v4259_v18 = vld [vmem:[%s15605_s1 + $0x268] sm:$0xff]  ;;  %v4590_v49 = vld [vmem:[%s15605_s1 + $0xcc0] sm:$0xff] }
 0x304   : > { %7402 = vmatprep.mubr.f32.mxu0 %v4687_v1  ;;  %v4577_v1 = vld [vmem:[%s15605_s1 + $0xc58] sm:$0xff] }
 0x305   : > { %6200 = vmatmul.mubr.f32.gmra.mrb[28].mxu1 %v4368_v37  ;;  %v4272_v37 = vld [vmem:[%s15605_s1 + $0x2d0] sm:$0xff] }
 0x306   : > { %7403 = vmatmul.mubr.f32.gmra.mrb[76].mxu0 %v4686_v24  ;;  %9273 = vmatpush1.bf16.msra.mxu1 %v15694_v14  ;;  %v4589_v24 = vld [vmem:[%s15605_s1 + $0xcb8] sm:$0xff]  ;;  %v4602_v14 = vld [vmem:[%s15605_s1 + $0xd20] sm:$0xff] }
 0x307   : > { %9258 = vmatprep.subr.bf16.mxu1 %v15695_v42  ;;  %6205 = vmatprep.mubr.f32.mxu1 %v4382_v32  ;;  %v4285_v32 = vld [vmem:[%s15605_s1 + $0x338] sm:$0xff]  ;;  %v4616_v42 = vld [vmem:[%s15605_s1 + $0xd90] sm:$0xff] }
 0x308   : > { %7408 = vmatprep.mubr.f32.mxu0 %v4700_v30  ;;  %v4603_v30 = vld [vmem:[%s15605_s1 + $0xd28] sm:$0xff] }
 0x309   : > { %6206 = vmatmul.mubr.f32.gmra.mrb[30].mxu1 %v4381_v50  ;;  %v4298_v50 = vld [vmem:[%s15605_s1 + $0x3a0] sm:$0xff] }
 0x30a   : > { %7409 = vmatmul.mubr.f32.gmra.mrb[78].mxu0 %v4699_v48  ;;  %9274 = vmatpush1.bf16.msra.mxu1 %v15696_v40  ;;  %v4615_v48 = vld [vmem:[%s15605_s1 + $0xd88] sm:$0xff]  ;;  %v4628_v40 = vld [vmem:[%s15605_s1 + $0xdf0] sm:$0xff] }
 0x30b   : > { %6211 = vmatprep.mubr.f32.mxu1 %v4395_v63  ;;  %7414 = vmatprep.mubr.f32.mxu0 %v4713_v11  ;;  %v4311_v63 = vld [vmem:[%s15605_s1 + $0x408] sm:$0xff]  ;;  %v4629_v11 = vld [vmem:[%s15605_s1 + $0xdf8] sm:$0xff] }
 0x30d   : > { %6212 = vmatmul.mubr.f32.gmra.mrb[32].mxu1 %v4394_v56  ;;  %v4324_v56 = vld [vmem:[%s15605_s1 + $0x470] sm:$0xff] }
 0x30e   : > { %7415 = vmatmul.mubr.f32.gmra.mrb[80].mxu0 %v4712_v0  ;;  %6217 = vmatprep.mubr.f32.mxu1 %v4408_v29  ;;  %v4642_v0 = vld [vmem:[%s15605_s1 + $0xe60] sm:$0xff]  ;;  %v4641_v29 = vld [vmem:[%s15605_s1 + $0xe58] sm:$0xff] }
 0x30f   : > { %7420 = vmatprep.mubr.f32.mxu0 %v4726_v57  ;;  %v4337_v57 = vld [vmem:[%s15605_s1 + $0x4d8] sm:$0xff] }
 0x311   : > { %6218 = vmatmul.mubr.f32.gmra.mrb[34].mxu1 %v4407_v39  ;;  %v4655_v39 = vld [vmem:[%s15605_s1 + $0xec8] sm:$0xff] }
 0x312   : > { %7421 = vmatmul.mubr.f32.gmra.mrb[82].mxu0 %v4725_v28  ;;  %6223 = vmatprep.mubr.f32.mxu1 %v4421_v54  ;;  %v4654_v28 = vld [vmem:[%s15605_s1 + $0xec0] sm:$0xff] }
 0x313   : > { %7426 = vmatprep.mubr.f32.mxu0 %v4739_v13  ;;  %v4350_v54 = vld [vmem:[%s15605_s1 + $0x540] sm:$0xff]  ;;  %v4668_v13 = vld [vmem:[%s15605_s1 + $0xf30] sm:$0xff] }
 0x315   : > { %6224 = vmatmul.mubr.f32.gmra.mrb[36].mxu1 %v4420_v38  ;;  %v4667_v38 = vld [vmem:[%s15605_s1 + $0xf28] sm:$0xff] }
 0x316   : > { %7427 = vmatmul.mubr.f32.gmra.mrb[84].mxu0 %v4738_v55  ;;  %6229 = vmatprep.mubr.f32.mxu1 %v4434_v10  ;;  %v4363_v55 = vld [vmem:[%s15605_s1 + $0x5a8] sm:$0xff]  ;;  %v4681_v10 = vld [vmem:[%s15605_s1 + $0xf98] sm:$0xff] }
 0x317   : > { %7432 = vmatprep.mubr.f32.mxu0 %v4752_v3  ;;  %v4680_v3 = vld [vmem:[%s15605_s1 + $0xf90] sm:$0xff] }
 0x319   : > { %6230 = vmatmul.mubr.f32.gmra.mrb[38].mxu1 %v4433_v35  ;;  %v4376_v35 = vld [vmem:[%s15605_s1 + $0x610] sm:$0xff] }
 0x31a   : > { %7433 = vmatmul.mubr.f32.gmra.mrb[86].mxu0 %v4751_v51  ;;  %6235 = vmatprep.mubr.f32.mxu1 %v4447_v7  ;;  %v4694_v51 = vld [vmem:[%s15605_s1 + $0x1000] sm:$0xff]  ;;  %v4693_v7 = vld [vmem:[%s15605_s1 + $0xff8] sm:$0xff] }
 0x31b   : > { %7438 = vmatprep.mubr.f32.mxu0 %v4765_v52  ;;  %v4389_v52 = vld [vmem:[%s15605_s1 + $0x678] sm:$0xff] }
 0x31d   : > { %6236 = vmatmul.mubr.f32.gmra.mrb[40].mxu1 %v4446_v36  ;;  %v4707_v36 = vld [vmem:[%s15605_s1 + $0x1068] sm:$0xff] }
 0x31e   : > { %7439 = vmatmul.mubr.f32.gmra.mrb[88].mxu0 %v4764_v8  ;;  %6241 = vmatprep.mubr.f32.mxu1 %v4460_v34  ;;  %v4706_v8 = vld [vmem:[%s15605_s1 + $0x1060] sm:$0xff] }
 0x31f   : > { %7444 = vmatprep.mubr.f32.mxu0 %v4778_v43  ;;  %v4402_v34 = vld [vmem:[%s15605_s1 + $0x6e0] sm:$0xff]  ;;  %v4720_v43 = vld [vmem:[%s15605_s1 + $0x10d0] sm:$0xff] }
 0x321   : > { %6242 = vmatmul.mubr.f32.gmra.mrb[42].mxu1 %v4459_v22  ;;  %v4719_v22 = vld [vmem:[%s15605_s1 + $0x10c8] sm:$0xff] }
 0x322   : > { %7445 = vmatmul.mubr.f32.gmra.mrb[90].mxu0 %v4777_v19  ;;  %6247 = vmatprep.mubr.f32.mxu1 %v4473_v31  ;;  %v4415_v19 = vld [vmem:[%s15605_s1 + $0x748] sm:$0xff]  ;;  %v4733_v31 = vld [vmem:[%s15605_s1 + $0x1138] sm:$0xff] }
 0x323   : > { %7450 = vmatprep.mubr.f32.mxu0 %v4791_v47  ;;  %v4732_v47 = vld [vmem:[%s15605_s1 + $0x1130] sm:$0xff] }
 0x325   : > { %6248 = vmatmul.mubr.f32.gmra.mrb[44].mxu1 %v4472_v45  ;;  %v4428_v45 = vld [vmem:[%s15605_s1 + $0x7b0] sm:$0xff] }
 0x326   : > { %7451 = vmatmul.mubr.f32.gmra.mrb[92].mxu0 %v4790_v23  ;;  %6253 = vmatprep.mubr.f32.mxu1 %v4486_v12  ;;  %v4746_v23 = vld [vmem:[%s15605_s1 + $0x11a0] sm:$0xff]  ;;  %v4745_v12 = vld [vmem:[%s15605_s1 + $0x1198] sm:$0xff] }
 0x327   : > { %7456 = vmatprep.mubr.f32.mxu0 %v4804_v21  ;;  %v4441_v21 = vld [vmem:[%s15605_s1 + $0x818] sm:$0xff] }
 0x329   : > { %6254 = vmatmul.mubr.f32.gmra.mrb[46].mxu1 %v4485_v15  ;;  %v4759_v15 = vld [vmem:[%s15605_s1 + $0x1208] sm:$0xff] }
 0x32a   : > { %7457 = vmatmul.mubr.f32.gmra.mrb[94].mxu0 %v4803_v60  ;;  %6259 = vmatprep.mubr.f32.mxu1 %v4499_v41  ;;  %v4758_v60 = vld [vmem:[%s15605_s1 + $0x1200] sm:$0xff] }
 0x32b   : > { %7527 = vmatprep.mubr.f32.mxu0 %v15677_v26  ;;  %v4454_v41 = vld [vmem:[%s15605_s1 + $0x880] sm:$0xff] }
 0x32d   : > { %6260 = vmatmul.mubr.f32.gmra.mrb[48].mxu1 %v4498_v53  ;;  %v4772_v53 = vld [vmem:[%s15605_s1 + $0x1270] sm:$0xff] }
 0x32e   : > { %8192 = vmatmul.mubr.msk.f32.vlgmr.msra.gmra.mrb[0].mxu0 %vm5200_vm3, %v4194_v59  ;;  %6265 = vmatprep.mubr.f32.mxu1 %v4512_v4  ;;  %v4771_v59 = vld [vmem:[%s15605_s1 + $0x1268] sm:$0xff] }
 0x32f   : > { %7533 = vmatprep.mubr.f32.mxu0 %v15677_v26  ;;  %v4467_v4 = vld [vmem:[%s15605_s1 + $0x8e8] sm:$0xff] }
 0x331   : > { %6266 = vmatmul.mubr.f32.gmra.mrb[50].mxu1 %v4511_v9  ;;  %v4785_v9 = vld [vmem:[%s15605_s1 + $0x12d8] sm:$0xff] }
 0x332   : > { %8193 = vmatmul.mubr.msk.f32.gmra.mrb[2].mxu0 %vm5200_vm3, %v4207_v16  ;;  %6271 = vmatprep.mubr.f32.mxu1 %v4525_v25  ;;  %v4784_v16 = vld [vmem:[%s15605_s1 + $0x12d0] sm:$0xff] }
 0x333   : > { %7539 = vmatprep.mubr.f32.mxu0 %v15677_v26  ;;  %v4480_v25 = vld [vmem:[%s15605_s1 + $0x950] sm:$0xff] }
 0x335   : > { %6272 = vmatmul.mubr.f32.gmra.mrb[52].mxu1 %v4524_v33  ;;  %v4798_v33 = vld [vmem:[%s15605_s1 + $0x1340] sm:$0xff] }
 0x336   : > { %8194 = vmatmul.mubr.msk.f32.gmra.mrb[4].mxu0 %vm5200_vm3, %v4220_v58  ;;  %6277 = vmatprep.mubr.f32.mxu1 %v4538_v2  ;;  %v4797_v58 = vld [vmem:[%s15605_s1 + $0x1338] sm:$0xff] }
 0x337   : > { %7545 = vmatprep.mubr.f32.mxu0 %v15677_v26  ;;  %v4493_v2 = vld [vmem:[%s15605_s1 + $0x9b8] sm:$0xff] }
 0x339   : > { %6278 = vmatmul.mubr.f32.gmra.mrb[54].mxu1 %v4537_v17  ;;  %v4566_v17 = vld [vmem:[%s15605_s1 + $0xc00] sm:$0xff] }
 0x33a   : > { %8195 = vmatmul.mubr.msk.f32.gmra.mrb[6].mxu0 %vm5200_vm3, %v4233_v27  ;;  %6283 = vmatprep.mubr.f32.mxu1 %v4551_v44  ;;  %v4565_v27 = vld [vmem:[%s15605_s1 + $0xbf8] sm:$0xff]  ;;  %v4506_v44 = vld [vmem:[%s15605_s1 + $0xa20] sm:$0xff] }
 0x33b   : > { %7551 = vmatprep.mubr.f32.mxu0 %v15677_v26 }
 0x33d   : > { %6284 = vmatmul.mubr.f32.gmra.mrb[56].mxu1 %v4550_v61  ;;  %v4579_v61 = vld [vmem:[%s15605_s1 + $0xc68] sm:$0xff] }
 0x33e   : > { %8196 = vmatmul.mubr.msk.f32.gmra.mrb[8].mxu0 %vm5200_vm3, %v4246_v62  ;;  %6289 = vmatprep.mubr.f32.mxu1 %v4564_v5  ;;  %v4578_v62 = vld [vmem:[%s15605_s1 + $0xc60] sm:$0xff]  ;;  %v4519_v5 = vld [vmem:[%s15605_s1 + $0xa88] sm:$0xff] }
 0x33f   : > { %7557 = vmatprep.mubr.f32.mxu0 %v15677_v26 }
 0x341   : > { %6290 = vmatmul.mubr.f32.gmra.mrb[58].mxu1 %v4563_v6  ;;  %v4592_v6 = vld [vmem:[%s15605_s1 + $0xcd0] sm:$0xff] }
 0x342   : > { %8197 = vmatmul.mubr.msk.f32.gmra.mrb[10].mxu0 %vm5200_vm3, %v4259_v18  ;;  %6295 = vmatprep.mubr.f32.mxu1 %v4577_v1  ;;  %v4591_v18 = vld [vmem:[%s15605_s1 + $0xcc8] sm:$0xff]  ;;  %v4532_v1 = vld [vmem:[%s15605_s1 + $0xaf0] sm:$0xff] }
 0x343   : > { %7563 = vmatprep.mubr.f32.mxu0 %v15677_v26 }
 0x345   : > { %6296 = vmatmul.mubr.f32.gmra.mrb[60].mxu1 %v4576_v20  ;;  %v4605_v20 = vld [vmem:[%s15605_s1 + $0xd38] sm:$0xff] }
 0x346   : > { %8198 = vmatmul.mubr.msk.f32.gmra.mrb[12].mxu0 %vm5200_vm3, %v4272_v37  ;;  %6301 = vmatprep.mubr.f32.mxu1 %v4590_v49  ;;  %v4604_v37 = vld [vmem:[%s15605_s1 + $0xd30] sm:$0xff]  ;;  %v4545_v49 = vld [vmem:[%s15605_s1 + $0xb58] sm:$0xff] }
 0x347   : > { %7569 = vmatprep.mubr.f32.mxu0 %v15677_v26 }
 0x349   : > { %6302 = vmatmul.mubr.f32.gmra.mrb[62].mxu1 %v4589_v24  ;;  %v4618_v24 = vld [vmem:[%s15605_s1 + $0xda0] sm:$0xff] }
 0x34a   : > { %8199 = vmatmul.mubr.msk.f32.gmra.mrb[14].mxu0 %vm5200_vm3, %v4285_v32  ;;  %6307 = vmatprep.mubr.f32.mxu1 %v4603_v30  ;;  %v4617_v32 = vld [vmem:[%s15605_s1 + $0xd98] sm:$0xff]  ;;  %v4558_v30 = vld [vmem:[%s15605_s1 + $0xbc0] sm:$0xff] }
 0x34b   : > { %7575 = vmatprep.mubr.f32.mxu0 %v15677_v26 }
 0x34d   : > { %6308 = vmatmul.mubr.f32.gmra.mrb[64].mxu1 %v4602_v14  ;;  %v4631_v14 = vld [vmem:[%s15605_s1 + $0xe08] sm:$0xff] }
 0x34e   : > { %8200 = vmatmul.mubr.msk.f32.gmra.mrb[16].mxu0 %vm5200_vm3, %v4298_v50  ;;  %6313 = vmatprep.mubr.f32.mxu1 %v4616_v42  ;;  %v4630_v50 = vld [vmem:[%s15605_s1 + $0xe00] sm:$0xff]  ;;  %v4571_v42 = vld [vmem:[%s15605_s1 + $0xc28] sm:$0xff] }
 0x34f   : > { %7581 = vmatprep.mubr.f32.mxu0 %v15677_v26 }
 0x351   : > { %6314 = vmatmul.mubr.f32.gmra.mrb[66].mxu1 %v4615_v48  ;;  %v4644_v48 = vld [vmem:[%s15605_s1 + $0xe70] sm:$0xff] }
 0x352   : > { %8201 = vmatmul.mubr.msk.f32.gmra.mrb[18].mxu0 %vm5200_vm3, %v4311_v63  ;;  %6319 = vmatprep.mubr.f32.mxu1 %v4629_v11 }
 0x353   : > { %7587 = vmatprep.mubr.f32.mxu0 %v15677_v26 }
 0x355   : > { %6320 = vmatmul.mubr.f32.gmra.mrb[68].mxu1 %v4628_v40  ;;  %v4643_v40 = vld [vmem:[%s15605_s1 + $0xe68] sm:$0xff] }
 0x356   : > { %8202 = vmatmul.mubr.msk.f32.gmra.mrb[20].mxu0 %vm5200_vm3, %v4324_v56  ;;  %6325 = vmatprep.mubr.f32.mxu1 %v4642_v0  ;;  %v4584_v56 = vld [vmem:[%s15605_s1 + $0xc90] sm:$0xff]  ;;  %v4657_v0 = vld [vmem:[%s15605_s1 + $0xed8] sm:$0xff] }
 0x357   : > { %7593 = vmatprep.mubr.f32.mxu0 %v15677_v26 }
 0x359   : > { %6326 = vmatmul.mubr.f32.gmra.mrb[70].mxu1 %v4641_v29 }
 0x35a   : > { %8203 = vmatmul.mubr.msk.f32.gmra.mrb[22].mxu0 %vm5200_vm3, %v4337_v57  ;;  %6331 = vmatprep.mubr.f32.mxu1 %v4655_v39  ;;  %v4656_v39 = vld [vmem:[%s15605_s1 + $0xed0] sm:$0xff] }
 0x35b   : > { %7599 = vmatprep.mubr.f32.mxu0 %v15677_v26 }
 0x35d   : > { %6332 = vmatmul.mubr.f32.gmra.mrb[72].mxu1 %v4654_v28  ;;  %v4597_v28 = vld [vmem:[%s15605_s1 + $0xcf8] sm:$0xff] }
 0x35e   : > { %8204 = vmatmul.mubr.msk.f32.gmra.mrb[24].mxu0 %vm5200_vm3, %v4350_v54  ;;  %6337 = vmatprep.mubr.f32.mxu1 %v4668_v13  ;;  %v4670_v54 = vld [vmem:[%s15605_s1 + $0xf40] sm:$0xff] }
 0x35f   : > { %7605 = vmatprep.mubr.f32.mxu0 %v15677_v26 }
 0x361   : > { %6338 = vmatmul.mubr.f32.gmra.mrb[74].mxu1 %v4667_v38 }
 0x362   : > { %8205 = vmatmul.mubr.msk.f32.gmra.mrb[26].mxu0 %vm5200_vm3, %v4363_v55  ;;  %6343 = vmatprep.mubr.f32.mxu1 %v4681_v10  ;;  %v4669_v55 = vld [vmem:[%s15605_s1 + $0xf38] sm:$0xff]  ;;  %v4610_v10 = vld [vmem:[%s15605_s1 + $0xd60] sm:$0xff] }
 0x363   : > { %7611 = vmatprep.mubr.f32.mxu0 %v15677_v26 }
 0x365   : > { %6344 = vmatmul.mubr.f32.gmra.mrb[76].mxu1 %v4680_v3  ;;  %v4683_v3 = vld [vmem:[%s15605_s1 + $0xfa8] sm:$0xff] }
 0x366   : > { %8206 = vmatmul.mubr.msk.f32.gmra.mrb[28].mxu0 %vm5200_vm3, %v4376_v35  ;;  %6349 = vmatprep.mubr.f32.mxu1 %v4694_v51 }
 0x367   : > { %7617 = vmatprep.mubr.f32.mxu0 %v15677_v26 }
 0x369   : > { %6350 = vmatmul.mubr.f32.gmra.mrb[78].mxu1 %v4693_v7  ;;  %v4682_v7 = vld [vmem:[%s15605_s1 + $0xfa0] sm:$0xff] }
 0x36a   : > { %8207 = vmatmul.mubr.msk.f32.gmra.mrb[30].mxu0 %vm5200_vm3, %v4389_v52  ;;  %6355 = vmatprep.mubr.f32.mxu1 %v4707_v36  ;;  %v4623_v52 = vld [vmem:[%s15605_s1 + $0xdc8] sm:$0xff]  ;;  %v4696_v36 = vld [vmem:[%s15605_s1 + $0x1010] sm:$0xff] }
 0x36b   : > { %7623 = vmatprep.mubr.f32.mxu0 %v15677_v26 }
 0x36d   : > { %6356 = vmatmul.mubr.f32.gmra.mrb[80].mxu1 %v4706_v8 }
 0x36e   : > { %8208 = vmatmul.mubr.msk.f32.gmra.mrb[32].mxu0 %vm5200_vm3, %v4402_v34  ;;  %6361 = vmatprep.mubr.f32.mxu1 %v4720_v43  ;;  %v4695_v43 = vld [vmem:[%s15605_s1 + $0x1008] sm:$0xff] }
 0x36f   : > { %7629 = vmatprep.mubr.f32.mxu0 %v15677_v26 }
 0x371   : > { %6362 = vmatmul.mubr.f32.gmra.mrb[82].mxu1 %v4719_v22  ;;  %v4636_v22 = vld [vmem:[%s15605_s1 + $0xe30] sm:$0xff] }
 0x372   : > { %8209 = vmatmul.mubr.msk.f32.gmra.mrb[34].mxu0 %vm5200_vm3, %v4415_v19  ;;  %6367 = vmatprep.mubr.f32.mxu1 %v4733_v31  ;;  %v4709_v19 = vld [vmem:[%s15605_s1 + $0x1078] sm:$0xff] }
 0x373   : > { %7635 = vmatprep.mubr.f32.mxu0 %v15677_v26 }
 0x375   : > { %6368 = vmatmul.mubr.f32.gmra.mrb[84].mxu1 %v4732_v47 }
 0x376   : > { %8210 = vmatmul.mubr.msk.f32.gmra.mrb[36].mxu0 %vm5200_vm3, %v4428_v45  ;;  %6373 = vmatprep.mubr.f32.mxu1 %v4746_v23  ;;  %v4708_v45 = vld [vmem:[%s15605_s1 + $0x1070] sm:$0xff]  ;;  %v4649_v23 = vld [vmem:[%s15605_s1 + $0xe98] sm:$0xff] }
 0x377   : > { %7641 = vmatprep.mubr.f32.mxu0 %v15677_v26 }
 0x379   : > { %6374 = vmatmul.mubr.f32.gmra.mrb[86].mxu1 %v4745_v12  ;;  %v4722_v12 = vld [vmem:[%s15605_s1 + $0x10e0] sm:$0xff] }
 0x37a   : > { %8211 = vmatmul.mubr.msk.f32.gmra.mrb[38].mxu0 %vm5200_vm3, %v4441_v21  ;;  %6379 = vmatprep.mubr.f32.mxu1 %v4759_v15 }
 0x37b   : > { %7647 = vmatprep.mubr.f32.mxu0 %v15677_v26 }
 0x37d   : > { %6380 = vmatmul.mubr.f32.gmra.mrb[88].mxu1 %v4758_v60  ;;  %v4721_v60 = vld [vmem:[%s15605_s1 + $0x10d8] sm:$0xff] }
 0x37e   : > { %8212 = vmatmul.mubr.msk.f32.gmra.mrb[40].mxu0 %vm5200_vm3, %v4454_v41  ;;  %6385 = vmatprep.mubr.f32.mxu1 %v4772_v53  ;;  %v4662_v41 = vld [vmem:[%s15605_s1 + $0xf00] sm:$0xff]  ;;  %v4735_v53 = vld [vmem:[%s15605_s1 + $0x1148] sm:$0xff] }
 0x37f   : > { %7653 = vmatprep.mubr.f32.mxu0 %v15677_v26 }
 0x381   : > { %6386 = vmatmul.mubr.f32.gmra.mrb[90].mxu1 %v4771_v59 }
 0x382   : > { %8213 = vmatmul.mubr.msk.f32.gmra.mrb[42].mxu0 %vm5200_vm3, %v4467_v4  ;;  %6391 = vmatprep.mubr.f32.mxu1 %v4785_v9  ;;  %v4734_v9 = vld [vmem:[%s15605_s1 + $0x1140] sm:$0xff] }
 0x383   : > { %7659 = vmatprep.mubr.f32.mxu0 %v15677_v26 }
 0x385   : > { %6392 = vmatmul.mubr.f32.gmra.mrb[92].mxu1 %v4784_v16  ;;  %v4675_v16 = vld [vmem:[%s15605_s1 + $0xf68] sm:$0xff] }
 0x386   : > { %8214 = vmatmul.mubr.msk.f32.gmra.mrb[44].mxu0 %vm5200_vm3, %v4480_v25  ;;  %6397 = vmatprep.mubr.f32.mxu1 %v4798_v33  ;;  %v4748_v25 = vld [vmem:[%s15605_s1 + $0x11b0] sm:$0xff] }
 0x387   : > { %7665 = vmatprep.mubr.f32.mxu0 %v15677_v26 }
 0x389   : > { %6398 = vmatmul.mubr.f32.gmra.mrb[94].mxu1 %v4797_v58 }
 0x38a   : > { %8215 = vmatmul.mubr.msk.f32.gmra.mrb[46].mxu0 %vm5200_vm3, %v4493_v2  ;;  %6642 = vmatprep.mubr.f32.mxu1 %v4566_v17  ;;  %v4747_v2 = vld [vmem:[%s15605_s1 + $0x11a8] sm:$0xff]  ;;  %v4688_v17 = vld [vmem:[%s15605_s1 + $0xfd0] sm:$0xff] }
 0x38b   : > { %7671 = vmatprep.mubr.f32.mxu0 %v15677_v26 }
 0x38d   : > { %6643 = vmatmul.mubr.f32.vlgmr.msra.gmra.mrb[58].mxu1 %v4565_v27  ;;  %v4761_v27 = vld [vmem:[%s15605_s1 + $0x1218] sm:$0xff] }
 0x38e   : > { %8216 = vmatmul.mubr.msk.f32.gmra.mrb[48].mxu0 %vm5200_vm3, %v4506_v44  ;;  %6648 = vmatprep.mubr.f32.mxu1 %v4579_v61 }
 0x38f   : > { %7677 = vmatprep.mubr.f32.mxu0 %v15677_v26 }
 0x391   : > { %6649 = vmatmul.mubr.f32.gmra.mrb[60].mxu1 %v4578_v62  ;;  %v4760_v62 = vld [vmem:[%s15605_s1 + $0x1210] sm:$0xff] }
 0x392   : > { %8217 = vmatmul.mubr.msk.f32.gmra.mrb[50].mxu0 %vm5200_vm3, %v4519_v5  ;;  %6654 = vmatprep.mubr.f32.mxu1 %v4592_v6  ;;  %v4701_v5 = vld [vmem:[%s15605_s1 + $0x1038] sm:$0xff]  ;;  %v4774_v6 = vld [vmem:[%s15605_s1 + $0x1280] sm:$0xff] }
 0x393   : > { %7683 = vmatprep.mubr.f32.mxu0 %v15677_v26 }
 0x395   : > { %6655 = vmatmul.mubr.f32.gmra.mrb[62].mxu1 %v4591_v18 }
 0x396   : > { %8218 = vmatmul.mubr.msk.f32.gmra.mrb[52].mxu0 %vm5200_vm3, %v4532_v1  ;;  %6660 = vmatprep.mubr.f32.mxu1 %v4605_v20  ;;  %v4773_v20 = vld [vmem:[%s15605_s1 + $0x1278] sm:$0xff] }
 0x397   : > { %7689 = vmatprep.mubr.f32.mxu0 %v15677_v26 }
 0x399   : > { %6661 = vmatmul.mubr.f32.gmra.mrb[64].mxu1 %v4604_v37  ;;  %v4714_v37 = vld [vmem:[%s15605_s1 + $0x10a0] sm:$0xff] }
 0x39a   : > { %8219 = vmatmul.mubr.msk.f32.gmra.mrb[54].mxu0 %vm5200_vm3, %v4545_v49  ;;  %6666 = vmatprep.mubr.f32.mxu1 %v4618_v24  ;;  %v4787_v49 = vld [vmem:[%s15605_s1 + $0x12e8] sm:$0xff] }
 0x39b   : > { %7695 = vmatprep.mubr.f32.mxu0 %v15677_v26 }
 0x39d   : > { %6667 = vmatmul.mubr.f32.gmra.mrb[66].mxu1 %v4617_v32 }
 0x39e   : > { %8220 = vmatmul.mubr.msk.f32.gmra.mrb[56].mxu0 %vm5200_vm3, %v4558_v30  ;;  %6672 = vmatprep.mubr.f32.mxu1 %v4631_v14  ;;  %v4786_v30 = vld [vmem:[%s15605_s1 + $0x12e0] sm:$0xff]  ;;  %v4727_v14 = vld [vmem:[%s15605_s1 + $0x1108] sm:$0xff] }
 0x39f   : > { %7701 = vmatprep.mubr.f32.mxu0 %v15677_v26 }
 0x3a0   : > { %v15184_v63 = vpop.f32.mrb[0].mxu1 }
 0x3a1   : > { %v15186_v11 = vpop.f32.mrb[1].mxu1  ;;  %6673 = vmatmul.mubr.f32.gmra.mrb[68].mxu1 %v4630_v50  ;;  %v4800_v50 = vld [vmem:[%s15605_s1 + $0x1350] sm:$0xff] }
 0x3a2   : > { %8221 = vmatmul.mubr.msk.f32.gmra.mrb[58].mxu0 %vm5200_vm3, %v4571_v42  ;;  %6678 = vmatprep.mubr.f32.mxu1 %v4644_v48 }
 0x3a3   : > { %7707 = vmatprep.mubr.f32.mxu0 %v15677_v26 }
 0x3a4   : > { %v15199_v29 = vpop.f32.mrb[2].mxu1 }
 0x3a5   : > { %v15201_v57 = vpop.f32.mrb[3].mxu1  ;;  %6679 = vmatmul.mubr.f32.gmra.mrb[70].mxu1 %v4643_v40  ;;  %v4799_v40 = vld [vmem:[%s15605_s1 + $0x1348] sm:$0xff] }
 0x3a6   : > { %8222 = vmatmul.mubr.msk.f32.gmra.mrb[60].mxu0 %vm5200_vm3, %v4584_v56  ;;  %6684 = vmatprep.mubr.f32.mxu1 %v4657_v0  ;;  %v4740_v56 = vld [vmem:[%s15605_s1 + $0x1170] sm:$0xff] }
 0x3a7   : > { %7713 = vmatprep.mubr.f32.mxu0 %v15677_v26 }
 0x3a8   : > { %v15214_v13 = vpop.f32.mrb[4].mxu1 }
 0x3a9   : > { %v15216_v38 = vpop.f32.mrb[5].mxu1  ;;  %6685 = vmatmul.mubr.f32.gmra.mrb[72].mxu1 %v4656_v39 }
 0x3aa   : > { %8223 = vmatmul.mubr.msk.f32.gmra.mrb[62].mxu0 %vm5200_vm3, %v4597_v28  ;;  %6690 = vmatprep.mubr.f32.mxu1 %v4670_v54  ;;  %v4753_v28 = vld [vmem:[%s15605_s1 + $0x11d8] sm:$0xff] }
 0x3ab   : > { %7719 = vmatprep.mubr.f32.mxu0 %v15677_v26 }
 0x3ac   : > { %v15229_v35 = vpop.f32.mrb[6].mxu1 }
 0x3ad   : > { %v15231_v51 = vpop.f32.mrb[7].mxu1  ;;  %6691 = vmatmul.mubr.f32.gmra.mrb[74].mxu1 %v4669_v55 }
 0x3ae   : > { %8224 = vmatmul.mubr.msk.f32.gmra.mrb[64].mxu0 %vm5200_vm3, %v4610_v10  ;;  %6696 = vmatprep.mubr.f32.mxu1 %v4683_v3  ;;  %v4766_v10 = vld [vmem:[%s15605_s1 + $0x1240] sm:$0xff] }
 0x3af   : > { %7725 = vmatprep.mubr.f32.mxu0 %v15677_v26 }
 0x3b0   : > { %v15244_v8 = vpop.f32.mrb[8].mxu1 }
 0x3b1   : > { %v15246_v34 = vpop.f32.mrb[9].mxu1  ;;  %6697 = vmatmul.mubr.f32.gmra.mrb[76].mxu1 %v4682_v7 }
 0x3b2   : > { %8225 = vmatmul.mubr.msk.f32.gmra.mrb[66].mxu0 %vm5200_vm3, %v4623_v52  ;;  %6702 = vmatprep.mubr.f32.mxu1 %v4696_v36  ;;  %v4779_v52 = vld [vmem:[%s15605_s1 + $0x12a8] sm:$0xff] }
 0x3b3   : > { %7731 = vmatprep.mubr.f32.mxu0 %v15677_v26 }
 0x3b4   : > { %v15259_v31 = vpop.f32.mrb[10].mxu1 }
 0x3b5   : > { %v15261_v47 = vpop.f32.mrb[11].mxu1  ;;  %6703 = vmatmul.mubr.f32.gmra.mrb[78].mxu1 %v4695_v43 }
 0x3b6   : > { %8226 = vmatmul.mubr.msk.f32.gmra.mrb[68].mxu0 %vm5200_vm3, %v4636_v22  ;;  %6708 = vmatprep.mubr.f32.mxu1 %v4709_v19  ;;  %v4792_v22 = vld [vmem:[%s15605_s1 + $0x1310] sm:$0xff] }
 0x3b7   : > { %7737 = vmatprep.mubr.f32.mxu0 %v15677_v26 }
 0x3b8   : > { %v15274_v21 = vpop.f32.mrb[12].mxu1 }
 0x3b9   : > { %v15276_v15 = vpop.f32.mrb[13].mxu1  ;;  %6709 = vmatmul.mubr.f32.gmra.mrb[80].mxu1 %v4708_v45 }
 0x3ba   : > { %8227 = vmatmul.mubr.msk.f32.gmra.mrb[70].mxu0 %vm5200_vm3, %v4649_v23  ;;  %6714 = vmatprep.mubr.f32.mxu1 %v4722_v12  ;;  %v4805_v23 = vld [vmem:[%s15605_s1 + $0x1378] sm:$0xff] }
 0x3bb   : > { %7743 = vmatprep.mubr.f32.mxu0 %v15677_v26 }
 0x3bc   : > { %v15289_v59 = vpop.f32.mrb[14].mxu1 }
 0x3bd   : > { %v15291_v4 = vpop.f32.mrb[15].mxu1  ;;  %6715 = vmatmul.mubr.f32.gmra.mrb[82].mxu1 %v4721_v60 }
 0x3be   : > { %8228 = vmatmul.mubr.msk.f32.gmra.mrb[72].mxu0 %vm5200_vm3, %v4662_v41  ;;  %6720 = vmatprep.mubr.f32.mxu1 %v4735_v53 }
 0x3bf   : > { %7749 = vmatprep.mubr.f32.mxu0 %v15677_v26 }
 0x3c0   : > { %v15304_v33 = vpop.f32.mrb[16].mxu1 }
 0x3c1   : > { %v15306_v58 = vpop.f32.mrb[17].mxu1  ;;  %6721 = vmatmul.mubr.f32.gmra.mrb[84].mxu1 %v4734_v9 }
 0x3c2   : > { %8229 = vmatmul.mubr.msk.f32.gmra.mrb[74].mxu0 %vm5200_vm3, %v4675_v16  ;;  %6726 = vmatprep.mubr.f32.mxu1 %v4748_v25 }
 0x3c3   : > { %7755 = vmatprep.mubr.f32.mxu0 %v15677_v26 }
 0x3c4   : > { %v15319_v44 = vpop.f32.mrb[18].mxu1 }
 0x3c5   : > { %v15321_v61 = vpop.f32.mrb[19].mxu1  ;;  %6727 = vmatmul.mubr.f32.gmra.mrb[86].mxu1 %v4747_v2 }
 0x3c6   : > { %8230 = vmatmul.mubr.msk.f32.gmra.mrb[76].mxu0 %vm5200_vm3, %v4688_v17  ;;  %6732 = vmatprep.mubr.f32.mxu1 %v4761_v27 }
 0x3c7   : > { %7761 = vmatprep.mubr.f32.mxu0 %v15677_v26 }
 0x3c8   : > { %v15334_v18 = vpop.f32.mrb[20].mxu1 }
 0x3c9   : > { %v15336_v1 = vpop.f32.mrb[21].mxu1  ;;  %6733 = vmatmul.mubr.f32.gmra.mrb[88].mxu1 %v4760_v62 }
 0x3ca   : > { %8231 = vmatmul.mubr.msk.f32.gmra.mrb[78].mxu0 %vm5200_vm3, %v4701_v5  ;;  %6738 = vmatprep.mubr.f32.mxu1 %v4774_v6 }
 0x3cb   : > { %7767 = vmatprep.mubr.f32.mxu0 %v15677_v26 }
 0x3cc   : > { %v15349_v24 = vpop.f32.mrb[22].mxu1 }
 0x3cd   : > { %v15351_v32 = vpop.f32.mrb[23].mxu1  ;;  %6739 = vmatmul.mubr.f32.gmra.mrb[90].mxu1 %v4773_v20 }
 0x3ce   : > { %8232 = vmatmul.mubr.msk.f32.gmra.mrb[80].mxu0 %vm5200_vm3, %v4714_v37  ;;  %6744 = vmatprep.mubr.f32.mxu1 %v4787_v49 }
 0x3cf   : > { %7773 = vmatprep.mubr.f32.mxu0 %v15677_v26 }
 0x3d0   : > { %v15364_v42 = vpop.f32.mrb[24].mxu1 }
 0x3d1   : > { %v15366_v48 = vpop.f32.mrb[25].mxu1  ;;  %6745 = vmatmul.mubr.f32.gmra.mrb[92].mxu1 %v4786_v30 }
 0x3d2   : > { %8233 = vmatmul.mubr.msk.f32.gmra.mrb[82].mxu0 %vm5200_vm3, %v4727_v14  ;;  %6750 = vmatprep.mubr.f32.mxu1 %v4800_v50 }
 0x3d3   : > { %7779 = vmatprep.mubr.f32.mxu0 %v15677_v26 }
 0x3d4   : > { %v15376_v0 = vpop.f32.mrb[26].mxu1 }
 0x3d5   : > { %v15378_v39 = vpop.f32.mrb[27].mxu1  ;;  %6751 = vmatmul.mubr.f32.gmra.mrb[94].mxu1 %v4799_v40 }
 0x3d6   : > { %8234 = vmatmul.mubr.msk.f32.gmra.mrb[84].mxu0 %vm5200_vm3, %v4740_v56 }
 0x3d7   : > { %7785 = vmatprep.mubr.f32.mxu0 %v15677_v26 }
 0x3d8   : > { %v15385_v54 = vpop.f32.mrb[28].mxu1 }
 0x3d9   : > { %v15387_v55 = vpop.f32.mrb[29].mxu1 }
 0x3da   : > { %8235 = vmatmul.mubr.msk.f32.gmra.mrb[86].mxu0 %vm5200_vm3, %v4753_v28 }
 0x3db   : > { %7791 = vmatprep.mubr.f32.mxu0 %v15677_v26 }
 0x3dc   : > { %v15394_v3 = vpop.f32.mrb[30].mxu1 }
 0x3dd   : > { %v15396_v7 = vpop.f32.mrb[31].mxu1 }
 0x3de   : > { %8236 = vmatmul.mubr.msk.f32.gmra.mrb[88].mxu0 %vm5200_vm3, %v4766_v10 }
 0x3df   : > { %7797 = vmatprep.mubr.f32.mxu0 %v15677_v26 }
 0x3e0   : > { %v15403_v36 = vpop.f32.mrb[32].mxu1 }
 0x3e1   : > { %v15405_v43 = vpop.f32.mrb[33].mxu1 }
 0x3e2   : > { %8237 = vmatmul.mubr.msk.f32.gmra.mrb[90].mxu0 %vm5200_vm3, %v4779_v52 }
 0x3e3   : > { %7803 = vmatprep.mubr.f32.mxu0 %v15677_v26 }
 0x3e4   : > { %v15412_v19 = vpop.f32.mrb[34].mxu1 }
 0x3e5   : > { %v15414_v45 = vpop.f32.mrb[35].mxu1 }
 0x3e6   : > { %8238 = vmatmul.mubr.msk.f32.gmra.mrb[92].mxu0 %vm5200_vm3, %v4792_v22 }
 0x3e7   : > { %7809 = vmatprep.mubr.f32.mxu0 %v15677_v26 }
 0x3e8   : > { %v15421_v12 = vpop.f32.mrb[36].mxu1 }
 0x3e9   : > { %v15423_v60 = vpop.f32.mrb[37].mxu1 }
 0x3ea   : > { %8239 = vmatmul.mubr.msk.f32.gmra.mrb[94].mxu0 %vm5200_vm3, %v4805_v23 }
 0x3ec   : > { %v15426_v41 = vpop.f32.mrb[38].mxu1 }
 0x3ed   : > { %v15428_v53 = vpop.f32.mrb[39].mxu1 }
 0x3f0   : > { %v15430_v9 = vpop.f32.mrb[40].mxu1 }
 0x3f1   : > { %v15432_v16 = vpop.f32.mrb[41].mxu1 }
 0x3f4   : > { %v15434_v25 = vpop.f32.mrb[42].mxu1 }
 0x3f5   : > { %v15436_v2 = vpop.f32.mrb[43].mxu1 }
 0x3f8   : > { %v15438_v17 = vpop.f32.mrb[44].mxu1 }
 0x3f9   : > { %v15440_v27 = vpop.f32.mrb[45].mxu1 }
 0x3fc   : > { %v15442_v62 = vpop.f32.mrb[46].mxu1 }
 0x3fd   : > { %v15444_v5 = vpop.f32.mrb[47].mxu1 }
 0x400   : > { %v15446_v6 = vpop.f32.mrb[48].mxu1 }
 0x401   : > { %15697 = vst [vmem:[#allocation8_spill] sm:$0xff] %v15446_v6  ;;  %v7529_v20 = vpop.f32.mrb[0].mxu0  ;;  %v15448_v37 = vpop.f32.mrb[49].mxu1 }
 0x402   : > { %15698 = vst [vmem:[#allocation9_spill] sm:$0xff] %v15448_v37  ;;  %v9275_v49 = vadd.f32 %v7529_v20, %v15184_v63  ;;  %v7531_v30 = vpop.f32.mrb[1].mxu0 }
 0x403   : > { %v9276_v14 = vadd.f32 %v7531_v30, %v15186_v11  ;;  %v7922_v11 = vsub.s32 1, %v14508_v46 }
 0x404   : > { %v15452_v50 = vpop.f32.mrb[50].mxu1  ;;  %v7816_v22 = vmax.f32 %v9275_v49, 0.0 }
 0x405   : > { %15699 = vst [vmem:[#allocation10_spill] sm:$0xff] %v15452_v50  ;;  %v7535_v40 = vpop.f32.mrb[2].mxu0  ;;  %v15454_v56 = vpop.f32.mrb[51].mxu1  ;;  %v7817_v37 = vmax.f32 %v9276_v14, 0.0 }
 0x406   : > { %15700 = vst [vmem:[#allocation11_spill] sm:$0xff] %v15454_v56  ;;  %v9277_v28 = vadd.f32 %v7535_v40, %v15199_v29  ;;  %v7537_v10 = vpop.f32.mrb[3].mxu0  ;;  %v15467_v29 = vld [vmem:[%s15606_s2] sm:$0x7] }
 0x407   : > { %v9278_v52 = vadd.f32 %v7537_v10, %v15201_v57  ;;  %15701 = vst [vmem:[#allocation12_spill] sm:$0xff] %v15467_v29  ;;  %v7923_v14 = vrot.slane %v15467_v29, %v7922_v11 }
 0x408   : > { %v7818_v23 = vmax.f32 %v9277_v28, 0.0  ;;  %v15458_v26 = vpop.f32.mrb[52].mxu1 }
 0x409   : > { %v7819_v6 = vmax.f32 %v9278_v52, 0.0  ;;  %v7541_v63 = vpop.f32.mrb[4].mxu0  ;;  %v15460_v20 = vpop.f32.mrb[53].mxu1  ;;  %7995 = vmatprep.mubr.f32.mxu1 %v7923_v14 }
 0x40a   : > { %v9149_v30 = vpack.c.bf16 %v7818_v23, %v7816_v22  ;;  %v9279_v50 = vadd.f32 %v7541_v63, %v15214_v13  ;;  %v7543_v56 = vpop.f32.mrb[5].mxu0 }
 0x40b   : > { %v9147_v57 = vpack.c.bf16 %v7819_v6, %v7817_v37  ;;  %v9280_v49 = vadd.f32 %v7543_v56, %v15216_v38 }
 0x40c   : > { %v15471_v40 = vpop.f32.mrb[54].mxu1  ;;  %v7820_v23 = vmax.f32 %v9279_v50, 0.0 }
 0x40d   : > { %v7547_v28 = vpop.f32.mrb[6].mxu0  ;;  %9148 = vmatprep.subr.bf16.mxu1 %v9147_v57  ;;  %v15473_v10 = vpop.f32.mrb[55].mxu1  ;;  %v7821_v38 = vmax.f32 %v9280_v49, 0.0 }
 0x40e   : > { %v9281_v13 = vadd.f32 %v7547_v28, %v15229_v35  ;;  %v7549_v52 = vpop.f32.mrb[7].mxu0  ;;  %9150 = vmatpush1.bf16.msra.mxu1 %v9149_v30 }
 0x40f   : > { %v9282_v22 = vadd.f32 %v7549_v52, %v15231_v51 }
 0x410   : > { %v7822_v63 = vmax.f32 %v9281_v13, 0.0  ;;  %v15477_v6 = vpop.f32.mrb[56].mxu1 }
 0x411   : > { %v7823_v37 = vmax.f32 %v9282_v22, 0.0  ;;  %v7553_v56 = vpop.f32.mrb[8].mxu0  ;;  %v15479_v11 = vpop.f32.mrb[57].mxu1 }
 0x412   : > { %15702 = vst [vmem:[#allocation13_spill] sm:$0xff] %v15479_v11  ;;  %v9153_v29 = vpack.c.bf16 %v7822_v63, %v7820_v23  ;;  %v9283_v57 = vadd.f32 %v7553_v56, %v15244_v8  ;;  %v7555_v46 = vpop.f32.mrb[9].mxu0 }
 0x413   : > { %v9151_v14 = vpack.c.bf16 %v7823_v37, %v7821_v38  ;;  %v9284_v35 = vadd.f32 %v7555_v46, %v15246_v34 }
 0x414   : > { %v7824_v49 = vmax.f32 %v9283_v57, 0.0 }
 0x415   : > { %v7559_v28 = vpop.f32.mrb[10].mxu0  ;;  %9152 = vmatprep.subr.bf16.mxu1 %v9151_v14  ;;  %v7825_v52 = vmax.f32 %v9284_v35, 0.0 }
 0x416   : > { %v9285_v51 = vadd.f32 %v7559_v28, %v15259_v31  ;;  %v7561_v50 = vpop.f32.mrb[11].mxu0  ;;  %9154 = vmatpush1.bf16.msra.mxu1 %v9153_v29 }
 0x417   : > { %v9286_v30 = vadd.f32 %v7561_v50, %v15261_v47 }
 0x418   : > { %v7826_v13 = vmax.f32 %v9285_v51, 0.0 }
 0x419   : > { %v7827_v22 = vmax.f32 %v9286_v30, 0.0  ;;  %v7565_v11 = vpop.f32.mrb[12].mxu0 }
 0x41a   : > { %v9157_v23 = vpack.c.bf16 %v7826_v13, %v7824_v49  ;;  %v9287_v8 = vadd.f32 %v7565_v11, %v15274_v21  ;;  %v7567_v63 = vpop.f32.mrb[13].mxu0 }
 0x41b   : > { %v9155_v38 = vpack.c.bf16 %v7827_v22, %v7825_v52  ;;  %v9288_v46 = vadd.f32 %v7567_v63, %v15276_v15 }
 0x41c   : > { %v7828_v29 = vmax.f32 %v9287_v8, 0.0 }
 0x41d   : > { %v7571_v34 = vpop.f32.mrb[14].mxu0  ;;  %9156 = vmatprep.subr.bf16.mxu1 %v9155_v38  ;;  %v7829_v57 = vmax.f32 %v9288_v46, 0.0 }
 0x41e   : > { %v9289_v31 = vadd.f32 %v7571_v34, %v15289_v59  ;;  %v7573_v37 = vpop.f32.mrb[15].mxu0  ;;  %9158 = vmatpush1.bf16.msra.mxu1 %v9157_v23 }
 0x41f   : > { %v9290_v47 = vadd.f32 %v7573_v37, %v15291_v4 }
 0x420   : > { %v7830_v56 = vmax.f32 %v9289_v31, 0.0 }
 0x421   : > { %v7831_v14 = vmax.f32 %v9290_v47, 0.0  ;;  %v7577_v35 = vpop.f32.mrb[16].mxu0 }
 0x422   : > { %v9161_v28 = vpack.c.bf16 %v7830_v56, %v7828_v29  ;;  %v9291_v21 = vadd.f32 %v7577_v35, %v15304_v33  ;;  %v7579_v11 = vpop.f32.mrb[17].mxu0 }
 0x423   : > { %v9159_v51 = vpack.c.bf16 %v7831_v14, %v7829_v57  ;;  %v9292_v15 = vadd.f32 %v7579_v11, %v15306_v58 }
 0x424   : > { %v7832_v49 = vmax.f32 %v9291_v21, 0.0 }
 0x425   : > { %v7583_v50 = vpop.f32.mrb[18].mxu0  ;;  %9160 = vmatprep.subr.bf16.mxu1 %v9159_v51  ;;  %v7833_v52 = vmax.f32 %v9292_v15, 0.0 }
 0x426   : > { %v9293_v59 = vadd.f32 %v7583_v50, %v15319_v44  ;;  %v7585_v30 = vpop.f32.mrb[19].mxu0  ;;  %9162 = vmatpush1.bf16.msra.mxu1 %v9161_v28 }
 0x427   : > { %v9294_v4 = vadd.f32 %v7585_v30, %v15321_v61 }
 0x428   : > { %v7834_v13 = vmax.f32 %v9293_v59, 0.0 }
 0x429   : > { %v7835_v22 = vmax.f32 %v9294_v4, 0.0  ;;  %v7589_v23 = vpop.f32.mrb[20].mxu0 }
 0x42a   : > { %v9165_v8 = vpack.c.bf16 %v7834_v13, %v7832_v49  ;;  %v9295_v33 = vadd.f32 %v7589_v23, %v15334_v18  ;;  %v7591_v63 = vpop.f32.mrb[21].mxu0 }
 0x42b   : > { %v9163_v38 = vpack.c.bf16 %v7835_v22, %v7833_v52  ;;  %v9296_v58 = vadd.f32 %v7591_v63, %v15336_v1 }
 0x42c   : > { %v7836_v31 = vmax.f32 %v9295_v33, 0.0 }
 0x42d   : > { %v7595_v46 = vpop.f32.mrb[22].mxu0  ;;  %9164 = vmatprep.subr.bf16.mxu1 %v9163_v38  ;;  %v7837_v47 = vmax.f32 %v9296_v58, 0.0 }
 0x42e   : > { %v9297_v44 = vadd.f32 %v7595_v46, %v15349_v24  ;;  %v7597_v34 = vpop.f32.mrb[23].mxu0  ;;  %9166 = vmatpush1.bf16.msra.mxu1 %v9165_v8 }
 0x42f   : > { %v9298_v61 = vadd.f32 %v7597_v34, %v15351_v32 }
 0x430   : > { %v7838_v37 = vmax.f32 %v9297_v44, 0.0 }
 0x431   : > { %v7839_v29 = vmax.f32 %v9298_v61, 0.0  ;;  %v7601_v56 = vpop.f32.mrb[24].mxu0 }
 0x432   : > { %v9169_v57 = vpack.c.bf16 %v7838_v37, %v7836_v31  ;;  %v9299_v18 = vadd.f32 %v7601_v56, %v15364_v42  ;;  %v7603_v14 = vpop.f32.mrb[25].mxu0 }
 0x433   : > { %v9167_v35 = vpack.c.bf16 %v7839_v29, %v7837_v47  ;;  %v9300_v1 = vadd.f32 %v7603_v14, %v15366_v48 }
 0x434   : > { %v7840_v11 = vmax.f32 %v9299_v18, 0.0 }
 0x435   : > { %v7607_v28 = vpop.f32.mrb[26].mxu0  ;;  %9168 = vmatprep.subr.bf16.mxu1 %v9167_v35  ;;  %v7841_v15 = vmax.f32 %v9300_v1, 0.0 }
 0x436   : > { %v9301_v24 = vadd.f32 %v7607_v28, %v15376_v0  ;;  %v7609_v21 = vpop.f32.mrb[27].mxu0  ;;  %9170 = vmatpush1.bf16.msra.mxu1 %v9169_v57 }
 0x437   : > { %v9302_v32 = vadd.f32 %v7609_v21, %v15378_v39 }
 0x438   : > { %v7842_v51 = vmax.f32 %v9301_v24, 0.0 }
 0x439   : > { %v7843_v50 = vmax.f32 %v9302_v32, 0.0  ;;  %v7613_v59 = vpop.f32.mrb[28].mxu0 }
 0x43a   : > { %v9173_v30 = vpack.c.bf16 %v7842_v51, %v7840_v11  ;;  %v9303_v42 = vadd.f32 %v7613_v59, %v15385_v54  ;;  %v7615_v4 = vpop.f32.mrb[29].mxu0 }
 0x43b   : > { %v9171_v49 = vpack.c.bf16 %v7843_v50, %v7841_v15  ;;  %v9304_v48 = vadd.f32 %v7615_v4, %v15387_v55 }
 0x43c   : > { %v7844_v22 = vmax.f32 %v9303_v42, 0.0 }
 0x43d   : > { %v7619_v13 = vpop.f32.mrb[30].mxu0  ;;  %9172 = vmatprep.subr.bf16.mxu1 %v9171_v49  ;;  %v7845_v8 = vmax.f32 %v9304_v48, 0.0 }
 0x43e   : > { %v9305_v0 = vadd.f32 %v7619_v13, %v15394_v3  ;;  %v7621_v52 = vpop.f32.mrb[31].mxu0  ;;  %9174 = vmatpush1.bf16.msra.mxu1 %v9173_v30 }
 0x43f   : > { %v9306_v39 = vadd.f32 %v7621_v52, %v15396_v7 }
 0x440   : > { %v7846_v23 = vmax.f32 %v9305_v0, 0.0 }
 0x441   : > { %v7847_v33 = vmax.f32 %v9306_v39, 0.0  ;;  %v7625_v63 = vpop.f32.mrb[32].mxu0 }
 0x442   : > { %v9177_v38 = vpack.c.bf16 %v7846_v23, %v7844_v22  ;;  %v9307_v54 = vadd.f32 %v7625_v63, %v15403_v36  ;;  %v7627_v58 = vpop.f32.mrb[33].mxu0 }
 0x443   : > { %v9175_v46 = vpack.c.bf16 %v7847_v33, %v7845_v8  ;;  %v9308_v55 = vadd.f32 %v7627_v58, %v15405_v43 }
 0x444   : > { %v7848_v61 = vmax.f32 %v9307_v54, 0.0 }
 0x445   : > { %v7631_v44 = vpop.f32.mrb[34].mxu0  ;;  %9176 = vmatprep.subr.bf16.mxu1 %v9175_v46  ;;  %v7849_v37 = vmax.f32 %v9308_v55, 0.0  ;;  %v15703_v46 = vld [vmem:[#allocation8_spill] sm:$0xff] }
 0x446   : > { %v9309_v3 = vadd.f32 %v7631_v44, %v15412_v19  ;;  %v7633_v34 = vpop.f32.mrb[35].mxu0  ;;  %9178 = vmatpush1.bf16.msra.mxu1 %v9177_v38 }
 0x447   : > { %v9310_v7 = vadd.f32 %v7633_v34, %v15414_v45 }
 0x448   : > { %v7850_v31 = vmax.f32 %v9309_v3, 0.0  ;;  %v15704_v3 = vld [vmem:[#allocation9_spill] sm:$0xff] }
 0x449   : > { %v7851_v47 = vmax.f32 %v9310_v7, 0.0  ;;  %v7637_v29 = vpop.f32.mrb[36].mxu0 }
 0x44a   : > { %v9181_v56 = vpack.c.bf16 %v7850_v31, %v7848_v61  ;;  %v9311_v36 = vadd.f32 %v7637_v29, %v15421_v12  ;;  %v7639_v57 = vpop.f32.mrb[37].mxu0  ;;  %v15705_v31 = vld [vmem:[#allocation10_spill] sm:$0xff] }
 0x44b   : > { %v9179_v18 = vpack.c.bf16 %v7851_v47, %v7849_v37  ;;  %v9312_v43 = vadd.f32 %v7639_v57, %v15423_v60  ;;  %v15706_v47 = vld [vmem:[#allocation11_spill] sm:$0xff] }
 0x44c   : > { %v7852_v1 = vmax.f32 %v9311_v36, 0.0 }
 0x44d   : > { %v7643_v14 = vpop.f32.mrb[38].mxu0  ;;  %9180 = vmatprep.subr.bf16.mxu1 %v9179_v18  ;;  %v7853_v24 = vmax.f32 %v9312_v43, 0.0 }
 0x44e   : > { %v9313_v19 = vadd.f32 %v7643_v14, %v15426_v41  ;;  %v7645_v35 = vpop.f32.mrb[39].mxu0  ;;  %9182 = vmatpush1.bf16.msra.mxu1 %v9181_v56 }
 0x44f   : > { %v9314_v45 = vadd.f32 %v7645_v35, %v15428_v53 }
 0x450   : > { %v7854_v28 = vmax.f32 %v9313_v19, 0.0 }
 0x451   : > { %v7855_v21 = vmax.f32 %v9314_v45, 0.0  ;;  %v7649_v32 = vpop.f32.mrb[40].mxu0 }
 0x452   : > { %v9185_v11 = vpack.c.bf16 %v7854_v28, %v7852_v1  ;;  %v9315_v12 = vadd.f32 %v7649_v32, %v15430_v9  ;;  %v7651_v51 = vpop.f32.mrb[41].mxu0 }
 0x453   : > { %v9183_v15 = vpack.c.bf16 %v7855_v21, %v7853_v24  ;;  %v9316_v60 = vadd.f32 %v7651_v51, %v15432_v16 }
 0x454   : > { %v7856_v30 = vmax.f32 %v9315_v12, 0.0 }
 0x455   : > { %v7655_v50 = vpop.f32.mrb[42].mxu0  ;;  %9184 = vmatprep.subr.bf16.mxu1 %v9183_v15  ;;  %v7857_v4 = vmax.f32 %v9316_v60, 0.0 }
 0x456   : > { %v9317_v41 = vadd.f32 %v7655_v50, %v15434_v25  ;;  %v7657_v59 = vpop.f32.mrb[43].mxu0  ;;  %9186 = vmatpush1.bf16.msra.mxu1 %v9185_v11 }
 0x457   : > { %v9318_v53 = vadd.f32 %v7657_v59, %v15436_v2 }
 0x458   : > { %v7858_v42 = vmax.f32 %v9317_v41, 0.0 }
 0x459   : > { %v7859_v49 = vmax.f32 %v9318_v53, 0.0  ;;  %v7661_v48 = vpop.f32.mrb[44].mxu0 }
 0x45a   : > { %v9189_v13 = vpack.c.bf16 %v7858_v42, %v7856_v30  ;;  %v9319_v9 = vadd.f32 %v7661_v48, %v15438_v17  ;;  %v7663_v0 = vpop.f32.mrb[45].mxu0  ;;  %v15707_v48 = vld [vmem:[#allocation13_spill] sm:$0xff] }
 0x45b   : > { %v9187_v52 = vpack.c.bf16 %v7859_v49, %v7857_v4  ;;  %v9320_v16 = vadd.f32 %v7663_v0, %v15440_v27 }
 0x45c   : > { %v7860_v23 = vmax.f32 %v9319_v9, 0.0 }
 0x45d   : > { %v7667_v39 = vpop.f32.mrb[46].mxu0  ;;  %9188 = vmatprep.subr.bf16.mxu1 %v9187_v52  ;;  %v7861_v63 = vmax.f32 %v9320_v16, 0.0 }
 0x45e   : > { %v9321_v25 = vadd.f32 %v7667_v39, %v15442_v62  ;;  %v7669_v22 = vpop.f32.mrb[47].mxu0  ;;  %9190 = vmatpush1.bf16.msra.mxu1 %v9189_v13 }
 0x45f   : > { %v9322_v2 = vadd.f32 %v7669_v22, %v15444_v5 }
 0x460   : > { %v7862_v8 = vmax.f32 %v9321_v25, 0.0  ;;  %v6644_v33 = vpop.f32.mrb[58].mxu1 }
 0x461   : > { %v7863_v38 = vmax.f32 %v9322_v2, 0.0  ;;  %v7673_v54 = vpop.f32.mrb[48].mxu0  ;;  %v6646_v58 = vpop.f32.mrb[59].mxu1 }
 0x462   : > { %v9193_v17 = vpack.c.bf16 %v7862_v8, %v7860_v23  ;;  %v9323_v55 = vadd.f32 %v7673_v54, %v15703_v46  ;;  %v7675_v44 = vpop.f32.mrb[49].mxu0 }
 0x463   : > { %v9191_v27 = vpack.c.bf16 %v7863_v38, %v7861_v63  ;;  %v9324_v34 = vadd.f32 %v7675_v44, %v15704_v3 }
 0x464   : > { %v6650_v7 = vpop.f32.mrb[60].mxu1  ;;  %v7864_v56 = vmax.f32 %v9323_v55, 0.0 }
 0x465   : > { %v7679_v62 = vpop.f32.mrb[50].mxu0  ;;  %9192 = vmatprep.subr.bf16.mxu1 %v9191_v27  ;;  %v6652_v61 = vpop.f32.mrb[61].mxu1  ;;  %v7865_v18 = vmax.f32 %v9324_v34, 0.0 }
 0x466   : > { %v9325_v5 = vadd.f32 %v7679_v62, %v15705_v31  ;;  %v7681_v37 = vpop.f32.mrb[51].mxu0  ;;  %9194 = vmatpush1.bf16.msra.mxu1 %v9193_v17 }
 0x467   : > { %v9326_v29 = vadd.f32 %v7681_v37, %v15706_v47 }
 0x468   : > { %v7866_v36 = vmax.f32 %v9325_v5, 0.0  ;;  %v6656_v57 = vpop.f32.mrb[62].mxu1 }
 0x469   : > { %v7867_v43 = vmax.f32 %v9326_v29, 0.0  ;;  %v7685_v14 = vpop.f32.mrb[52].mxu0  ;;  %v6658_v19 = vpop.f32.mrb[63].mxu1 }
 0x46a   : > { %v9197_v35 = vpack.c.bf16 %v7866_v36, %v7864_v56  ;;  %v9327_v45 = vadd.f32 %v7685_v14, %v15458_v26  ;;  %v7687_v1 = vpop.f32.mrb[53].mxu0  ;;  %v15708_v56 = vld [vmem:[#allocation25_spill] sm:$0xff] }
 0x46b   : > { %v9195_v28 = vpack.c.bf16 %v7867_v43, %v7865_v18  ;;  %v9328_v24 = vadd.f32 %v7687_v1, %v15460_v20 }
 0x46c   : > { %v6662_v21 = vpop.f32.mrb[64].mxu1  ;;  %v7868_v60 = vmax.f32 %v9327_v45, 0.0 }
 0x46d   : > { %v7691_v32 = vpop.f32.mrb[54].mxu0  ;;  %9196 = vmatprep.subr.bf16.mxu1 %v9195_v28  ;;  %v6664_v11 = vpop.f32.mrb[65].mxu1  ;;  %v7869_v59 = vmax.f32 %v9328_v24, 0.0 }
 0x46e   : > { %v9329_v12 = vadd.f32 %v7691_v32, %v15471_v40  ;;  %v7693_v51 = vpop.f32.mrb[55].mxu0  ;;  %9198 = vmatpush1.bf16.msra.mxu1 %v9197_v35 }
 0x46f   : > { %v9330_v15 = vadd.f32 %v7693_v51, %v15473_v10 }
 0x470   : > { %v7870_v50 = vmax.f32 %v9329_v12, 0.0  ;;  %v6668_v41 = vpop.f32.mrb[66].mxu1 }
 0x471   : > { %v7871_v53 = vmax.f32 %v9330_v15, 0.0  ;;  %v7697_v26 = vpop.f32.mrb[56].mxu0  ;;  %v6670_v30 = vpop.f32.mrb[67].mxu1 }
 0x472   : > { %v9201_v42 = vpack.c.bf16 %v7870_v50, %v7868_v60  ;;  %v9331_v20 = vadd.f32 %v7697_v26, %v15477_v6  ;;  %v7699_v4 = vpop.f32.mrb[57].mxu0 }
 0x473   : > { %v9199_v49 = vpack.c.bf16 %v7871_v53, %v7869_v59  ;;  %v9332_v13 = vadd.f32 %v7699_v4, %v15707_v48 }
 0x474   : > { %v6674_v9 = vpop.f32.mrb[68].mxu1  ;;  %v7872_v39 = vmax.f32 %v9331_v20, 0.0 }
 0x475   : > { %v7703_v40 = vpop.f32.mrb[58].mxu0  ;;  %9200 = vmatprep.subr.bf16.mxu1 %v9199_v49  ;;  %v6676_v0 = vpop.f32.mrb[69].mxu1  ;;  %v7873_v2 = vmax.f32 %v9332_v13, 0.0 }
 0x476   : > { %v9333_v52 = vadd.f32 %v7703_v40, %v6644_v33  ;;  %v7705_v10 = vpop.f32.mrb[59].mxu0  ;;  %9202 = vmatpush1.bf16.msra.mxu1 %v9201_v42  ;;  %v15710_v42 = vmov 0.0  }
 0x477   : > { %v9334_v16 = vadd.f32 %v7705_v10, %v6646_v58 }
 0x478   : > { %v7874_v25 = vmax.f32 %v9333_v52, 0.0  ;;  %v6680_v22 = vpop.f32.mrb[70].mxu1 }
 0x479   : > { %v7875_v23 = vmax.f32 %v9334_v16, 0.0  ;;  %v7709_v8 = vpop.f32.mrb[60].mxu0  ;;  %v6682_v63 = vpop.f32.mrb[71].mxu1 }
 0x47a   : > { %v9205_v6 = vpack.c.bf16 %v7874_v25, %v7872_v39  ;;  %v9335_v38 = vadd.f32 %v7709_v8, %v6650_v7  ;;  %v7711_v54 = vpop.f32.mrb[61].mxu0  ;;  %v15532_v7 = vsub.s32 0, %v15708_v56 }
 0x47b   : > { %v9203_v17 = vpack.c.bf16 %v7875_v23, %v7873_v2  ;;  %v9336_v46 = vadd.f32 %v7711_v54, %v6652_v61 }
 0x47c   : > { %v6686_v55 = vpop.f32.mrb[72].mxu1  ;;  %v7876_v34 = vmax.f32 %v9335_v38, 0.0 }
 0x47d   : > { %v7715_v44 = vpop.f32.mrb[62].mxu0  ;;  %9204 = vmatprep.subr.bf16.mxu1 %v9203_v17  ;;  %v6688_v27 = vpop.f32.mrb[73].mxu1  ;;  %v7877_v5 = vmax.f32 %v9336_v46, 0.0 }
 0x47e   : > { %v9337_v33 = vadd.f32 %v7715_v44, %v6656_v57  ;;  %v7717_v3 = vpop.f32.mrb[63].mxu0  ;;  %9206 = vmatpush1.bf16.msra.mxu1 %v9205_v6 }
 0x47f   : > { %v9338_v58 = vadd.f32 %v7717_v3, %v6658_v19  ;;  %v15709_v19 = vld [vmem:[#allocation12_spill] sm:$0xff] }
 0x480   : > { %v7878_v62 = vmax.f32 %v9337_v33, 0.0  ;;  %v6692_v31 = vpop.f32.mrb[74].mxu1  ;;  %v7919_v1 = vrot.slane %v15709_v19, %v15532_v7 }
 0x481   : > { %v7879_v37 = vmax.f32 %v9338_v58, 0.0  ;;  %v7721_v47 = vpop.f32.mrb[64].mxu0  ;;  %v6694_v29 = vpop.f32.mrb[75].mxu1 }
 0x482   : > { %v9209_v36 = vpack.c.bf16 %v7878_v62, %v7876_v34  ;;  %v9339_v61 = vadd.f32 %v7721_v47, %v6662_v21  ;;  %v7723_v18 = vpop.f32.mrb[65].mxu0 }
 0x483   : > { %v9207_v43 = vpack.c.bf16 %v7879_v37, %v7877_v5  ;;  %v9340_v14 = vadd.f32 %v7723_v18, %v6664_v11 }
 0x484   : > { %v6698_v35 = vpop.f32.mrb[76].mxu1  ;;  %v7880_v12 = vmax.f32 %v9339_v61, 0.0 }
 0x485   : > { %v7727_v57 = vpop.f32.mrb[66].mxu0  ;;  %9208 = vmatprep.subr.bf16.mxu1 %v9207_v43  ;;  %v6700_v45 = vpop.f32.mrb[77].mxu1  ;;  %v7881_v60 = vmax.f32 %v9340_v14, 0.0 }
 0x486   : > { %v9341_v28 = vadd.f32 %v7727_v57, %v6668_v41  ;;  %v7729_v24 = vpop.f32.mrb[67].mxu0  ;;  %9210 = vmatpush1.bf16.msra.mxu1 %v9209_v36 }
 0x487   : > { %v9342_v32 = vadd.f32 %v7729_v24, %v6670_v30 }
 0x488   : > { %v7882_v51 = vmax.f32 %v9341_v28, 0.0  ;;  %v6704_v15 = vpop.f32.mrb[78].mxu1 }
 0x489   : > { %v7883_v50 = vmax.f32 %v9342_v32, 0.0  ;;  %v7733_v21 = vpop.f32.mrb[68].mxu0  ;;  %v6706_v59 = vpop.f32.mrb[79].mxu1  ;;  %7996 = vmatmul.mubr.f32.vlgmr.msra.gmra.mrb[96].mxu1 %v7919_v1 }
 0x48a   : > { %v9213_v11 = vpack.c.bf16 %v7882_v51, %v7880_v12  ;;  %v9343_v53 = vadd.f32 %v7733_v21, %v6674_v9  ;;  %v7735_v26 = vpop.f32.mrb[69].mxu0  ;;  %8066 = vmatprep.mubr.f32.mxu1 %v15710_v42 }
 0x48b   : > { %v9211_v20 = vpack.c.bf16 %v7883_v50, %v7881_v60  ;;  %v9344_v4 = vadd.f32 %v7735_v26, %v6676_v0 }
 0x48c   : > { %v6710_v49 = vpop.f32.mrb[80].mxu1  ;;  %v7884_v52 = vmax.f32 %v9343_v53, 0.0 }
 0x48d   : > { %v7739_v41 = vpop.f32.mrb[70].mxu0  ;;  %9212 = vmatprep.subr.bf16.mxu1 %v9211_v20  ;;  %v6712_v48 = vpop.f32.mrb[81].mxu1  ;;  %v7885_v39 = vmax.f32 %v9344_v4, 0.0 }
 0x48e   : > { %v9345_v30 = vadd.f32 %v7739_v41, %v6680_v22  ;;  %v7741_v13 = vpop.f32.mrb[71].mxu0  ;;  %9214 = vmatpush1.bf16.msra.mxu1 %v9213_v11 }
 0x48f   : > { %v9346_v40 = vadd.f32 %v7741_v13, %v6682_v63 }
 0x490   : > { %v7886_v10 = vmax.f32 %v9345_v30, 0.0  ;;  %v6716_v16 = vpop.f32.mrb[82].mxu1 }
 0x491   : > { %v7887_v25 = vmax.f32 %v9346_v40, 0.0  ;;  %v7745_v2 = vpop.f32.mrb[72].mxu0  ;;  %v6718_v9 = vpop.f32.mrb[83].mxu1 }
 0x492   : > { %v9217_v23 = vpack.c.bf16 %v7886_v10, %v7884_v52  ;;  %v9347_v8 = vadd.f32 %v7745_v2, %v6686_v55  ;;  %v7747_v6 = vpop.f32.mrb[73].mxu0 }
 0x493   : > { %v9215_v38 = vpack.c.bf16 %v7887_v25, %v7885_v39  ;;  %v9348_v0 = vadd.f32 %v7747_v6, %v6688_v27 }
 0x494   : > { %v6722_v54 = vpop.f32.mrb[84].mxu1  ;;  %v7888_v33 = vmax.f32 %v9347_v8, 0.0 }
 0x495   : > { %v7751_v17 = vpop.f32.mrb[74].mxu0  ;;  %9216 = vmatprep.subr.bf16.mxu1 %v9215_v38  ;;  %v6724_v46 = vpop.f32.mrb[85].mxu1  ;;  %v7889_v34 = vmax.f32 %v9348_v0, 0.0 }
 0x496   : > { %v9349_v22 = vadd.f32 %v7751_v17, %v6692_v31  ;;  %v7753_v44 = vpop.f32.mrb[75].mxu0  ;;  %9218 = vmatpush1.bf16.msra.mxu1 %v9217_v23 }
 0x497   : > { %v9350_v63 = vadd.f32 %v7753_v44, %v6694_v29 }
 0x498   : > { %v7890_v3 = vmax.f32 %v9349_v22, 0.0  ;;  %v6728_v58 = vpop.f32.mrb[86].mxu1 }
 0x499   : > { %v7891_v62 = vmax.f32 %v9350_v63, 0.0  ;;  %v7757_v5 = vpop.f32.mrb[76].mxu0  ;;  %v6730_v37 = vpop.f32.mrb[87].mxu1 }
 0x49a   : > { %v9221_v47 = vpack.c.bf16 %v7890_v3, %v7888_v33  ;;  %v9351_v55 = vadd.f32 %v7757_v5, %v6698_v35  ;;  %v7759_v36 = vpop.f32.mrb[77].mxu0 }
 0x49b   : > { %v9219_v61 = vpack.c.bf16 %v7891_v62, %v7889_v34  ;;  %v9352_v27 = vadd.f32 %v7759_v36, %v6700_v45 }
 0x49c   : > { %v6734_v18 = vpop.f32.mrb[88].mxu1  ;;  %v7892_v1 = vmax.f32 %v9351_v55, 0.0 }
 0x49d   : > { %v7763_v43 = vpop.f32.mrb[78].mxu0  ;;  %9220 = vmatprep.subr.bf16.mxu1 %v9219_v61  ;;  %v6736_v14 = vpop.f32.mrb[89].mxu1  ;;  %v7893_v32 = vmax.f32 %v9352_v27, 0.0 }
 0x49e   : > { %v9353_v31 = vadd.f32 %v7763_v43, %v6704_v15  ;;  %v7765_v57 = vpop.f32.mrb[79].mxu0  ;;  %9222 = vmatpush1.bf16.msra.mxu1 %v9221_v47 }
 0x49f   : > { %v9354_v29 = vadd.f32 %v7765_v57, %v6706_v59 }
 0x4a0   : > { %v7894_v28 = vmax.f32 %v9353_v31, 0.0  ;;  %v6740_v24 = vpop.f32.mrb[90].mxu1 }
 0x4a1   : > { %v7895_v12 = vmax.f32 %v9354_v29, 0.0  ;;  %v7769_v51 = vpop.f32.mrb[80].mxu0  ;;  %v6742_v60 = vpop.f32.mrb[91].mxu1 }
 0x4a2   : > { %v9225_v50 = vpack.c.bf16 %v7894_v28, %v7892_v1  ;;  %v9355_v35 = vadd.f32 %v7769_v51, %v6710_v49  ;;  %v7771_v21 = vpop.f32.mrb[81].mxu0  ;;  %v7926_v51 = vsub.s32 2, %v15708_v56 }
 0x4a3   : > { %v9223_v11 = vpack.c.bf16 %v7895_v12, %v7893_v32  ;;  %v9356_v45 = vadd.f32 %v7771_v21, %v6712_v48  ;;  %v7914_v21 = vstv %s7913_s24 }
 0x4a4   : > { %v6746_v53 = vpop.f32.mrb[92].mxu1  ;;  %v7896_v4 = vmax.f32 %v9355_v35, 0.0  ;;  %v7927_v35 = vrot.slane %v15709_v19, %v7926_v51 }
 0x4a5   : > { %v7775_v26 = vpop.f32.mrb[82].mxu0  ;;  %9224 = vmatprep.subr.bf16.mxu1 %v9223_v11  ;;  %v6748_v42 = vpop.f32.mrb[93].mxu1  ;;  %v7897_v13 = vmax.f32 %v9356_v45, 0.0 }
 0x4a6   : > { %v9357_v15 = vadd.f32 %v7775_v26, %v6716_v16  ;;  %v7777_v20 = vpop.f32.mrb[83].mxu0  ;;  %9226 = vmatpush1.bf16.msra.mxu1 %v9225_v50 }
 0x4a7   : > { %v9358_v59 = vadd.f32 %v7777_v20, %v6718_v9 }
 0x4a8   : > { %v7898_v41 = vmax.f32 %v9357_v15, 0.0  ;;  %v6752_v30 = vpop.f32.mrb[94].mxu1 }
 0x4a9   : > { %v7899_v40 = vmax.f32 %v9358_v59, 0.0  ;;  %v7781_v52 = vpop.f32.mrb[84].mxu0  ;;  %v6754_v10 = vpop.f32.mrb[95].mxu1 }
 0x4aa   : > { %v9229_v39 = vpack.c.bf16 %v7898_v41, %v7896_v4  ;;  %v9359_v49 = vadd.f32 %v7781_v52, %v6722_v54  ;;  %v7783_v25 = vpop.f32.mrb[85].mxu0 }
 0x4ab   : > { %v9227_v2 = vpack.c.bf16 %v7899_v40, %v7897_v13  ;;  %v9360_v48 = vadd.f32 %v7783_v25, %v6724_v46  ;;  %v11425_v40 = vld [vmem:[%s11630_s6] sm:$0xff] }
 0x4ac   : > { %v7900_v38 = vmax.f32 %v9359_v49, 0.0  ;;  %v11427_v49 = vld [vmem:[%s11630_s6 + $0x20] sm:$0xff] }
 0x4ad   : > { %v7787_v23 = vpop.f32.mrb[86].mxu0  ;;  %9228 = vmatprep.subr.bf16.mxu1 %v9227_v2  ;;  %v7901_v0 = vmax.f32 %v9360_v48, 0.0  ;;  %v11428_v2 = vld [vmem:[%s11630_s6 + $0x30] sm:$0xff] }
 0x4ae   : > { %v9361_v8 = vadd.f32 %v7787_v23, %v6728_v58  ;;  %v7789_v6 = vpop.f32.mrb[87].mxu0  ;;  %9230 = vmatpush1.bf16.msra.mxu1 %v9229_v39  ;;  %v11429_v23 = vld [vmem:[%s11630_s6 + $0x8] sm:$0xff] }
 0x4af   : > { %v9362_v16 = vadd.f32 %v7789_v6, %v6730_v37  ;;  %v11430_v6 = vld [vmem:[%s11630_s6 + $0x18] sm:$0xff] }
 0x4b0   : > { %v7902_v9 = vmax.f32 %v9361_v8, 0.0 }
 0x4b1   : > { %v7903_v17 = vmax.f32 %v9362_v16, 0.0  ;;  %v7793_v22 = vpop.f32.mrb[88].mxu0 }
 0x4b2   : > { %v9233_v44 = vpack.c.bf16 %v7902_v9, %v7900_v38  ;;  %v9363_v63 = vadd.f32 %v7793_v22, %v6734_v18  ;;  %v7795_v33 = vpop.f32.mrb[89].mxu0  ;;  %v11432_v9 = vld [vmem:[%s11630_s6 + $0x38] sm:$0xff] }
 0x4b3   : > { %v9231_v3 = vpack.c.bf16 %v7903_v17, %v7901_v0  ;;  %v9364_v34 = vadd.f32 %v7795_v33, %v6736_v14 }
 0x4b4   : > { %v7904_v58 = vmax.f32 %v9363_v63, 0.0 }
 0x4b5   : > { %v7799_v54 = vpop.f32.mrb[90].mxu0  ;;  %9232 = vmatprep.subr.bf16.mxu1 %v9231_v3  ;;  %v7905_v55 = vmax.f32 %v9364_v34, 0.0 }
 0x4b6   : > { %v9365_v62 = vadd.f32 %v7799_v54, %v6740_v24  ;;  %v7801_v46 = vpop.f32.mrb[91].mxu0  ;;  %9234 = vmatpush1.bf16.msra.mxu1 %v9233_v44 }
 0x4b7   : > { %v9366_v5 = vadd.f32 %v7801_v46, %v6742_v60 }
 0x4b8   : > { %v7906_v47 = vmax.f32 %v9365_v62, 0.0 }
 0x4b9   : > { %v7907_v37 = vmax.f32 %v9366_v5, 0.0  ;;  %v7805_v36 = vpop.f32.mrb[92].mxu0 }
 0x4ba   : > { %v9237_v61 = vpack.c.bf16 %v7906_v47, %v7904_v58  ;;  %v9367_v27 = vadd.f32 %v7805_v36, %v6746_v53  ;;  %v7807_v43 = vpop.f32.mrb[93].mxu0 }
 0x4bb   : > { %v9235_v31 = vpack.c.bf16 %v7907_v37, %v7905_v55  ;;  %v9368_v57 = vadd.f32 %v7807_v43, %v6748_v42 }
 0x4bc   : > { %v7908_v28 = vmax.f32 %v9367_v27, 0.0 }
 0x4bd   : > { %v7811_v18 = vpop.f32.mrb[94].mxu0  ;;  %9236 = vmatprep.subr.bf16.mxu1 %v9235_v31  ;;  %v7909_v32 = vmax.f32 %v9368_v57, 0.0 }
 0x4be   : > { %v9369_v29 = vadd.f32 %v7811_v18, %v6752_v30  ;;  %v7813_v14 = vpop.f32.mrb[95].mxu0  ;;  %9238 = vmatpush1.bf16.msra.mxu1 %v9237_v61 }
 0x4bf   : > { %v9370_v1 = vadd.f32 %v7813_v14, %v6754_v10  ;;  %v11426_v10 = vld [vmem:[%s11630_s6 + $0x10] sm:$0xff] }
 0x4c0   : > { %v7910_v24 = vmax.f32 %v9369_v29, 0.0 }
 0x4c1   : > { %v7911_v12 = vmax.f32 %v9370_v1, 0.0 }
 0x4c2   : > { %v9241_v60 = vpack.c.bf16 %v7910_v24, %v7908_v28 }
 0x4c3   : > { %v9239_v50 = vpack.c.bf16 %v7911_v12, %v7909_v32 }
 0x4c5   : > { %9240 = vmatprep.subr.bf16.mxu1 %v9239_v50 }
 0x4c6   : > { %9242 = vmatpush1.bf16.msra.mxu1 %v9241_v60 }
 0x4c9   : > { %8067 = vmatmul.mubr.f32.vlgmr.msra.gmra.mrb[96].mxu1 %v7927_v35 }
 0x59c   : > { %v8068_v11 = vpop.f32.mrb[96].mxu1 }
 0x59d   : > { %v9371_v45 = vadd.f32 %v8068_v11, %v7914_v21  ;;  %v8070_v53 = vpop.f32.mrb[97].mxu1 }
 0x59e   : > { %v9372_v26 = vadd.f32 %v8070_v53, %v7914_v21 }
 0x59f   : > { %v8240_v42 = vmul.f32 -1.442695, %v9371_v45 }
 0x5a0   : > { %v8241_v15 = vmul.f32 -1.442695, %v9372_v26 }
 0x5a1   : > { %11385 = vpow2.f32 %v8240_v42 }
 0x5a2   : > { %11387 = vpow2.f32 %v8241_v15 }
 0x5ab   : > { %v11386_v56 = vpop.eup %11385 }
 0x5ac   : > { %v11388_v20 = vpop.eup %11387  ;;  %v8079_v19 = vadd.f32 1.0, %v11386_v56 }
 0x5ad   : > { %v8080_v59 = vadd.f32 1.0, %v11388_v20 }
 0x5ae   : > { %11389 = vrcp.f32 %v8079_v19 }
 0x5af   : > { %11391 = vrcp.f32 %v8080_v59 }
 0x5b8   : > { %v11390_v4 = vpop.eup %11389 }
 0x5b9   : > { %v11392_v41 = vpop.eup %11391  ;;  %v8088_v30 = vrot.slane %v11390_v4, %v15532_v7 }
 0x5ba   : > { %v8092_v13 = vrot.slane %v11392_v41, %v15532_v7  ;;  %v11431_v7 = vld [vmem:[%s11630_s6 + $0x28] sm:$0xff]  ;;  %s11547_s6 = smov [#allocation5]  }
 0x5bb   : > { %v8093_v52 = vmul.f32 %v11425_v40, %v8088_v30  ;;  %v8095_v39 = vmul.f32 %v11426_v10, %v8088_v30  ;;  %v8097_v25 = vmul.f32 %v11427_v49, %v8088_v30  ;;  %v8099_v48 = vmul.f32 %v11428_v2, %v8088_v30  ;;  %s11437_s11 = sshll.u32 %s11547_s6, 4  ;;  %s11438_s11 = int_to_ptr.vmem [resolvable:$false] %s11437_s11 }
 0x5bc   : > { %v8094_v8 = vmul.f32 %v11429_v23, %v8092_v13  ;;  %v8096_v16 = vmul.f32 %v11430_v6, %v8092_v13  ;;  %v8098_v38 = vmul.f32 %v11431_v7, %v8092_v13  ;;  %v8100_v0 = vmul.f32 %v11432_v9, %v8092_v13  ;;  %s11439_s16 = scalar_lea.vmem %s11438_s11, 2048  ;;  %p11440_p0 = scmp.lt.s32.totalorder %s15558_s29, %s11438_s11 }
 0x5bd   : > { %8101 = vst [vmem:[%s191_s23] sm:$0xff] %v8093_v52  ;;  %8103 = vst [vmem:[%s191_s23 + $0x10] sm:$0xff] %v8095_v39  ;;  %p11441_p1 = scmp.lt.s32.totalorder %s11439_s16, %s11433_s10 }
 0x5be   : > { %8105 = vst [vmem:[%s191_s23 + $0x20] sm:$0xff] %v8097_v25  ;;  %8107 = vst [vmem:[%s191_s23 + $0x30] sm:$0xff] %v8099_v48 }
 0x5bf   : > { %8102 = vst [vmem:[%s191_s23 + $0x8] sm:$0xff] %v8094_v8  ;;  %8104 = vst [vmem:[%s191_s23 + $0x18] sm:$0xff] %v8096_v16  ;;  %p11442_p2 = por %p11441_p1, %p11440_p0 }
 0x5c0   : > { %8106 = vst [vmem:[%s191_s23 + $0x28] sm:$0xff] %v8098_v38  ;;  %8108 = vst [vmem:[%s191_s23 + $0x38] sm:$0xff] %v8100_v0 }
 0x5c1   : > { %p11443_p3 = pnand %p11442_p2, %p11436_p13 }
 0x5c3   : > { %11446 = shalt.err (!%p11443_p3)
}
 0x5c4   : > { %s11447_s12 = scalar_lea.hbm %s15552_s8, 1024  ;;  %s11451_s21 = scalar_lea.hbm %s15608_s4, 2048 }
 0x5c5   : > { %p11448_p4 = scmp.ne.s32.totalorder %s15552_s8, %s11447_s12  ;;  %p11452_p9 = scmp.lt.u32.totalorder %s15552_s8, %s15608_s4 }
 0x5c6   : > { %p11453_p10 = scmp.lt.u32.totalorder %s11451_s21, %s11447_s12  ;;  %p11455_p12 = scmp.lt.u32.totalorder %s11447_s12, %s15552_s8 }
 0x5c7   : > { %p11449_p7 = pnand %p11448_p4, %p11615_p5 }
 0x5c8   : > { %p11454_p11 = por %p11453_p10, %p11452_p9 }
 0x5c9   : > { %p11450_p8 = pneg %p11449_p7 }
 0x5ca   : > { %p11456_p13 = por %p11455_p12, %p11454_p11 }
 0x5cc   : > { %p11457_p0 = pnand %p11456_p13, %p11450_p8 }
 0x5ce   : > { %11460 = shalt.err (!%p11457_p0)
}
 0x5cf   : > { %s11548_s9 = smov 256  }
 0x5d0   : > { %9855 = dma.vmem_to_hbm [thread:$0]  (%p11615_p5), %s15558_s29, 1024, %s15552_s8, %s15562_s7, %s11548_s9, %s11548_s9, %s11538_s13  }
 0x5d1 PF: > { %p9861_p1 = scmp.ge.s32.totalorder %s11495_s20, 2  ;;  %s8138_s15 = sand.u32 1, %s11483_s17  }
 0x5d2   : > { %s8139_s23 = scalar_lea.sflag [#allocation6], %s8138_s15 }
 0x5d3   : > { %p9858_p2 = pnand %p9861_p1, %p11619_p6 }
 0x5d5   : > { %11478 = dma.done.wait (!%p9858_p2), %s8139_s23, 1024  }
 0x5d6   : > { %11480 = vsyncadd (!%p9858_p2), %s8139_s23, 4294966272  ;;  %p15_p3 = scmp.ge.s32.totalorder %s11602_s22, 4   ;;  %s15711_s17 = smov %s11487_s18 }
 0x5d7   : > { %s15712_s18 = smov %s11491_s19  ;;  %s15713_s19 = smov %s11613_s25 }
 0x5d8   : > { %s15714_s20 = smov %s11602_s22  ;;  %17 = sbr.rel (!%p15_p3) target bundleno = 5 (0x5), region = 71 }
 0x5df   :  { %8144 = vsyncpa [#allocation6], 1 }
 0x5e0   :  { %8146 = vsyncpa [#allocation6 + $0x1], 1 }

</bundles_post_ra>
